<compile_context>
chip_gen: v7x
topology: tpu7x:2x2x1
jax: 0.10.0
libtpu: 0.0.40
codegen_flags: <defaults>
</compile_context>

<pallas_src>
import functools
import math

import jax
import jax.numpy as jnp
from jax.experimental import pallas as pl
from jax.experimental.pallas import tpu as pltpu

HIDDEN = 128
NUM_LAYERS = 2
KAN_NUM = 5                       # grid intervals (pykan default)
KAN_K = 3                         # spline order (pykan default)
GRID_RANGE = (-1.0, 1.0)
NB = KAN_NUM + KAN_K              # number of B-spline basis functions (8)
LAYER_NUMS = [2 * HIDDEN, 16, 1]  # KAN widths; first must equal 2*hidden
KAN_PAD = 128                     # lane-dense padding for KAN outputs

_VMEM = pl.BlockSpec(memory_space=pltpu.MemorySpace.VMEM)
_ANY = pl.BlockSpec(memory_space=pl.ANY)
_CPARAMS = pltpu.CompilerParams(vmem_limit_bytes=32 * 1024 * 1024)


# ----------------------------------------------------------------------------
# Shared LSTM cell math (f32 elementwise, PyTorch [i, f, g, o] gate order).
# Works on per-direction (Bp, 4H) gates or packed (2*Bp, 4H) gates.
# ----------------------------------------------------------------------------
def _lstm_cell(gates, c, H):
    i = jax.nn.sigmoid(gates[:, 0:H])
    f = jax.nn.sigmoid(gates[:, H:2 * H])
    g = jnp.tanh(gates[:, 2 * H:3 * H])
    o = jax.nn.sigmoid(gates[:, 3 * H:4 * H])
    c_new = f * c + i * g
    h_new = o * jnp.tanh(c_new)
    return h_new, c_new


# ----------------------------------------------------------------------------
# Cox-de Boor recursion on the uniform extended grid (matches pykan B_batch).
# Knot-difference reciprocals are Python constants -> multiplies, no divides.
#   x: (Bp, d) f32 -> list of NB arrays of shape (Bp, d), f32.
# ----------------------------------------------------------------------------
def _bspline_basis(x):
    h = (GRID_RANGE[1] - GRID_RANGE[0]) / KAN_NUM
    knots = [GRID_RANGE[0] + (j - KAN_K) * h
             for j in range(KAN_NUM + 2 * KAN_K + 1)]
    basis = [((x >= knots[j]) & (x < knots[j + 1])).astype(jnp.float32)
             for j in range(len(knots) - 1)]
    for order in range(1, KAN_K + 1):
        new_basis = []
        for j in range(len(basis) - 1):
            inv_l = 1.0 / (knots[j + order] - knots[j])
            inv_r = 1.0 / (knots[j + order + 1] - knots[j + 1])
            new_basis.append(((x - knots[j]) * inv_l) * basis[j]
                             + ((knots[j + order + 1] - x) * inv_r) * basis[j + 1])
        basis = new_basis
    return basis


# ----------------------------------------------------------------------------
# The fused kernel: BiLSTM layer 1 (full sequence) -> BiLSTM layer 2 (last
# step only) -> KAN layer 1 -> KAN layer 2 -> sigmoid.  All intermediates in
# VMEM scratch; stage-2/3 weights double-buffered in via manual DMA that
# overlaps with the layer-1 recurrence.
# ----------------------------------------------------------------------------
def fused_forward_kernel(T, Bp, H,
                         x_ref, wih1_ref, whh1_ref, bias1_ref,
                         bias2_f_ref, bias2_b_ref,
                         wih2_f_hbm, whh2_f_hbm, wih2_b_hbm, kw1_hbm, kw2_hbm,
                         o_ref,
                         wih2_f_v, whh2_f_v, wih2_b_v, kw1_v, kw2_v, dma_sem,
                         g1_ref, y1_ref, gf2_ref, f1_ref, f2_ref):
    H4 = 4 * H
    H8 = 8 * H

    # -- Stage-2/3 weights: start HBM->VMEM DMAs now; they complete while the
    #    layer-1 recurrence runs.  Waits sit right before first use.
    cp_wih2f = pltpu.make_async_copy(wih2_f_hbm, wih2_f_v, dma_sem.at[0])
    cp_whh2f = pltpu.make_async_copy(whh2_f_hbm, whh2_f_v, dma_sem.at[1])
    cp_wih2b = pltpu.make_async_copy(wih2_b_hbm, wih2_b_v, dma_sem.at[2])
    cp_kw1 = pltpu.make_async_copy(kw1_hbm, kw1_v, dma_sem.at[3])
    cp_kw2 = pltpu.make_async_copy(kw2_hbm, kw2_v, dma_sem.at[4])
    cp_wih2f.start(); cp_whh2f.start(); cp_wih2b.start()
    cp_kw1.start(); cp_kw2.start()

    # ---------------- Layer 1 (bidirectional, full sequence) ----------------
    # Hoisted input projection: both directions in ONE MXU matmul, bias folded.
    x_bf = x_ref[...].astype(jnp.bfloat16)                       # (T*Bp, F)
    g1_ref[...] = (jnp.dot(x_bf, wih1_ref[...],
                           preferred_element_type=jnp.float32) + bias1_ref[...])

    # Packed recurrence: rows [0:Bp] = forward state, rows [Bp:2Bp] = backward.
    h_fb = jnp.zeros((2 * Bp, H), jnp.float32)
    c_fb = jnp.zeros((2 * Bp, H), jnp.float32)
    for t in range(T):   # static, fully unrolled (small T; see TODO for big T)
        tb = T - 1 - t
        # whh1 re-read from its ref each step (keeps vreg live ranges short).
        r = jnp.dot(h_fb.astype(jnp.bfloat16), whh1_ref[...],
                    preferred_element_type=jnp.float32)          # (2Bp, 8H)
        gates = jnp.concatenate(
            [g1_ref[t * Bp:(t + 1) * Bp, 0:H4] + r[0:Bp, 0:H4],
             g1_ref[tb * Bp:(tb + 1) * Bp, H4:H8] + r[Bp:2 * Bp, H4:H8]],
            axis=0)                                              # (2Bp, 4H)
        h_fb, c_fb = _lstm_cell(gates, c_fb, H)
        y1_ref[t * Bp:(t + 1) * Bp, 0:H] = h_fb[0:Bp]
        y1_ref[tb * Bp:(tb + 1) * Bp, H:2 * H] = h_fb[Bp:2 * Bp]

    # ---------------- Layer 2 (only output[:, -1, :] is consumed) -----------
    cp_wih2f.wait(); cp_whh2f.wait()
    y1_bf = y1_ref[...].astype(jnp.bfloat16)                     # (T*Bp, 2H)
    gf2_ref[...] = (jnp.dot(y1_bf, wih2_f_v[...],
                            preferred_element_type=jnp.float32) + bias2_f_ref[...])
    h_f = jnp.zeros((Bp, H), jnp.float32)
    c_f = jnp.zeros((Bp, H), jnp.float32)
    for t in range(T):
        gates_f = gf2_ref[t * Bp:(t + 1) * Bp, :] + jnp.dot(
            h_f.astype(jnp.bfloat16), whh2_f_v[...],
            preferred_element_type=jnp.float32)
        h_f, c_f = _lstm_cell(gates_f, c_f, H)

    # Backward direction at position T-1 is just its first step (zero state).
    cp_wih2b.wait()
    y1_last = y1_ref[(T - 1) * Bp:T * Bp, :].astype(jnp.bfloat16)
    gates_b = (jnp.dot(y1_last, wih2_b_v[...],
                       preferred_element_type=jnp.float32) + bias2_b_ref[...])
    h_b, _ = _lstm_cell(gates_b, jnp.zeros((Bp, H), jnp.float32), H)
    last = jnp.concatenate([h_f, h_b], axis=1)                   # (Bp, 2H)

    # ---------------- KAN head (2 layers) + sigmoid --------------------------
    cp_kw1.wait(); cp_kw2.wait()
    in1 = kw1_v.shape[0] // (NB + 1)          # 2H
    in2 = kw2_v.shape[0] // (NB + 1)          # 128 (padded KAN layer-1 width)

    # Feature slab [base | basis_0 | ... | basis_{NB-1}] -> one MXU matmul.
    f1_ref[:, 0:in1] = last * jax.nn.sigmoid(last)               # SiLU base
    basis1 = _bspline_basis(last)
    for j in range(NB):
        f1_ref[:, (j + 1) * in1:(j + 2) * in1] = basis1[j]
    y1k = jnp.dot(f1_ref[...].astype(jnp.bfloat16), kw1_v[...],
                  preferred_element_type=jnp.float32)            # (Bp, 128)

    # Padded columns of y1k are exactly zero; their spline features are killed
    # by the matching zero rows of kw2, so the slab stays lane-dense (128 wide).
    f2_ref[:, 0:in2] = y1k * jax.nn.sigmoid(y1k)
    basis2 = _bspline_basis(y1k)
    for j in range(NB):
        f2_ref[:, (j + 1) * in2:(j + 2) * in2] = basis2[j]
    y2 = jnp.dot(f2_ref[...].astype(jnp.bfloat16), kw2_v[...],
                 preferred_element_type=jnp.float32)             # (Bp, 128)
    o_ref[...] = jax.nn.sigmoid(y2)                              # unmasked store


# ----------------------------------------------------------------------------
# Parameter init (deterministic, synthetic) with TPU-friendly pre-layout.
#   Layer 1: wih packed (F, 8H) bf16, whh packed (H, 8H) bf16, bias (1, 8H) f32
#            (forward columns 0:4H, backward columns 4H:8H).
#   Layer 2: separate (2H,4H)/(H,4H) bf16 weights (backward needs wih only).
#   KAN: scale/mask/coef folded into one stacked ((NB+1)*in_pad, out_pad) bf16
#        weight, zero-padded to 128 output lanes.
# ----------------------------------------------------------------------------
def init_lstm_params(key, feature_number):
    scale = 1.0 / math.sqrt(HIDDEN)

    def one_dir(key, in_size):
        key, k1, k2, k3, k4 = jax.random.split(key, 5)
        wih = jax.random.uniform(k1, (4 * HIDDEN, in_size), jnp.float32, -scale, scale)
        whh = jax.random.uniform(k2, (4 * HIDDEN, HIDDEN), jnp.float32, -scale, scale)
        bih = jax.random.uniform(k3, (4 * HIDDEN,), jnp.float32, -scale, scale)
        bhh = jax.random.uniform(k4, (4 * HIDDEN,), jnp.float32, -scale, scale)
        return key, wih.T, whh.T, (bih + bhh).reshape(1, -1)

    # Layer 1 (packed fwd|bwd).
    key, wih1_f, whh1_f, b1_f = one_dir(key, feature_number)
    key, wih1_b, whh1_b, b1_b = one_dir(key, feature_number)
    l1 = dict(
        wih=jnp.concatenate([wih1_f, wih1_b], axis=1).astype(jnp.bfloat16),  # (F, 8H)
        whh=jnp.concatenate([whh1_f, whh1_b], axis=1).astype(jnp.bfloat16),  # (H, 8H)
        bias=jnp.concatenate([b1_f, b1_b], axis=1),                          # (1, 8H)
    )
    # Layer 2 (fwd full; bwd only needs wih/bias for its first step).
    key, wih2_f, whh2_f, b2_f = one_dir(key, 2 * HIDDEN)
    key, wih2_b, _whh2_b, b2_b = one_dir(key, 2 * HIDDEN)
    l2 = dict(
        wih_f=wih2_f.astype(jnp.bfloat16),   # (2H, 4H)
        whh_f=whh2_f.astype(jnp.bfloat16),   # (H, 4H)
        bias_f=b2_f,                         # (1, 4H)
        wih_b=wih2_b.astype(jnp.bfloat16),   # (2H, 4H)
        bias_b=b2_b,                         # (1, 4H)
    )
    return l1, l2


def _build_kan_weight(key, in_dim, out_dim, in_pad, out_pad):
    size = in_dim * out_dim
    key, kc = jax.random.split(key)
    coef = jax.random.uniform(kc, (size, NB), jnp.float32, -0.1, 0.1)
    scale_base = jnp.ones((size,), jnp.float32)
    scale_sp = jnp.ones((size,), jnp.float32)
    mask = jnp.ones((size,), jnp.float32)
    # pykan flattening is s = o * in_dim + i
    coef3 = coef.reshape(out_dim, in_dim, NB)
    sb = (scale_base * mask).reshape(out_dim, in_dim)
    ssp = (scale_sp * mask).reshape(out_dim, in_dim)
    wb = sb.T[None]                                               # (1, in, out)
    wsp = jnp.transpose(coef3 * ssp[:, :, None], (2, 1, 0))       # (NB, in, out)
    w3 = jnp.concatenate([wb, wsp], axis=0)                       # (NB+1, in, out)
    w3 = jnp.pad(w3, ((0, 0), (0, in_pad - in_dim), (0, out_pad - out_dim)))
    return key, w3.reshape((NB + 1) * in_pad, out_pad).astype(jnp.bfloat16)


def init_kan_params(key, layer_nums):
    assert len(layer_nums) == 3 and layer_nums[0] == 2 * HIDDEN
    key, w1 = _build_kan_weight(key, layer_nums[0], layer_nums[1],
                                in_pad=layer_nums[0], out_pad=KAN_PAD)
    key, w2 = _build_kan_weight(key, layer_nums[1], layer_nums[2],
                                in_pad=KAN_PAD, out_pad=KAN_PAD)
    return w1, w2


# ----------------------------------------------------------------------------
# Full forward: one fused pallas_call.
# ----------------------------------------------------------------------------
def forward(x_btf, l1, l2, kan_w1, kan_w2):
    B, T, F = x_btf.shape
    Bp = ((B + 7) // 8) * 8                        # pad batch to full sublanes
    x = jnp.transpose(x_btf, (1, 0, 2))            # (T, B, F) time-major
    if Bp != B:
        x = jnp.pad(x, ((0, 0), (0, Bp - B), (0, 0)))
    x_flat = x.reshape(T * Bp, F)

    out = pl.pallas_call(
        functools.partial(fused_forward_kernel, T, Bp, HIDDEN),
        out_shape=jax.ShapeDtypeStruct((Bp, KAN_PAD), jnp.float32),
        in_specs=[_VMEM] * 6 + [_ANY] * 5,
        out_specs=_VMEM,
        scratch_shapes=[
            pltpu.VMEM((2 * HIDDEN, 4 * HIDDEN), jnp.bfloat16),       # wih2_f
            pltpu.VMEM((HIDDEN, 4 * HIDDEN), jnp.bfloat16),           # whh2_f
            pltpu.VMEM((2 * HIDDEN, 4 * HIDDEN), jnp.bfloat16),       # wih2_b
            pltpu.VMEM(((NB + 1) * 2 * HIDDEN, KAN_PAD), jnp.bfloat16),  # KAN w1
            pltpu.VMEM(((NB + 1) * KAN_PAD, KAN_PAD), jnp.bfloat16),     # KAN w2
            pltpu.SemaphoreType.DMA((5,)),
            pltpu.VMEM((T * Bp, 8 * HIDDEN), jnp.float32),            # g1 (L1 proj)
            pltpu.VMEM((T * Bp, 2 * HIDDEN), jnp.float32),            # y1 (L1 out)
            pltpu.VMEM((T * Bp, 4 * HIDDEN), jnp.float32),            # gf2 (L2 proj)
            pltpu.VMEM((Bp, (NB + 1) * 2 * HIDDEN), jnp.float32),     # KAN slab 1
            pltpu.VMEM((Bp, (NB + 1) * KAN_PAD), jnp.float32),        # KAN slab 2
        ],
        compiler_params=_CPARAMS,
    )(x_flat, l1["wih"], l1["whh"], l1["bias"],
      l2["bias_f"], l2["bias_b"],
      l2["wih_f"], l2["whh_f"], l2["wih_b"], kan_w1, kan_w2)
    return out[:B, 0]                              # drop batch/lane padding


if __name__ == "__main__":
    B, T, F = 2, 8, 16                             # small example shapes
    key = jax.random.PRNGKey(0)
    kx, kl, kk = jax.random.split(key, 3)
    x = jax.random.normal(kx, (B, T, F), jnp.float32)

    l1, l2 = init_lstm_params(kl, F)
    kan_w1, kan_w2 = init_kan_params(kk, LAYER_NUMS)

    out = jax.block_until_ready(forward(x, l1, l2, kan_w1, kan_w2))
    assert out.shape == (B,), out.shape
    assert bool(jnp.all(jnp.isfinite(out)))
    print("KERNEL_OK")
</pallas_src>

<mosaic_0001>
module attributes {stable_mosaic.version = 11 : i64} {
  func.func @fused_forward_kernel(%arg0: memref<64x16xf32, #tpu.memory_space<vmem>>, %arg1: memref<16x1024xbf16, #tpu.memory_space<vmem>>, %arg2: memref<128x1024xbf16, #tpu.memory_space<vmem>>, %arg3: memref<1x1024xf32, #tpu.memory_space<vmem>>, %arg4: memref<1x512xf32, #tpu.memory_space<vmem>>, %arg5: memref<1x512xf32, #tpu.memory_space<vmem>>, %arg6: memref<256x512xbf16, #tpu.memory_space<any>>, %arg7: memref<128x512xbf16, #tpu.memory_space<any>>, %arg8: memref<256x512xbf16, #tpu.memory_space<any>>, %arg9: memref<2304x128xbf16, #tpu.memory_space<any>>, %arg10: memref<1152x128xbf16, #tpu.memory_space<any>>, %arg11: memref<8x128xf32, #tpu.memory_space<vmem>>, %arg12: memref<256x512xbf16, #tpu.memory_space<vmem>>, %arg13: memref<128x512xbf16, #tpu.memory_space<vmem>>, %arg14: memref<256x512xbf16, #tpu.memory_space<vmem>>, %arg15: memref<2304x128xbf16, #tpu.memory_space<vmem>>, %arg16: memref<1152x128xbf16, #tpu.memory_space<vmem>>, %arg17: memref<5x!tpu.dma_semaphore, #tpu.memory_space<semaphore_mem>>, %arg18: memref<64x1024xf32, #tpu.memory_space<vmem>>, %arg19: memref<64x256xf32, #tpu.memory_space<vmem>>, %arg20: memref<64x512xf32, #tpu.memory_space<vmem>>, %arg21: memref<8x2304xf32, #tpu.memory_space<vmem>>, %arg22: memref<8x1152xf32, #tpu.memory_space<vmem>>) attributes {dimension_semantics = [], scalar_prefetch = 0 : i64, scratch_operands = 11 : i64, tpu.core_type = #tpu.core_type<tc>} {
    %c0_i32 = arith.constant 0 : i32
    %0 = tpu.memref_slice %arg17[%c0_i32] : memref<5x!tpu.dma_semaphore, #tpu.memory_space<semaphore_mem>> -> memref<1x!tpu.dma_semaphore, #tpu.memory_space<semaphore_mem>>
    %1 = tpu.memref_squeeze %0 : memref<1x!tpu.dma_semaphore, #tpu.memory_space<semaphore_mem>> -> memref<!tpu.dma_semaphore, #tpu.memory_space<semaphore_mem>>
    tpu.enqueue_dma source(%arg6 : memref<256x512xbf16, #tpu.memory_space<any>>) target(%arg12 : memref<256x512xbf16, #tpu.memory_space<vmem>>) target_semaphore(%1 : memref<!tpu.dma_semaphore, #tpu.memory_space<semaphore_mem>>)
    %c1_i32 = arith.constant 1 : i32
    %2 = tpu.memref_slice %arg17[%c1_i32] : memref<5x!tpu.dma_semaphore, #tpu.memory_space<semaphore_mem>> -> memref<1x!tpu.dma_semaphore, #tpu.memory_space<semaphore_mem>>
    %3 = tpu.memref_squeeze %2 : memref<1x!tpu.dma_semaphore, #tpu.memory_space<semaphore_mem>> -> memref<!tpu.dma_semaphore, #tpu.memory_space<semaphore_mem>>
    tpu.enqueue_dma source(%arg7 : memref<128x512xbf16, #tpu.memory_space<any>>) target(%arg13 : memref<128x512xbf16, #tpu.memory_space<vmem>>) target_semaphore(%3 : memref<!tpu.dma_semaphore, #tpu.memory_space<semaphore_mem>>)
    %c2_i32 = arith.constant 2 : i32
    %4 = tpu.memref_slice %arg17[%c2_i32] : memref<5x!tpu.dma_semaphore, #tpu.memory_space<semaphore_mem>> -> memref<1x!tpu.dma_semaphore, #tpu.memory_space<semaphore_mem>>
    %5 = tpu.memref_squeeze %4 : memref<1x!tpu.dma_semaphore, #tpu.memory_space<semaphore_mem>> -> memref<!tpu.dma_semaphore, #tpu.memory_space<semaphore_mem>>
    tpu.enqueue_dma source(%arg8 : memref<256x512xbf16, #tpu.memory_space<any>>) target(%arg14 : memref<256x512xbf16, #tpu.memory_space<vmem>>) target_semaphore(%5 : memref<!tpu.dma_semaphore, #tpu.memory_space<semaphore_mem>>)
    %c3_i32 = arith.constant 3 : i32
    %6 = tpu.memref_slice %arg17[%c3_i32] : memref<5x!tpu.dma_semaphore, #tpu.memory_space<semaphore_mem>> -> memref<1x!tpu.dma_semaphore, #tpu.memory_space<semaphore_mem>>
    %7 = tpu.memref_squeeze %6 : memref<1x!tpu.dma_semaphore, #tpu.memory_space<semaphore_mem>> -> memref<!tpu.dma_semaphore, #tpu.memory_space<semaphore_mem>>
    tpu.enqueue_dma source(%arg9 : memref<2304x128xbf16, #tpu.memory_space<any>>) target(%arg15 : memref<2304x128xbf16, #tpu.memory_space<vmem>>) target_semaphore(%7 : memref<!tpu.dma_semaphore, #tpu.memory_space<semaphore_mem>>)
    %c4_i32 = arith.constant 4 : i32
    %8 = tpu.memref_slice %arg17[%c4_i32] : memref<5x!tpu.dma_semaphore, #tpu.memory_space<semaphore_mem>> -> memref<1x!tpu.dma_semaphore, #tpu.memory_space<semaphore_mem>>
    %9 = tpu.memref_squeeze %8 : memref<1x!tpu.dma_semaphore, #tpu.memory_space<semaphore_mem>> -> memref<!tpu.dma_semaphore, #tpu.memory_space<semaphore_mem>>
    tpu.enqueue_dma source(%arg10 : memref<1152x128xbf16, #tpu.memory_space<any>>) target(%arg16 : memref<1152x128xbf16, #tpu.memory_space<vmem>>) target_semaphore(%9 : memref<!tpu.dma_semaphore, #tpu.memory_space<semaphore_mem>>)
    %c0 = arith.constant 0 : index
    %c0_0 = arith.constant 0 : index
    %10 = vector.load %arg0[%c0, %c0_0] : memref<64x16xf32, #tpu.memory_space<vmem>>, vector<64x16xf32>
    %11 = arith.truncf %10 : vector<64x16xf32> to vector<64x16xbf16>
    %c0_1 = arith.constant 0 : index
    %c0_2 = arith.constant 0 : index
    %12 = vector.load %arg1[%c0_1, %c0_2] : memref<16x1024xbf16, #tpu.memory_space<vmem>>, vector<16x1024xbf16>
    %cst = arith.constant dense<0.000000e+00> : vector<64x1024xf32>
    %13 = tpu.matmul %11, %12, %cst {dimension_numbers = #tpu.dot_dimension_numbers<[1], [0], [0], [1], [0, 0, 1, 1], [], []>} : vector<64x16xbf16>, vector<16x1024xbf16>, vector<64x1024xf32> -> vector<64x1024xf32>
    %c0_3 = arith.constant 0 : index
    %c0_4 = arith.constant 0 : index
    %14 = vector.load %arg3[%c0_3, %c0_4] : memref<1x1024xf32, #tpu.memory_space<vmem>>, vector<1x1024xf32>
    %15 = vector.broadcast %14 : vector<1x1024xf32> to vector<64x1024xf32>
    %16 = arith.addf %13, %15 : vector<64x1024xf32>
    %c0_5 = arith.constant 0 : index
    %c0_6 = arith.constant 0 : index
    %17 = vector.load %arg18[%c0_5, %c0_6] : memref<64x1024xf32, #tpu.memory_space<vmem>>, vector<64x1024xf32>
    tpu.vector_store %arg18[%c0_5, %c0_6], %16 {strides = array<i32>} : memref<64x1024xf32, #tpu.memory_space<vmem>>, vector<64x1024xf32>,
    %cst_7 = arith.constant 0.000000e+00 : f32
    %18 = vector.broadcast %cst_7 : f32 to vector<16x128xf32>
    %cst_8 = arith.constant 0.000000e+00 : f32
    %19 = vector.broadcast %cst_8 : f32 to vector<16x128xf32>
    %20 = arith.truncf %18 : vector<16x128xf32> to vector<16x128xbf16>
    %c0_9 = arith.constant 0 : index
    %c0_10 = arith.constant 0 : index
    %21 = vector.load %arg2[%c0_9, %c0_10] : memref<128x1024xbf16, #tpu.memory_space<vmem>>, vector<128x1024xbf16>
    %cst_11 = arith.constant dense<0.000000e+00> : vector<16x1024xf32>
    %22 = tpu.matmul %20, %21, %cst_11 {dimension_numbers = #tpu.dot_dimension_numbers<[1], [0], [0], [1], [0, 0, 1, 1], [], []>} : vector<16x128xbf16>, vector<128x1024xbf16>, vector<16x1024xf32> -> vector<16x1024xf32>
    %c0_12 = arith.constant 0 : index
    %c0_13 = arith.constant 0 : index
    %23 = vector.load %arg18[%c0_12, %c0_13] : memref<64x1024xf32, #tpu.memory_space<vmem>>, vector<8x512xf32>
    %24 = vector.extract_strided_slice %22 {offsets = [0, 0], sizes = [8, 512], strides = [1, 1]} : vector<16x1024xf32> to vector<8x512xf32>
    %25 = arith.addf %23, %24 : vector<8x512xf32>
    %c56 = arith.constant 56 : index
    %c512 = arith.constant 512 : index
    %26 = vector.load %arg18[%c56, %c512] : memref<64x1024xf32, #tpu.memory_space<vmem>>, vector<8x512xf32>
    %27 = vector.extract_strided_slice %22 {offsets = [8, 512], sizes = [8, 512], strides = [1, 1]} : vector<16x1024xf32> to vector<8x512xf32>
    %28 = arith.addf %26, %27 : vector<8x512xf32>
    %29 = tpu.concatenate %25, %28 in 0 : vector<8x512xf32>, vector<8x512xf32> -> vector<16x512xf32>
    %30 = vector.extract_strided_slice %29 {offsets = [0, 0], sizes = [16, 128], strides = [1, 1]} : vector<16x512xf32> to vector<16x128xf32>
    %31 = arith.negf %30 : vector<16x128xf32>
    %32 = math.exp %31 : vector<16x128xf32>
    %cst_14 = arith.constant 1.000000e+00 : f32
    %33 = vector.broadcast %cst_14 : f32 to vector<16x128xf32>
    %34 = arith.addf %33, %32 : vector<16x128xf32>
    %35 = arith.divf %33, %34 : vector<16x128xf32>
    %36 = vector.extract_strided_slice %29 {offsets = [0, 128], sizes = [16, 128], strides = [1, 1]} : vector<16x512xf32> to vector<16x128xf32>
    %37 = arith.negf %36 : vector<16x128xf32>
    %38 = math.exp %37 : vector<16x128xf32>
    %cst_15 = arith.constant 1.000000e+00 : f32
    %39 = vector.broadcast %cst_15 : f32 to vector<16x128xf32>
    %40 = arith.addf %39, %38 : vector<16x128xf32>
    %41 = arith.divf %39, %40 : vector<16x128xf32>
    %42 = vector.extract_strided_slice %29 {offsets = [0, 256], sizes = [16, 128], strides = [1, 1]} : vector<16x512xf32> to vector<16x128xf32>
    %43 = math.tanh %42 : vector<16x128xf32>
    %44 = vector.extract_strided_slice %29 {offsets = [0, 384], sizes = [16, 128], strides = [1, 1]} : vector<16x512xf32> to vector<16x128xf32>
    %45 = arith.negf %44 : vector<16x128xf32>
    %46 = math.exp %45 : vector<16x128xf32>
    %cst_16 = arith.constant 1.000000e+00 : f32
    %47 = vector.broadcast %cst_16 : f32 to vector<16x128xf32>
    %48 = arith.addf %47, %46 : vector<16x128xf32>
    %49 = arith.divf %47, %48 : vector<16x128xf32>
    %50 = arith.mulf %41, %19 : vector<16x128xf32>
    %51 = arith.mulf %35, %43 : vector<16x128xf32>
    %52 = arith.addf %50, %51 : vector<16x128xf32>
    %53 = math.tanh %52 : vector<16x128xf32>
    %54 = arith.mulf %49, %53 : vector<16x128xf32>
    %55 = vector.extract_strided_slice %54 {offsets = [0, 0], sizes = [8, 128], strides = [1, 1]} : vector<16x128xf32> to vector<8x128xf32>
    %c0_17 = arith.constant 0 : index
    %c0_18 = arith.constant 0 : index
    %56 = vector.load %arg19[%c0_17, %c0_18] : memref<64x256xf32, #tpu.memory_space<vmem>>, vector<8x128xf32>
    tpu.vector_store %arg19[%c0_17, %c0_18], %55 {strides = array<i32>} : memref<64x256xf32, #tpu.memory_space<vmem>>, vector<8x128xf32>,
    %57 = vector.extract_strided_slice %54 {offsets = [8, 0], sizes = [8, 128], strides = [1, 1]} : vector<16x128xf32> to vector<8x128xf32>
    %c56_19 = arith.constant 56 : index
    %c128 = arith.constant 128 : index
    %58 = vector.load %arg19[%c56_19, %c128] : memref<64x256xf32, #tpu.memory_space<vmem>>, vector<8x128xf32>
    tpu.vector_store %arg19[%c56_19, %c128], %57 {strides = array<i32>} : memref<64x256xf32, #tpu.memory_space<vmem>>, vector<8x128xf32>,
    %59 = arith.truncf %54 : vector<16x128xf32> to vector<16x128xbf16>
    %c0_20 = arith.constant 0 : index
    %c0_21 = arith.constant 0 : index
    %60 = vector.load %arg2[%c0_20, %c0_21] : memref<128x1024xbf16, #tpu.memory_space<vmem>>, vector<128x1024xbf16>
    %cst_22 = arith.constant dense<0.000000e+00> : vector<16x1024xf32>
    %61 = tpu.matmul %59, %60, %cst_22 {dimension_numbers = #tpu.dot_dimension_numbers<[1], [0], [0], [1], [0, 0, 1, 1], [], []>} : vector<16x128xbf16>, vector<128x1024xbf16>, vector<16x1024xf32> -> vector<16x1024xf32>
    %c8 = arith.constant 8 : index
    %c0_23 = arith.constant 0 : index
    %62 = vector.load %arg18[%c8, %c0_23] : memref<64x1024xf32, #tpu.memory_space<vmem>>, vector<8x512xf32>
    %63 = vector.extract_strided_slice %61 {offsets = [0, 0], sizes = [8, 512], strides = [1, 1]} : vector<16x1024xf32> to vector<8x512xf32>
    %64 = arith.addf %62, %63 : vector<8x512xf32>
    %c48 = arith.constant 48 : index
    %c512_24 = arith.constant 512 : index
    %65 = vector.load %arg18[%c48, %c512_24] : memref<64x1024xf32, #tpu.memory_space<vmem>>, vector<8x512xf32>
    %66 = vector.extract_strided_slice %61 {offsets = [8, 512], sizes = [8, 512], strides = [1, 1]} : vector<16x1024xf32> to vector<8x512xf32>
    %67 = arith.addf %65, %66 : vector<8x512xf32>
    %68 = tpu.concatenate %64, %67 in 0 : vector<8x512xf32>, vector<8x512xf32> -> vector<16x512xf32>
    %69 = vector.extract_strided_slice %68 {offsets = [0, 0], sizes = [16, 128], strides = [1, 1]} : vector<16x512xf32> to vector<16x128xf32>
    %70 = arith.negf %69 : vector<16x128xf32>
    %71 = math.exp %70 : vector<16x128xf32>
    %cst_25 = arith.constant 1.000000e+00 : f32
    %72 = vector.broadcast %cst_25 : f32 to vector<16x128xf32>
    %73 = arith.addf %72, %71 : vector<16x128xf32>
    %74 = arith.divf %72, %73 : vector<16x128xf32>
    %75 = vector.extract_strided_slice %68 {offsets = [0, 128], sizes = [16, 128], strides = [1, 1]} : vector<16x512xf32> to vector<16x128xf32>
    %76 = arith.negf %75 : vector<16x128xf32>
    %77 = math.exp %76 : vector<16x128xf32>
    %cst_26 = arith.constant 1.000000e+00 : f32
    %78 = vector.broadcast %cst_26 : f32 to vector<16x128xf32>
    %79 = arith.addf %78, %77 : vector<16x128xf32>
    %80 = arith.divf %78, %79 : vector<16x128xf32>
    %81 = vector.extract_strided_slice %68 {offsets = [0, 256], sizes = [16, 128], strides = [1, 1]} : vector<16x512xf32> to vector<16x128xf32>
    %82 = math.tanh %81 : vector<16x128xf32>
    %83 = vector.extract_strided_slice %68 {offsets = [0, 384], sizes = [16, 128], strides = [1, 1]} : vector<16x512xf32> to vector<16x128xf32>
    %84 = arith.negf %83 : vector<16x128xf32>
    %85 = math.exp %84 : vector<16x128xf32>
    %cst_27 = arith.constant 1.000000e+00 : f32
    %86 = vector.broadcast %cst_27 : f32 to vector<16x128xf32>
    %87 = arith.addf %86, %85 : vector<16x128xf32>
    %88 = arith.divf %86, %87 : vector<16x128xf32>
    %89 = arith.mulf %80, %52 : vector<16x128xf32>
    %90 = arith.mulf %74, %82 : vector<16x128xf32>
    %91 = arith.addf %89, %90 : vector<16x128xf32>
    %92 = math.tanh %91 : vector<16x128xf32>
    %93 = arith.mulf %88, %92 : vector<16x128xf32>
    %94 = vector.extract_strided_slice %93 {offsets = [0, 0], sizes = [8, 128], strides = [1, 1]} : vector<16x128xf32> to vector<8x128xf32>
    %c8_28 = arith.constant 8 : index
    %c0_29 = arith.constant 0 : index
    %95 = vector.load %arg19[%c8_28, %c0_29] : memref<64x256xf32, #tpu.memory_space<vmem>>, vector<8x128xf32>
    tpu.vector_store %arg19[%c8_28, %c0_29], %94 {strides = array<i32>} : memref<64x256xf32, #tpu.memory_space<vmem>>, vector<8x128xf32>,
    %96 = vector.extract_strided_slice %93 {offsets = [8, 0], sizes = [8, 128], strides = [1, 1]} : vector<16x128xf32> to vector<8x128xf32>
    %c48_30 = arith.constant 48 : index
    %c128_31 = arith.constant 128 : index
    %97 = vector.load %arg19[%c48_30, %c128_31] : memref<64x256xf32, #tpu.memory_space<vmem>>, vector<8x128xf32>
    tpu.vector_store %arg19[%c48_30, %c128_31], %96 {strides = array<i32>} : memref<64x256xf32, #tpu.memory_space<vmem>>, vector<8x128xf32>,
    %98 = arith.truncf %93 : vector<16x128xf32> to vector<16x128xbf16>
    %c0_32 = arith.constant 0 : index
    %c0_33 = arith.constant 0 : index
    %99 = vector.load %arg2[%c0_32, %c0_33] : memref<128x1024xbf16, #tpu.memory_space<vmem>>, vector<128x1024xbf16>
    %cst_34 = arith.constant dense<0.000000e+00> : vector<16x1024xf32>
    %100 = tpu.matmul %98, %99, %cst_34 {dimension_numbers = #tpu.dot_dimension_numbers<[1], [0], [0], [1], [0, 0, 1, 1], [], []>} : vector<16x128xbf16>, vector<128x1024xbf16>, vector<16x1024xf32> -> vector<16x1024xf32>
    %c16 = arith.constant 16 : index
    %c0_35 = arith.constant 0 : index
    %101 = vector.load %arg18[%c16, %c0_35] : memref<64x1024xf32, #tpu.memory_space<vmem>>, vector<8x512xf32>
    %102 = vector.extract_strided_slice %100 {offsets = [0, 0], sizes = [8, 512], strides = [1, 1]} : vector<16x1024xf32> to vector<8x512xf32>
    %103 = arith.addf %101, %102 : vector<8x512xf32>
    %c40 = arith.constant 40 : index
    %c512_36 = arith.constant 512 : index
    %104 = vector.load %arg18[%c40, %c512_36] : memref<64x1024xf32, #tpu.memory_space<vmem>>, vector<8x512xf32>
    %105 = vector.extract_strided_slice %100 {offsets = [8, 512], sizes = [8, 512], strides = [1, 1]} : vector<16x1024xf32> to vector<8x512xf32>
    %106 = arith.addf %104, %105 : vector<8x512xf32>
    %107 = tpu.concatenate %103, %106 in 0 : vector<8x512xf32>, vector<8x512xf32> -> vector<16x512xf32>
    %108 = vector.extract_strided_slice %107 {offsets = [0, 0], sizes = [16, 128], strides = [1, 1]} : vector<16x512xf32> to vector<16x128xf32>
    %109 = arith.negf %108 : vector<16x128xf32>
    %110 = math.exp %109 : vector<16x128xf32>
    %cst_37 = arith.constant 1.000000e+00 : f32
    %111 = vector.broadcast %cst_37 : f32 to vector<16x128xf32>
    %112 = arith.addf %111, %110 : vector<16x128xf32>
    %113 = arith.divf %111, %112 : vector<16x128xf32>
    %114 = vector.extract_strided_slice %107 {offsets = [0, 128], sizes = [16, 128], strides = [1, 1]} : vector<16x512xf32> to vector<16x128xf32>
    %115 = arith.negf %114 : vector<16x128xf32>
    %116 = math.exp %115 : vector<16x128xf32>
    %cst_38 = arith.constant 1.000000e+00 : f32
    %117 = vector.broadcast %cst_38 : f32 to vector<16x128xf32>
    %118 = arith.addf %117, %116 : vector<16x128xf32>
    %119 = arith.divf %117, %118 : vector<16x128xf32>
    %120 = vector.extract_strided_slice %107 {offsets = [0, 256], sizes = [16, 128], strides = [1, 1]} : vector<16x512xf32> to vector<16x128xf32>
    %121 = math.tanh %120 : vector<16x128xf32>
    %122 = vector.extract_strided_slice %107 {offsets = [0, 384], sizes = [16, 128], strides = [1, 1]} : vector<16x512xf32> to vector<16x128xf32>
    %123 = arith.negf %122 : vector<16x128xf32>
    %124 = math.exp %123 : vector<16x128xf32>
    %cst_39 = arith.constant 1.000000e+00 : f32
    %125 = vector.broadcast %cst_39 : f32 to vector<16x128xf32>
    %126 = arith.addf %125, %124 : vector<16x128xf32>
    %127 = arith.divf %125, %126 : vector<16x128xf32>
    %128 = arith.mulf %119, %91 : vector<16x128xf32>
    %129 = arith.mulf %113, %121 : vector<16x128xf32>
    %130 = arith.addf %128, %129 : vector<16x128xf32>
    %131 = math.tanh %130 : vector<16x128xf32>
    %132 = arith.mulf %127, %131 : vector<16x128xf32>
    %133 = vector.extract_strided_slice %132 {offsets = [0, 0], sizes = [8, 128], strides = [1, 1]} : vector<16x128xf32> to vector<8x128xf32>
    %c16_40 = arith.constant 16 : index
    %c0_41 = arith.constant 0 : index
    %134 = vector.load %arg19[%c16_40, %c0_41] : memref<64x256xf32, #tpu.memory_space<vmem>>, vector<8x128xf32>
    tpu.vector_store %arg19[%c16_40, %c0_41], %133 {strides = array<i32>} : memref<64x256xf32, #tpu.memory_space<vmem>>, vector<8x128xf32>,
    %135 = vector.extract_strided_slice %132 {offsets = [8, 0], sizes = [8, 128], strides = [1, 1]} : vector<16x128xf32> to vector<8x128xf32>
    %c40_42 = arith.constant 40 : index
    %c128_43 = arith.constant 128 : index
    %136 = vector.load %arg19[%c40_42, %c128_43] : memref<64x256xf32, #tpu.memory_space<vmem>>, vector<8x128xf32>
    tpu.vector_store %arg19[%c40_42, %c128_43], %135 {strides = array<i32>} : memref<64x256xf32, #tpu.memory_space<vmem>>, vector<8x128xf32>,
    %137 = arith.truncf %132 : vector<16x128xf32> to vector<16x128xbf16>
    %c0_44 = arith.constant 0 : index
    %c0_45 = arith.constant 0 : index
    %138 = vector.load %arg2[%c0_44, %c0_45] : memref<128x1024xbf16, #tpu.memory_space<vmem>>, vector<128x1024xbf16>
    %cst_46 = arith.constant dense<0.000000e+00> : vector<16x1024xf32>
    %139 = tpu.matmul %137, %138, %cst_46 {dimension_numbers = #tpu.dot_dimension_numbers<[1], [0], [0], [1], [0, 0, 1, 1], [], []>} : vector<16x128xbf16>, vector<128x1024xbf16>, vector<16x1024xf32> -> vector<16x1024xf32>
    %c24 = arith.constant 24 : index
    %c0_47 = arith.constant 0 : index
    %140 = vector.load %arg18[%c24, %c0_47] : memref<64x1024xf32, #tpu.memory_space<vmem>>, vector<8x512xf32>
    %141 = vector.extract_strided_slice %139 {offsets = [0, 0], sizes = [8, 512], strides = [1, 1]} : vector<16x1024xf32> to vector<8x512xf32>
    %142 = arith.addf %140, %141 : vector<8x512xf32>
    %c32 = arith.constant 32 : index
    %c512_48 = arith.constant 512 : index
    %143 = vector.load %arg18[%c32, %c512_48] : memref<64x1024xf32, #tpu.memory_space<vmem>>, vector<8x512xf32>
    %144 = vector.extract_strided_slice %139 {offsets = [8, 512], sizes = [8, 512], strides = [1, 1]} : vector<16x1024xf32> to vector<8x512xf32>
    %145 = arith.addf %143, %144 : vector<8x512xf32>
    %146 = tpu.concatenate %142, %145 in 0 : vector<8x512xf32>, vector<8x512xf32> -> vector<16x512xf32>
    %147 = vector.extract_strided_slice %146 {offsets = [0, 0], sizes = [16, 128], strides = [1, 1]} : vector<16x512xf32> to vector<16x128xf32>
    %148 = arith.negf %147 : vector<16x128xf32>
    %149 = math.exp %148 : vector<16x128xf32>
    %cst_49 = arith.constant 1.000000e+00 : f32
    %150 = vector.broadcast %cst_49 : f32 to vector<16x128xf32>
    %151 = arith.addf %150, %149 : vector<16x128xf32>
    %152 = arith.divf %150, %151 : vector<16x128xf32>
    %153 = vector.extract_strided_slice %146 {offsets = [0, 128], sizes = [16, 128], strides = [1, 1]} : vector<16x512xf32> to vector<16x128xf32>
    %154 = arith.negf %153 : vector<16x128xf32>
    %155 = math.exp %154 : vector<16x128xf32>
    %cst_50 = arith.constant 1.000000e+00 : f32
    %156 = vector.broadcast %cst_50 : f32 to vector<16x128xf32>
    %157 = arith.addf %156, %155 : vector<16x128xf32>
    %158 = arith.divf %156, %157 : vector<16x128xf32>
    %159 = vector.extract_strided_slice %146 {offsets = [0, 256], sizes = [16, 128], strides = [1, 1]} : vector<16x512xf32> to vector<16x128xf32>
    %160 = math.tanh %159 : vector<16x128xf32>
    %161 = vector.extract_strided_slice %146 {offsets = [0, 384], sizes = [16, 128], strides = [1, 1]} : vector<16x512xf32> to vector<16x128xf32>
    %162 = arith.negf %161 : vector<16x128xf32>
    %163 = math.exp %162 : vector<16x128xf32>
    %cst_51 = arith.constant 1.000000e+00 : f32
    %164 = vector.broadcast %cst_51 : f32 to vector<16x128xf32>
    %165 = arith.addf %164, %163 : vector<16x128xf32>
    %166 = arith.divf %164, %165 : vector<16x128xf32>
    %167 = arith.mulf %158, %130 : vector<16x128xf32>
    %168 = arith.mulf %152, %160 : vector<16x128xf32>
    %169 = arith.addf %167, %168 : vector<16x128xf32>
    %170 = math.tanh %169 : vector<16x128xf32>
    %171 = arith.mulf %166, %170 : vector<16x128xf32>
    %172 = vector.extract_strided_slice %171 {offsets = [0, 0], sizes = [8, 128], strides = [1, 1]} : vector<16x128xf32> to vector<8x128xf32>
    %c24_52 = arith.constant 24 : index
    %c0_53 = arith.constant 0 : index
    %173 = vector.load %arg19[%c24_52, %c0_53] : memref<64x256xf32, #tpu.memory_space<vmem>>, vector<8x128xf32>
    tpu.vector_store %arg19[%c24_52, %c0_53], %172 {strides = array<i32>} : memref<64x256xf32, #tpu.memory_space<vmem>>, vector<8x128xf32>,
    %174 = vector.extract_strided_slice %171 {offsets = [8, 0], sizes = [8, 128], strides = [1, 1]} : vector<16x128xf32> to vector<8x128xf32>
    %c32_54 = arith.constant 32 : index
    %c128_55 = arith.constant 128 : index
    %175 = vector.load %arg19[%c32_54, %c128_55] : memref<64x256xf32, #tpu.memory_space<vmem>>, vector<8x128xf32>
    tpu.vector_store %arg19[%c32_54, %c128_55], %174 {strides = array<i32>} : memref<64x256xf32, #tpu.memory_space<vmem>>, vector<8x128xf32>,
    %176 = arith.truncf %171 : vector<16x128xf32> to vector<16x128xbf16>
    %c0_56 = arith.constant 0 : index
    %c0_57 = arith.constant 0 : index
    %177 = vector.load %arg2[%c0_56, %c0_57] : memref<128x1024xbf16, #tpu.memory_space<vmem>>, vector<128x1024xbf16>
    %cst_58 = arith.constant dense<0.000000e+00> : vector<16x1024xf32>
    %178 = tpu.matmul %176, %177, %cst_58 {dimension_numbers = #tpu.dot_dimension_numbers<[1], [0], [0], [1], [0, 0, 1, 1], [], []>} : vector<16x128xbf16>, vector<128x1024xbf16>, vector<16x1024xf32> -> vector<16x1024xf32>
    %c32_59 = arith.constant 32 : index
    %c0_60 = arith.constant 0 : index
    %179 = vector.load %arg18[%c32_59, %c0_60] : memref<64x1024xf32, #tpu.memory_space<vmem>>, vector<8x512xf32>
    %180 = vector.extract_strided_slice %178 {offsets = [0, 0], sizes = [8, 512], strides = [1, 1]} : vector<16x1024xf32> to vector<8x512xf32>
    %181 = arith.addf %179, %180 : vector<8x512xf32>
    %c24_61 = arith.constant 24 : index
    %c512_62 = arith.constant 512 : index
    %182 = vector.load %arg18[%c24_61, %c512_62] : memref<64x1024xf32, #tpu.memory_space<vmem>>, vector<8x512xf32>
    %183 = vector.extract_strided_slice %178 {offsets = [8, 512], sizes = [8, 512], strides = [1, 1]} : vector<16x1024xf32> to vector<8x512xf32>
    %184 = arith.addf %182, %183 : vector<8x512xf32>
    %185 = tpu.concatenate %181, %184 in 0 : vector<8x512xf32>, vector<8x512xf32> -> vector<16x512xf32>
    %186 = vector.extract_strided_slice %185 {offsets = [0, 0], sizes = [16, 128], strides = [1, 1]} : vector<16x512xf32> to vector<16x128xf32>
    %187 = arith.negf %186 : vector<16x128xf32>
    %188 = math.exp %187 : vector<16x128xf32>
    %cst_63 = arith.constant 1.000000e+00 : f32
    %189 = vector.broadcast %cst_63 : f32 to vector<16x128xf32>
    %190 = arith.addf %189, %188 : vector<16x128xf32>
    %191 = arith.divf %189, %190 : vector<16x128xf32>
    %192 = vector.extract_strided_slice %185 {offsets = [0, 128], sizes = [16, 128], strides = [1, 1]} : vector<16x512xf32> to vector<16x128xf32>
    %193 = arith.negf %192 : vector<16x128xf32>
    %194 = math.exp %193 : vector<16x128xf32>
    %cst_64 = arith.constant 1.000000e+00 : f32
    %195 = vector.broadcast %cst_64 : f32 to vector<16x128xf32>
    %196 = arith.addf %195, %194 : vector<16x128xf32>
    %197 = arith.divf %195, %196 : vector<16x128xf32>
    %198 = vector.extract_strided_slice %185 {offsets = [0, 256], sizes = [16, 128], strides = [1, 1]} : vector<16x512xf32> to vector<16x128xf32>
    %199 = math.tanh %198 : vector<16x128xf32>
    %200 = vector.extract_strided_slice %185 {offsets = [0, 384], sizes = [16, 128], strides = [1, 1]} : vector<16x512xf32> to vector<16x128xf32>
    %201 = arith.negf %200 : vector<16x128xf32>
    %202 = math.exp %201 : vector<16x128xf32>
    %cst_65 = arith.constant 1.000000e+00 : f32
    %203 = vector.broadcast %cst_65 : f32 to vector<16x128xf32>
    %204 = arith.addf %203, %202 : vector<16x128xf32>
    %205 = arith.divf %203, %204 : vector<16x128xf32>
    %206 = arith.mulf %197, %169 : vector<16x128xf32>
    %207 = arith.mulf %191, %199 : vector<16x128xf32>
    %208 = arith.addf %206, %207 : vector<16x128xf32>
    %209 = math.tanh %208 : vector<16x128xf32>
    %210 = arith.mulf %205, %209 : vector<16x128xf32>
    %211 = vector.extract_strided_slice %210 {offsets = [0, 0], sizes = [8, 128], strides = [1, 1]} : vector<16x128xf32> to vector<8x128xf32>
    %c32_66 = arith.constant 32 : index
    %c0_67 = arith.constant 0 : index
    %212 = vector.load %arg19[%c32_66, %c0_67] : memref<64x256xf32, #tpu.memory_space<vmem>>, vector<8x128xf32>
    tpu.vector_store %arg19[%c32_66, %c0_67], %211 {strides = array<i32>} : memref<64x256xf32, #tpu.memory_space<vmem>>, vector<8x128xf32>,
    %213 = vector.extract_strided_slice %210 {offsets = [8, 0], sizes = [8, 128], strides = [1, 1]} : vector<16x128xf32> to vector<8x128xf32>
    %c24_68 = arith.constant 24 : index
    %c128_69 = arith.constant 128 : index
    %214 = vector.load %arg19[%c24_68, %c128_69] : memref<64x256xf32, #tpu.memory_space<vmem>>, vector<8x128xf32>
    tpu.vector_store %arg19[%c24_68, %c128_69], %213 {strides = array<i32>} : memref<64x256xf32, #tpu.memory_space<vmem>>, vector<8x128xf32>,
    %215 = arith.truncf %210 : vector<16x128xf32> to vector<16x128xbf16>
    %c0_70 = arith.constant 0 : index
    %c0_71 = arith.constant 0 : index
    %216 = vector.load %arg2[%c0_70, %c0_71] : memref<128x1024xbf16, #tpu.memory_space<vmem>>, vector<128x1024xbf16>
    %cst_72 = arith.constant dense<0.000000e+00> : vector<16x1024xf32>
    %217 = tpu.matmul %215, %216, %cst_72 {dimension_numbers = #tpu.dot_dimension_numbers<[1], [0], [0], [1], [0, 0, 1, 1], [], []>} : vector<16x128xbf16>, vector<128x1024xbf16>, vector<16x1024xf32> -> vector<16x1024xf32>
    %c40_73 = arith.constant 40 : index
    %c0_74 = arith.constant 0 : index
    %218 = vector.load %arg18[%c40_73, %c0_74] : memref<64x1024xf32, #tpu.memory_space<vmem>>, vector<8x512xf32>
    %219 = vector.extract_strided_slice %217 {offsets = [0, 0], sizes = [8, 512], strides = [1, 1]} : vector<16x1024xf32> to vector<8x512xf32>
    %220 = arith.addf %218, %219 : vector<8x512xf32>
    %c16_75 = arith.constant 16 : index
    %c512_76 = arith.constant 512 : index
    %221 = vector.load %arg18[%c16_75, %c512_76] : memref<64x1024xf32, #tpu.memory_space<vmem>>, vector<8x512xf32>
    %222 = vector.extract_strided_slice %217 {offsets = [8, 512], sizes = [8, 512], strides = [1, 1]} : vector<16x1024xf32> to vector<8x512xf32>
    %223 = arith.addf %221, %222 : vector<8x512xf32>
    %224 = tpu.concatenate %220, %223 in 0 : vector<8x512xf32>, vector<8x512xf32> -> vector<16x512xf32>
    %225 = vector.extract_strided_slice %224 {offsets = [0, 0], sizes = [16, 128], strides = [1, 1]} : vector<16x512xf32> to vector<16x128xf32>
    %226 = arith.negf %225 : vector<16x128xf32>
    %227 = math.exp %226 : vector<16x128xf32>
    %cst_77 = arith.constant 1.000000e+00 : f32
    %228 = vector.broadcast %cst_77 : f32 to vector<16x128xf32>
    %229 = arith.addf %228, %227 : vector<16x128xf32>
    %230 = arith.divf %228, %229 : vector<16x128xf32>
    %231 = vector.extract_strided_slice %224 {offsets = [0, 128], sizes = [16, 128], strides = [1, 1]} : vector<16x512xf32> to vector<16x128xf32>
    %232 = arith.negf %231 : vector<16x128xf32>
    %233 = math.exp %232 : vector<16x128xf32>
    %cst_78 = arith.constant 1.000000e+00 : f32
    %234 = vector.broadcast %cst_78 : f32 to vector<16x128xf32>
    %235 = arith.addf %234, %233 : vector<16x128xf32>
    %236 = arith.divf %234, %235 : vector<16x128xf32>
    %237 = vector.extract_strided_slice %224 {offsets = [0, 256], sizes = [16, 128], strides = [1, 1]} : vector<16x512xf32> to vector<16x128xf32>
    %238 = math.tanh %237 : vector<16x128xf32>
    %239 = vector.extract_strided_slice %224 {offsets = [0, 384], sizes = [16, 128], strides = [1, 1]} : vector<16x512xf32> to vector<16x128xf32>
    %240 = arith.negf %239 : vector<16x128xf32>
    %241 = math.exp %240 : vector<16x128xf32>
    %cst_79 = arith.constant 1.000000e+00 : f32
    %242 = vector.broadcast %cst_79 : f32 to vector<16x128xf32>
    %243 = arith.addf %242, %241 : vector<16x128xf32>
    %244 = arith.divf %242, %243 : vector<16x128xf32>
    %245 = arith.mulf %236, %208 : vector<16x128xf32>
    %246 = arith.mulf %230, %238 : vector<16x128xf32>
    %247 = arith.addf %245, %246 : vector<16x128xf32>
    %248 = math.tanh %247 : vector<16x128xf32>
    %249 = arith.mulf %244, %248 : vector<16x128xf32>
    %250 = vector.extract_strided_slice %249 {offsets = [0, 0], sizes = [8, 128], strides = [1, 1]} : vector<16x128xf32> to vector<8x128xf32>
    %c40_80 = arith.constant 40 : index
    %c0_81 = arith.constant 0 : index
    %251 = vector.load %arg19[%c40_80, %c0_81] : memref<64x256xf32, #tpu.memory_space<vmem>>, vector<8x128xf32>
    tpu.vector_store %arg19[%c40_80, %c0_81], %250 {strides = array<i32>} : memref<64x256xf32, #tpu.memory_space<vmem>>, vector<8x128xf32>,
    %252 = vector.extract_strided_slice %249 {offsets = [8, 0], sizes = [8, 128], strides = [1, 1]} : vector<16x128xf32> to vector<8x128xf32>
    %c16_82 = arith.constant 16 : index
    %c128_83 = arith.constant 128 : index
    %253 = vector.load %arg19[%c16_82, %c128_83] : memref<64x256xf32, #tpu.memory_space<vmem>>, vector<8x128xf32>
    tpu.vector_store %arg19[%c16_82, %c128_83], %252 {strides = array<i32>} : memref<64x256xf32, #tpu.memory_space<vmem>>, vector<8x128xf32>,
    %254 = arith.truncf %249 : vector<16x128xf32> to vector<16x128xbf16>
    %c0_84 = arith.constant 0 : index
    %c0_85 = arith.constant 0 : index
    %255 = vector.load %arg2[%c0_84, %c0_85] : memref<128x1024xbf16, #tpu.memory_space<vmem>>, vector<128x1024xbf16>
    %cst_86 = arith.constant dense<0.000000e+00> : vector<16x1024xf32>
    %256 = tpu.matmul %254, %255, %cst_86 {dimension_numbers = #tpu.dot_dimension_numbers<[1], [0], [0], [1], [0, 0, 1, 1], [], []>} : vector<16x128xbf16>, vector<128x1024xbf16>, vector<16x1024xf32> -> vector<16x1024xf32>
    %c48_87 = arith.constant 48 : index
    %c0_88 = arith.constant 0 : index
    %257 = vector.load %arg18[%c48_87, %c0_88] : memref<64x1024xf32, #tpu.memory_space<vmem>>, vector<8x512xf32>
    %258 = vector.extract_strided_slice %256 {offsets = [0, 0], sizes = [8, 512], strides = [1, 1]} : vector<16x1024xf32> to vector<8x512xf32>
    %259 = arith.addf %257, %258 : vector<8x512xf32>
    %c8_89 = arith.constant 8 : index
    %c512_90 = arith.constant 512 : index
    %260 = vector.load %arg18[%c8_89, %c512_90] : memref<64x1024xf32, #tpu.memory_space<vmem>>, vector<8x512xf32>
    %261 = vector.extract_strided_slice %256 {offsets = [8, 512], sizes = [8, 512], strides = [1, 1]} : vector<16x1024xf32> to vector<8x512xf32>
    %262 = arith.addf %260, %261 : vector<8x512xf32>
    %263 = tpu.concatenate %259, %262 in 0 : vector<8x512xf32>, vector<8x512xf32> -> vector<16x512xf32>
    %264 = vector.extract_strided_slice %263 {offsets = [0, 0], sizes = [16, 128], strides = [1, 1]} : vector<16x512xf32> to vector<16x128xf32>
    %265 = arith.negf %264 : vector<16x128xf32>
    %266 = math.exp %265 : vector<16x128xf32>
    %cst_91 = arith.constant 1.000000e+00 : f32
    %267 = vector.broadcast %cst_91 : f32 to vector<16x128xf32>
    %268 = arith.addf %267, %266 : vector<16x128xf32>
    %269 = arith.divf %267, %268 : vector<16x128xf32>
    %270 = vector.extract_strided_slice %263 {offsets = [0, 128], sizes = [16, 128], strides = [1, 1]} : vector<16x512xf32> to vector<16x128xf32>
    %271 = arith.negf %270 : vector<16x128xf32>
    %272 = math.exp %271 : vector<16x128xf32>
    %cst_92 = arith.constant 1.000000e+00 : f32
    %273 = vector.broadcast %cst_92 : f32 to vector<16x128xf32>
    %274 = arith.addf %273, %272 : vector<16x128xf32>
    %275 = arith.divf %273, %274 : vector<16x128xf32>
    %276 = vector.extract_strided_slice %263 {offsets = [0, 256], sizes = [16, 128], strides = [1, 1]} : vector<16x512xf32> to vector<16x128xf32>
    %277 = math.tanh %276 : vector<16x128xf32>
    %278 = vector.extract_strided_slice %263 {offsets = [0, 384], sizes = [16, 128], strides = [1, 1]} : vector<16x512xf32> to vector<16x128xf32>
    %279 = arith.negf %278 : vector<16x128xf32>
    %280 = math.exp %279 : vector<16x128xf32>
    %cst_93 = arith.constant 1.000000e+00 : f32
    %281 = vector.broadcast %cst_93 : f32 to vector<16x128xf32>
    %282 = arith.addf %281, %280 : vector<16x128xf32>
    %283 = arith.divf %281, %282 : vector<16x128xf32>
    %284 = arith.mulf %275, %247 : vector<16x128xf32>
    %285 = arith.mulf %269, %277 : vector<16x128xf32>
    %286 = arith.addf %284, %285 : vector<16x128xf32>
    %287 = math.tanh %286 : vector<16x128xf32>
    %288 = arith.mulf %283, %287 : vector<16x128xf32>
    %289 = vector.extract_strided_slice %288 {offsets = [0, 0], sizes = [8, 128], strides = [1, 1]} : vector<16x128xf32> to vector<8x128xf32>
    %c48_94 = arith.constant 48 : index
    %c0_95 = arith.constant 0 : index
    %290 = vector.load %arg19[%c48_94, %c0_95] : memref<64x256xf32, #tpu.memory_space<vmem>>, vector<8x128xf32>
    tpu.vector_store %arg19[%c48_94, %c0_95], %289 {strides = array<i32>} : memref<64x256xf32, #tpu.memory_space<vmem>>, vector<8x128xf32>,
    %291 = vector.extract_strided_slice %288 {offsets = [8, 0], sizes = [8, 128], strides = [1, 1]} : vector<16x128xf32> to vector<8x128xf32>
    %c8_96 = arith.constant 8 : index
    %c128_97 = arith.constant 128 : index
    %292 = vector.load %arg19[%c8_96, %c128_97] : memref<64x256xf32, #tpu.memory_space<vmem>>, vector<8x128xf32>
    tpu.vector_store %arg19[%c8_96, %c128_97], %291 {strides = array<i32>} : memref<64x256xf32, #tpu.memory_space<vmem>>, vector<8x128xf32>,
    %293 = arith.truncf %288 : vector<16x128xf32> to vector<16x128xbf16>
    %c0_98 = arith.constant 0 : index
    %c0_99 = arith.constant 0 : index
    %294 = vector.load %arg2[%c0_98, %c0_99] : memref<128x1024xbf16, #tpu.memory_space<vmem>>, vector<128x1024xbf16>
    %cst_100 = arith.constant dense<0.000000e+00> : vector<16x1024xf32>
    %295 = tpu.matmul %293, %294, %cst_100 {dimension_numbers = #tpu.dot_dimension_numbers<[1], [0], [0], [1], [0, 0, 1, 1], [], []>} : vector<16x128xbf16>, vector<128x1024xbf16>, vector<16x1024xf32> -> vector<16x1024xf32>
    %c56_101 = arith.constant 56 : index
    %c0_102 = arith.constant 0 : index
    %296 = vector.load %arg18[%c56_101, %c0_102] : memref<64x1024xf32, #tpu.memory_space<vmem>>, vector<8x512xf32>
    %297 = vector.extract_strided_slice %295 {offsets = [0, 0], sizes = [8, 512], strides = [1, 1]} : vector<16x1024xf32> to vector<8x512xf32>
    %298 = arith.addf %296, %297 : vector<8x512xf32>
    %c0_103 = arith.constant 0 : index
    %c512_104 = arith.constant 512 : index
    %299 = vector.load %arg18[%c0_103, %c512_104] : memref<64x1024xf32, #tpu.memory_space<vmem>>, vector<8x512xf32>
    %300 = vector.extract_strided_slice %295 {offsets = [8, 512], sizes = [8, 512], strides = [1, 1]} : vector<16x1024xf32> to vector<8x512xf32>
    %301 = arith.addf %299, %300 : vector<8x512xf32>
    %302 = tpu.concatenate %298, %301 in 0 : vector<8x512xf32>, vector<8x512xf32> -> vector<16x512xf32>
    %303 = vector.extract_strided_slice %302 {offsets = [0, 0], sizes = [16, 128], strides = [1, 1]} : vector<16x512xf32> to vector<16x128xf32>
    %304 = arith.negf %303 : vector<16x128xf32>
    %305 = math.exp %304 : vector<16x128xf32>
    %cst_105 = arith.constant 1.000000e+00 : f32
    %306 = vector.broadcast %cst_105 : f32 to vector<16x128xf32>
    %307 = arith.addf %306, %305 : vector<16x128xf32>
    %308 = arith.divf %306, %307 : vector<16x128xf32>
    %309 = vector.extract_strided_slice %302 {offsets = [0, 128], sizes = [16, 128], strides = [1, 1]} : vector<16x512xf32> to vector<16x128xf32>
    %310 = arith.negf %309 : vector<16x128xf32>
    %311 = math.exp %310 : vector<16x128xf32>
    %cst_106 = arith.constant 1.000000e+00 : f32
    %312 = vector.broadcast %cst_106 : f32 to vector<16x128xf32>
    %313 = arith.addf %312, %311 : vector<16x128xf32>
    %314 = arith.divf %312, %313 : vector<16x128xf32>
    %315 = vector.extract_strided_slice %302 {offsets = [0, 256], sizes = [16, 128], strides = [1, 1]} : vector<16x512xf32> to vector<16x128xf32>
    %316 = math.tanh %315 : vector<16x128xf32>
    %317 = vector.extract_strided_slice %302 {offsets = [0, 384], sizes = [16, 128], strides = [1, 1]} : vector<16x512xf32> to vector<16x128xf32>
    %318 = arith.negf %317 : vector<16x128xf32>
    %319 = math.exp %318 : vector<16x128xf32>
    %cst_107 = arith.constant 1.000000e+00 : f32
    %320 = vector.broadcast %cst_107 : f32 to vector<16x128xf32>
    %321 = arith.addf %320, %319 : vector<16x128xf32>
    %322 = arith.divf %320, %321 : vector<16x128xf32>
    %323 = arith.mulf %314, %286 : vector<16x128xf32>
    %324 = arith.mulf %308, %316 : vector<16x128xf32>
    %325 = arith.addf %323, %324 : vector<16x128xf32>
    %326 = math.tanh %325 : vector<16x128xf32>
    %327 = arith.mulf %322, %326 : vector<16x128xf32>
    %328 = vector.extract_strided_slice %327 {offsets = [0, 0], sizes = [8, 128], strides = [1, 1]} : vector<16x128xf32> to vector<8x128xf32>
    %c56_108 = arith.constant 56 : index
    %c0_109 = arith.constant 0 : index
    %329 = vector.load %arg19[%c56_108, %c0_109] : memref<64x256xf32, #tpu.memory_space<vmem>>, vector<8x128xf32>
    tpu.vector_store %arg19[%c56_108, %c0_109], %328 {strides = array<i32>} : memref<64x256xf32, #tpu.memory_space<vmem>>, vector<8x128xf32>,
    %330 = vector.extract_strided_slice %327 {offsets = [8, 0], sizes = [8, 128], strides = [1, 1]} : vector<16x128xf32> to vector<8x128xf32>
    %c0_110 = arith.constant 0 : index
    %c128_111 = arith.constant 128 : index
    %331 = vector.load %arg19[%c0_110, %c128_111] : memref<64x256xf32, #tpu.memory_space<vmem>>, vector<8x128xf32>
    tpu.vector_store %arg19[%c0_110, %c128_111], %330 {strides = array<i32>} : memref<64x256xf32, #tpu.memory_space<vmem>>, vector<8x128xf32>,
    %c0_i32_112 = arith.constant 0 : i32
    %332 = tpu.memref_slice %arg17[%c0_i32_112] : memref<5x!tpu.dma_semaphore, #tpu.memory_space<semaphore_mem>> -> memref<1x!tpu.dma_semaphore, #tpu.memory_space<semaphore_mem>>
    %333 = tpu.memref_squeeze %332 : memref<1x!tpu.dma_semaphore, #tpu.memory_space<semaphore_mem>> -> memref<!tpu.dma_semaphore, #tpu.memory_space<semaphore_mem>>
    tpu.wait_dma2 semaphore(%333 : memref<!tpu.dma_semaphore, #tpu.memory_space<semaphore_mem>>) src(%arg6 : memref<256x512xbf16, #tpu.memory_space<any>>) dst(%arg12 : memref<256x512xbf16, #tpu.memory_space<vmem>>)
    %c1_i32_113 = arith.constant 1 : i32
    %334 = tpu.memref_slice %arg17[%c1_i32_113] : memref<5x!tpu.dma_semaphore, #tpu.memory_space<semaphore_mem>> -> memref<1x!tpu.dma_semaphore, #tpu.memory_space<semaphore_mem>>
    %335 = tpu.memref_squeeze %334 : memref<1x!tpu.dma_semaphore, #tpu.memory_space<semaphore_mem>> -> memref<!tpu.dma_semaphore, #tpu.memory_space<semaphore_mem>>
    tpu.wait_dma2 semaphore(%335 : memref<!tpu.dma_semaphore, #tpu.memory_space<semaphore_mem>>) src(%arg7 : memref<128x512xbf16, #tpu.memory_space<any>>) dst(%arg13 : memref<128x512xbf16, #tpu.memory_space<vmem>>)
    %c0_114 = arith.constant 0 : index
    %c0_115 = arith.constant 0 : index
    %336 = vector.load %arg19[%c0_114, %c0_115] : memref<64x256xf32, #tpu.memory_space<vmem>>, vector<64x256xf32>
    %337 = arith.truncf %336 : vector<64x256xf32> to vector<64x256xbf16>
    %c0_116 = arith.constant 0 : index
    %c0_117 = arith.constant 0 : index
    %338 = vector.load %arg12[%c0_116, %c0_117] : memref<256x512xbf16, #tpu.memory_space<vmem>>, vector<256x512xbf16>
    %cst_118 = arith.constant dense<0.000000e+00> : vector<64x512xf32>
    %339 = tpu.matmul %337, %338, %cst_118 {dimension_numbers = #tpu.dot_dimension_numbers<[1], [0], [0], [1], [0, 0, 1, 1], [], []>} : vector<64x256xbf16>, vector<256x512xbf16>, vector<64x512xf32> -> vector<64x512xf32>
    %c0_119 = arith.constant 0 : index
    %c0_120 = arith.constant 0 : index
    %340 = vector.load %arg4[%c0_119, %c0_120] : memref<1x512xf32, #tpu.memory_space<vmem>>, vector<1x512xf32>
    %341 = vector.broadcast %340 : vector<1x512xf32> to vector<64x512xf32>
    %342 = arith.addf %339, %341 : vector<64x512xf32>
    %c0_121 = arith.constant 0 : index
    %c0_122 = arith.constant 0 : index
    %343 = vector.load %arg20[%c0_121, %c0_122] : memref<64x512xf32, #tpu.memory_space<vmem>>, vector<64x512xf32>
    tpu.vector_store %arg20[%c0_121, %c0_122], %342 {strides = array<i32>} : memref<64x512xf32, #tpu.memory_space<vmem>>, vector<64x512xf32>,
    %cst_123 = arith.constant 0.000000e+00 : f32
    %344 = vector.broadcast %cst_123 : f32 to vector<8x128xf32>
    %cst_124 = arith.constant 0.000000e+00 : f32
    %345 = vector.broadcast %cst_124 : f32 to vector<8x128xf32>
    %c0_125 = arith.constant 0 : index
    %c0_126 = arith.constant 0 : index
    %346 = vector.load %arg20[%c0_125, %c0_126] : memref<64x512xf32, #tpu.memory_space<vmem>>, vector<8x512xf32>
    %347 = arith.truncf %344 : vector<8x128xf32> to vector<8x128xbf16>
    %c0_127 = arith.constant 0 : index
    %c0_128 = arith.constant 0 : index
    %348 = vector.load %arg13[%c0_127, %c0_128] : memref<128x512xbf16, #tpu.memory_space<vmem>>, vector<128x512xbf16>
    %cst_129 = arith.constant dense<0.000000e+00> : vector<8x512xf32>
    %349 = tpu.matmul %347, %348, %cst_129 {dimension_numbers = #tpu.dot_dimension_numbers<[1], [0], [0], [1], [0, 0, 1, 1], [], []>} : vector<8x128xbf16>, vector<128x512xbf16>, vector<8x512xf32> -> vector<8x512xf32>
    %350 = arith.addf %346, %349 : vector<8x512xf32>
    %351 = vector.extract_strided_slice %350 {offsets = [0, 0], sizes = [8, 128], strides = [1, 1]} : vector<8x512xf32> to vector<8x128xf32>
    %352 = arith.negf %351 : vector<8x128xf32>
    %353 = math.exp %352 : vector<8x128xf32>
    %cst_130 = arith.constant 1.000000e+00 : f32
    %354 = vector.broadcast %cst_130 : f32 to vector<8x128xf32>
    %355 = arith.addf %354, %353 : vector<8x128xf32>
    %356 = arith.divf %354, %355 : vector<8x128xf32>
    %357 = vector.extract_strided_slice %350 {offsets = [0, 128], sizes = [8, 128], strides = [1, 1]} : vector<8x512xf32> to vector<8x128xf32>
    %358 = arith.negf %357 : vector<8x128xf32>
    %359 = math.exp %358 : vector<8x128xf32>
    %cst_131 = arith.constant 1.000000e+00 : f32
    %360 = vector.broadcast %cst_131 : f32 to vector<8x128xf32>
    %361 = arith.addf %360, %359 : vector<8x128xf32>
    %362 = arith.divf %360, %361 : vector<8x128xf32>
    %363 = vector.extract_strided_slice %350 {offsets = [0, 256], sizes = [8, 128], strides = [1, 1]} : vector<8x512xf32> to vector<8x128xf32>
    %364 = math.tanh %363 : vector<8x128xf32>
    %365 = vector.extract_strided_slice %350 {offsets = [0, 384], sizes = [8, 128], strides = [1, 1]} : vector<8x512xf32> to vector<8x128xf32>
    %366 = arith.negf %365 : vector<8x128xf32>
    %367 = math.exp %366 : vector<8x128xf32>
    %cst_132 = arith.constant 1.000000e+00 : f32
    %368 = vector.broadcast %cst_132 : f32 to vector<8x128xf32>
    %369 = arith.addf %368, %367 : vector<8x128xf32>
    %370 = arith.divf %368, %369 : vector<8x128xf32>
    %371 = arith.mulf %362, %345 : vector<8x128xf32>
    %372 = arith.mulf %356, %364 : vector<8x128xf32>
    %373 = arith.addf %371, %372 : vector<8x128xf32>
    %374 = math.tanh %373 : vector<8x128xf32>
    %375 = arith.mulf %370, %374 : vector<8x128xf32>
    %c8_133 = arith.constant 8 : index
    %c0_134 = arith.constant 0 : index
    %376 = vector.load %arg20[%c8_133, %c0_134] : memref<64x512xf32, #tpu.memory_space<vmem>>, vector<8x512xf32>
    %377 = arith.truncf %375 : vector<8x128xf32> to vector<8x128xbf16>
    %c0_135 = arith.constant 0 : index
    %c0_136 = arith.constant 0 : index
    %378 = vector.load %arg13[%c0_135, %c0_136] : memref<128x512xbf16, #tpu.memory_space<vmem>>, vector<128x512xbf16>
    %cst_137 = arith.constant dense<0.000000e+00> : vector<8x512xf32>
    %379 = tpu.matmul %377, %378, %cst_137 {dimension_numbers = #tpu.dot_dimension_numbers<[1], [0], [0], [1], [0, 0, 1, 1], [], []>} : vector<8x128xbf16>, vector<128x512xbf16>, vector<8x512xf32> -> vector<8x512xf32>
    %380 = arith.addf %376, %379 : vector<8x512xf32>
    %381 = vector.extract_strided_slice %380 {offsets = [0, 0], sizes = [8, 128], strides = [1, 1]} : vector<8x512xf32> to vector<8x128xf32>
    %382 = arith.negf %381 : vector<8x128xf32>
    %383 = math.exp %382 : vector<8x128xf32>
    %cst_138 = arith.constant 1.000000e+00 : f32
    %384 = vector.broadcast %cst_138 : f32 to vector<8x128xf32>
    %385 = arith.addf %384, %383 : vector<8x128xf32>
    %386 = arith.divf %384, %385 : vector<8x128xf32>
    %387 = vector.extract_strided_slice %380 {offsets = [0, 128], sizes = [8, 128], strides = [1, 1]} : vector<8x512xf32> to vector<8x128xf32>
    %388 = arith.negf %387 : vector<8x128xf32>
    %389 = math.exp %388 : vector<8x128xf32>
    %cst_139 = arith.constant 1.000000e+00 : f32
    %390 = vector.broadcast %cst_139 : f32 to vector<8x128xf32>
    %391 = arith.addf %390, %389 : vector<8x128xf32>
    %392 = arith.divf %390, %391 : vector<8x128xf32>
    %393 = vector.extract_strided_slice %380 {offsets = [0, 256], sizes = [8, 128], strides = [1, 1]} : vector<8x512xf32> to vector<8x128xf32>
    %394 = math.tanh %393 : vector<8x128xf32>
    %395 = vector.extract_strided_slice %380 {offsets = [0, 384], sizes = [8, 128], strides = [1, 1]} : vector<8x512xf32> to vector<8x128xf32>
    %396 = arith.negf %395 : vector<8x128xf32>
    %397 = math.exp %396 : vector<8x128xf32>
    %cst_140 = arith.constant 1.000000e+00 : f32
    %398 = vector.broadcast %cst_140 : f32 to vector<8x128xf32>
    %399 = arith.addf %398, %397 : vector<8x128xf32>
    %400 = arith.divf %398, %399 : vector<8x128xf32>
    %401 = arith.mulf %392, %373 : vector<8x128xf32>
    %402 = arith.mulf %386, %394 : vector<8x128xf32>
    %403 = arith.addf %401, %402 : vector<8x128xf32>
    %404 = math.tanh %403 : vector<8x128xf32>
    %405 = arith.mulf %400, %404 : vector<8x128xf32>
    %c16_141 = arith.constant 16 : index
    %c0_142 = arith.constant 0 : index
    %406 = vector.load %arg20[%c16_141, %c0_142] : memref<64x512xf32, #tpu.memory_space<vmem>>, vector<8x512xf32>
    %407 = arith.truncf %405 : vector<8x128xf32> to vector<8x128xbf16>
    %c0_143 = arith.constant 0 : index
    %c0_144 = arith.constant 0 : index
    %408 = vector.load %arg13[%c0_143, %c0_144] : memref<128x512xbf16, #tpu.memory_space<vmem>>, vector<128x512xbf16>
    %cst_145 = arith.constant dense<0.000000e+00> : vector<8x512xf32>
    %409 = tpu.matmul %407, %408, %cst_145 {dimension_numbers = #tpu.dot_dimension_numbers<[1], [0], [0], [1], [0, 0, 1, 1], [], []>} : vector<8x128xbf16>, vector<128x512xbf16>, vector<8x512xf32> -> vector<8x512xf32>
    %410 = arith.addf %406, %409 : vector<8x512xf32>
    %411 = vector.extract_strided_slice %410 {offsets = [0, 0], sizes = [8, 128], strides = [1, 1]} : vector<8x512xf32> to vector<8x128xf32>
    %412 = arith.negf %411 : vector<8x128xf32>
    %413 = math.exp %412 : vector<8x128xf32>
    %cst_146 = arith.constant 1.000000e+00 : f32
    %414 = vector.broadcast %cst_146 : f32 to vector<8x128xf32>
    %415 = arith.addf %414, %413 : vector<8x128xf32>
    %416 = arith.divf %414, %415 : vector<8x128xf32>
    %417 = vector.extract_strided_slice %410 {offsets = [0, 128], sizes = [8, 128], strides = [1, 1]} : vector<8x512xf32> to vector<8x128xf32>
    %418 = arith.negf %417 : vector<8x128xf32>
    %419 = math.exp %418 : vector<8x128xf32>
    %cst_147 = arith.constant 1.000000e+00 : f32
    %420 = vector.broadcast %cst_147 : f32 to vector<8x128xf32>
    %421 = arith.addf %420, %419 : vector<8x128xf32>
    %422 = arith.divf %420, %421 : vector<8x128xf32>
    %423 = vector.extract_strided_slice %410 {offsets = [0, 256], sizes = [8, 128], strides = [1, 1]} : vector<8x512xf32> to vector<8x128xf32>
    %424 = math.tanh %423 : vector<8x128xf32>
    %425 = vector.extract_strided_slice %410 {offsets = [0, 384], sizes = [8, 128], strides = [1, 1]} : vector<8x512xf32> to vector<8x128xf32>
    %426 = arith.negf %425 : vector<8x128xf32>
    %427 = math.exp %426 : vector<8x128xf32>
    %cst_148 = arith.constant 1.000000e+00 : f32
    %428 = vector.broadcast %cst_148 : f32 to vector<8x128xf32>
    %429 = arith.addf %428, %427 : vector<8x128xf32>
    %430 = arith.divf %428, %429 : vector<8x128xf32>
    %431 = arith.mulf %422, %403 : vector<8x128xf32>
    %432 = arith.mulf %416, %424 : vector<8x128xf32>
    %433 = arith.addf %431, %432 : vector<8x128xf32>
    %434 = math.tanh %433 : vector<8x128xf32>
    %435 = arith.mulf %430, %434 : vector<8x128xf32>
    %c24_149 = arith.constant 24 : index
    %c0_150 = arith.constant 0 : index
    %436 = vector.load %arg20[%c24_149, %c0_150] : memref<64x512xf32, #tpu.memory_space<vmem>>, vector<8x512xf32>
    %437 = arith.truncf %435 : vector<8x128xf32> to vector<8x128xbf16>
    %c0_151 = arith.constant 0 : index
    %c0_152 = arith.constant 0 : index
    %438 = vector.load %arg13[%c0_151, %c0_152] : memref<128x512xbf16, #tpu.memory_space<vmem>>, vector<128x512xbf16>
    %cst_153 = arith.constant dense<0.000000e+00> : vector<8x512xf32>
    %439 = tpu.matmul %437, %438, %cst_153 {dimension_numbers = #tpu.dot_dimension_numbers<[1], [0], [0], [1], [0, 0, 1, 1], [], []>} : vector<8x128xbf16>, vector<128x512xbf16>, vector<8x512xf32> -> vector<8x512xf32>
    %440 = arith.addf %436, %439 : vector<8x512xf32>
    %441 = vector.extract_strided_slice %440 {offsets = [0, 0], sizes = [8, 128], strides = [1, 1]} : vector<8x512xf32> to vector<8x128xf32>
    %442 = arith.negf %441 : vector<8x128xf32>
    %443 = math.exp %442 : vector<8x128xf32>
    %cst_154 = arith.constant 1.000000e+00 : f32
    %444 = vector.broadcast %cst_154 : f32 to vector<8x128xf32>
    %445 = arith.addf %444, %443 : vector<8x128xf32>
    %446 = arith.divf %444, %445 : vector<8x128xf32>
    %447 = vector.extract_strided_slice %440 {offsets = [0, 128], sizes = [8, 128], strides = [1, 1]} : vector<8x512xf32> to vector<8x128xf32>
    %448 = arith.negf %447 : vector<8x128xf32>
    %449 = math.exp %448 : vector<8x128xf32>
    %cst_155 = arith.constant 1.000000e+00 : f32
    %450 = vector.broadcast %cst_155 : f32 to vector<8x128xf32>
    %451 = arith.addf %450, %449 : vector<8x128xf32>
    %452 = arith.divf %450, %451 : vector<8x128xf32>
    %453 = vector.extract_strided_slice %440 {offsets = [0, 256], sizes = [8, 128], strides = [1, 1]} : vector<8x512xf32> to vector<8x128xf32>
    %454 = math.tanh %453 : vector<8x128xf32>
    %455 = vector.extract_strided_slice %440 {offsets = [0, 384], sizes = [8, 128], strides = [1, 1]} : vector<8x512xf32> to vector<8x128xf32>
    %456 = arith.negf %455 : vector<8x128xf32>
    %457 = math.exp %456 : vector<8x128xf32>
    %cst_156 = arith.constant 1.000000e+00 : f32
    %458 = vector.broadcast %cst_156 : f32 to vector<8x128xf32>
    %459 = arith.addf %458, %457 : vector<8x128xf32>
    %460 = arith.divf %458, %459 : vector<8x128xf32>
    %461 = arith.mulf %452, %433 : vector<8x128xf32>
    %462 = arith.mulf %446, %454 : vector<8x128xf32>
    %463 = arith.addf %461, %462 : vector<8x128xf32>
    %464 = math.tanh %463 : vector<8x128xf32>
    %465 = arith.mulf %460, %464 : vector<8x128xf32>
    %c32_157 = arith.constant 32 : index
    %c0_158 = arith.constant 0 : index
    %466 = vector.load %arg20[%c32_157, %c0_158] : memref<64x512xf32, #tpu.memory_space<vmem>>, vector<8x512xf32>
    %467 = arith.truncf %465 : vector<8x128xf32> to vector<8x128xbf16>
    %c0_159 = arith.constant 0 : index
    %c0_160 = arith.constant 0 : index
    %468 = vector.load %arg13[%c0_159, %c0_160] : memref<128x512xbf16, #tpu.memory_space<vmem>>, vector<128x512xbf16>
    %cst_161 = arith.constant dense<0.000000e+00> : vector<8x512xf32>
    %469 = tpu.matmul %467, %468, %cst_161 {dimension_numbers = #tpu.dot_dimension_numbers<[1], [0], [0], [1], [0, 0, 1, 1], [], []>} : vector<8x128xbf16>, vector<128x512xbf16>, vector<8x512xf32> -> vector<8x512xf32>
    %470 = arith.addf %466, %469 : vector<8x512xf32>
    %471 = vector.extract_strided_slice %470 {offsets = [0, 0], sizes = [8, 128], strides = [1, 1]} : vector<8x512xf32> to vector<8x128xf32>
    %472 = arith.negf %471 : vector<8x128xf32>
    %473 = math.exp %472 : vector<8x128xf32>
    %cst_162 = arith.constant 1.000000e+00 : f32
    %474 = vector.broadcast %cst_162 : f32 to vector<8x128xf32>
    %475 = arith.addf %474, %473 : vector<8x128xf32>
    %476 = arith.divf %474, %475 : vector<8x128xf32>
    %477 = vector.extract_strided_slice %470 {offsets = [0, 128], sizes = [8, 128], strides = [1, 1]} : vector<8x512xf32> to vector<8x128xf32>
    %478 = arith.negf %477 : vector<8x128xf32>
    %479 = math.exp %478 : vector<8x128xf32>
    %cst_163 = arith.constant 1.000000e+00 : f32
    %480 = vector.broadcast %cst_163 : f32 to vector<8x128xf32>
    %481 = arith.addf %480, %479 : vector<8x128xf32>
    %482 = arith.divf %480, %481 : vector<8x128xf32>
    %483 = vector.extract_strided_slice %470 {offsets = [0, 256], sizes = [8, 128], strides = [1, 1]} : vector<8x512xf32> to vector<8x128xf32>
    %484 = math.tanh %483 : vector<8x128xf32>
    %485 = vector.extract_strided_slice %470 {offsets = [0, 384], sizes = [8, 128], strides = [1, 1]} : vector<8x512xf32> to vector<8x128xf32>
    %486 = arith.negf %485 : vector<8x128xf32>
    %487 = math.exp %486 : vector<8x128xf32>
    %cst_164 = arith.constant 1.000000e+00 : f32
    %488 = vector.broadcast %cst_164 : f32 to vector<8x128xf32>
    %489 = arith.addf %488, %487 : vector<8x128xf32>
    %490 = arith.divf %488, %489 : vector<8x128xf32>
    %491 = arith.mulf %482, %463 : vector<8x128xf32>
    %492 = arith.mulf %476, %484 : vector<8x128xf32>
    %493 = arith.addf %491, %492 : vector<8x128xf32>
    %494 = math.tanh %493 : vector<8x128xf32>
    %495 = arith.mulf %490, %494 : vector<8x128xf32>
    %c40_165 = arith.constant 40 : index
    %c0_166 = arith.constant 0 : index
    %496 = vector.load %arg20[%c40_165, %c0_166] : memref<64x512xf32, #tpu.memory_space<vmem>>, vector<8x512xf32>
    %497 = arith.truncf %495 : vector<8x128xf32> to vector<8x128xbf16>
    %c0_167 = arith.constant 0 : index
    %c0_168 = arith.constant 0 : index
    %498 = vector.load %arg13[%c0_167, %c0_168] : memref<128x512xbf16, #tpu.memory_space<vmem>>, vector<128x512xbf16>
    %cst_169 = arith.constant dense<0.000000e+00> : vector<8x512xf32>
    %499 = tpu.matmul %497, %498, %cst_169 {dimension_numbers = #tpu.dot_dimension_numbers<[1], [0], [0], [1], [0, 0, 1, 1], [], []>} : vector<8x128xbf16>, vector<128x512xbf16>, vector<8x512xf32> -> vector<8x512xf32>
    %500 = arith.addf %496, %499 : vector<8x512xf32>
    %501 = vector.extract_strided_slice %500 {offsets = [0, 0], sizes = [8, 128], strides = [1, 1]} : vector<8x512xf32> to vector<8x128xf32>
    %502 = arith.negf %501 : vector<8x128xf32>
    %503 = math.exp %502 : vector<8x128xf32>
    %cst_170 = arith.constant 1.000000e+00 : f32
    %504 = vector.broadcast %cst_170 : f32 to vector<8x128xf32>
    %505 = arith.addf %504, %503 : vector<8x128xf32>
    %506 = arith.divf %504, %505 : vector<8x128xf32>
    %507 = vector.extract_strided_slice %500 {offsets = [0, 128], sizes = [8, 128], strides = [1, 1]} : vector<8x512xf32> to vector<8x128xf32>
    %508 = arith.negf %507 : vector<8x128xf32>
    %509 = math.exp %508 : vector<8x128xf32>
    %cst_171 = arith.constant 1.000000e+00 : f32
    %510 = vector.broadcast %cst_171 : f32 to vector<8x128xf32>
    %511 = arith.addf %510, %509 : vector<8x128xf32>
    %512 = arith.divf %510, %511 : vector<8x128xf32>
    %513 = vector.extract_strided_slice %500 {offsets = [0, 256], sizes = [8, 128], strides = [1, 1]} : vector<8x512xf32> to vector<8x128xf32>
    %514 = math.tanh %513 : vector<8x128xf32>
    %515 = vector.extract_strided_slice %500 {offsets = [0, 384], sizes = [8, 128], strides = [1, 1]} : vector<8x512xf32> to vector<8x128xf32>
    %516 = arith.negf %515 : vector<8x128xf32>
    %517 = math.exp %516 : vector<8x128xf32>
    %cst_172 = arith.constant 1.000000e+00 : f32
    %518 = vector.broadcast %cst_172 : f32 to vector<8x128xf32>
    %519 = arith.addf %518, %517 : vector<8x128xf32>
    %520 = arith.divf %518, %519 : vector<8x128xf32>
    %521 = arith.mulf %512, %493 : vector<8x128xf32>
    %522 = arith.mulf %506, %514 : vector<8x128xf32>
    %523 = arith.addf %521, %522 : vector<8x128xf32>
    %524 = math.tanh %523 : vector<8x128xf32>
    %525 = arith.mulf %520, %524 : vector<8x128xf32>
    %c48_173 = arith.constant 48 : index
    %c0_174 = arith.constant 0 : index
    %526 = vector.load %arg20[%c48_173, %c0_174] : memref<64x512xf32, #tpu.memory_space<vmem>>, vector<8x512xf32>
    %527 = arith.truncf %525 : vector<8x128xf32> to vector<8x128xbf16>
    %c0_175 = arith.constant 0 : index
    %c0_176 = arith.constant 0 : index
    %528 = vector.load %arg13[%c0_175, %c0_176] : memref<128x512xbf16, #tpu.memory_space<vmem>>, vector<128x512xbf16>
    %cst_177 = arith.constant dense<0.000000e+00> : vector<8x512xf32>
    %529 = tpu.matmul %527, %528, %cst_177 {dimension_numbers = #tpu.dot_dimension_numbers<[1], [0], [0], [1], [0, 0, 1, 1], [], []>} : vector<8x128xbf16>, vector<128x512xbf16>, vector<8x512xf32> -> vector<8x512xf32>
    %530 = arith.addf %526, %529 : vector<8x512xf32>
    %531 = vector.extract_strided_slice %530 {offsets = [0, 0], sizes = [8, 128], strides = [1, 1]} : vector<8x512xf32> to vector<8x128xf32>
    %532 = arith.negf %531 : vector<8x128xf32>
    %533 = math.exp %532 : vector<8x128xf32>
    %cst_178 = arith.constant 1.000000e+00 : f32
    %534 = vector.broadcast %cst_178 : f32 to vector<8x128xf32>
    %535 = arith.addf %534, %533 : vector<8x128xf32>
    %536 = arith.divf %534, %535 : vector<8x128xf32>
    %537 = vector.extract_strided_slice %530 {offsets = [0, 128], sizes = [8, 128], strides = [1, 1]} : vector<8x512xf32> to vector<8x128xf32>
    %538 = arith.negf %537 : vector<8x128xf32>
    %539 = math.exp %538 : vector<8x128xf32>
    %cst_179 = arith.constant 1.000000e+00 : f32
    %540 = vector.broadcast %cst_179 : f32 to vector<8x128xf32>
    %541 = arith.addf %540, %539 : vector<8x128xf32>
    %542 = arith.divf %540, %541 : vector<8x128xf32>
    %543 = vector.extract_strided_slice %530 {offsets = [0, 256], sizes = [8, 128], strides = [1, 1]} : vector<8x512xf32> to vector<8x128xf32>
    %544 = math.tanh %543 : vector<8x128xf32>
    %545 = vector.extract_strided_slice %530 {offsets = [0, 384], sizes = [8, 128], strides = [1, 1]} : vector<8x512xf32> to vector<8x128xf32>
    %546 = arith.negf %545 : vector<8x128xf32>
    %547 = math.exp %546 : vector<8x128xf32>
    %cst_180 = arith.constant 1.000000e+00 : f32
    %548 = vector.broadcast %cst_180 : f32 to vector<8x128xf32>
    %549 = arith.addf %548, %547 : vector<8x128xf32>
    %550 = arith.divf %548, %549 : vector<8x128xf32>
    %551 = arith.mulf %542, %523 : vector<8x128xf32>
    %552 = arith.mulf %536, %544 : vector<8x128xf32>
    %553 = arith.addf %551, %552 : vector<8x128xf32>
    %554 = math.tanh %553 : vector<8x128xf32>
    %555 = arith.mulf %550, %554 : vector<8x128xf32>
    %c56_181 = arith.constant 56 : index
    %c0_182 = arith.constant 0 : index
    %556 = vector.load %arg20[%c56_181, %c0_182] : memref<64x512xf32, #tpu.memory_space<vmem>>, vector<8x512xf32>
    %557 = arith.truncf %555 : vector<8x128xf32> to vector<8x128xbf16>
    %c0_183 = arith.constant 0 : index
    %c0_184 = arith.constant 0 : index
    %558 = vector.load %arg13[%c0_183, %c0_184] : memref<128x512xbf16, #tpu.memory_space<vmem>>, vector<128x512xbf16>
    %cst_185 = arith.constant dense<0.000000e+00> : vector<8x512xf32>
    %559 = tpu.matmul %557, %558, %cst_185 {dimension_numbers = #tpu.dot_dimension_numbers<[1], [0], [0], [1], [0, 0, 1, 1], [], []>} : vector<8x128xbf16>, vector<128x512xbf16>, vector<8x512xf32> -> vector<8x512xf32>
    %560 = arith.addf %556, %559 : vector<8x512xf32>
    %561 = vector.extract_strided_slice %560 {offsets = [0, 0], sizes = [8, 128], strides = [1, 1]} : vector<8x512xf32> to vector<8x128xf32>
    %562 = arith.negf %561 : vector<8x128xf32>
    %563 = math.exp %562 : vector<8x128xf32>
    %cst_186 = arith.constant 1.000000e+00 : f32
    %564 = vector.broadcast %cst_186 : f32 to vector<8x128xf32>
    %565 = arith.addf %564, %563 : vector<8x128xf32>
    %566 = arith.divf %564, %565 : vector<8x128xf32>
    %567 = vector.extract_strided_slice %560 {offsets = [0, 128], sizes = [8, 128], strides = [1, 1]} : vector<8x512xf32> to vector<8x128xf32>
    %568 = arith.negf %567 : vector<8x128xf32>
    %569 = math.exp %568 : vector<8x128xf32>
    %cst_187 = arith.constant 1.000000e+00 : f32
    %570 = vector.broadcast %cst_187 : f32 to vector<8x128xf32>
    %571 = arith.addf %570, %569 : vector<8x128xf32>
    %572 = arith.divf %570, %571 : vector<8x128xf32>
    %573 = vector.extract_strided_slice %560 {offsets = [0, 256], sizes = [8, 128], strides = [1, 1]} : vector<8x512xf32> to vector<8x128xf32>
    %574 = math.tanh %573 : vector<8x128xf32>
    %575 = vector.extract_strided_slice %560 {offsets = [0, 384], sizes = [8, 128], strides = [1, 1]} : vector<8x512xf32> to vector<8x128xf32>
    %576 = arith.negf %575 : vector<8x128xf32>
    %577 = math.exp %576 : vector<8x128xf32>
    %cst_188 = arith.constant 1.000000e+00 : f32
    %578 = vector.broadcast %cst_188 : f32 to vector<8x128xf32>
    %579 = arith.addf %578, %577 : vector<8x128xf32>
    %580 = arith.divf %578, %579 : vector<8x128xf32>
    %581 = arith.mulf %572, %553 : vector<8x128xf32>
    %582 = arith.mulf %566, %574 : vector<8x128xf32>
    %583 = arith.addf %581, %582 : vector<8x128xf32>
    %584 = math.tanh %583 : vector<8x128xf32>
    %585 = arith.mulf %580, %584 : vector<8x128xf32>
    %c2_i32_189 = arith.constant 2 : i32
    %586 = tpu.memref_slice %arg17[%c2_i32_189] : memref<5x!tpu.dma_semaphore, #tpu.memory_space<semaphore_mem>> -> memref<1x!tpu.dma_semaphore, #tpu.memory_space<semaphore_mem>>
    %587 = tpu.memref_squeeze %586 : memref<1x!tpu.dma_semaphore, #tpu.memory_space<semaphore_mem>> -> memref<!tpu.dma_semaphore, #tpu.memory_space<semaphore_mem>>
    tpu.wait_dma2 semaphore(%587 : memref<!tpu.dma_semaphore, #tpu.memory_space<semaphore_mem>>) src(%arg8 : memref<256x512xbf16, #tpu.memory_space<any>>) dst(%arg14 : memref<256x512xbf16, #tpu.memory_space<vmem>>)
    %c56_190 = arith.constant 56 : index
    %c0_191 = arith.constant 0 : index
    %588 = vector.load %arg19[%c56_190, %c0_191] : memref<64x256xf32, #tpu.memory_space<vmem>>, vector<8x256xf32>
    %589 = arith.truncf %588 : vector<8x256xf32> to vector<8x256xbf16>
    %c0_192 = arith.constant 0 : index
    %c0_193 = arith.constant 0 : index
    %590 = vector.load %arg14[%c0_192, %c0_193] : memref<256x512xbf16, #tpu.memory_space<vmem>>, vector<256x512xbf16>
    %cst_194 = arith.constant dense<0.000000e+00> : vector<8x512xf32>
    %591 = tpu.matmul %589, %590, %cst_194 {dimension_numbers = #tpu.dot_dimension_numbers<[1], [0], [0], [1], [0, 0, 1, 1], [], []>} : vector<8x256xbf16>, vector<256x512xbf16>, vector<8x512xf32> -> vector<8x512xf32>
    %c0_195 = arith.constant 0 : index
    %c0_196 = arith.constant 0 : index
    %592 = vector.load %arg5[%c0_195, %c0_196] : memref<1x512xf32, #tpu.memory_space<vmem>>, vector<1x512xf32>
    %593 = vector.broadcast %592 : vector<1x512xf32> to vector<8x512xf32>
    %594 = arith.addf %591, %593 : vector<8x512xf32>
    %cst_197 = arith.constant 0.000000e+00 : f32
    %595 = vector.broadcast %cst_197 : f32 to vector<8x128xf32>
    %596 = vector.extract_strided_slice %594 {offsets = [0, 0], sizes = [8, 128], strides = [1, 1]} : vector<8x512xf32> to vector<8x128xf32>
    %597 = arith.negf %596 : vector<8x128xf32>
    %598 = math.exp %597 : vector<8x128xf32>
    %cst_198 = arith.constant 1.000000e+00 : f32
    %599 = vector.broadcast %cst_198 : f32 to vector<8x128xf32>
    %600 = arith.addf %599, %598 : vector<8x128xf32>
    %601 = arith.divf %599, %600 : vector<8x128xf32>
    %602 = vector.extract_strided_slice %594 {offsets = [0, 128], sizes = [8, 128], strides = [1, 1]} : vector<8x512xf32> to vector<8x128xf32>
    %603 = arith.negf %602 : vector<8x128xf32>
    %604 = math.exp %603 : vector<8x128xf32>
    %cst_199 = arith.constant 1.000000e+00 : f32
    %605 = vector.broadcast %cst_199 : f32 to vector<8x128xf32>
    %606 = arith.addf %605, %604 : vector<8x128xf32>
    %607 = arith.divf %605, %606 : vector<8x128xf32>
    %608 = vector.extract_strided_slice %594 {offsets = [0, 256], sizes = [8, 128], strides = [1, 1]} : vector<8x512xf32> to vector<8x128xf32>
    %609 = math.tanh %608 : vector<8x128xf32>
    %610 = vector.extract_strided_slice %594 {offsets = [0, 384], sizes = [8, 128], strides = [1, 1]} : vector<8x512xf32> to vector<8x128xf32>
    %611 = arith.negf %610 : vector<8x128xf32>
    %612 = math.exp %611 : vector<8x128xf32>
    %cst_200 = arith.constant 1.000000e+00 : f32
    %613 = vector.broadcast %cst_200 : f32 to vector<8x128xf32>
    %614 = arith.addf %613, %612 : vector<8x128xf32>
    %615 = arith.divf %613, %614 : vector<8x128xf32>
    %616 = arith.mulf %607, %595 : vector<8x128xf32>
    %617 = arith.mulf %601, %609 : vector<8x128xf32>
    %618 = arith.addf %616, %617 : vector<8x128xf32>
    %619 = math.tanh %618 : vector<8x128xf32>
    %620 = arith.mulf %615, %619 : vector<8x128xf32>
    %621 = tpu.concatenate %585, %620 in 1 : vector<8x128xf32>, vector<8x128xf32> -> vector<8x256xf32>
    %c3_i32_201 = arith.constant 3 : i32
    %622 = tpu.memref_slice %arg17[%c3_i32_201] : memref<5x!tpu.dma_semaphore, #tpu.memory_space<semaphore_mem>> -> memref<1x!tpu.dma_semaphore, #tpu.memory_space<semaphore_mem>>
    %623 = tpu.memref_squeeze %622 : memref<1x!tpu.dma_semaphore, #tpu.memory_space<semaphore_mem>> -> memref<!tpu.dma_semaphore, #tpu.memory_space<semaphore_mem>>
    tpu.wait_dma2 semaphore(%623 : memref<!tpu.dma_semaphore, #tpu.memory_space<semaphore_mem>>) src(%arg9 : memref<2304x128xbf16, #tpu.memory_space<any>>) dst(%arg15 : memref<2304x128xbf16, #tpu.memory_space<vmem>>)
    %c4_i32_202 = arith.constant 4 : i32
    %624 = tpu.memref_slice %arg17[%c4_i32_202] : memref<5x!tpu.dma_semaphore, #tpu.memory_space<semaphore_mem>> -> memref<1x!tpu.dma_semaphore, #tpu.memory_space<semaphore_mem>>
    %625 = tpu.memref_squeeze %624 : memref<1x!tpu.dma_semaphore, #tpu.memory_space<semaphore_mem>> -> memref<!tpu.dma_semaphore, #tpu.memory_space<semaphore_mem>>
    tpu.wait_dma2 semaphore(%625 : memref<!tpu.dma_semaphore, #tpu.memory_space<semaphore_mem>>) src(%arg10 : memref<1152x128xbf16, #tpu.memory_space<any>>) dst(%arg16 : memref<1152x128xbf16, #tpu.memory_space<vmem>>)
    %626 = arith.negf %621 : vector<8x256xf32>
    %627 = math.exp %626 : vector<8x256xf32>
    %cst_203 = arith.constant 1.000000e+00 : f32
    %628 = vector.broadcast %cst_203 : f32 to vector<8x256xf32>
    %629 = arith.addf %628, %627 : vector<8x256xf32>
    %630 = arith.divf %628, %629 : vector<8x256xf32>
    %631 = arith.mulf %621, %630 : vector<8x256xf32>
    %c0_204 = arith.constant 0 : index
    %c0_205 = arith.constant 0 : index
    %632 = vector.load %arg21[%c0_204, %c0_205] : memref<8x2304xf32, #tpu.memory_space<vmem>>, vector<8x256xf32>
    tpu.vector_store %arg21[%c0_204, %c0_205], %631 {strides = array<i32>} : memref<8x2304xf32, #tpu.memory_space<vmem>>, vector<8x256xf32>,
    %cst_206 = arith.constant -2.200000e+00 : f32
    %633 = vector.broadcast %cst_206 : f32 to vector<8x256xf32>
    %634 = arith.cmpf oge, %621, %633 : vector<8x256xf32>
    %cst_207 = arith.constant -1.800000e+00 : f32
    %635 = vector.broadcast %cst_207 : f32 to vector<8x256xf32>
    %636 = arith.cmpf olt, %621, %635 : vector<8x256xf32>
    %637 = arith.andi %634, %636 : vector<8x256xi1>
    %638 = arith.extui %637 : vector<8x256xi1> to vector<8x256xi32>
    %639 = arith.sitofp %638 : vector<8x256xi32> to vector<8x256xf32>
    %cst_208 = arith.constant -1.800000e+00 : f32
    %640 = vector.broadcast %cst_208 : f32 to vector<8x256xf32>
    %641 = arith.cmpf oge, %621, %640 : vector<8x256xf32>
    %cst_209 = arith.constant -1.400000e+00 : f32
    %642 = vector.broadcast %cst_209 : f32 to vector<8x256xf32>
    %643 = arith.cmpf olt, %621, %642 : vector<8x256xf32>
    %644 = arith.andi %641, %643 : vector<8x256xi1>
    %645 = arith.extui %644 : vector<8x256xi1> to vector<8x256xi32>
    %646 = arith.sitofp %645 : vector<8x256xi32> to vector<8x256xf32>
    %cst_210 = arith.constant -1.400000e+00 : f32
    %647 = vector.broadcast %cst_210 : f32 to vector<8x256xf32>
    %648 = arith.cmpf oge, %621, %647 : vector<8x256xf32>
    %cst_211 = arith.constant -1.000000e+00 : f32
    %649 = vector.broadcast %cst_211 : f32 to vector<8x256xf32>
    %650 = arith.cmpf olt, %621, %649 : vector<8x256xf32>
    %651 = arith.andi %648, %650 : vector<8x256xi1>
    %652 = arith.extui %651 : vector<8x256xi1> to vector<8x256xi32>
    %653 = arith.sitofp %652 : vector<8x256xi32> to vector<8x256xf32>
    %cst_212 = arith.constant -1.000000e+00 : f32
    %654 = vector.broadcast %cst_212 : f32 to vector<8x256xf32>
    %655 = arith.cmpf oge, %621, %654 : vector<8x256xf32>
    %cst_213 = arith.constant -6.000000e-01 : f32
    %656 = vector.broadcast %cst_213 : f32 to vector<8x256xf32>
    %657 = arith.cmpf olt, %621, %656 : vector<8x256xf32>
    %658 = arith.andi %655, %657 : vector<8x256xi1>
    %659 = arith.extui %658 : vector<8x256xi1> to vector<8x256xi32>
    %660 = arith.sitofp %659 : vector<8x256xi32> to vector<8x256xf32>
    %cst_214 = arith.constant -6.000000e-01 : f32
    %661 = vector.broadcast %cst_214 : f32 to vector<8x256xf32>
    %662 = arith.cmpf oge, %621, %661 : vector<8x256xf32>
    %cst_215 = arith.constant -2.000000e-01 : f32
    %663 = vector.broadcast %cst_215 : f32 to vector<8x256xf32>
    %664 = arith.cmpf olt, %621, %663 : vector<8x256xf32>
    %665 = arith.andi %662, %664 : vector<8x256xi1>
    %666 = arith.extui %665 : vector<8x256xi1> to vector<8x256xi32>
    %667 = arith.sitofp %666 : vector<8x256xi32> to vector<8x256xf32>
    %cst_216 = arith.constant -2.000000e-01 : f32
    %668 = vector.broadcast %cst_216 : f32 to vector<8x256xf32>
    %669 = arith.cmpf oge, %621, %668 : vector<8x256xf32>
    %cst_217 = arith.constant 2.000000e-01 : f32
    %670 = vector.broadcast %cst_217 : f32 to vector<8x256xf32>
    %671 = arith.cmpf olt, %621, %670 : vector<8x256xf32>
    %672 = arith.andi %669, %671 : vector<8x256xi1>
    %673 = arith.extui %672 : vector<8x256xi1> to vector<8x256xi32>
    %674 = arith.sitofp %673 : vector<8x256xi32> to vector<8x256xf32>
    %cst_218 = arith.constant 2.000000e-01 : f32
    %675 = vector.broadcast %cst_218 : f32 to vector<8x256xf32>
    %676 = arith.cmpf oge, %621, %675 : vector<8x256xf32>
    %cst_219 = arith.constant 6.000000e-01 : f32
    %677 = vector.broadcast %cst_219 : f32 to vector<8x256xf32>
    %678 = arith.cmpf olt, %621, %677 : vector<8x256xf32>
    %679 = arith.andi %676, %678 : vector<8x256xi1>
    %680 = arith.extui %679 : vector<8x256xi1> to vector<8x256xi32>
    %681 = arith.sitofp %680 : vector<8x256xi32> to vector<8x256xf32>
    %cst_220 = arith.constant 6.000000e-01 : f32
    %682 = vector.broadcast %cst_220 : f32 to vector<8x256xf32>
    %683 = arith.cmpf oge, %621, %682 : vector<8x256xf32>
    %cst_221 = arith.constant 1.000000e+00 : f32
    %684 = vector.broadcast %cst_221 : f32 to vector<8x256xf32>
    %685 = arith.cmpf olt, %621, %684 : vector<8x256xf32>
    %686 = arith.andi %683, %685 : vector<8x256xi1>
    %687 = arith.extui %686 : vector<8x256xi1> to vector<8x256xi32>
    %688 = arith.sitofp %687 : vector<8x256xi32> to vector<8x256xf32>
    %cst_222 = arith.constant 1.000000e+00 : f32
    %689 = vector.broadcast %cst_222 : f32 to vector<8x256xf32>
    %690 = arith.cmpf oge, %621, %689 : vector<8x256xf32>
    %cst_223 = arith.constant 1.400000e+00 : f32
    %691 = vector.broadcast %cst_223 : f32 to vector<8x256xf32>
    %692 = arith.cmpf olt, %621, %691 : vector<8x256xf32>
    %693 = arith.andi %690, %692 : vector<8x256xi1>
    %694 = arith.extui %693 : vector<8x256xi1> to vector<8x256xi32>
    %695 = arith.sitofp %694 : vector<8x256xi32> to vector<8x256xf32>
    %cst_224 = arith.constant 1.400000e+00 : f32
    %696 = vector.broadcast %cst_224 : f32 to vector<8x256xf32>
    %697 = arith.cmpf oge, %621, %696 : vector<8x256xf32>
    %cst_225 = arith.constant 1.800000e+00 : f32
    %698 = vector.broadcast %cst_225 : f32 to vector<8x256xf32>
    %699 = arith.cmpf olt, %621, %698 : vector<8x256xf32>
    %700 = arith.andi %697, %699 : vector<8x256xi1>
    %701 = arith.extui %700 : vector<8x256xi1> to vector<8x256xi32>
    %702 = arith.sitofp %701 : vector<8x256xi32> to vector<8x256xf32>
    %cst_226 = arith.constant 1.800000e+00 : f32
    %703 = vector.broadcast %cst_226 : f32 to vector<8x256xf32>
    %704 = arith.cmpf oge, %621, %703 : vector<8x256xf32>
    %cst_227 = arith.constant 2.200000e+00 : f32
    %705 = vector.broadcast %cst_227 : f32 to vector<8x256xf32>
    %706 = arith.cmpf olt, %621, %705 : vector<8x256xf32>
    %707 = arith.andi %704, %706 : vector<8x256xi1>
    %708 = arith.extui %707 : vector<8x256xi1> to vector<8x256xi32>
    %709 = arith.sitofp %708 : vector<8x256xi32> to vector<8x256xf32>
    %cst_228 = arith.constant -2.200000e+00 : f32
    %710 = vector.broadcast %cst_228 : f32 to vector<8x256xf32>
    %711 = arith.subf %621, %710 : vector<8x256xf32>
    %cst_229 = arith.constant 2.500000e+00 : f32
    %712 = vector.broadcast %cst_229 : f32 to vector<8x256xf32>
    %713 = arith.mulf %711, %712 : vector<8x256xf32>
    %714 = arith.mulf %713, %639 : vector<8x256xf32>
    %cst_230 = arith.constant -1.400000e+00 : f32
    %715 = vector.broadcast %cst_230 : f32 to vector<8x256xf32>
    %716 = arith.subf %715, %621 : vector<8x256xf32>
    %cst_231 = arith.constant 2.500000e+00 : f32
    %717 = vector.broadcast %cst_231 : f32 to vector<8x256xf32>
    %718 = arith.mulf %716, %717 : vector<8x256xf32>
    %719 = arith.mulf %718, %646 : vector<8x256xf32>
    %720 = arith.addf %714, %719 : vector<8x256xf32>
    %cst_232 = arith.constant -1.800000e+00 : f32
    %721 = vector.broadcast %cst_232 : f32 to vector<8x256xf32>
    %722 = arith.subf %621, %721 : vector<8x256xf32>
    %cst_233 = arith.constant 2.500000e+00 : f32
    %723 = vector.broadcast %cst_233 : f32 to vector<8x256xf32>
    %724 = arith.mulf %722, %723 : vector<8x256xf32>
    %725 = arith.mulf %724, %646 : vector<8x256xf32>
    %cst_234 = arith.constant -1.000000e+00 : f32
    %726 = vector.broadcast %cst_234 : f32 to vector<8x256xf32>
    %727 = arith.subf %726, %621 : vector<8x256xf32>
    %cst_235 = arith.constant 2.500000e+00 : f32
    %728 = vector.broadcast %cst_235 : f32 to vector<8x256xf32>
    %729 = arith.mulf %727, %728 : vector<8x256xf32>
    %730 = arith.mulf %729, %653 : vector<8x256xf32>
    %731 = arith.addf %725, %730 : vector<8x256xf32>
    %cst_236 = arith.constant -1.400000e+00 : f32
    %732 = vector.broadcast %cst_236 : f32 to vector<8x256xf32>
    %733 = arith.subf %621, %732 : vector<8x256xf32>
    %cst_237 = arith.constant 2.500000e+00 : f32
    %734 = vector.broadcast %cst_237 : f32 to vector<8x256xf32>
    %735 = arith.mulf %733, %734 : vector<8x256xf32>
    %736 = arith.mulf %735, %653 : vector<8x256xf32>
    %cst_238 = arith.constant -6.000000e-01 : f32
    %737 = vector.broadcast %cst_238 : f32 to vector<8x256xf32>
    %738 = arith.subf %737, %621 : vector<8x256xf32>
    %cst_239 = arith.constant 2.500000e+00 : f32
    %739 = vector.broadcast %cst_239 : f32 to vector<8x256xf32>
    %740 = arith.mulf %738, %739 : vector<8x256xf32>
    %741 = arith.mulf %740, %660 : vector<8x256xf32>
    %742 = arith.addf %736, %741 : vector<8x256xf32>
    %cst_240 = arith.constant -1.000000e+00 : f32
    %743 = vector.broadcast %cst_240 : f32 to vector<8x256xf32>
    %744 = arith.subf %621, %743 : vector<8x256xf32>
    %cst_241 = arith.constant 2.500000e+00 : f32
    %745 = vector.broadcast %cst_241 : f32 to vector<8x256xf32>
    %746 = arith.mulf %744, %745 : vector<8x256xf32>
    %747 = arith.mulf %746, %660 : vector<8x256xf32>
    %cst_242 = arith.constant -2.000000e-01 : f32
    %748 = vector.broadcast %cst_242 : f32 to vector<8x256xf32>
    %749 = arith.subf %748, %621 : vector<8x256xf32>
    %cst_243 = arith.constant 2.500000e+00 : f32
    %750 = vector.broadcast %cst_243 : f32 to vector<8x256xf32>
    %751 = arith.mulf %749, %750 : vector<8x256xf32>
    %752 = arith.mulf %751, %667 : vector<8x256xf32>
    %753 = arith.addf %747, %752 : vector<8x256xf32>
    %cst_244 = arith.constant -6.000000e-01 : f32
    %754 = vector.broadcast %cst_244 : f32 to vector<8x256xf32>
    %755 = arith.subf %621, %754 : vector<8x256xf32>
    %cst_245 = arith.constant 2.500000e+00 : f32
    %756 = vector.broadcast %cst_245 : f32 to vector<8x256xf32>
    %757 = arith.mulf %755, %756 : vector<8x256xf32>
    %758 = arith.mulf %757, %667 : vector<8x256xf32>
    %cst_246 = arith.constant 2.000000e-01 : f32
    %759 = vector.broadcast %cst_246 : f32 to vector<8x256xf32>
    %760 = arith.subf %759, %621 : vector<8x256xf32>
    %cst_247 = arith.constant 2.500000e+00 : f32
    %761 = vector.broadcast %cst_247 : f32 to vector<8x256xf32>
    %762 = arith.mulf %760, %761 : vector<8x256xf32>
    %763 = arith.mulf %762, %674 : vector<8x256xf32>
    %764 = arith.addf %758, %763 : vector<8x256xf32>
    %cst_248 = arith.constant -2.000000e-01 : f32
    %765 = vector.broadcast %cst_248 : f32 to vector<8x256xf32>
    %766 = arith.subf %621, %765 : vector<8x256xf32>
    %cst_249 = arith.constant 2.500000e+00 : f32
    %767 = vector.broadcast %cst_249 : f32 to vector<8x256xf32>
    %768 = arith.mulf %766, %767 : vector<8x256xf32>
    %769 = arith.mulf %768, %674 : vector<8x256xf32>
    %cst_250 = arith.constant 6.000000e-01 : f32
    %770 = vector.broadcast %cst_250 : f32 to vector<8x256xf32>
    %771 = arith.subf %770, %621 : vector<8x256xf32>
    %cst_251 = arith.constant 2.500000e+00 : f32
    %772 = vector.broadcast %cst_251 : f32 to vector<8x256xf32>
    %773 = arith.mulf %771, %772 : vector<8x256xf32>
    %774 = arith.mulf %773, %681 : vector<8x256xf32>
    %775 = arith.addf %769, %774 : vector<8x256xf32>
    %cst_252 = arith.constant 2.000000e-01 : f32
    %776 = vector.broadcast %cst_252 : f32 to vector<8x256xf32>
    %777 = arith.subf %621, %776 : vector<8x256xf32>
    %cst_253 = arith.constant 2.500000e+00 : f32
    %778 = vector.broadcast %cst_253 : f32 to vector<8x256xf32>
    %779 = arith.mulf %777, %778 : vector<8x256xf32>
    %780 = arith.mulf %779, %681 : vector<8x256xf32>
    %cst_254 = arith.constant 1.000000e+00 : f32
    %781 = vector.broadcast %cst_254 : f32 to vector<8x256xf32>
    %782 = arith.subf %781, %621 : vector<8x256xf32>
    %cst_255 = arith.constant 2.500000e+00 : f32
    %783 = vector.broadcast %cst_255 : f32 to vector<8x256xf32>
    %784 = arith.mulf %782, %783 : vector<8x256xf32>
    %785 = arith.mulf %784, %688 : vector<8x256xf32>
    %786 = arith.addf %780, %785 : vector<8x256xf32>
    %cst_256 = arith.constant 6.000000e-01 : f32
    %787 = vector.broadcast %cst_256 : f32 to vector<8x256xf32>
    %788 = arith.subf %621, %787 : vector<8x256xf32>
    %cst_257 = arith.constant 2.500000e+00 : f32
    %789 = vector.broadcast %cst_257 : f32 to vector<8x256xf32>
    %790 = arith.mulf %788, %789 : vector<8x256xf32>
    %791 = arith.mulf %790, %688 : vector<8x256xf32>
    %cst_258 = arith.constant 1.400000e+00 : f32
    %792 = vector.broadcast %cst_258 : f32 to vector<8x256xf32>
    %793 = arith.subf %792, %621 : vector<8x256xf32>
    %cst_259 = arith.constant 2.500000e+00 : f32
    %794 = vector.broadcast %cst_259 : f32 to vector<8x256xf32>
    %795 = arith.mulf %793, %794 : vector<8x256xf32>
    %796 = arith.mulf %795, %695 : vector<8x256xf32>
    %797 = arith.addf %791, %796 : vector<8x256xf32>
    %cst_260 = arith.constant 1.000000e+00 : f32
    %798 = vector.broadcast %cst_260 : f32 to vector<8x256xf32>
    %799 = arith.subf %621, %798 : vector<8x256xf32>
    %cst_261 = arith.constant 2.500000e+00 : f32
    %800 = vector.broadcast %cst_261 : f32 to vector<8x256xf32>
    %801 = arith.mulf %799, %800 : vector<8x256xf32>
    %802 = arith.mulf %801, %695 : vector<8x256xf32>
    %cst_262 = arith.constant 1.800000e+00 : f32
    %803 = vector.broadcast %cst_262 : f32 to vector<8x256xf32>
    %804 = arith.subf %803, %621 : vector<8x256xf32>
    %cst_263 = arith.constant 2.500000e+00 : f32
    %805 = vector.broadcast %cst_263 : f32 to vector<8x256xf32>
    %806 = arith.mulf %804, %805 : vector<8x256xf32>
    %807 = arith.mulf %806, %702 : vector<8x256xf32>
    %808 = arith.addf %802, %807 : vector<8x256xf32>
    %cst_264 = arith.constant 1.400000e+00 : f32
    %809 = vector.broadcast %cst_264 : f32 to vector<8x256xf32>
    %810 = arith.subf %621, %809 : vector<8x256xf32>
    %cst_265 = arith.constant 2.500000e+00 : f32
    %811 = vector.broadcast %cst_265 : f32 to vector<8x256xf32>
    %812 = arith.mulf %810, %811 : vector<8x256xf32>
    %813 = arith.mulf %812, %702 : vector<8x256xf32>
    %cst_266 = arith.constant 2.200000e+00 : f32
    %814 = vector.broadcast %cst_266 : f32 to vector<8x256xf32>
    %815 = arith.subf %814, %621 : vector<8x256xf32>
    %cst_267 = arith.constant 2.500000e+00 : f32
    %816 = vector.broadcast %cst_267 : f32 to vector<8x256xf32>
    %817 = arith.mulf %815, %816 : vector<8x256xf32>
    %818 = arith.mulf %817, %709 : vector<8x256xf32>
    %819 = arith.addf %813, %818 : vector<8x256xf32>
    %cst_268 = arith.constant -2.200000e+00 : f32
    %820 = vector.broadcast %cst_268 : f32 to vector<8x256xf32>
    %821 = arith.subf %621, %820 : vector<8x256xf32>
    %cst_269 = arith.constant 1.250000e+00 : f32
    %822 = vector.broadcast %cst_269 : f32 to vector<8x256xf32>
    %823 = arith.mulf %821, %822 : vector<8x256xf32>
    %824 = arith.mulf %823, %720 : vector<8x256xf32>
    %cst_270 = arith.constant -1.000000e+00 : f32
    %825 = vector.broadcast %cst_270 : f32 to vector<8x256xf32>
    %826 = arith.subf %825, %621 : vector<8x256xf32>
    %cst_271 = arith.constant 1.250000e+00 : f32
    %827 = vector.broadcast %cst_271 : f32 to vector<8x256xf32>
    %828 = arith.mulf %826, %827 : vector<8x256xf32>
    %829 = arith.mulf %828, %731 : vector<8x256xf32>
    %830 = arith.addf %824, %829 : vector<8x256xf32>
    %cst_272 = arith.constant -1.800000e+00 : f32
    %831 = vector.broadcast %cst_272 : f32 to vector<8x256xf32>
    %832 = arith.subf %621, %831 : vector<8x256xf32>
    %cst_273 = arith.constant 1.250000e+00 : f32
    %833 = vector.broadcast %cst_273 : f32 to vector<8x256xf32>
    %834 = arith.mulf %832, %833 : vector<8x256xf32>
    %835 = arith.mulf %834, %731 : vector<8x256xf32>
    %cst_274 = arith.constant -6.000000e-01 : f32
    %836 = vector.broadcast %cst_274 : f32 to vector<8x256xf32>
    %837 = arith.subf %836, %621 : vector<8x256xf32>
    %cst_275 = arith.constant 1.250000e+00 : f32
    %838 = vector.broadcast %cst_275 : f32 to vector<8x256xf32>
    %839 = arith.mulf %837, %838 : vector<8x256xf32>
    %840 = arith.mulf %839, %742 : vector<8x256xf32>
    %841 = arith.addf %835, %840 : vector<8x256xf32>
    %cst_276 = arith.constant -1.400000e+00 : f32
    %842 = vector.broadcast %cst_276 : f32 to vector<8x256xf32>
    %843 = arith.subf %621, %842 : vector<8x256xf32>
    %cst_277 = arith.constant 1.250000e+00 : f32
    %844 = vector.broadcast %cst_277 : f32 to vector<8x256xf32>
    %845 = arith.mulf %843, %844 : vector<8x256xf32>
    %846 = arith.mulf %845, %742 : vector<8x256xf32>
    %cst_278 = arith.constant -2.000000e-01 : f32
    %847 = vector.broadcast %cst_278 : f32 to vector<8x256xf32>
    %848 = arith.subf %847, %621 : vector<8x256xf32>
    %cst_279 = arith.constant 1.250000e+00 : f32
    %849 = vector.broadcast %cst_279 : f32 to vector<8x256xf32>
    %850 = arith.mulf %848, %849 : vector<8x256xf32>
    %851 = arith.mulf %850, %753 : vector<8x256xf32>
    %852 = arith.addf %846, %851 : vector<8x256xf32>
    %cst_280 = arith.constant -1.000000e+00 : f32
    %853 = vector.broadcast %cst_280 : f32 to vector<8x256xf32>
    %854 = arith.subf %621, %853 : vector<8x256xf32>
    %cst_281 = arith.constant 1.250000e+00 : f32
    %855 = vector.broadcast %cst_281 : f32 to vector<8x256xf32>
    %856 = arith.mulf %854, %855 : vector<8x256xf32>
    %857 = arith.mulf %856, %753 : vector<8x256xf32>
    %cst_282 = arith.constant 2.000000e-01 : f32
    %858 = vector.broadcast %cst_282 : f32 to vector<8x256xf32>
    %859 = arith.subf %858, %621 : vector<8x256xf32>
    %cst_283 = arith.constant 1.250000e+00 : f32
    %860 = vector.broadcast %cst_283 : f32 to vector<8x256xf32>
    %861 = arith.mulf %859, %860 : vector<8x256xf32>
    %862 = arith.mulf %861, %764 : vector<8x256xf32>
    %863 = arith.addf %857, %862 : vector<8x256xf32>
    %cst_284 = arith.constant -6.000000e-01 : f32
    %864 = vector.broadcast %cst_284 : f32 to vector<8x256xf32>
    %865 = arith.subf %621, %864 : vector<8x256xf32>
    %cst_285 = arith.constant 1.250000e+00 : f32
    %866 = vector.broadcast %cst_285 : f32 to vector<8x256xf32>
    %867 = arith.mulf %865, %866 : vector<8x256xf32>
    %868 = arith.mulf %867, %764 : vector<8x256xf32>
    %cst_286 = arith.constant 6.000000e-01 : f32
    %869 = vector.broadcast %cst_286 : f32 to vector<8x256xf32>
    %870 = arith.subf %869, %621 : vector<8x256xf32>
    %cst_287 = arith.constant 1.250000e+00 : f32
    %871 = vector.broadcast %cst_287 : f32 to vector<8x256xf32>
    %872 = arith.mulf %870, %871 : vector<8x256xf32>
    %873 = arith.mulf %872, %775 : vector<8x256xf32>
    %874 = arith.addf %868, %873 : vector<8x256xf32>
    %cst_288 = arith.constant -2.000000e-01 : f32
    %875 = vector.broadcast %cst_288 : f32 to vector<8x256xf32>
    %876 = arith.subf %621, %875 : vector<8x256xf32>
    %cst_289 = arith.constant 1.250000e+00 : f32
    %877 = vector.broadcast %cst_289 : f32 to vector<8x256xf32>
    %878 = arith.mulf %876, %877 : vector<8x256xf32>
    %879 = arith.mulf %878, %775 : vector<8x256xf32>
    %cst_290 = arith.constant 1.000000e+00 : f32
    %880 = vector.broadcast %cst_290 : f32 to vector<8x256xf32>
    %881 = arith.subf %880, %621 : vector<8x256xf32>
    %cst_291 = arith.constant 1.250000e+00 : f32
    %882 = vector.broadcast %cst_291 : f32 to vector<8x256xf32>
    %883 = arith.mulf %881, %882 : vector<8x256xf32>
    %884 = arith.mulf %883, %786 : vector<8x256xf32>
    %885 = arith.addf %879, %884 : vector<8x256xf32>
    %cst_292 = arith.constant 2.000000e-01 : f32
    %886 = vector.broadcast %cst_292 : f32 to vector<8x256xf32>
    %887 = arith.subf %621, %886 : vector<8x256xf32>
    %cst_293 = arith.constant 1.250000e+00 : f32
    %888 = vector.broadcast %cst_293 : f32 to vector<8x256xf32>
    %889 = arith.mulf %887, %888 : vector<8x256xf32>
    %890 = arith.mulf %889, %786 : vector<8x256xf32>
    %cst_294 = arith.constant 1.400000e+00 : f32
    %891 = vector.broadcast %cst_294 : f32 to vector<8x256xf32>
    %892 = arith.subf %891, %621 : vector<8x256xf32>
    %cst_295 = arith.constant 1.250000e+00 : f32
    %893 = vector.broadcast %cst_295 : f32 to vector<8x256xf32>
    %894 = arith.mulf %892, %893 : vector<8x256xf32>
    %895 = arith.mulf %894, %797 : vector<8x256xf32>
    %896 = arith.addf %890, %895 : vector<8x256xf32>
    %cst_296 = arith.constant 6.000000e-01 : f32
    %897 = vector.broadcast %cst_296 : f32 to vector<8x256xf32>
    %898 = arith.subf %621, %897 : vector<8x256xf32>
    %cst_297 = arith.constant 1.250000e+00 : f32
    %899 = vector.broadcast %cst_297 : f32 to vector<8x256xf32>
    %900 = arith.mulf %898, %899 : vector<8x256xf32>
    %901 = arith.mulf %900, %797 : vector<8x256xf32>
    %cst_298 = arith.constant 1.800000e+00 : f32
    %902 = vector.broadcast %cst_298 : f32 to vector<8x256xf32>
    %903 = arith.subf %902, %621 : vector<8x256xf32>
    %cst_299 = arith.constant 1.250000e+00 : f32
    %904 = vector.broadcast %cst_299 : f32 to vector<8x256xf32>
    %905 = arith.mulf %903, %904 : vector<8x256xf32>
    %906 = arith.mulf %905, %808 : vector<8x256xf32>
    %907 = arith.addf %901, %906 : vector<8x256xf32>
    %cst_300 = arith.constant 1.000000e+00 : f32
    %908 = vector.broadcast %cst_300 : f32 to vector<8x256xf32>
    %909 = arith.subf %621, %908 : vector<8x256xf32>
    %cst_301 = arith.constant 1.250000e+00 : f32
    %910 = vector.broadcast %cst_301 : f32 to vector<8x256xf32>
    %911 = arith.mulf %909, %910 : vector<8x256xf32>
    %912 = arith.mulf %911, %808 : vector<8x256xf32>
    %cst_302 = arith.constant 2.200000e+00 : f32
    %913 = vector.broadcast %cst_302 : f32 to vector<8x256xf32>
    %914 = arith.subf %913, %621 : vector<8x256xf32>
    %cst_303 = arith.constant 1.250000e+00 : f32
    %915 = vector.broadcast %cst_303 : f32 to vector<8x256xf32>
    %916 = arith.mulf %914, %915 : vector<8x256xf32>
    %917 = arith.mulf %916, %819 : vector<8x256xf32>
    %918 = arith.addf %912, %917 : vector<8x256xf32>
    %cst_304 = arith.constant -2.200000e+00 : f32
    %919 = vector.broadcast %cst_304 : f32 to vector<8x256xf32>
    %920 = arith.subf %621, %919 : vector<8x256xf32>
    %cst_305 = arith.constant 0.833333313 : f32
    %921 = vector.broadcast %cst_305 : f32 to vector<8x256xf32>
    %922 = arith.mulf %920, %921 : vector<8x256xf32>
    %923 = arith.mulf %922, %830 : vector<8x256xf32>
    %cst_306 = arith.constant -6.000000e-01 : f32
    %924 = vector.broadcast %cst_306 : f32 to vector<8x256xf32>
    %925 = arith.subf %924, %621 : vector<8x256xf32>
    %cst_307 = arith.constant 0.833333313 : f32
    %926 = vector.broadcast %cst_307 : f32 to vector<8x256xf32>
    %927 = arith.mulf %925, %926 : vector<8x256xf32>
    %928 = arith.mulf %927, %841 : vector<8x256xf32>
    %929 = arith.addf %923, %928 : vector<8x256xf32>
    %cst_308 = arith.constant -1.800000e+00 : f32
    %930 = vector.broadcast %cst_308 : f32 to vector<8x256xf32>
    %931 = arith.subf %621, %930 : vector<8x256xf32>
    %cst_309 = arith.constant 0.833333313 : f32
    %932 = vector.broadcast %cst_309 : f32 to vector<8x256xf32>
    %933 = arith.mulf %931, %932 : vector<8x256xf32>
    %934 = arith.mulf %933, %841 : vector<8x256xf32>
    %cst_310 = arith.constant -2.000000e-01 : f32
    %935 = vector.broadcast %cst_310 : f32 to vector<8x256xf32>
    %936 = arith.subf %935, %621 : vector<8x256xf32>
    %cst_311 = arith.constant 0.833333313 : f32
    %937 = vector.broadcast %cst_311 : f32 to vector<8x256xf32>
    %938 = arith.mulf %936, %937 : vector<8x256xf32>
    %939 = arith.mulf %938, %852 : vector<8x256xf32>
    %940 = arith.addf %934, %939 : vector<8x256xf32>
    %cst_312 = arith.constant -1.400000e+00 : f32
    %941 = vector.broadcast %cst_312 : f32 to vector<8x256xf32>
    %942 = arith.subf %621, %941 : vector<8x256xf32>
    %cst_313 = arith.constant 0.833333313 : f32
    %943 = vector.broadcast %cst_313 : f32 to vector<8x256xf32>
    %944 = arith.mulf %942, %943 : vector<8x256xf32>
    %945 = arith.mulf %944, %852 : vector<8x256xf32>
    %cst_314 = arith.constant 2.000000e-01 : f32
    %946 = vector.broadcast %cst_314 : f32 to vector<8x256xf32>
    %947 = arith.subf %946, %621 : vector<8x256xf32>
    %cst_315 = arith.constant 0.833333313 : f32
    %948 = vector.broadcast %cst_315 : f32 to vector<8x256xf32>
    %949 = arith.mulf %947, %948 : vector<8x256xf32>
    %950 = arith.mulf %949, %863 : vector<8x256xf32>
    %951 = arith.addf %945, %950 : vector<8x256xf32>
    %cst_316 = arith.constant -1.000000e+00 : f32
    %952 = vector.broadcast %cst_316 : f32 to vector<8x256xf32>
    %953 = arith.subf %621, %952 : vector<8x256xf32>
    %cst_317 = arith.constant 0.833333313 : f32
    %954 = vector.broadcast %cst_317 : f32 to vector<8x256xf32>
    %955 = arith.mulf %953, %954 : vector<8x256xf32>
    %956 = arith.mulf %955, %863 : vector<8x256xf32>
    %cst_318 = arith.constant 6.000000e-01 : f32
    %957 = vector.broadcast %cst_318 : f32 to vector<8x256xf32>
    %958 = arith.subf %957, %621 : vector<8x256xf32>
    %cst_319 = arith.constant 0.833333313 : f32
    %959 = vector.broadcast %cst_319 : f32 to vector<8x256xf32>
    %960 = arith.mulf %958, %959 : vector<8x256xf32>
    %961 = arith.mulf %960, %874 : vector<8x256xf32>
    %962 = arith.addf %956, %961 : vector<8x256xf32>
    %cst_320 = arith.constant -6.000000e-01 : f32
    %963 = vector.broadcast %cst_320 : f32 to vector<8x256xf32>
    %964 = arith.subf %621, %963 : vector<8x256xf32>
    %cst_321 = arith.constant 0.833333313 : f32
    %965 = vector.broadcast %cst_321 : f32 to vector<8x256xf32>
    %966 = arith.mulf %964, %965 : vector<8x256xf32>
    %967 = arith.mulf %966, %874 : vector<8x256xf32>
    %cst_322 = arith.constant 1.000000e+00 : f32
    %968 = vector.broadcast %cst_322 : f32 to vector<8x256xf32>
    %969 = arith.subf %968, %621 : vector<8x256xf32>
    %cst_323 = arith.constant 0.833333313 : f32
    %970 = vector.broadcast %cst_323 : f32 to vector<8x256xf32>
    %971 = arith.mulf %969, %970 : vector<8x256xf32>
    %972 = arith.mulf %971, %885 : vector<8x256xf32>
    %973 = arith.addf %967, %972 : vector<8x256xf32>
    %cst_324 = arith.constant -2.000000e-01 : f32
    %974 = vector.broadcast %cst_324 : f32 to vector<8x256xf32>
    %975 = arith.subf %621, %974 : vector<8x256xf32>
    %cst_325 = arith.constant 0.833333313 : f32
    %976 = vector.broadcast %cst_325 : f32 to vector<8x256xf32>
    %977 = arith.mulf %975, %976 : vector<8x256xf32>
    %978 = arith.mulf %977, %885 : vector<8x256xf32>
    %cst_326 = arith.constant 1.400000e+00 : f32
    %979 = vector.broadcast %cst_326 : f32 to vector<8x256xf32>
    %980 = arith.subf %979, %621 : vector<8x256xf32>
    %cst_327 = arith.constant 0.833333313 : f32
    %981 = vector.broadcast %cst_327 : f32 to vector<8x256xf32>
    %982 = arith.mulf %980, %981 : vector<8x256xf32>
    %983 = arith.mulf %982, %896 : vector<8x256xf32>
    %984 = arith.addf %978, %983 : vector<8x256xf32>
    %cst_328 = arith.constant 2.000000e-01 : f32
    %985 = vector.broadcast %cst_328 : f32 to vector<8x256xf32>
    %986 = arith.subf %621, %985 : vector<8x256xf32>
    %cst_329 = arith.constant 0.833333313 : f32
    %987 = vector.broadcast %cst_329 : f32 to vector<8x256xf32>
    %988 = arith.mulf %986, %987 : vector<8x256xf32>
    %989 = arith.mulf %988, %896 : vector<8x256xf32>
    %cst_330 = arith.constant 1.800000e+00 : f32
    %990 = vector.broadcast %cst_330 : f32 to vector<8x256xf32>
    %991 = arith.subf %990, %621 : vector<8x256xf32>
    %cst_331 = arith.constant 0.833333313 : f32
    %992 = vector.broadcast %cst_331 : f32 to vector<8x256xf32>
    %993 = arith.mulf %991, %992 : vector<8x256xf32>
    %994 = arith.mulf %993, %907 : vector<8x256xf32>
    %995 = arith.addf %989, %994 : vector<8x256xf32>
    %cst_332 = arith.constant 6.000000e-01 : f32
    %996 = vector.broadcast %cst_332 : f32 to vector<8x256xf32>
    %997 = arith.subf %621, %996 : vector<8x256xf32>
    %cst_333 = arith.constant 0.833333313 : f32
    %998 = vector.broadcast %cst_333 : f32 to vector<8x256xf32>
    %999 = arith.mulf %997, %998 : vector<8x256xf32>
    %1000 = arith.mulf %999, %907 : vector<8x256xf32>
    %cst_334 = arith.constant 2.200000e+00 : f32
    %1001 = vector.broadcast %cst_334 : f32 to vector<8x256xf32>
    %1002 = arith.subf %1001, %621 : vector<8x256xf32>
    %cst_335 = arith.constant 0.833333313 : f32
    %1003 = vector.broadcast %cst_335 : f32 to vector<8x256xf32>
    %1004 = arith.mulf %1002, %1003 : vector<8x256xf32>
    %1005 = arith.mulf %1004, %918 : vector<8x256xf32>
    %1006 = arith.addf %1000, %1005 : vector<8x256xf32>
    %c0_336 = arith.constant 0 : index
    %c256 = arith.constant 256 : index
    %1007 = vector.load %arg21[%c0_336, %c256] : memref<8x2304xf32, #tpu.memory_space<vmem>>, vector<8x256xf32>
    tpu.vector_store %arg21[%c0_336, %c256], %929 {strides = array<i32>} : memref<8x2304xf32, #tpu.memory_space<vmem>>, vector<8x256xf32>,
    %c0_337 = arith.constant 0 : index
    %c512_338 = arith.constant 512 : index
    %1008 = vector.load %arg21[%c0_337, %c512_338] : memref<8x2304xf32, #tpu.memory_space<vmem>>, vector<8x256xf32>
    tpu.vector_store %arg21[%c0_337, %c512_338], %940 {strides = array<i32>} : memref<8x2304xf32, #tpu.memory_space<vmem>>, vector<8x256xf32>,
    %c0_339 = arith.constant 0 : index
    %c768 = arith.constant 768 : index
    %1009 = vector.load %arg21[%c0_339, %c768] : memref<8x2304xf32, #tpu.memory_space<vmem>>, vector<8x256xf32>
    tpu.vector_store %arg21[%c0_339, %c768], %951 {strides = array<i32>} : memref<8x2304xf32, #tpu.memory_space<vmem>>, vector<8x256xf32>,
    %c0_340 = arith.constant 0 : index
    %c1024 = arith.constant 1024 : index
    %1010 = vector.load %arg21[%c0_340, %c1024] : memref<8x2304xf32, #tpu.memory_space<vmem>>, vector<8x256xf32>
    tpu.vector_store %arg21[%c0_340, %c1024], %962 {strides = array<i32>} : memref<8x2304xf32, #tpu.memory_space<vmem>>, vector<8x256xf32>,
    %c0_341 = arith.constant 0 : index
    %c1280 = arith.constant 1280 : index
    %1011 = vector.load %arg21[%c0_341, %c1280] : memref<8x2304xf32, #tpu.memory_space<vmem>>, vector<8x256xf32>
    tpu.vector_store %arg21[%c0_341, %c1280], %973 {strides = array<i32>} : memref<8x2304xf32, #tpu.memory_space<vmem>>, vector<8x256xf32>,
    %c0_342 = arith.constant 0 : index
    %c1536 = arith.constant 1536 : index
    %1012 = vector.load %arg21[%c0_342, %c1536] : memref<8x2304xf32, #tpu.memory_space<vmem>>, vector<8x256xf32>
    tpu.vector_store %arg21[%c0_342, %c1536], %984 {strides = array<i32>} : memref<8x2304xf32, #tpu.memory_space<vmem>>, vector<8x256xf32>,
    %c0_343 = arith.constant 0 : index
    %c1792 = arith.constant 1792 : index
    %1013 = vector.load %arg21[%c0_343, %c1792] : memref<8x2304xf32, #tpu.memory_space<vmem>>, vector<8x256xf32>
    tpu.vector_store %arg21[%c0_343, %c1792], %995 {strides = array<i32>} : memref<8x2304xf32, #tpu.memory_space<vmem>>, vector<8x256xf32>,
    %c0_344 = arith.constant 0 : index
    %c2048 = arith.constant 2048 : index
    %1014 = vector.load %arg21[%c0_344, %c2048] : memref<8x2304xf32, #tpu.memory_space<vmem>>, vector<8x256xf32>
    tpu.vector_store %arg21[%c0_344, %c2048], %1006 {strides = array<i32>} : memref<8x2304xf32, #tpu.memory_space<vmem>>, vector<8x256xf32>,
    %c0_345 = arith.constant 0 : index
    %c0_346 = arith.constant 0 : index
    %1015 = vector.load %arg21[%c0_345, %c0_346] : memref<8x2304xf32, #tpu.memory_space<vmem>>, vector<8x2304xf32>
    %1016 = arith.truncf %1015 : vector<8x2304xf32> to vector<8x2304xbf16>
    %c0_347 = arith.constant 0 : index
    %c0_348 = arith.constant 0 : index
    %1017 = vector.load %arg15[%c0_347, %c0_348] : memref<2304x128xbf16, #tpu.memory_space<vmem>>, vector<2304x128xbf16>
    %cst_349 = arith.constant dense<0.000000e+00> : vector<8x128xf32>
    %1018 = tpu.matmul %1016, %1017, %cst_349 {dimension_numbers = #tpu.dot_dimension_numbers<[1], [0], [0], [1], [0, 0, 1, 1], [], []>} : vector<8x2304xbf16>, vector<2304x128xbf16>, vector<8x128xf32> -> vector<8x128xf32>
    %1019 = arith.negf %1018 : vector<8x128xf32>
    %1020 = math.exp %1019 : vector<8x128xf32>
    %cst_350 = arith.constant 1.000000e+00 : f32
    %1021 = vector.broadcast %cst_350 : f32 to vector<8x128xf32>
    %1022 = arith.addf %1021, %1020 : vector<8x128xf32>
    %1023 = arith.divf %1021, %1022 : vector<8x128xf32>
    %1024 = arith.mulf %1018, %1023 : vector<8x128xf32>
    %c0_351 = arith.constant 0 : index
    %c0_352 = arith.constant 0 : index
    %1025 = vector.load %arg22[%c0_351, %c0_352] : memref<8x1152xf32, #tpu.memory_space<vmem>>, vector<8x128xf32>
    tpu.vector_store %arg22[%c0_351, %c0_352], %1024 {strides = array<i32>} : memref<8x1152xf32, #tpu.memory_space<vmem>>, vector<8x128xf32>,
    %cst_353 = arith.constant -2.200000e+00 : f32
    %1026 = vector.broadcast %cst_353 : f32 to vector<8x128xf32>
    %1027 = arith.cmpf oge, %1018, %1026 : vector<8x128xf32>
    %cst_354 = arith.constant -1.800000e+00 : f32
    %1028 = vector.broadcast %cst_354 : f32 to vector<8x128xf32>
    %1029 = arith.cmpf olt, %1018, %1028 : vector<8x128xf32>
    %1030 = arith.andi %1027, %1029 : vector<8x128xi1>
    %1031 = arith.extui %1030 : vector<8x128xi1> to vector<8x128xi32>
    %1032 = arith.sitofp %1031 : vector<8x128xi32> to vector<8x128xf32>
    %cst_355 = arith.constant -1.800000e+00 : f32
    %1033 = vector.broadcast %cst_355 : f32 to vector<8x128xf32>
    %1034 = arith.cmpf oge, %1018, %1033 : vector<8x128xf32>
    %cst_356 = arith.constant -1.400000e+00 : f32
    %1035 = vector.broadcast %cst_356 : f32 to vector<8x128xf32>
    %1036 = arith.cmpf olt, %1018, %1035 : vector<8x128xf32>
    %1037 = arith.andi %1034, %1036 : vector<8x128xi1>
    %1038 = arith.extui %1037 : vector<8x128xi1> to vector<8x128xi32>
    %1039 = arith.sitofp %1038 : vector<8x128xi32> to vector<8x128xf32>
    %cst_357 = arith.constant -1.400000e+00 : f32
    %1040 = vector.broadcast %cst_357 : f32 to vector<8x128xf32>
    %1041 = arith.cmpf oge, %1018, %1040 : vector<8x128xf32>
    %cst_358 = arith.constant -1.000000e+00 : f32
    %1042 = vector.broadcast %cst_358 : f32 to vector<8x128xf32>
    %1043 = arith.cmpf olt, %1018, %1042 : vector<8x128xf32>
    %1044 = arith.andi %1041, %1043 : vector<8x128xi1>
    %1045 = arith.extui %1044 : vector<8x128xi1> to vector<8x128xi32>
    %1046 = arith.sitofp %1045 : vector<8x128xi32> to vector<8x128xf32>
    %cst_359 = arith.constant -1.000000e+00 : f32
    %1047 = vector.broadcast %cst_359 : f32 to vector<8x128xf32>
    %1048 = arith.cmpf oge, %1018, %1047 : vector<8x128xf32>
    %cst_360 = arith.constant -6.000000e-01 : f32
    %1049 = vector.broadcast %cst_360 : f32 to vector<8x128xf32>
    %1050 = arith.cmpf olt, %1018, %1049 : vector<8x128xf32>
    %1051 = arith.andi %1048, %1050 : vector<8x128xi1>
    %1052 = arith.extui %1051 : vector<8x128xi1> to vector<8x128xi32>
    %1053 = arith.sitofp %1052 : vector<8x128xi32> to vector<8x128xf32>
    %cst_361 = arith.constant -6.000000e-01 : f32
    %1054 = vector.broadcast %cst_361 : f32 to vector<8x128xf32>
    %1055 = arith.cmpf oge, %1018, %1054 : vector<8x128xf32>
    %cst_362 = arith.constant -2.000000e-01 : f32
    %1056 = vector.broadcast %cst_362 : f32 to vector<8x128xf32>
    %1057 = arith.cmpf olt, %1018, %1056 : vector<8x128xf32>
    %1058 = arith.andi %1055, %1057 : vector<8x128xi1>
    %1059 = arith.extui %1058 : vector<8x128xi1> to vector<8x128xi32>
    %1060 = arith.sitofp %1059 : vector<8x128xi32> to vector<8x128xf32>
    %cst_363 = arith.constant -2.000000e-01 : f32
    %1061 = vector.broadcast %cst_363 : f32 to vector<8x128xf32>
    %1062 = arith.cmpf oge, %1018, %1061 : vector<8x128xf32>
    %cst_364 = arith.constant 2.000000e-01 : f32
    %1063 = vector.broadcast %cst_364 : f32 to vector<8x128xf32>
    %1064 = arith.cmpf olt, %1018, %1063 : vector<8x128xf32>
    %1065 = arith.andi %1062, %1064 : vector<8x128xi1>
    %1066 = arith.extui %1065 : vector<8x128xi1> to vector<8x128xi32>
    %1067 = arith.sitofp %1066 : vector<8x128xi32> to vector<8x128xf32>
    %cst_365 = arith.constant 2.000000e-01 : f32
    %1068 = vector.broadcast %cst_365 : f32 to vector<8x128xf32>
    %1069 = arith.cmpf oge, %1018, %1068 : vector<8x128xf32>
    %cst_366 = arith.constant 6.000000e-01 : f32
    %1070 = vector.broadcast %cst_366 : f32 to vector<8x128xf32>
    %1071 = arith.cmpf olt, %1018, %1070 : vector<8x128xf32>
    %1072 = arith.andi %1069, %1071 : vector<8x128xi1>
    %1073 = arith.extui %1072 : vector<8x128xi1> to vector<8x128xi32>
    %1074 = arith.sitofp %1073 : vector<8x128xi32> to vector<8x128xf32>
    %cst_367 = arith.constant 6.000000e-01 : f32
    %1075 = vector.broadcast %cst_367 : f32 to vector<8x128xf32>
    %1076 = arith.cmpf oge, %1018, %1075 : vector<8x128xf32>
    %cst_368 = arith.constant 1.000000e+00 : f32
    %1077 = vector.broadcast %cst_368 : f32 to vector<8x128xf32>
    %1078 = arith.cmpf olt, %1018, %1077 : vector<8x128xf32>
    %1079 = arith.andi %1076, %1078 : vector<8x128xi1>
    %1080 = arith.extui %1079 : vector<8x128xi1> to vector<8x128xi32>
    %1081 = arith.sitofp %1080 : vector<8x128xi32> to vector<8x128xf32>
    %cst_369 = arith.constant 1.000000e+00 : f32
    %1082 = vector.broadcast %cst_369 : f32 to vector<8x128xf32>
    %1083 = arith.cmpf oge, %1018, %1082 : vector<8x128xf32>
    %cst_370 = arith.constant 1.400000e+00 : f32
    %1084 = vector.broadcast %cst_370 : f32 to vector<8x128xf32>
    %1085 = arith.cmpf olt, %1018, %1084 : vector<8x128xf32>
    %1086 = arith.andi %1083, %1085 : vector<8x128xi1>
    %1087 = arith.extui %1086 : vector<8x128xi1> to vector<8x128xi32>
    %1088 = arith.sitofp %1087 : vector<8x128xi32> to vector<8x128xf32>
    %cst_371 = arith.constant 1.400000e+00 : f32
    %1089 = vector.broadcast %cst_371 : f32 to vector<8x128xf32>
    %1090 = arith.cmpf oge, %1018, %1089 : vector<8x128xf32>
    %cst_372 = arith.constant 1.800000e+00 : f32
    %1091 = vector.broadcast %cst_372 : f32 to vector<8x128xf32>
    %1092 = arith.cmpf olt, %1018, %1091 : vector<8x128xf32>
    %1093 = arith.andi %1090, %1092 : vector<8x128xi1>
    %1094 = arith.extui %1093 : vector<8x128xi1> to vector<8x128xi32>
    %1095 = arith.sitofp %1094 : vector<8x128xi32> to vector<8x128xf32>
    %cst_373 = arith.constant 1.800000e+00 : f32
    %1096 = vector.broadcast %cst_373 : f32 to vector<8x128xf32>
    %1097 = arith.cmpf oge, %1018, %1096 : vector<8x128xf32>
    %cst_374 = arith.constant 2.200000e+00 : f32
    %1098 = vector.broadcast %cst_374 : f32 to vector<8x128xf32>
    %1099 = arith.cmpf olt, %1018, %1098 : vector<8x128xf32>
    %1100 = arith.andi %1097, %1099 : vector<8x128xi1>
    %1101 = arith.extui %1100 : vector<8x128xi1> to vector<8x128xi32>
    %1102 = arith.sitofp %1101 : vector<8x128xi32> to vector<8x128xf32>
    %cst_375 = arith.constant -2.200000e+00 : f32
    %1103 = vector.broadcast %cst_375 : f32 to vector<8x128xf32>
    %1104 = arith.subf %1018, %1103 : vector<8x128xf32>
    %cst_376 = arith.constant 2.500000e+00 : f32
    %1105 = vector.broadcast %cst_376 : f32 to vector<8x128xf32>
    %1106 = arith.mulf %1104, %1105 : vector<8x128xf32>
    %1107 = arith.mulf %1106, %1032 : vector<8x128xf32>
    %cst_377 = arith.constant -1.400000e+00 : f32
    %1108 = vector.broadcast %cst_377 : f32 to vector<8x128xf32>
    %1109 = arith.subf %1108, %1018 : vector<8x128xf32>
    %cst_378 = arith.constant 2.500000e+00 : f32
    %1110 = vector.broadcast %cst_378 : f32 to vector<8x128xf32>
    %1111 = arith.mulf %1109, %1110 : vector<8x128xf32>
    %1112 = arith.mulf %1111, %1039 : vector<8x128xf32>
    %1113 = arith.addf %1107, %1112 : vector<8x128xf32>
    %cst_379 = arith.constant -1.800000e+00 : f32
    %1114 = vector.broadcast %cst_379 : f32 to vector<8x128xf32>
    %1115 = arith.subf %1018, %1114 : vector<8x128xf32>
    %cst_380 = arith.constant 2.500000e+00 : f32
    %1116 = vector.broadcast %cst_380 : f32 to vector<8x128xf32>
    %1117 = arith.mulf %1115, %1116 : vector<8x128xf32>
    %1118 = arith.mulf %1117, %1039 : vector<8x128xf32>
    %cst_381 = arith.constant -1.000000e+00 : f32
    %1119 = vector.broadcast %cst_381 : f32 to vector<8x128xf32>
    %1120 = arith.subf %1119, %1018 : vector<8x128xf32>
    %cst_382 = arith.constant 2.500000e+00 : f32
    %1121 = vector.broadcast %cst_382 : f32 to vector<8x128xf32>
    %1122 = arith.mulf %1120, %1121 : vector<8x128xf32>
    %1123 = arith.mulf %1122, %1046 : vector<8x128xf32>
    %1124 = arith.addf %1118, %1123 : vector<8x128xf32>
    %cst_383 = arith.constant -1.400000e+00 : f32
    %1125 = vector.broadcast %cst_383 : f32 to vector<8x128xf32>
    %1126 = arith.subf %1018, %1125 : vector<8x128xf32>
    %cst_384 = arith.constant 2.500000e+00 : f32
    %1127 = vector.broadcast %cst_384 : f32 to vector<8x128xf32>
    %1128 = arith.mulf %1126, %1127 : vector<8x128xf32>
    %1129 = arith.mulf %1128, %1046 : vector<8x128xf32>
    %cst_385 = arith.constant -6.000000e-01 : f32
    %1130 = vector.broadcast %cst_385 : f32 to vector<8x128xf32>
    %1131 = arith.subf %1130, %1018 : vector<8x128xf32>
    %cst_386 = arith.constant 2.500000e+00 : f32
    %1132 = vector.broadcast %cst_386 : f32 to vector<8x128xf32>
    %1133 = arith.mulf %1131, %1132 : vector<8x128xf32>
    %1134 = arith.mulf %1133, %1053 : vector<8x128xf32>
    %1135 = arith.addf %1129, %1134 : vector<8x128xf32>
    %cst_387 = arith.constant -1.000000e+00 : f32
    %1136 = vector.broadcast %cst_387 : f32 to vector<8x128xf32>
    %1137 = arith.subf %1018, %1136 : vector<8x128xf32>
    %cst_388 = arith.constant 2.500000e+00 : f32
    %1138 = vector.broadcast %cst_388 : f32 to vector<8x128xf32>
    %1139 = arith.mulf %1137, %1138 : vector<8x128xf32>
    %1140 = arith.mulf %1139, %1053 : vector<8x128xf32>
    %cst_389 = arith.constant -2.000000e-01 : f32
    %1141 = vector.broadcast %cst_389 : f32 to vector<8x128xf32>
    %1142 = arith.subf %1141, %1018 : vector<8x128xf32>
    %cst_390 = arith.constant 2.500000e+00 : f32
    %1143 = vector.broadcast %cst_390 : f32 to vector<8x128xf32>
    %1144 = arith.mulf %1142, %1143 : vector<8x128xf32>
    %1145 = arith.mulf %1144, %1060 : vector<8x128xf32>
    %1146 = arith.addf %1140, %1145 : vector<8x128xf32>
    %cst_391 = arith.constant -6.000000e-01 : f32
    %1147 = vector.broadcast %cst_391 : f32 to vector<8x128xf32>
    %1148 = arith.subf %1018, %1147 : vector<8x128xf32>
    %cst_392 = arith.constant 2.500000e+00 : f32
    %1149 = vector.broadcast %cst_392 : f32 to vector<8x128xf32>
    %1150 = arith.mulf %1148, %1149 : vector<8x128xf32>
    %1151 = arith.mulf %1150, %1060 : vector<8x128xf32>
    %cst_393 = arith.constant 2.000000e-01 : f32
    %1152 = vector.broadcast %cst_393 : f32 to vector<8x128xf32>
    %1153 = arith.subf %1152, %1018 : vector<8x128xf32>
    %cst_394 = arith.constant 2.500000e+00 : f32
    %1154 = vector.broadcast %cst_394 : f32 to vector<8x128xf32>
    %1155 = arith.mulf %1153, %1154 : vector<8x128xf32>
    %1156 = arith.mulf %1155, %1067 : vector<8x128xf32>
    %1157 = arith.addf %1151, %1156 : vector<8x128xf32>
    %cst_395 = arith.constant -2.000000e-01 : f32
    %1158 = vector.broadcast %cst_395 : f32 to vector<8x128xf32>
    %1159 = arith.subf %1018, %1158 : vector<8x128xf32>
    %cst_396 = arith.constant 2.500000e+00 : f32
    %1160 = vector.broadcast %cst_396 : f32 to vector<8x128xf32>
    %1161 = arith.mulf %1159, %1160 : vector<8x128xf32>
    %1162 = arith.mulf %1161, %1067 : vector<8x128xf32>
    %cst_397 = arith.constant 6.000000e-01 : f32
    %1163 = vector.broadcast %cst_397 : f32 to vector<8x128xf32>
    %1164 = arith.subf %1163, %1018 : vector<8x128xf32>
    %cst_398 = arith.constant 2.500000e+00 : f32
    %1165 = vector.broadcast %cst_398 : f32 to vector<8x128xf32>
    %1166 = arith.mulf %1164, %1165 : vector<8x128xf32>
    %1167 = arith.mulf %1166, %1074 : vector<8x128xf32>
    %1168 = arith.addf %1162, %1167 : vector<8x128xf32>
    %cst_399 = arith.constant 2.000000e-01 : f32
    %1169 = vector.broadcast %cst_399 : f32 to vector<8x128xf32>
    %1170 = arith.subf %1018, %1169 : vector<8x128xf32>
    %cst_400 = arith.constant 2.500000e+00 : f32
    %1171 = vector.broadcast %cst_400 : f32 to vector<8x128xf32>
    %1172 = arith.mulf %1170, %1171 : vector<8x128xf32>
    %1173 = arith.mulf %1172, %1074 : vector<8x128xf32>
    %cst_401 = arith.constant 1.000000e+00 : f32
    %1174 = vector.broadcast %cst_401 : f32 to vector<8x128xf32>
    %1175 = arith.subf %1174, %1018 : vector<8x128xf32>
    %cst_402 = arith.constant 2.500000e+00 : f32
    %1176 = vector.broadcast %cst_402 : f32 to vector<8x128xf32>
    %1177 = arith.mulf %1175, %1176 : vector<8x128xf32>
    %1178 = arith.mulf %1177, %1081 : vector<8x128xf32>
    %1179 = arith.addf %1173, %1178 : vector<8x128xf32>
    %cst_403 = arith.constant 6.000000e-01 : f32
    %1180 = vector.broadcast %cst_403 : f32 to vector<8x128xf32>
    %1181 = arith.subf %1018, %1180 : vector<8x128xf32>
    %cst_404 = arith.constant 2.500000e+00 : f32
    %1182 = vector.broadcast %cst_404 : f32 to vector<8x128xf32>
    %1183 = arith.mulf %1181, %1182 : vector<8x128xf32>
    %1184 = arith.mulf %1183, %1081 : vector<8x128xf32>
    %cst_405 = arith.constant 1.400000e+00 : f32
    %1185 = vector.broadcast %cst_405 : f32 to vector<8x128xf32>
    %1186 = arith.subf %1185, %1018 : vector<8x128xf32>
    %cst_406 = arith.constant 2.500000e+00 : f32
    %1187 = vector.broadcast %cst_406 : f32 to vector<8x128xf32>
    %1188 = arith.mulf %1186, %1187 : vector<8x128xf32>
    %1189 = arith.mulf %1188, %1088 : vector<8x128xf32>
    %1190 = arith.addf %1184, %1189 : vector<8x128xf32>
    %cst_407 = arith.constant 1.000000e+00 : f32
    %1191 = vector.broadcast %cst_407 : f32 to vector<8x128xf32>
    %1192 = arith.subf %1018, %1191 : vector<8x128xf32>
    %cst_408 = arith.constant 2.500000e+00 : f32
    %1193 = vector.broadcast %cst_408 : f32 to vector<8x128xf32>
    %1194 = arith.mulf %1192, %1193 : vector<8x128xf32>
    %1195 = arith.mulf %1194, %1088 : vector<8x128xf32>
    %cst_409 = arith.constant 1.800000e+00 : f32
    %1196 = vector.broadcast %cst_409 : f32 to vector<8x128xf32>
    %1197 = arith.subf %1196, %1018 : vector<8x128xf32>
    %cst_410 = arith.constant 2.500000e+00 : f32
    %1198 = vector.broadcast %cst_410 : f32 to vector<8x128xf32>
    %1199 = arith.mulf %1197, %1198 : vector<8x128xf32>
    %1200 = arith.mulf %1199, %1095 : vector<8x128xf32>
    %1201 = arith.addf %1195, %1200 : vector<8x128xf32>
    %cst_411 = arith.constant 1.400000e+00 : f32
    %1202 = vector.broadcast %cst_411 : f32 to vector<8x128xf32>
    %1203 = arith.subf %1018, %1202 : vector<8x128xf32>
    %cst_412 = arith.constant 2.500000e+00 : f32
    %1204 = vector.broadcast %cst_412 : f32 to vector<8x128xf32>
    %1205 = arith.mulf %1203, %1204 : vector<8x128xf32>
    %1206 = arith.mulf %1205, %1095 : vector<8x128xf32>
    %cst_413 = arith.constant 2.200000e+00 : f32
    %1207 = vector.broadcast %cst_413 : f32 to vector<8x128xf32>
    %1208 = arith.subf %1207, %1018 : vector<8x128xf32>
    %cst_414 = arith.constant 2.500000e+00 : f32
    %1209 = vector.broadcast %cst_414 : f32 to vector<8x128xf32>
    %1210 = arith.mulf %1208, %1209 : vector<8x128xf32>
    %1211 = arith.mulf %1210, %1102 : vector<8x128xf32>
    %1212 = arith.addf %1206, %1211 : vector<8x128xf32>
    %cst_415 = arith.constant -2.200000e+00 : f32
    %1213 = vector.broadcast %cst_415 : f32 to vector<8x128xf32>
    %1214 = arith.subf %1018, %1213 : vector<8x128xf32>
    %cst_416 = arith.constant 1.250000e+00 : f32
    %1215 = vector.broadcast %cst_416 : f32 to vector<8x128xf32>
    %1216 = arith.mulf %1214, %1215 : vector<8x128xf32>
    %1217 = arith.mulf %1216, %1113 : vector<8x128xf32>
    %cst_417 = arith.constant -1.000000e+00 : f32
    %1218 = vector.broadcast %cst_417 : f32 to vector<8x128xf32>
    %1219 = arith.subf %1218, %1018 : vector<8x128xf32>
    %cst_418 = arith.constant 1.250000e+00 : f32
    %1220 = vector.broadcast %cst_418 : f32 to vector<8x128xf32>
    %1221 = arith.mulf %1219, %1220 : vector<8x128xf32>
    %1222 = arith.mulf %1221, %1124 : vector<8x128xf32>
    %1223 = arith.addf %1217, %1222 : vector<8x128xf32>
    %cst_419 = arith.constant -1.800000e+00 : f32
    %1224 = vector.broadcast %cst_419 : f32 to vector<8x128xf32>
    %1225 = arith.subf %1018, %1224 : vector<8x128xf32>
    %cst_420 = arith.constant 1.250000e+00 : f32
    %1226 = vector.broadcast %cst_420 : f32 to vector<8x128xf32>
    %1227 = arith.mulf %1225, %1226 : vector<8x128xf32>
    %1228 = arith.mulf %1227, %1124 : vector<8x128xf32>
    %cst_421 = arith.constant -6.000000e-01 : f32
    %1229 = vector.broadcast %cst_421 : f32 to vector<8x128xf32>
    %1230 = arith.subf %1229, %1018 : vector<8x128xf32>
    %cst_422 = arith.constant 1.250000e+00 : f32
    %1231 = vector.broadcast %cst_422 : f32 to vector<8x128xf32>
    %1232 = arith.mulf %1230, %1231 : vector<8x128xf32>
    %1233 = arith.mulf %1232, %1135 : vector<8x128xf32>
    %1234 = arith.addf %1228, %1233 : vector<8x128xf32>
    %cst_423 = arith.constant -1.400000e+00 : f32
    %1235 = vector.broadcast %cst_423 : f32 to vector<8x128xf32>
    %1236 = arith.subf %1018, %1235 : vector<8x128xf32>
    %cst_424 = arith.constant 1.250000e+00 : f32
    %1237 = vector.broadcast %cst_424 : f32 to vector<8x128xf32>
    %1238 = arith.mulf %1236, %1237 : vector<8x128xf32>
    %1239 = arith.mulf %1238, %1135 : vector<8x128xf32>
    %cst_425 = arith.constant -2.000000e-01 : f32
    %1240 = vector.broadcast %cst_425 : f32 to vector<8x128xf32>
    %1241 = arith.subf %1240, %1018 : vector<8x128xf32>
    %cst_426 = arith.constant 1.250000e+00 : f32
    %1242 = vector.broadcast %cst_426 : f32 to vector<8x128xf32>
    %1243 = arith.mulf %1241, %1242 : vector<8x128xf32>
    %1244 = arith.mulf %1243, %1146 : vector<8x128xf32>
    %1245 = arith.addf %1239, %1244 : vector<8x128xf32>
    %cst_427 = arith.constant -1.000000e+00 : f32
    %1246 = vector.broadcast %cst_427 : f32 to vector<8x128xf32>
    %1247 = arith.subf %1018, %1246 : vector<8x128xf32>
    %cst_428 = arith.constant 1.250000e+00 : f32
    %1248 = vector.broadcast %cst_428 : f32 to vector<8x128xf32>
    %1249 = arith.mulf %1247, %1248 : vector<8x128xf32>
    %1250 = arith.mulf %1249, %1146 : vector<8x128xf32>
    %cst_429 = arith.constant 2.000000e-01 : f32
    %1251 = vector.broadcast %cst_429 : f32 to vector<8x128xf32>
    %1252 = arith.subf %1251, %1018 : vector<8x128xf32>
    %cst_430 = arith.constant 1.250000e+00 : f32
    %1253 = vector.broadcast %cst_430 : f32 to vector<8x128xf32>
    %1254 = arith.mulf %1252, %1253 : vector<8x128xf32>
    %1255 = arith.mulf %1254, %1157 : vector<8x128xf32>
    %1256 = arith.addf %1250, %1255 : vector<8x128xf32>
    %cst_431 = arith.constant -6.000000e-01 : f32
    %1257 = vector.broadcast %cst_431 : f32 to vector<8x128xf32>
    %1258 = arith.subf %1018, %1257 : vector<8x128xf32>
    %cst_432 = arith.constant 1.250000e+00 : f32
    %1259 = vector.broadcast %cst_432 : f32 to vector<8x128xf32>
    %1260 = arith.mulf %1258, %1259 : vector<8x128xf32>
    %1261 = arith.mulf %1260, %1157 : vector<8x128xf32>
    %cst_433 = arith.constant 6.000000e-01 : f32
    %1262 = vector.broadcast %cst_433 : f32 to vector<8x128xf32>
    %1263 = arith.subf %1262, %1018 : vector<8x128xf32>
    %cst_434 = arith.constant 1.250000e+00 : f32
    %1264 = vector.broadcast %cst_434 : f32 to vector<8x128xf32>
    %1265 = arith.mulf %1263, %1264 : vector<8x128xf32>
    %1266 = arith.mulf %1265, %1168 : vector<8x128xf32>
    %1267 = arith.addf %1261, %1266 : vector<8x128xf32>
    %cst_435 = arith.constant -2.000000e-01 : f32
    %1268 = vector.broadcast %cst_435 : f32 to vector<8x128xf32>
    %1269 = arith.subf %1018, %1268 : vector<8x128xf32>
    %cst_436 = arith.constant 1.250000e+00 : f32
    %1270 = vector.broadcast %cst_436 : f32 to vector<8x128xf32>
    %1271 = arith.mulf %1269, %1270 : vector<8x128xf32>
    %1272 = arith.mulf %1271, %1168 : vector<8x128xf32>
    %cst_437 = arith.constant 1.000000e+00 : f32
    %1273 = vector.broadcast %cst_437 : f32 to vector<8x128xf32>
    %1274 = arith.subf %1273, %1018 : vector<8x128xf32>
    %cst_438 = arith.constant 1.250000e+00 : f32
    %1275 = vector.broadcast %cst_438 : f32 to vector<8x128xf32>
    %1276 = arith.mulf %1274, %1275 : vector<8x128xf32>
    %1277 = arith.mulf %1276, %1179 : vector<8x128xf32>
    %1278 = arith.addf %1272, %1277 : vector<8x128xf32>
    %cst_439 = arith.constant 2.000000e-01 : f32
    %1279 = vector.broadcast %cst_439 : f32 to vector<8x128xf32>
    %1280 = arith.subf %1018, %1279 : vector<8x128xf32>
    %cst_440 = arith.constant 1.250000e+00 : f32
    %1281 = vector.broadcast %cst_440 : f32 to vector<8x128xf32>
    %1282 = arith.mulf %1280, %1281 : vector<8x128xf32>
    %1283 = arith.mulf %1282, %1179 : vector<8x128xf32>
    %cst_441 = arith.constant 1.400000e+00 : f32
    %1284 = vector.broadcast %cst_441 : f32 to vector<8x128xf32>
    %1285 = arith.subf %1284, %1018 : vector<8x128xf32>
    %cst_442 = arith.constant 1.250000e+00 : f32
    %1286 = vector.broadcast %cst_442 : f32 to vector<8x128xf32>
    %1287 = arith.mulf %1285, %1286 : vector<8x128xf32>
    %1288 = arith.mulf %1287, %1190 : vector<8x128xf32>
    %1289 = arith.addf %1283, %1288 : vector<8x128xf32>
    %cst_443 = arith.constant 6.000000e-01 : f32
    %1290 = vector.broadcast %cst_443 : f32 to vector<8x128xf32>
    %1291 = arith.subf %1018, %1290 : vector<8x128xf32>
    %cst_444 = arith.constant 1.250000e+00 : f32
    %1292 = vector.broadcast %cst_444 : f32 to vector<8x128xf32>
    %1293 = arith.mulf %1291, %1292 : vector<8x128xf32>
    %1294 = arith.mulf %1293, %1190 : vector<8x128xf32>
    %cst_445 = arith.constant 1.800000e+00 : f32
    %1295 = vector.broadcast %cst_445 : f32 to vector<8x128xf32>
    %1296 = arith.subf %1295, %1018 : vector<8x128xf32>
    %cst_446 = arith.constant 1.250000e+00 : f32
    %1297 = vector.broadcast %cst_446 : f32 to vector<8x128xf32>
    %1298 = arith.mulf %1296, %1297 : vector<8x128xf32>
    %1299 = arith.mulf %1298, %1201 : vector<8x128xf32>
    %1300 = arith.addf %1294, %1299 : vector<8x128xf32>
    %cst_447 = arith.constant 1.000000e+00 : f32
    %1301 = vector.broadcast %cst_447 : f32 to vector<8x128xf32>
    %1302 = arith.subf %1018, %1301 : vector<8x128xf32>
    %cst_448 = arith.constant 1.250000e+00 : f32
    %1303 = vector.broadcast %cst_448 : f32 to vector<8x128xf32>
    %1304 = arith.mulf %1302, %1303 : vector<8x128xf32>
    %1305 = arith.mulf %1304, %1201 : vector<8x128xf32>
    %cst_449 = arith.constant 2.200000e+00 : f32
    %1306 = vector.broadcast %cst_449 : f32 to vector<8x128xf32>
    %1307 = arith.subf %1306, %1018 : vector<8x128xf32>
    %cst_450 = arith.constant 1.250000e+00 : f32
    %1308 = vector.broadcast %cst_450 : f32 to vector<8x128xf32>
    %1309 = arith.mulf %1307, %1308 : vector<8x128xf32>
    %1310 = arith.mulf %1309, %1212 : vector<8x128xf32>
    %1311 = arith.addf %1305, %1310 : vector<8x128xf32>
    %cst_451 = arith.constant -2.200000e+00 : f32
    %1312 = vector.broadcast %cst_451 : f32 to vector<8x128xf32>
    %1313 = arith.subf %1018, %1312 : vector<8x128xf32>
    %cst_452 = arith.constant 0.833333313 : f32
    %1314 = vector.broadcast %cst_452 : f32 to vector<8x128xf32>
    %1315 = arith.mulf %1313, %1314 : vector<8x128xf32>
    %1316 = arith.mulf %1315, %1223 : vector<8x128xf32>
    %cst_453 = arith.constant -6.000000e-01 : f32
    %1317 = vector.broadcast %cst_453 : f32 to vector<8x128xf32>
    %1318 = arith.subf %1317, %1018 : vector<8x128xf32>
    %cst_454 = arith.constant 0.833333313 : f32
    %1319 = vector.broadcast %cst_454 : f32 to vector<8x128xf32>
    %1320 = arith.mulf %1318, %1319 : vector<8x128xf32>
    %1321 = arith.mulf %1320, %1234 : vector<8x128xf32>
    %1322 = arith.addf %1316, %1321 : vector<8x128xf32>
    %cst_455 = arith.constant -1.800000e+00 : f32
    %1323 = vector.broadcast %cst_455 : f32 to vector<8x128xf32>
    %1324 = arith.subf %1018, %1323 : vector<8x128xf32>
    %cst_456 = arith.constant 0.833333313 : f32
    %1325 = vector.broadcast %cst_456 : f32 to vector<8x128xf32>
    %1326 = arith.mulf %1324, %1325 : vector<8x128xf32>
    %1327 = arith.mulf %1326, %1234 : vector<8x128xf32>
    %cst_457 = arith.constant -2.000000e-01 : f32
    %1328 = vector.broadcast %cst_457 : f32 to vector<8x128xf32>
    %1329 = arith.subf %1328, %1018 : vector<8x128xf32>
    %cst_458 = arith.constant 0.833333313 : f32
    %1330 = vector.broadcast %cst_458 : f32 to vector<8x128xf32>
    %1331 = arith.mulf %1329, %1330 : vector<8x128xf32>
    %1332 = arith.mulf %1331, %1245 : vector<8x128xf32>
    %1333 = arith.addf %1327, %1332 : vector<8x128xf32>
    %cst_459 = arith.constant -1.400000e+00 : f32
    %1334 = vector.broadcast %cst_459 : f32 to vector<8x128xf32>
    %1335 = arith.subf %1018, %1334 : vector<8x128xf32>
    %cst_460 = arith.constant 0.833333313 : f32
    %1336 = vector.broadcast %cst_460 : f32 to vector<8x128xf32>
    %1337 = arith.mulf %1335, %1336 : vector<8x128xf32>
    %1338 = arith.mulf %1337, %1245 : vector<8x128xf32>
    %cst_461 = arith.constant 2.000000e-01 : f32
    %1339 = vector.broadcast %cst_461 : f32 to vector<8x128xf32>
    %1340 = arith.subf %1339, %1018 : vector<8x128xf32>
    %cst_462 = arith.constant 0.833333313 : f32
    %1341 = vector.broadcast %cst_462 : f32 to vector<8x128xf32>
    %1342 = arith.mulf %1340, %1341 : vector<8x128xf32>
    %1343 = arith.mulf %1342, %1256 : vector<8x128xf32>
    %1344 = arith.addf %1338, %1343 : vector<8x128xf32>
    %cst_463 = arith.constant -1.000000e+00 : f32
    %1345 = vector.broadcast %cst_463 : f32 to vector<8x128xf32>
    %1346 = arith.subf %1018, %1345 : vector<8x128xf32>
    %cst_464 = arith.constant 0.833333313 : f32
    %1347 = vector.broadcast %cst_464 : f32 to vector<8x128xf32>
    %1348 = arith.mulf %1346, %1347 : vector<8x128xf32>
    %1349 = arith.mulf %1348, %1256 : vector<8x128xf32>
    %cst_465 = arith.constant 6.000000e-01 : f32
    %1350 = vector.broadcast %cst_465 : f32 to vector<8x128xf32>
    %1351 = arith.subf %1350, %1018 : vector<8x128xf32>
    %cst_466 = arith.constant 0.833333313 : f32
    %1352 = vector.broadcast %cst_466 : f32 to vector<8x128xf32>
    %1353 = arith.mulf %1351, %1352 : vector<8x128xf32>
    %1354 = arith.mulf %1353, %1267 : vector<8x128xf32>
    %1355 = arith.addf %1349, %1354 : vector<8x128xf32>
    %cst_467 = arith.constant -6.000000e-01 : f32
    %1356 = vector.broadcast %cst_467 : f32 to vector<8x128xf32>
    %1357 = arith.subf %1018, %1356 : vector<8x128xf32>
    %cst_468 = arith.constant 0.833333313 : f32
    %1358 = vector.broadcast %cst_468 : f32 to vector<8x128xf32>
    %1359 = arith.mulf %1357, %1358 : vector<8x128xf32>
    %1360 = arith.mulf %1359, %1267 : vector<8x128xf32>
    %cst_469 = arith.constant 1.000000e+00 : f32
    %1361 = vector.broadcast %cst_469 : f32 to vector<8x128xf32>
    %1362 = arith.subf %1361, %1018 : vector<8x128xf32>
    %cst_470 = arith.constant 0.833333313 : f32
    %1363 = vector.broadcast %cst_470 : f32 to vector<8x128xf32>
    %1364 = arith.mulf %1362, %1363 : vector<8x128xf32>
    %1365 = arith.mulf %1364, %1278 : vector<8x128xf32>
    %1366 = arith.addf %1360, %1365 : vector<8x128xf32>
    %cst_471 = arith.constant -2.000000e-01 : f32
    %1367 = vector.broadcast %cst_471 : f32 to vector<8x128xf32>
    %1368 = arith.subf %1018, %1367 : vector<8x128xf32>
    %cst_472 = arith.constant 0.833333313 : f32
    %1369 = vector.broadcast %cst_472 : f32 to vector<8x128xf32>
    %1370 = arith.mulf %1368, %1369 : vector<8x128xf32>
    %1371 = arith.mulf %1370, %1278 : vector<8x128xf32>
    %cst_473 = arith.constant 1.400000e+00 : f32
    %1372 = vector.broadcast %cst_473 : f32 to vector<8x128xf32>
    %1373 = arith.subf %1372, %1018 : vector<8x128xf32>
    %cst_474 = arith.constant 0.833333313 : f32
    %1374 = vector.broadcast %cst_474 : f32 to vector<8x128xf32>
    %1375 = arith.mulf %1373, %1374 : vector<8x128xf32>
    %1376 = arith.mulf %1375, %1289 : vector<8x128xf32>
    %1377 = arith.addf %1371, %1376 : vector<8x128xf32>
    %cst_475 = arith.constant 2.000000e-01 : f32
    %1378 = vector.broadcast %cst_475 : f32 to vector<8x128xf32>
    %1379 = arith.subf %1018, %1378 : vector<8x128xf32>
    %cst_476 = arith.constant 0.833333313 : f32
    %1380 = vector.broadcast %cst_476 : f32 to vector<8x128xf32>
    %1381 = arith.mulf %1379, %1380 : vector<8x128xf32>
    %1382 = arith.mulf %1381, %1289 : vector<8x128xf32>
    %cst_477 = arith.constant 1.800000e+00 : f32
    %1383 = vector.broadcast %cst_477 : f32 to vector<8x128xf32>
    %1384 = arith.subf %1383, %1018 : vector<8x128xf32>
    %cst_478 = arith.constant 0.833333313 : f32
    %1385 = vector.broadcast %cst_478 : f32 to vector<8x128xf32>
    %1386 = arith.mulf %1384, %1385 : vector<8x128xf32>
    %1387 = arith.mulf %1386, %1300 : vector<8x128xf32>
    %1388 = arith.addf %1382, %1387 : vector<8x128xf32>
    %cst_479 = arith.constant 6.000000e-01 : f32
    %1389 = vector.broadcast %cst_479 : f32 to vector<8x128xf32>
    %1390 = arith.subf %1018, %1389 : vector<8x128xf32>
    %cst_480 = arith.constant 0.833333313 : f32
    %1391 = vector.broadcast %cst_480 : f32 to vector<8x128xf32>
    %1392 = arith.mulf %1390, %1391 : vector<8x128xf32>
    %1393 = arith.mulf %1392, %1300 : vector<8x128xf32>
    %cst_481 = arith.constant 2.200000e+00 : f32
    %1394 = vector.broadcast %cst_481 : f32 to vector<8x128xf32>
    %1395 = arith.subf %1394, %1018 : vector<8x128xf32>
    %cst_482 = arith.constant 0.833333313 : f32
    %1396 = vector.broadcast %cst_482 : f32 to vector<8x128xf32>
    %1397 = arith.mulf %1395, %1396 : vector<8x128xf32>
    %1398 = arith.mulf %1397, %1311 : vector<8x128xf32>
    %1399 = arith.addf %1393, %1398 : vector<8x128xf32>
    %c0_483 = arith.constant 0 : index
    %c128_484 = arith.constant 128 : index
    %1400 = vector.load %arg22[%c0_483, %c128_484] : memref<8x1152xf32, #tpu.memory_space<vmem>>, vector<8x128xf32>
    tpu.vector_store %arg22[%c0_483, %c128_484], %1322 {strides = array<i32>} : memref<8x1152xf32, #tpu.memory_space<vmem>>, vector<8x128xf32>,
    %c0_485 = arith.constant 0 : index
    %c256_486 = arith.constant 256 : index
    %1401 = vector.load %arg22[%c0_485, %c256_486] : memref<8x1152xf32, #tpu.memory_space<vmem>>, vector<8x128xf32>
    tpu.vector_store %arg22[%c0_485, %c256_486], %1333 {strides = array<i32>} : memref<8x1152xf32, #tpu.memory_space<vmem>>, vector<8x128xf32>,
    %c0_487 = arith.constant 0 : index
    %c384 = arith.constant 384 : index
    %1402 = vector.load %arg22[%c0_487, %c384] : memref<8x1152xf32, #tpu.memory_space<vmem>>, vector<8x128xf32>
    tpu.vector_store %arg22[%c0_487, %c384], %1344 {strides = array<i32>} : memref<8x1152xf32, #tpu.memory_space<vmem>>, vector<8x128xf32>,
    %c0_488 = arith.constant 0 : index
    %c512_489 = arith.constant 512 : index
    %1403 = vector.load %arg22[%c0_488, %c512_489] : memref<8x1152xf32, #tpu.memory_space<vmem>>, vector<8x128xf32>
    tpu.vector_store %arg22[%c0_488, %c512_489], %1355 {strides = array<i32>} : memref<8x1152xf32, #tpu.memory_space<vmem>>, vector<8x128xf32>,
    %c0_490 = arith.constant 0 : index
    %c640 = arith.constant 640 : index
    %1404 = vector.load %arg22[%c0_490, %c640] : memref<8x1152xf32, #tpu.memory_space<vmem>>, vector<8x128xf32>
    tpu.vector_store %arg22[%c0_490, %c640], %1366 {strides = array<i32>} : memref<8x1152xf32, #tpu.memory_space<vmem>>, vector<8x128xf32>,
    %c0_491 = arith.constant 0 : index
    %c768_492 = arith.constant 768 : index
    %1405 = vector.load %arg22[%c0_491, %c768_492] : memref<8x1152xf32, #tpu.memory_space<vmem>>, vector<8x128xf32>
    tpu.vector_store %arg22[%c0_491, %c768_492], %1377 {strides = array<i32>} : memref<8x1152xf32, #tpu.memory_space<vmem>>, vector<8x128xf32>,
    %c0_493 = arith.constant 0 : index
    %c896 = arith.constant 896 : index
    %1406 = vector.load %arg22[%c0_493, %c896] : memref<8x1152xf32, #tpu.memory_space<vmem>>, vector<8x128xf32>
    tpu.vector_store %arg22[%c0_493, %c896], %1388 {strides = array<i32>} : memref<8x1152xf32, #tpu.memory_space<vmem>>, vector<8x128xf32>,
    %c0_494 = arith.constant 0 : index
    %c1024_495 = arith.constant 1024 : index
    %1407 = vector.load %arg22[%c0_494, %c1024_495] : memref<8x1152xf32, #tpu.memory_space<vmem>>, vector<8x128xf32>
    tpu.vector_store %arg22[%c0_494, %c1024_495], %1399 {strides = array<i32>} : memref<8x1152xf32, #tpu.memory_space<vmem>>, vector<8x128xf32>,
    %c0_496 = arith.constant 0 : index
    %c0_497 = arith.constant 0 : index
    %1408 = vector.load %arg22[%c0_496, %c0_497] : memref<8x1152xf32, #tpu.memory_space<vmem>>, vector<8x1152xf32>
    %1409 = arith.truncf %1408 : vector<8x1152xf32> to vector<8x1152xbf16>
    %c0_498 = arith.constant 0 : index
    %c0_499 = arith.constant 0 : index
    %1410 = vector.load %arg16[%c0_498, %c0_499] : memref<1152x128xbf16, #tpu.memory_space<vmem>>, vector<1152x128xbf16>
    %cst_500 = arith.constant dense<0.000000e+00> : vector<8x128xf32>
    %1411 = tpu.matmul %1409, %1410, %cst_500 {dimension_numbers = #tpu.dot_dimension_numbers<[1], [0], [0], [1], [0, 0, 1, 1], [], []>} : vector<8x1152xbf16>, vector<1152x128xbf16>, vector<8x128xf32> -> vector<8x128xf32>
    %1412 = arith.negf %1411 : vector<8x128xf32>
    %1413 = math.exp %1412 : vector<8x128xf32>
    %cst_501 = arith.constant 1.000000e+00 : f32
    %1414 = vector.broadcast %cst_501 : f32 to vector<8x128xf32>
    %1415 = arith.addf %1414, %1413 : vector<8x128xf32>
    %1416 = arith.divf %1414, %1415 : vector<8x128xf32>
    %c0_502 = arith.constant 0 : index
    %c0_503 = arith.constant 0 : index
    %1417 = vector.load %arg11[%c0_502, %c0_503] : memref<8x128xf32, #tpu.memory_space<vmem>>, vector<8x128xf32>
    tpu.vector_store %arg11[%c0_502, %c0_503], %1416 {strides = array<i32>} : memref<8x128xf32, #tpu.memory_space<vmem>>, vector<8x128xf32>,
    return
  }
}

</mosaic_0001>

<bundles_post_ra>
// kernel: tpu_custom_call.1
= control target key start
LH: loop header
LB: loop body
LE: loop exit
PB: predicated region body
PF: predicated region fallthrough
CT: control target
= control target key end

     0   :  { %16 = vsyncpa [#allocation14], 0  ;;  %s12935_s0 = inlined_call_operand.vmem [shape: f32[64,16], index: 0, kind: input, shape index: {}]   ;;  %s12936_s1 = inlined_call_operand.vmem [shape: bf16[16,1024], index: 1, kind: input, shape index: {}]   ;;  %s12937_s2 = inlined_call_operand.hbm [shape: bf16[128,1024], index: 2, kind: input, shape index: {}]   ;;  %s12938_s3 = inlined_call_operand.vmem [shape: f32[1,1024], index: 3, kind: input, shape index: {}]   ;;  %s12939_s4 = inlined_call_operand.vmem [shape: f32[1,512], index: 4, kind: input, shape index: {}]   ;;  %s12940_s5 = inlined_call_operand.vmem [shape: f32[1,512], index: 5, kind: input, shape index: {}]   ;;  %s12941_s6 = inlined_call_operand.hbm [shape: bf16[256,512], index: 6, kind: input, shape index: {}]   ;;  %s12942_s7 = inlined_call_operand.hbm [shape: bf16[128,512], index: 7, kind: input, shape index: {}]   ;;  %s12943_s8 = inlined_call_operand.hbm [shape: bf16[256,512], index: 8, kind: input, shape index: {}]   ;;  %s12944_s9 = inlined_call_operand.hbm [shape: bf16[2304,128], index: 9, kind: input, shape index: {}]   ;;  %s12945_s10 = inlined_call_operand.hbm [shape: bf16[1152,128], index: 10, kind: input, shape index: {}]   ;;  %s12946_s11 = inlined_call_operand.hbm [shape: f32[8,128], index: 11, kind: output, shape index: {}]  }
   0x1   :  { %17 = vsyncpa [#allocation15], 0  ;;  %s10157_s17 = smov [#allocation13]   ;;  %s10055_s21 = scalar_lea.hbm %s12937_s2, 8192 }
   0x2   :  { %s27_s18 = sshll.u32 %s10157_s17, 4  ;;  %p10056_p0 = scmp.ne.s32.totalorder %s12937_s2, %s10055_s21  ;;  %s28_s18 = int_to_ptr.vmem [resolvable:$true] %s27_s18 }
   0x3   :  { %p10059_p1 = scmp.lt.u32.totalorder %s10055_s21, %s12937_s2 }
   0x5   :  { %p10061_p2 = pnand %p10059_p1, %p10056_p0 }
   0x7   :  { %10064 = shalt.err (!%p10061_p2)
}
   0x8   :  { %s10065_s26 = scalar_lea.vmem %s28_s18, 8192  ;;  %p10070_p4 = scmp.lt.s32.totalorder %s28_s18, %s28_s18 }
   0x9   :  { %p10066_p3 = scmp.ne.s32.totalorder %s28_s18, %s10065_s26  ;;  %p10071_p5 = scmp.lt.s32.totalorder %s10065_s26, %s10065_s26 }
   0xb   :  { %p10072_p6 = por %p10071_p5, %p10070_p4 }
   0xd   :  { %p10073_p7 = pnand %p10072_p6, %p10066_p3 }
   0xf   :  { %10076 = shalt.err (!%p10073_p7)
}
  0x10   :  { %s10158_s27 = smov 512   ;;  %s10159_s28 = smov 32  }
  0x11   :  { %33 = dma.hbm_to_vmem [thread:$0]  %s12937_s2, 8192, %s28_s18, [#allocation14], %s10158_s27, %s10158_s27, %s10159_s28  }
  0x12   :  { %10143 = dma.done.wait [#allocation14], 8192  }
  0x13   :  { %10144 = vsyncadd [#allocation14], 4294959104  ;;  %s48_s12 = sld [smem:[#allocation0]]   ;;  %60 = sst [smem:[#allocation18]] %s10158_s27  ;;  %v12947_v0 = vmov 0   ;;  %vm275_vm0 = vcmask 130048  }
  0x14   :  { %320 = vmatprep.mubr.bf16.mxu0 %v12947_v0  ;;  %393 = vmatprep.mubr.bf16.mxu1 %v12947_v0  ;;  %62 = sst [smem:[#allocation18 + $0x1]] %s10158_s27  ;;  %s10161_s13 = smov 4  }
  0x15   :  { %64 = sst [smem:[#allocation18 + $0x2]] %s10161_s13  ;;  %s10162_s14 = smov [#allocation2]  }
  0x16   :  { %s56_s15 = sshll.u32 %s10162_s14, 4  ;;  %s10163_s16 = smov 64   ;;  %s57_s15 = int_to_ptr.vmem [resolvable:$true] %s56_s15 }
  0x17   :  { %66 = sst [smem:[#allocation18 + $0x3]] %s10163_s16  ;;  %s10164_s17 = smov 128  }
  0x18   :  { %74 = sst [smem:[#allocation18 + $0x7]] %s10163_s16  ;;  %s10165_s19 = smov 2  }
  0x19   :  { %76 = sst [smem:[#allocation18 + $0x8]] %s10161_s13  ;;  %s8580_s2 = sshll.u32 %s48_s12, 26 }
  0x1a   :  { %68 = sst [smem:[#allocation18 + $0x4]] %s10164_s17  ;;  %s10263_s18 = sadd.s32 134217728, %s8580_s2 }
  0x1b   :  { %70 = sst [smem:[#allocation18 + $0x5]] %s10165_s19  ;;  %s10166_s20 = smov 256  }
  0x1c   :  { %72 = sst [smem:[#allocation18 + $0x6]] %s10166_s20  ;;  %s10167_s21 = smov [#allocation7]  }
  0x1d   :  { %s10168_s22 = smov [#allocation17]   ;;  %s10169_s25 = smov [#allocation3]  }
  0x1e   :  { %78 = dma.general %s12941_s6, 8192, %s57_s15, %s10167_s21, %s10168_s22, [#allocation18], %s10263_s18, 0  }
  0x1f   :  { %95 = sst [smem:[#allocation20]] %s10158_s27  ;;  %s91_s26 = sshll.u32 %s10169_s25, 4  ;;  %s92_s26 = int_to_ptr.vmem [resolvable:$true] %s91_s26 }
  0x20   :  { %97 = sst [smem:[#allocation20 + $0x1]] %s10158_s27  ;;  %s10170_s6 = smov [#allocation7 + $0x1]  }
  0x21   :  { %99 = sst [smem:[#allocation20 + $0x2]] %s10161_s13  ;;  %s10171_s28 = smov [#allocation19]  }
  0x22   :  { %101 = sst [smem:[#allocation20 + $0x3]] %s10163_s16  ;;  %s10172_s12 = smov [#allocation4]  }
  0x23   :  { %103 = sst [smem:[#allocation20 + $0x4]] %s10164_s17  ;;  %s126_s14 = sshll.u32 %s10172_s12, 4  ;;  %s127_s14 = int_to_ptr.vmem [resolvable:$true] %s126_s14 }
  0x24   :  { %105 = sst [smem:[#allocation20 + $0x5]] %s10165_s19  ;;  %s10174_s15 = smov [#allocation21]  }
  0x25   :  { %107 = sst [smem:[#allocation20 + $0x6]] %s10166_s20 }
  0x26   :  { %109 = sst [smem:[#allocation20 + $0x7]] %s10163_s16 }
  0x27   :  { %111 = sst [smem:[#allocation20 + $0x8]] %s10161_s13 }
  0x28   :  { %113 = dma.general %s12942_s7, 4096, %s92_s26, %s10170_s6, %s10171_s28, [#allocation20], %s10263_s18, 0  }
  0x29   :  { %130 = sst [smem:[#allocation22]] %s10158_s27  ;;  %s10173_s7 = smov [#allocation7 + $0x2]  }
  0x2a   :  { %132 = sst [smem:[#allocation22 + $0x1]] %s10158_s27  ;;  %s10077_s28 = scalar_lea.hbm %s12944_s9, 18432 }
  0x2b   :  { %134 = sst [smem:[#allocation22 + $0x2]] %s10161_s13  ;;  %p10078_p8 = scmp.ne.s32.totalorder %s12944_s9, %s10077_s28 }
  0x2c   :  { %136 = sst [smem:[#allocation22 + $0x3]] %s10163_s16  ;;  %p10081_p9 = scmp.lt.u32.totalorder %s10077_s28, %s12944_s9 }
  0x2d   :  { %138 = sst [smem:[#allocation22 + $0x4]] %s10164_s17 }
  0x2e   :  { %140 = sst [smem:[#allocation22 + $0x5]] %s10165_s19  ;;  %p10083_p10 = pnand %p10081_p9, %p10078_p8 }
  0x2f   :  { %142 = sst [smem:[#allocation22 + $0x6]] %s10166_s20 }
  0x30   :  { %144 = sst [smem:[#allocation22 + $0x7]] %s10163_s16 }
  0x31   :  { %146 = sst [smem:[#allocation22 + $0x8]] %s10161_s13 }
  0x32   :  { %148 = dma.general %s12943_s8, 8192, %s127_s14, %s10173_s7, %s10174_s15, [#allocation22], %s10263_s18, 0  }
  0x33   :  { %v185_v1 = vld [vmem:[%s12936_s1] sm:$0xff]  ;;  %v186_v3 = vld [vmem:[%s12936_s1 + $0x8] sm:$0xff]  ;;  %v187_v11 = vld [vmem:[%s12936_s1 + $0x10] sm:$0xff]  ;;  %s10176_s18 = smov [#allocation6]  }
  0x34   :  { %v189_v2 = vld [vmem:[%s12936_s1 + $0x20] sm:$0xff]  ;;  %v190_v5 = vld [vmem:[%s12936_s1 + $0x28] sm:$0xff]  ;;  %v191_v12 = vld [vmem:[%s12936_s1 + $0x30] sm:$0xff]  ;;  %s169_s25 = sshll.u32 %s10176_s18, 4  ;;  %s170_s25 = int_to_ptr.vmem [resolvable:$true] %s169_s25 }
  0x35   :  { %v8587_v4 = vcombine.high %v185_v1, %v189_v2  ;;  %v8586_v6 = vcombine.low %v185_v1, %v189_v2  ;;  %v173_v7 = vld [vmem:[%s12935_s0] sm:$0xff]  ;;  %v174_v8 = vld [vmem:[%s12935_s0 + $0x8] sm:$0xff]  ;;  %v8589_v9 = vcombine.high %v186_v3, %v190_v5  ;;  %v8588_v10 = vcombine.low %v186_v3, %v190_v5  ;;  %v188_v15 = vld [vmem:[%s12936_s1 + $0x18] sm:$0xff] }
  0x36   :  { %v181_v13 = vpack.c.bf16 %v174_v8, %v173_v7  ;;  %v8591_v14 = vcombine.high %v187_v11, %v191_v12  ;;  %v192_v16 = vld [vmem:[%s12936_s1 + $0x38] sm:$0xff]  ;;  %v8590_v17 = vcombine.low %v187_v11, %v191_v12  ;;  %v644_v19 = vld [vmem:[#allocation13] sm:$0xff]  ;;  %v645_v23 = vld [vmem:[#allocation13 + $0x8] sm:$0xff] }
  0x37   :  { %288 = vmatprep.subr.bf16.mxu0 %v8587_v4  ;;  %361 = vmatprep.subr.bf16.mxu1 %v8589_v9  ;;  %v8593_v18 = vcombine.high %v188_v15, %v192_v16  ;;  %v648_v20 = vld [vmem:[#allocation13 + $0x20] sm:$0xff]  ;;  %v8592_v21 = vcombine.low %v188_v15, %v192_v16  ;;  %v649_v24 = vld [vmem:[#allocation13 + $0x28] sm:$0xff]  ;;  %v175_v26 = vld [vmem:[%s12935_s0 + $0x10] sm:$0xff] }
  0x38   :  { %289 = vmatpush1.bf16.msra.mxu0 %v8586_v6  ;;  %362 = vmatpush1.bf16.msra.mxu1 %v8588_v10  ;;  %v10324_v22 = vcombine.high %v644_v19, %v648_v20  ;;  %v10327_v25 = vcombine.high %v645_v23, %v649_v24  ;;  %v176_v27 = vld [vmem:[%s12935_s0 + $0x18] sm:$0xff]  ;;  %v177_v29 = vld [vmem:[%s12935_s0 + $0x20] sm:$0xff]  ;;  %v178_v30 = vld [vmem:[%s12935_s0 + $0x28] sm:$0xff]  ;;  %v10372_v39 = vcombine.low %v644_v19, %v648_v20 }
  0x39   :  { %434 = vmatprep.subr.bf16.mxu0 %v8591_v14  ;;  %507 = vmatprep.subr.bf16.mxu1 %v8593_v18  ;;  %v182_v28 = vpack.c.bf16 %v176_v27, %v175_v26  ;;  %v10350_v31 = vpack.c.bf16 %v178_v30, %v177_v29  ;;  %v179_v32 = vld [vmem:[%s12935_s0 + $0x30] sm:$0xff]  ;;  %v180_v33 = vld [vmem:[%s12935_s0 + $0x38] sm:$0xff]  ;;  %v652_v35 = vld [vmem:[#allocation13 + $0x40] sm:$0xff]  ;;  %v10374_v40 = vcombine.low %v645_v23, %v649_v24 }
  0x3a   :  { %v10364_v34 = vpack.c.bf16 %v180_v33, %v179_v32  ;;  %v656_v36 = vld [vmem:[#allocation13 + $0x60] sm:$0xff]  ;;  %v653_v37 = vld [vmem:[#allocation13 + $0x48] sm:$0xff]  ;;  %v646_v30 = vld [vmem:[#allocation13 + $0x10] sm:$0xff] }
  0x3b   :  { %8594 = vmatmul.mubr.msk.bf16.vlgmr.msra.gmra.mrb[0].mxu0 %vm275_vm0, %v181_v13  ;;  %8598 = vmatmul.mubr.msk.bf16.vlgmr.msra.gmra.mrb[0].mxu1 %vm275_vm0, %v181_v13  ;;  %v657_v38 = vld [vmem:[#allocation13 + $0x68] sm:$0xff]  ;;  %v10376_v41 = vcombine.high %v652_v35, %v656_v36  ;;  %v660_v43 = vld [vmem:[#allocation13 + $0x80] sm:$0xff]  ;;  %v10383_v47 = vcombine.low %v652_v35, %v656_v36  ;;  %v647_v32 = vld [vmem:[#allocation13 + $0x18] sm:$0xff] }
  0x3c   :  { %435 = vmatpush1.bf16.msra.mxu0 %v8590_v17  ;;  %330 = vmatprep.mubr.bf16.mxu0 %v12947_v0  ;;  %v10378_v42 = vcombine.high %v653_v37, %v657_v38  ;;  %v664_v44 = vld [vmem:[#allocation13 + $0xa0] sm:$0xff]  ;;  %v661_v45 = vld [vmem:[#allocation13 + $0x88] sm:$0xff]  ;;  %v10387_v48 = vcombine.low %v653_v37, %v657_v38  ;;  %v651_v33 = vld [vmem:[#allocation13 + $0x38] sm:$0xff] }
  0x3d   :  { %403 = vmatprep.mubr.bf16.mxu1 %v12947_v0  ;;  %508 = vmatpush1.bf16.msra.mxu1 %v8592_v21  ;;  %v665_v46 = vld [vmem:[#allocation13 + $0xa8] sm:$0xff]  ;;  %v10389_v49 = vcombine.high %v660_v43, %v664_v44  ;;  %v668_v51 = vld [vmem:[#allocation13 + $0xc0] sm:$0xff]  ;;  %v10397_v55 = vcombine.low %v660_v43, %v664_v44  ;;  %v10481_v38 = vcombine.high %v647_v32, %v651_v33  ;;  %v654_v43 = vld [vmem:[#allocation13 + $0x50] sm:$0xff] }
  0x3e   :  { %1028 = vmatprep.subr.bf16.mxu0 %v10324_v22  ;;  %1069 = vmatprep.subr.bf16.mxu1 %v10327_v25  ;;  %v10393_v50 = vcombine.high %v661_v45, %v665_v46  ;;  %v672_v52 = vld [vmem:[#allocation13 + $0xe0] sm:$0xff]  ;;  %v669_v53 = vld [vmem:[#allocation13 + $0xc8] sm:$0xff]  ;;  %v10401_v56 = vcombine.low %v661_v45, %v665_v46  ;;  %v655_v44 = vld [vmem:[#allocation13 + $0x58] sm:$0xff] }
  0x3f   :  { %v673_v54 = vld [vmem:[#allocation13 + $0xe8] sm:$0xff]  ;;  %v10403_v57 = vcombine.high %v668_v51, %v672_v52  ;;  %v676_v59 = vld [vmem:[#allocation13 + $0x100] sm:$0xff]  ;;  %v10411_v63 = vcombine.low %v668_v51, %v672_v52  ;;  %v659_v45 = vld [vmem:[#allocation13 + $0x78] sm:$0xff]  ;;  %v10489_v51 = vcombine.low %v647_v32, %v651_v33 }
  0x40   :  { %v10406_v58 = vcombine.high %v669_v53, %v673_v54  ;;  %v680_v60 = vld [vmem:[#allocation13 + $0x120] sm:$0xff]  ;;  %v677_v61 = vld [vmem:[#allocation13 + $0x108] sm:$0xff]  ;;  %v10415_v1 = vcombine.low %v669_v53, %v673_v54  ;;  %v10494_v53 = vcombine.high %v655_v44, %v659_v45  ;;  %v662_v54 = vld [vmem:[#allocation13 + $0x90] sm:$0xff] }
  0x41   :  { %v681_v62 = vld [vmem:[#allocation13 + $0x128] sm:$0xff]  ;;  %v10417_v2 = vcombine.high %v676_v59, %v680_v60  ;;  %v684_v4 = vld [vmem:[#allocation13 + $0x140] sm:$0xff]  ;;  %v10425_v8 = vcombine.low %v676_v59, %v680_v60  ;;  %v666_v59 = vld [vmem:[#allocation13 + $0xb0] sm:$0xff] }
  0x42   :  { %v10421_v3 = vcombine.high %v677_v61, %v681_v62  ;;  %v688_v5 = vld [vmem:[#allocation13 + $0x160] sm:$0xff]  ;;  %v685_v6 = vld [vmem:[#allocation13 + $0x148] sm:$0xff]  ;;  %v10429_v9 = vcombine.low %v677_v61, %v681_v62  ;;  %v663_v60 = vld [vmem:[#allocation13 + $0x98] sm:$0xff] }
  0x43   :  { %8595 = vmatmul.mubr.msk.bf16.gmra.mrb[4].mxu0 %vm275_vm0, %v182_v28  ;;  %8599 = vmatmul.mubr.msk.bf16.gmra.mrb[4].mxu1 %vm275_vm0, %v182_v28  ;;  %v689_v7 = vld [vmem:[#allocation13 + $0x168] sm:$0xff]  ;;  %v10431_v10 = vcombine.high %v684_v4, %v688_v5  ;;  %v692_v12 = vld [vmem:[#allocation13 + $0x180] sm:$0xff]  ;;  %v10441_v16 = vcombine.low %v684_v4, %v688_v5  ;;  %v667_v61 = vld [vmem:[#allocation13 + $0xb8] sm:$0xff]  ;;  %v10503_v4 = vcombine.low %v655_v44, %v659_v45 }
  0x44   :  { %340 = vmatprep.mubr.bf16.mxu0 %v12947_v0  ;;  %413 = vmatprep.mubr.bf16.mxu1 %v12947_v0  ;;  %v10434_v11 = vcombine.high %v685_v6, %v689_v7  ;;  %v693_v14 = vld [vmem:[#allocation13 + $0x188] sm:$0xff]  ;;  %v10445_v17 = vcombine.low %v685_v6, %v689_v7  ;;  %v700_v20 = vld [vmem:[#allocation13 + $0x1c0] sm:$0xff]  ;;  %v10505_v5 = vcombine.high %v662_v54, %v666_v59  ;;  %v670_v7 = vld [vmem:[#allocation13 + $0xd0] sm:$0xff] }
  0x45   :  { %v697_v15 = vld [vmem:[#allocation13 + $0x1a8] sm:$0xff]  ;;  %v704_v21 = vld [vmem:[#allocation13 + $0x1e0] sm:$0xff]  ;;  %v10508_v6 = vcombine.high %v663_v60, %v667_v61  ;;  %v683_v32 = vld [vmem:[#allocation13 + $0x138] sm:$0xff] }
  0x46   :  { %v10451_v19 = vcombine.high %v693_v14, %v697_v15  ;;  %v701_v23 = vld [vmem:[#allocation13 + $0x1c8] sm:$0xff]  ;;  %v10459_v27 = vcombine.low %v693_v14, %v697_v15  ;;  %v10471_v35 = vcombine.low %v700_v20, %v704_v21  ;;  %v675_v14 = vld [vmem:[#allocation13 + $0xf8] sm:$0xff]  ;;  %v10513_v15 = vcombine.low %v662_v54, %v666_v59  ;;  %v686_v45 = vld [vmem:[#allocation13 + $0x150] sm:$0xff] }
  0x47   :  { %v705_v24 = vld [vmem:[#allocation13 + $0x1e8] sm:$0xff]  ;;  %v690_v54 = vld [vmem:[#allocation13 + $0x170] sm:$0xff]  ;;  %v687_v59 = vld [vmem:[#allocation13 + $0x158] sm:$0xff] }
  0x48   :  { %v10464_v29 = vcombine.high %v701_v23, %v705_v24  ;;  %v10475_v36 = vcombine.low %v701_v23, %v705_v24  ;;  %v678_v24 = vld [vmem:[#allocation13 + $0x110] sm:$0xff] }
  0x4b   :  { %8596 = vmatmul.mubr.msk.bf16.gmra.mrb[8].mxu0 %vm275_vm0, %v10350_v31  ;;  %8600 = vmatmul.mubr.msk.bf16.gmra.mrb[8].mxu1 %vm275_vm0, %v10350_v31 }
  0x4c   :  { %350 = vmatprep.mubr.bf16.mxu0 %v12947_v0  ;;  %423 = vmatprep.mubr.bf16.mxu1 %v12947_v0 }
  0x53   :  { %8597 = vmatmul.mubr.msk.bf16.gmra.mrb[12].mxu0 %vm275_vm0, %v10364_v34  ;;  %8601 = vmatmul.mubr.msk.bf16.gmra.mrb[12].mxu1 %vm275_vm0, %v10364_v34 }
  0x54   :  { %466 = vmatprep.mubr.bf16.mxu0 %v12947_v0  ;;  %539 = vmatprep.mubr.bf16.mxu1 %v12947_v0 }
  0x5b   :  { %8602 = vmatmul.mubr.msk.bf16.vlgmr.msra.gmra.mrb[16].mxu0 %vm275_vm0, %v181_v13  ;;  %8606 = vmatmul.mubr.msk.bf16.vlgmr.msra.gmra.mrb[16].mxu1 %vm275_vm0, %v181_v13  ;;  %v696_v13 = vld [vmem:[#allocation13 + $0x1a0] sm:$0xff] }
  0x5c   :  { %1029 = vmatpush1.bf16.msra.mxu0 %v10372_v39  ;;  %1070 = vmatpush1.bf16.msra.mxu1 %v10374_v40  ;;  %v10447_v18 = vcombine.high %v692_v12, %v696_v13  ;;  %v10455_v26 = vcombine.low %v692_v12, %v696_v13  ;;  %v674_v12 = vld [vmem:[#allocation13 + $0xf0] sm:$0xff]  ;;  %v671_v13 = vld [vmem:[#allocation13 + $0xd8] sm:$0xff] }
  0x5d   :  { %1030 = vmatprep.subr.bf16.mxu0 %v10376_v41  ;;  %1071 = vmatprep.subr.bf16.mxu1 %v10378_v42  ;;  %v10522_v23 = vcombine.high %v671_v13, %v675_v14  ;;  %v10525_v33 = vcombine.low %v670_v7, %v674_v12 }
  0x5e   :  { %476 = vmatprep.mubr.bf16.mxu0 %v12947_v0  ;;  %549 = vmatprep.mubr.bf16.mxu1 %v12947_v0 }
  0x5f   :  { %13015 = vst [vmem:[#allocation37_spill] sm:$0xff] %v10522_v23  ;;  %13016 = vst [vmem:[#allocation38_spill] sm:$0xff] %v10525_v33 }
  0x60   :  { %1031 = vmatpush1.bf16.msra.mxu0 %v10383_v47  ;;  %1072 = vmatpush1.bf16.msra.mxu1 %v10387_v48 }
  0x61   :  { %1032 = vmatprep.subr.bf16.mxu0 %v10389_v49  ;;  %1073 = vmatprep.subr.bf16.mxu1 %v10393_v50 }
  0x63   :  { %8603 = vmatmul.mubr.msk.bf16.gmra.mrb[20].mxu0 %vm275_vm0, %v182_v28  ;;  %8607 = vmatmul.mubr.msk.bf16.gmra.mrb[20].mxu1 %vm275_vm0, %v182_v28  ;;  %v10461_v28 = vcombine.high %v700_v20, %v704_v21  ;;  %v10517_v20 = vcombine.low %v663_v60, %v667_v61  ;;  %v10519_v21 = vcombine.high %v670_v7, %v674_v12  ;;  %v691_v60 = vld [vmem:[#allocation13 + $0x178] sm:$0xff] }
  0x64   :  { %1033 = vmatpush1.bf16.msra.mxu0 %v10397_v55  ;;  %1074 = vmatpush1.bf16.msra.mxu1 %v10401_v56  ;;  %v10543_v12 = vcombine.high %v686_v45, %v690_v54 }
  0x65   :  { %1034 = vmatprep.subr.bf16.mxu0 %v10403_v57  ;;  %1075 = vmatprep.subr.bf16.mxu1 %v10406_v58  ;;  %13014 = vst [vmem:[#allocation36_spill] sm:$0xff] %v10519_v21 }
  0x66   :  { %486 = vmatprep.mubr.bf16.mxu0 %v12947_v0  ;;  %559 = vmatprep.mubr.bf16.mxu1 %v12947_v0 }
  0x68   :  { %1035 = vmatpush1.bf16.msra.mxu0 %v10411_v63  ;;  %1076 = vmatpush1.bf16.msra.mxu1 %v10415_v1 }
  0x69   :  { %1036 = vmatprep.subr.bf16.mxu0 %v10417_v2  ;;  %1077 = vmatprep.subr.bf16.mxu1 %v10421_v3 }
  0x6b   :  { %8604 = vmatmul.mubr.msk.bf16.gmra.mrb[24].mxu0 %vm275_vm0, %v10350_v31  ;;  %8608 = vmatmul.mubr.msk.bf16.gmra.mrb[24].mxu1 %vm275_vm0, %v10350_v31  ;;  %v650_v31 = vld [vmem:[#allocation13 + $0x30] sm:$0xff] }
  0x6c   :  { %1037 = vmatpush1.bf16.msra.mxu0 %v10425_v8  ;;  %1078 = vmatpush1.bf16.msra.mxu1 %v10429_v9  ;;  %v10477_v37 = vcombine.high %v646_v30, %v650_v31  ;;  %v10485_v46 = vcombine.low %v646_v30, %v650_v31  ;;  %v682_v30 = vld [vmem:[#allocation13 + $0x130] sm:$0xff]  ;;  %v679_v31 = vld [vmem:[#allocation13 + $0x118] sm:$0xff] }
  0x6d   :  { %1038 = vmatprep.subr.bf16.mxu0 %v10431_v10  ;;  %1079 = vmatprep.subr.bf16.mxu1 %v10434_v11  ;;  %v10534_v44 = vcombine.high %v679_v31, %v683_v32  ;;  %v10537_v61 = vcombine.low %v678_v24, %v682_v30  ;;  %v10541_v7 = vcombine.low %v679_v31, %v683_v32 }
  0x6e   :  { %496 = vmatprep.mubr.bf16.mxu0 %v12947_v0  ;;  %569 = vmatprep.mubr.bf16.mxu1 %v12947_v0 }
  0x6f   :  { %13019 = vst [vmem:[#allocation41_spill] sm:$0xff] %v10534_v44 }
  0x70   :  { %1039 = vmatpush1.bf16.msra.mxu0 %v10441_v16  ;;  %1080 = vmatpush1.bf16.msra.mxu1 %v10445_v17 }
  0x71   :  { %1040 = vmatprep.subr.bf16.mxu0 %v10447_v18  ;;  %1081 = vmatprep.subr.bf16.mxu1 %v10451_v19 }
  0x73   :  { %8605 = vmatmul.mubr.msk.bf16.gmra.mrb[28].mxu0 %vm275_vm0, %v10364_v34  ;;  %8609 = vmatmul.mubr.msk.bf16.gmra.mrb[28].mxu1 %vm275_vm0, %v10364_v34  ;;  %v658_v34 = vld [vmem:[#allocation13 + $0x70] sm:$0xff] }
  0x74   :  { %1041 = vmatpush1.bf16.msra.mxu0 %v10455_v26  ;;  %1082 = vmatpush1.bf16.msra.mxu1 %v10459_v27  ;;  %v10491_v52 = vcombine.high %v654_v43, %v658_v34  ;;  %v10499_v62 = vcombine.low %v654_v43, %v658_v34  ;;  %v10529_v43 = vcombine.low %v671_v13, %v675_v14  ;;  %v694_v14 = vld [vmem:[#allocation13 + $0x190] sm:$0xff] }
  0x75   :  { %1042 = vmatprep.subr.bf16.mxu0 %v10461_v28  ;;  %1083 = vmatprep.subr.bf16.mxu1 %v10464_v29  ;;  %v10531_v34 = vcombine.high %v678_v24, %v682_v30  ;;  %v10546_v13 = vcombine.high %v687_v59, %v691_v60  ;;  %v10549_v24 = vcombine.low %v686_v45, %v690_v54 }
  0x76   :  { %1060 = vmatprep.mubr.bf16.mxu0 %v12947_v0  ;;  %1101 = vmatprep.mubr.bf16.mxu1 %v12947_v0  ;;  %13017 = vst [vmem:[#allocation39_spill] sm:$0xff] %v10529_v43  ;;  %v10553_v30 = vcombine.low %v687_v59, %v691_v60 }
  0x77   :  { %13018 = vst [vmem:[#allocation40_spill] sm:$0xff] %v10531_v34  ;;  %13020 = vst [vmem:[#allocation42_spill] sm:$0xff] %v10546_v13 }
  0x78   :  { %1043 = vmatpush1.bf16.msra.mxu0 %v10471_v35  ;;  %1084 = vmatpush1.bf16.msra.mxu1 %v10475_v36 }
  0x79   :  { %1110 = vmatprep.subr.bf16.mxu0 %v10477_v37  ;;  %1151 = vmatprep.subr.bf16.mxu1 %v10481_v38 }
  0x7b   :  { %1061 = vmatmul.mubr.bf16.vlgmr.msra.gmra.mrb[32].mxu0 %v12947_v0  ;;  %1102 = vmatmul.mubr.bf16.vlgmr.msra.gmra.mrb[32].mxu1 %v12947_v0 }
  0x7c   :  { %1111 = vmatpush1.bf16.msra.mxu0 %v10485_v46  ;;  %1152 = vmatpush1.bf16.msra.mxu1 %v10489_v51 }
  0x7d   :  { %1112 = vmatprep.subr.bf16.mxu0 %v10491_v52  ;;  %1153 = vmatprep.subr.bf16.mxu1 %v10494_v53 }
  0x7e   :  { %1142 = vmatprep.mubr.bf16.mxu0 %v12947_v0  ;;  %1183 = vmatprep.mubr.bf16.mxu1 %v12947_v0  ;;  %v698_v0 = vld [vmem:[#allocation13 + $0x1b0] sm:$0xff] }
  0x7f   :  { %v10555_v31 = vcombine.high %v694_v14, %v698_v0  ;;  %v10561_v45 = vcombine.low %v694_v14, %v698_v0 }
  0x80   :  { %1113 = vmatpush1.bf16.msra.mxu0 %v10499_v62  ;;  %1154 = vmatpush1.bf16.msra.mxu1 %v10503_v4 }
  0x81   :  { %1114 = vmatprep.subr.bf16.mxu0 %v10505_v5  ;;  %1155 = vmatprep.subr.bf16.mxu1 %v10508_v6 }
  0x84   :  { %1115 = vmatpush1.bf16.msra.mxu0 %v10513_v15  ;;  %1156 = vmatpush1.bf16.msra.mxu1 %v10517_v20 }
  0x85   :  { %1116 = vmatprep.subr.bf16.mxu0 %v10519_v21  ;;  %1157 = vmatprep.subr.bf16.mxu1 %v10522_v23  ;;  %v695_v23 = vld [vmem:[#allocation13 + $0x198] sm:$0xff] }
  0x86   :  { %v699_v21 = vld [vmem:[#allocation13 + $0x1b8] sm:$0xff] }
  0x87   :  { %v10558_v32 = vcombine.high %v695_v23, %v699_v21  ;;  %v10565_v54 = vcombine.low %v695_v23, %v699_v21  ;;  %v13021_v21 = vmov 0  }
  0x88   :  { %1117 = vmatpush1.bf16.msra.mxu0 %v10525_v33  ;;  %1158 = vmatpush1.bf16.msra.mxu1 %v10529_v43  ;;  %v703_v43 = vld [vmem:[#allocation13 + $0x1d8] sm:$0xff] }
  0x89   :  { %1118 = vmatprep.subr.bf16.mxu0 %v10531_v34  ;;  %1159 = vmatprep.subr.bf16.mxu1 %v10534_v44  ;;  %v702_v44 = vld [vmem:[#allocation13 + $0x1d0] sm:$0xff]  ;;  %v707_v33 = vld [vmem:[#allocation13 + $0x1f8] sm:$0xff] }
  0x8a   :  { %v706_v34 = vld [vmem:[#allocation13 + $0x1f0] sm:$0xff]  ;;  %v10570_v60 = vcombine.high %v703_v43, %v707_v33  ;;  %v10577_v0 = vcombine.low %v703_v43, %v707_v33 }
  0x8b   :  { %v10567_v59 = vcombine.high %v702_v44, %v706_v34 }
  0x8c   :  { %1119 = vmatpush1.bf16.msra.mxu0 %v10537_v61  ;;  %1160 = vmatpush1.bf16.msra.mxu1 %v10541_v7 }
  0x8d   :  { %1120 = vmatprep.subr.bf16.mxu0 %v10543_v12  ;;  %1161 = vmatprep.subr.bf16.mxu1 %v10546_v13  ;;  %v10573_v13 = vcombine.low %v702_v44, %v706_v34 }
  0x90   :  { %1121 = vmatpush1.bf16.msra.mxu0 %v10549_v24  ;;  %1162 = vmatpush1.bf16.msra.mxu1 %v10553_v30 }
  0x91   :  { %1122 = vmatprep.subr.bf16.mxu0 %v10555_v31  ;;  %1163 = vmatprep.subr.bf16.mxu1 %v10558_v32 }
  0x94   :  { %1123 = vmatpush1.bf16.msra.mxu0 %v10561_v45  ;;  %1164 = vmatpush1.bf16.msra.mxu1 %v10565_v54 }
  0x95   :  { %1124 = vmatprep.subr.bf16.mxu0 %v10567_v59  ;;  %1165 = vmatprep.subr.bf16.mxu1 %v10570_v60 }
  0x98   :  { %1125 = vmatpush1.bf16.msra.mxu0 %v10573_v13  ;;  %1166 = vmatpush1.bf16.msra.mxu1 %v10577_v0 }
  0x99   :  { %1643 = vmatprep.subr.bf16.mxu0 %v10324_v22  ;;  %1684 = vmatprep.subr.bf16.mxu1 %v10327_v25  ;;  %v195_v22 = vlaneseq }
  0x9b   :  { %1143 = vmatmul.mubr.bf16.vlgmr.msra.gmra.mrb[36].mxu0 %v13021_v21  ;;  %1184 = vmatmul.mubr.bf16.vlgmr.msra.gmra.mrb[36].mxu1 %v13021_v21  ;;  %v10620_v25 = vshrl.u32 %v195_v22, 7 }
  0x9c   :  { %1644 = vmatpush1.bf16.msra.mxu0 %v10372_v39  ;;  %1685 = vmatpush1.bf16.msra.mxu1 %v10374_v40 }
  0x9d   :  { %1645 = vmatprep.subr.bf16.mxu0 %v10376_v41  ;;  %1686 = vmatprep.subr.bf16.mxu1 %v10378_v42  ;;  %v10623_v39 = vsub.s32 2, %v10620_v25  ;;  %v10626_v40 = vsub.s32 0, %v10620_v25  ;;  %v10629_v41 = vsub.s32 3, %v10620_v25  ;;  %v10634_v42 = vld [vmem:[%s12938_s3] sm:$0xff]  ;;  %s10175_s3 = smov [#allocation5]  }
  0x9e   :  { %1675 = vmatprep.mubr.bf16.mxu0 %v13021_v21  ;;  %1716 = vmatprep.mubr.bf16.mxu1 %v13021_v21  ;;  %s157_s8 = sshll.u32 %s10175_s3, 4  ;;  %s158_s8 = int_to_ptr.vmem [resolvable:$true] %s157_s8 }
  0x9f   :  { %13022 = vst [vmem:[#allocation43_spill] sm:$0xff] %v10623_v39  ;;  %13023 = vst [vmem:[#allocation44_spill] sm:$0xff] %v10626_v40 }
  0xa0   :  { %1646 = vmatpush1.bf16.msra.mxu0 %v10383_v47  ;;  %1687 = vmatpush1.bf16.msra.mxu1 %v10387_v48  ;;  %13024 = vst [vmem:[#allocation45_spill] sm:$0xff] %v10629_v41  ;;  %v10637_v47 = vsub.s32 1, %v10620_v25 }
  0xa1   :  { %1647 = vmatprep.subr.bf16.mxu0 %v10389_v49  ;;  %1688 = vmatprep.subr.bf16.mxu1 %v10393_v50  ;;  %v10643_v49 = vrot.slane %v10634_v42, %v10623_v39  ;;  %v10647_v50 = vrot.slane %v10634_v42, %v10626_v40  ;;  %v213_v40 = vsub.s32 4, %v10620_v25  ;;  %v217_v39 = vsub.s32 5, %v10620_v25 }
  0xa2   :  { %13025 = vst [vmem:[#allocation46_spill] sm:$0xff] %v10637_v47 }
  0xa4   :  { %1648 = vmatpush1.bf16.msra.mxu0 %v10397_v55  ;;  %1689 = vmatpush1.bf16.msra.mxu1 %v10401_v56 }
  0xa5   :  { %1649 = vmatprep.subr.bf16.mxu0 %v10403_v57  ;;  %1690 = vmatprep.subr.bf16.mxu1 %v10406_v58  ;;  %v10655_v57 = vrot.slane %v10634_v42, %v10629_v41  ;;  %v10659_v58 = vrot.slane %v10634_v42, %v10637_v47 }
  0xa8   :  { %1650 = vmatpush1.bf16.msra.mxu0 %v10411_v63  ;;  %1691 = vmatpush1.bf16.msra.mxu1 %v10415_v1 }
  0xa9   :  { %1651 = vmatprep.subr.bf16.mxu0 %v10417_v2  ;;  %1692 = vmatprep.subr.bf16.mxu1 %v10421_v3 }
  0xac   :  { %1652 = vmatpush1.bf16.msra.mxu0 %v10425_v8  ;;  %1693 = vmatpush1.bf16.msra.mxu1 %v10429_v9 }
  0xad   :  { %1653 = vmatprep.subr.bf16.mxu0 %v10431_v10  ;;  %1694 = vmatprep.subr.bf16.mxu1 %v10434_v11 }
  0xb0   :  { %1654 = vmatpush1.bf16.msra.mxu0 %v10441_v16  ;;  %1695 = vmatpush1.bf16.msra.mxu1 %v10445_v17 }
  0xb1   :  { %1655 = vmatprep.subr.bf16.mxu0 %v10447_v18  ;;  %1696 = vmatprep.subr.bf16.mxu1 %v10451_v19 }
  0xb4   :  { %1656 = vmatpush1.bf16.msra.mxu0 %v10455_v26  ;;  %1697 = vmatpush1.bf16.msra.mxu1 %v10459_v27 }
  0xb5   :  { %1657 = vmatprep.subr.bf16.mxu0 %v10461_v28  ;;  %1698 = vmatprep.subr.bf16.mxu1 %v10464_v29 }
  0xb8   :  { %1658 = vmatpush1.bf16.msra.mxu0 %v10471_v35  ;;  %1699 = vmatpush1.bf16.msra.mxu1 %v10475_v36 }
  0xb9   :  { %1725 = vmatprep.subr.bf16.mxu0 %v10477_v37  ;;  %1766 = vmatprep.subr.bf16.mxu1 %v10481_v38 }
 0x10e   :  { %v10639_v48 = vpop.f32.mrb[0].mxu0  ;;  %v10651_v56 = vpop.f32.mrb[0].mxu1 }
 0x10f   :  { %v10649_v55 = vpop.f32.mrb[1].mxu0  ;;  %v10661_v1 = vpop.f32.mrb[1].mxu1 }
 0x110   :  { %v326_v63 = vpop.f32.mrb[2].mxu0  ;;  %v399_v8 = vpop.f32.mrb[2].mxu1 }
 0x111   :  { %v10664_v2 = vadd.f32 %v326_v63, %v10647_v50  ;;  %v328_v3 = vpop.f32.mrb[3].mxu0  ;;  %v10670_v10 = vadd.f32 %v399_v8, %v10643_v49  ;;  %v401_v11 = vpop.f32.mrb[3].mxu1 }
 0x112   :  { %v10667_v9 = vadd.f32 %v328_v3, %v10659_v58  ;;  %v10673_v16 = vadd.f32 %v401_v11, %v10655_v57 }
 0x116   :  { %v332_v17 = vpop.f32.mrb[4].mxu0  ;;  %v405_v26 = vpop.f32.mrb[4].mxu1 }
 0x117   :  { %v10676_v18 = vadd.f32 %v332_v17, %v10647_v50  ;;  %v334_v19 = vpop.f32.mrb[5].mxu0  ;;  %v10682_v29 = vadd.f32 %v405_v26, %v10643_v49  ;;  %v407_v35 = vpop.f32.mrb[5].mxu1 }
 0x118   :  { %v10679_v27 = vadd.f32 %v334_v19, %v10659_v58  ;;  %v336_v28 = vpop.f32.mrb[6].mxu0  ;;  %v10688_v38 = vadd.f32 %v407_v35, %v10655_v57  ;;  %v409_v23 = vpop.f32.mrb[6].mxu1 }
 0x119   :  { %13026 = vst [vmem:[#allocation47_spill] sm:$0xff] %v10676_v18  ;;  %13028 = vst [vmem:[#allocation49_spill] sm:$0xff] %v10682_v29  ;;  %v10685_v36 = vadd.f32 %v336_v28, %v10647_v50  ;;  %v338_v37 = vpop.f32.mrb[7].mxu0  ;;  %v10694_v43 = vadd.f32 %v409_v23, %v10643_v49  ;;  %v411_v34 = vpop.f32.mrb[7].mxu1 }
 0x11a   :  { %13027 = vst [vmem:[#allocation48_spill] sm:$0xff] %v10679_v27  ;;  %13030 = vst [vmem:[#allocation51_spill] sm:$0xff] %v10688_v38  ;;  %v10691_v33 = vadd.f32 %v338_v37, %v10659_v58  ;;  %v10697_v44 = vadd.f32 %v411_v34, %v10655_v57 }
 0x11b   :  { %13029 = vst [vmem:[#allocation50_spill] sm:$0xff] %v10685_v36  ;;  %13032 = vst [vmem:[#allocation53_spill] sm:$0xff] %v10694_v43 }
 0x11c   :  { %13031 = vst [vmem:[#allocation52_spill] sm:$0xff] %v10691_v33  ;;  %13033 = vst [vmem:[#allocation54_spill] sm:$0xff] %v10697_v44  ;;  %v325_v44 = vadd.f32 %v10649_v55, %v10659_v58 }
 0x11e   :  { %v342_v14 = vpop.f32.mrb[8].mxu0  ;;  %v415_v3 = vpop.f32.mrb[8].mxu1 }
 0x11f   :  { %v10700_v22 = vadd.f32 %v342_v14, %v10647_v50  ;;  %v344_v63 = vpop.f32.mrb[9].mxu0  ;;  %v10706_v17 = vadd.f32 %v415_v3, %v10643_v49  ;;  %v417_v19 = vpop.f32.mrb[9].mxu1 }
 0x120   :  { %v10703_v8 = vadd.f32 %v344_v63, %v10659_v58  ;;  %v346_v11 = vpop.f32.mrb[10].mxu0  ;;  %v10712_v35 = vadd.f32 %v417_v19, %v10655_v57  ;;  %v419_v37 = vpop.f32.mrb[10].mxu1 }
 0x121   :  { %13034 = vst [vmem:[#allocation55_spill] sm:$0xff] %v10700_v22  ;;  %13036 = vst [vmem:[#allocation57_spill] sm:$0xff] %v10706_v17  ;;  %v10709_v26 = vadd.f32 %v346_v11, %v10647_v50  ;;  %v348_v28 = vpop.f32.mrb[11].mxu0  ;;  %v10718_v34 = vadd.f32 %v419_v37, %v10643_v49  ;;  %v421_v14 = vpop.f32.mrb[11].mxu1 }
 0x122   :  { %13035 = vst [vmem:[#allocation56_spill] sm:$0xff] %v10703_v8  ;;  %13038 = vst [vmem:[#allocation59_spill] sm:$0xff] %v10712_v35  ;;  %v10715_v23 = vadd.f32 %v348_v28, %v10659_v58  ;;  %v10721_v63 = vadd.f32 %v421_v14, %v10655_v57  ;;  %v221_v14 = vsub.s32 6, %v10620_v25 }
 0x123   :  { %13037 = vst [vmem:[#allocation58_spill] sm:$0xff] %v10709_v26  ;;  %13040 = vst [vmem:[#allocation61_spill] sm:$0xff] %v10718_v34 }
 0x124   :  { %13039 = vst [vmem:[#allocation60_spill] sm:$0xff] %v10715_v23  ;;  %13041 = vst [vmem:[#allocation62_spill] sm:$0xff] %v10721_v63 }
 0x126   :  { %v352_v3 = vpop.f32.mrb[12].mxu0  ;;  %v425_v19 = vpop.f32.mrb[12].mxu1 }
 0x127   :  { %v10724_v47 = vadd.f32 %v352_v3, %v10647_v50  ;;  %v354_v11 = vpop.f32.mrb[13].mxu0  ;;  %v10732_v37 = vadd.f32 %v425_v19, %v10643_v49  ;;  %v427_v23 = vpop.f32.mrb[13].mxu1 }
 0x128   :  { %v10728_v41 = vadd.f32 %v354_v11, %v10659_v58  ;;  %v356_v28 = vpop.f32.mrb[14].mxu0  ;;  %v429_v34 = vpop.f32.mrb[14].mxu1  ;;  %v225_v11 = vsub.s32 7, %v10620_v25 }
 0x129   :  { %13042 = vst [vmem:[#allocation63_spill] sm:$0xff] %v10724_v47  ;;  %13044 = vst [vmem:[#allocation65_spill] sm:$0xff] %v10732_v37  ;;  %v10736_v63 = vadd.f32 %v356_v28, %v10647_v50  ;;  %v358_v3 = vpop.f32.mrb[15].mxu0  ;;  %v10739_v47 = vadd.f32 %v427_v23, %v10655_v57  ;;  %v10746_v26 = vadd.f32 %v429_v34, %v10643_v49  ;;  %v431_v19 = vpop.f32.mrb[15].mxu1 }
 0x12a   :  { %13043 = vst [vmem:[#allocation64_spill] sm:$0xff] %v10728_v41  ;;  %v10743_v41 = vadd.f32 %v358_v3, %v10659_v58  ;;  %v10749_v37 = vrot.slane %v10634_v42, %v213_v40  ;;  %v10752_v28 = vadd.f32 %v431_v19, %v10655_v57  ;;  %v10758_v23 = vrot.slane %v10634_v42, %v221_v14 }
 0x12b   :  { %13045 = vst [vmem:[#allocation66_spill] sm:$0xff] %v10736_v63  ;;  %13046 = vst [vmem:[#allocation67_spill] sm:$0xff] %v10739_v47  ;;  %v10755_v63 = vrot.slane %v10634_v42, %v217_v39  ;;  %v10761_v25 = vrot.slane %v10634_v42, %v225_v11 }
 0x12c   :  { %13047 = vst [vmem:[#allocation68_spill] sm:$0xff] %v10743_v41  ;;  %13048 = vst [vmem:[#allocation69_spill] sm:$0xff] %v10746_v26 }
 0x12d   :  { %13049 = vst [vmem:[#allocation70_spill] sm:$0xff] %v10752_v28 }
 0x12e   :  { %v468_v3 = vpop.f32.mrb[16].mxu0  ;;  %v541_v26 = vpop.f32.mrb[16].mxu1 }
 0x12f   :  { %v10764_v34 = vadd.f32 %v468_v3, %v10749_v37  ;;  %v470_v41 = vpop.f32.mrb[17].mxu0  ;;  %v10770_v28 = vadd.f32 %v541_v26, %v10758_v23  ;;  %v543_v39 = vpop.f32.mrb[17].mxu1 }
 0x130   :  { %v10767_v40 = vadd.f32 %v470_v41, %v10755_v63  ;;  %v472_v19 = vpop.f32.mrb[18].mxu0  ;;  %v10776_v42 = vadd.f32 %v543_v39, %v10761_v25  ;;  %v545_v11 = vpop.f32.mrb[18].mxu1 }
 0x131   :  { %13050 = vst [vmem:[#allocation71_spill] sm:$0xff] %v10764_v34  ;;  %13052 = vst [vmem:[#allocation73_spill] sm:$0xff] %v10770_v28  ;;  %v10773_v14 = vadd.f32 %v472_v19, %v10749_v37  ;;  %v474_v47 = vpop.f32.mrb[19].mxu0  ;;  %v10782_v34 = vadd.f32 %v545_v11, %v10758_v23  ;;  %v547_v41 = vpop.f32.mrb[19].mxu1 }
 0x132   :  { %13051 = vst [vmem:[#allocation72_spill] sm:$0xff] %v10767_v40  ;;  %13054 = vst [vmem:[#allocation75_spill] sm:$0xff] %v10776_v42  ;;  %v10779_v3 = vadd.f32 %v474_v47, %v10755_v63  ;;  %v10785_v40 = vadd.f32 %v547_v41, %v10761_v25 }
 0x133   :  { %13053 = vst [vmem:[#allocation74_spill] sm:$0xff] %v10773_v14  ;;  %13056 = vst [vmem:[#allocation77_spill] sm:$0xff] %v10782_v34 }
 0x134   :  { %13055 = vst [vmem:[#allocation76_spill] sm:$0xff] %v10779_v3  ;;  %13057 = vst [vmem:[#allocation78_spill] sm:$0xff] %v10785_v40 }
 0x136   :  { %v478_v26 = vpop.f32.mrb[20].mxu0  ;;  %v551_v14 = vpop.f32.mrb[20].mxu1 }
 0x137   :  { %v10788_v28 = vadd.f32 %v478_v26, %v10749_v37  ;;  %v480_v19 = vpop.f32.mrb[21].mxu0  ;;  %v10794_v47 = vadd.f32 %v551_v14, %v10758_v23  ;;  %v553_v3 = vpop.f32.mrb[21].mxu1 }
 0x138   :  { %v10791_v39 = vadd.f32 %v480_v19, %v10755_v63  ;;  %v482_v42 = vpop.f32.mrb[22].mxu0  ;;  %v10800_v41 = vadd.f32 %v553_v3, %v10761_v25  ;;  %v555_v40 = vpop.f32.mrb[22].mxu1 }
 0x139   :  { %13058 = vst [vmem:[#allocation79_spill] sm:$0xff] %v10788_v28  ;;  %13060 = vst [vmem:[#allocation81_spill] sm:$0xff] %v10794_v47  ;;  %v10797_v11 = vadd.f32 %v482_v42, %v10749_v37  ;;  %v484_v34 = vpop.f32.mrb[23].mxu0  ;;  %v10806_v28 = vadd.f32 %v555_v40, %v10758_v23  ;;  %v557_v19 = vpop.f32.mrb[23].mxu1 }
 0x13a   :  { %13059 = vst [vmem:[#allocation80_spill] sm:$0xff] %v10791_v39  ;;  %13062 = vst [vmem:[#allocation83_spill] sm:$0xff] %v10800_v41  ;;  %v10803_v26 = vadd.f32 %v484_v34, %v10755_v63  ;;  %v10809_v39 = vadd.f32 %v557_v19, %v10761_v25 }
 0x13b   :  { %13061 = vst [vmem:[#allocation82_spill] sm:$0xff] %v10797_v11  ;;  %13064 = vst [vmem:[#allocation85_spill] sm:$0xff] %v10806_v28 }
 0x13c   :  { %13063 = vst [vmem:[#allocation84_spill] sm:$0xff] %v10803_v26  ;;  %13065 = vst [vmem:[#allocation86_spill] sm:$0xff] %v10809_v39 }
 0x13e   :  { %v488_v14 = vpop.f32.mrb[24].mxu0  ;;  %v561_v11 = vpop.f32.mrb[24].mxu1 }
 0x13f   :  { %v10812_v47 = vadd.f32 %v488_v14, %v10749_v37  ;;  %v490_v42 = vpop.f32.mrb[25].mxu0  ;;  %v10818_v34 = vadd.f32 %v561_v11, %v10758_v23  ;;  %v563_v26 = vpop.f32.mrb[25].mxu1 }
 0x140   :  { %v10815_v3 = vadd.f32 %v490_v42, %v10755_v63  ;;  %v492_v41 = vpop.f32.mrb[26].mxu0  ;;  %v10824_v19 = vadd.f32 %v563_v26, %v10761_v25  ;;  %v565_v39 = vpop.f32.mrb[26].mxu1 }
 0x141   :  { %13066 = vst [vmem:[#allocation87_spill] sm:$0xff] %v10812_v47  ;;  %13068 = vst [vmem:[#allocation89_spill] sm:$0xff] %v10818_v34  ;;  %v10821_v40 = vadd.f32 %v492_v41, %v10749_v37  ;;  %v494_v28 = vpop.f32.mrb[27].mxu0  ;;  %v10830_v35 = vadd.f32 %v565_v39, %v10758_v23  ;;  %v567_v42 = vpop.f32.mrb[27].mxu1 }
 0x142   :  { %13067 = vst [vmem:[#allocation88_spill] sm:$0xff] %v10815_v3  ;;  %13070 = vst [vmem:[#allocation91_spill] sm:$0xff] %v10824_v19  ;;  %v10827_v14 = vadd.f32 %v494_v28, %v10755_v63  ;;  %v10833_v8 = vadd.f32 %v567_v42, %v10761_v25 }
 0x143   :  { %13069 = vst [vmem:[#allocation90_spill] sm:$0xff] %v10821_v40  ;;  %13072 = vst [vmem:[#allocation93_spill] sm:$0xff] %v10830_v35 }
 0x144   :  { %13071 = vst [vmem:[#allocation92_spill] sm:$0xff] %v10827_v14  ;;  %13073 = vst [vmem:[#allocation94_spill] sm:$0xff] %v10833_v8 }
 0x146   :  { %v498_v11 = vpop.f32.mrb[28].mxu0  ;;  %v571_v22 = vpop.f32.mrb[28].mxu1 }
 0x147   :  { %v10836_v17 = vadd.f32 %v498_v11, %v10749_v37  ;;  %v500_v41 = vpop.f32.mrb[29].mxu0  ;;  %v10842_v28 = vadd.f32 %v571_v22, %v10758_v23  ;;  %v573_v3 = vpop.f32.mrb[29].mxu1  ;;  %v323_v11 = vadd.f32 %v10639_v48, %v10647_v50  ;;  %v398_v22 = vadd.f32 %v10661_v1, %v10655_v57 }
 0x148   :  { %v10839_v26 = vadd.f32 %v500_v41, %v10755_v63  ;;  %v502_v19 = vpop.f32.mrb[30].mxu0  ;;  %v10845_v34 = vadd.f32 %v573_v3, %v10761_v25  ;;  %v575_v42 = vpop.f32.mrb[30].mxu1  ;;  %v396_v41 = vadd.f32 %v10651_v56, %v10643_v49 }
 0x149   :  { %v504_v39 = vpop.f32.mrb[31].mxu0  ;;  %v577_v47 = vpop.f32.mrb[31].mxu1 }
 0x14e   :  { %v1062_v33 = vpop.f32.mrb[32].mxu0  ;;  %v1103_v36 = vpop.f32.mrb[32].mxu1 }
 0x14f   :  { %v1196_v43 = vadd.f32 %v1062_v33, %v323_v11  ;;  %v1064_v8 = vpop.f32.mrb[33].mxu0  ;;  %v1198_v3 = vadd.f32 %v1103_v36, %v396_v41  ;;  %v1105_v35 = vpop.f32.mrb[33].mxu1  ;;  %v576_v11 = vadd.f32 %v575_v42, %v10758_v23 }
 0x150   :  { %v1197_v14 = vadd.f32 %v1064_v8, %v325_v44  ;;  %v1066_v40 = vpop.f32.mrb[34].mxu0  ;;  %v1199_v27 = vadd.f32 %v1105_v35, %v398_v22  ;;  %v1107_v50 = vpop.f32.mrb[34].mxu1 }
 0x151   :  { %v8674_v38 = vmul.f32 -1.442695, %v1196_v43  ;;  %v1067_v48 = vpop.f32.mrb[35].mxu0  ;;  %v1108_v55 = vpop.f32.mrb[35].mxu1  ;;  %v503_v40 = vadd.f32 %v502_v19, %v10749_v37 }
 0x152   :  { %v8676_v29 = vmul.f32 -1.442695, %v1197_v14  ;;  %v8678_v37 = vmul.f32 -1.442695, %v1199_v27 }
 0x153   :  { %9607 = vpow2.f32 %v8674_v38 }
 0x154   :  { %9609 = vpow2.f32 %v8676_v29  ;;  %v505_v29 = vadd.f32 %v504_v39, %v10755_v63 }
 0x155   :  { %9611 = vtanh.f32 %v1198_v3  ;;  %v578_v3 = vadd.f32 %v577_v47, %v10761_v25 }
 0x15d   :  { %v9608_v49 = vpop.eup %9607 }
 0x15e   :  { %v9610_v56 = vpop.eup %9609  ;;  %v1214_v58 = vadd.f32 1.0, %v9608_v49 }
 0x15f   :  { %v1226_v57 = vadd.f32 1.0, %v9610_v56  ;;  %v9612_v1 = vpop.eup %9611 }
 0x160   :  { %9613 = vrcp.f32 %v1214_v58 }
 0x161   :  { %9615 = vrcp.f32 %v1226_v57 }
 0x16a   :  { %v9614_v36 = vpop.eup %9613 }
 0x16b   :  { %v9616_v33 = vpop.eup %9615  ;;  %v1248_v44 = vmul.f32 %v9614_v36, %v9612_v1 }
 0x16c   :  { %v1246_v8 = vmul.f32 0.0, %v9616_v33 }
 0x16e   :  { %v10855_v43 = vadd.f32 %v1248_v44, %v1246_v8  ;;  %v1144_v35 = vpop.f32.mrb[36].mxu0  ;;  %v1185_v14 = vpop.f32.mrb[36].mxu1 }
 0x16f   :  { %v1145_v38 = vpop.f32.mrb[37].mxu0  ;;  %v1186_v41 = vpop.f32.mrb[37].mxu1 }
 0x170   :  { %v1146_v22 = vpop.f32.mrb[38].mxu0  ;;  %v1187_v50 = vpop.f32.mrb[38].mxu1 }
 0x171   :  { %v1204_v48 = vadd.f32 %v1146_v22, %v503_v40  ;;  %v1148_v55 = vpop.f32.mrb[39].mxu0  ;;  %v1206_v49 = vadd.f32 %v1187_v50, %v576_v11  ;;  %v1189_v58 = vpop.f32.mrb[39].mxu1 }
 0x172   :  { %v1205_v56 = vadd.f32 %v1148_v55, %v505_v29  ;;  %v1207_v1 = vadd.f32 %v1189_v58, %v578_v3  ;;  %v13080_v55 = vld [vmem:[#allocation40_spill] sm:$0xff] }
 0x173   :  { %v8675_v57 = vmul.f32 -1.442695, %v1204_v48 }
 0x174   :  { %v8677_v36 = vmul.f32 -1.442695, %v1205_v56  ;;  %v8679_v19 = vmul.f32 -1.442695, %v1207_v1  ;;  %v1891_v56 = vld [vmem:[#allocation13 + $0x88] sm:$0xff] }
 0x175   :  { %9617 = vpow2.f32 %v8675_v57  ;;  %v1895_v57 = vld [vmem:[#allocation13 + $0xa8] sm:$0xff] }
 0x176   :  { %9619 = vpow2.f32 %v8677_v36  ;;  %v10933_v36 = vcombine.low %v1891_v56, %v1895_v57 }
 0x177   :  { %9621 = vpow2.f32 %v8678_v37  ;;  %v10935_v37 = vcombine.high %v1891_v56, %v1895_v57  ;;  %v1880_v56 = vld [vmem:[#allocation13 + $0x30] sm:$0xff]  ;;  %v1877_v57 = vld [vmem:[#allocation13 + $0x18] sm:$0xff] }
 0x178   :  { %9623 = vpow2.f32 %v8679_v19  ;;  %v1898_v19 = vld [vmem:[#allocation13 + $0xc0] sm:$0xff] }
 0x179   :  { %9625 = vtanh.f32 %v1206_v49  ;;  %v1894_v49 = vld [vmem:[#allocation13 + $0xa0] sm:$0xff] }
 0x17f   :  { %v9618_v63 = vpop.eup %9617 }
 0x180   :  { %v9620_v23 = vpop.eup %9619  ;;  %v1215_v39 = vadd.f32 1.0, %v9618_v63  ;;  %v1902_v63 = vld [vmem:[#allocation13 + $0xe0] sm:$0xff] }
 0x181   :  { %v1227_v25 = vadd.f32 1.0, %v9620_v23  ;;  %v9622_v47 = vpop.eup %9621  ;;  %v1899_v23 = vld [vmem:[#allocation13 + $0xc8] sm:$0xff] }
 0x182   :  { %9627 = vrcp.f32 %v1215_v39  ;;  %v9624_v42 = vpop.eup %9623  ;;  %v1240_v44 = vadd.f32 1.0, %v9622_v47  ;;  %v10941_v39 = vcombine.high %v1898_v19, %v1902_v63  ;;  %v10943_v47 = vcombine.low %v1898_v19, %v1902_v63 }
 0x183   :  { %9629 = vrcp.f32 %v1227_v25  ;;  %v9626_v33 = vpop.eup %9625  ;;  %v1241_v14 = vadd.f32 1.0, %v9624_v42  ;;  %v1903_v25 = vld [vmem:[#allocation13 + $0xe8] sm:$0xff] }
 0x184   :  { %9631 = vrcp.f32 %v1240_v44  ;;  %v10945_v42 = vcombine.low %v1899_v23, %v1903_v25  ;;  %v1906_v44 = vld [vmem:[#allocation13 + $0x100] sm:$0xff] }
 0x185   :  { %9633 = vtanh.f32 %v10855_v43 }
 0x186   :  { %9635 = vrcp.f32 %v1241_v14  ;;  %v1911_v14 = vld [vmem:[#allocation13 + $0x128] sm:$0xff] }
 0x18c   :  { %v9628_v8 = vpop.eup %9627 }
 0x18d   :  { %v9630_v35 = vpop.eup %9629  ;;  %v1249_v40 = vmul.f32 %v9628_v8, %v9626_v33  ;;  %v10947_v33 = vcombine.high %v1899_v23, %v1903_v25  ;;  %v1910_v8 = vld [vmem:[#allocation13 + $0x120] sm:$0xff]  ;;  %v1881_v25 = vld [vmem:[#allocation13 + $0x38] sm:$0xff] }
 0x18e   :  { %v1247_v38 = vmul.f32 0.0, %v9630_v35  ;;  %v9632_v29 = vpop.eup %9631  ;;  %v1907_v35 = vld [vmem:[#allocation13 + $0x108] sm:$0xff] }
 0x18f   :  { %v9634_v11 = vpop.eup %9633 }
 0x190   :  { %v10862_v27 = vadd.f32 %v1249_v40, %v1247_v38  ;;  %v9636_v41 = vpop.eup %9635  ;;  %v10865_v3 = vmul.f32 %v9634_v11, %v9632_v29  ;;  %v10953_v40 = vcombine.high %v1906_v44, %v1910_v8  ;;  %v10955_v38 = vcombine.low %v1906_v44, %v1910_v8 }
 0x191   :  { %v10957_v29 = vcombine.low %v1907_v35, %v1911_v14  ;;  %v10959_v11 = vcombine.high %v1907_v35, %v1911_v14  ;;  %v10993_v8 = vcombine.low %v1877_v57, %v1881_v25 }
 0x192   :  { %9637 = vtanh.f32 %v10862_v27  ;;  %13074 = vst [vmem:[#allocation95_spill] sm:$0xff] %v10865_v3 }
 0x19c   :  { %v9638_v22 = vpop.eup %9637 }
 0x19d   :  { %v10867_v48 = vmul.f32 %v9638_v22, %v9636_v41  ;;  %v1914_v41 = vld [vmem:[#allocation13 + $0x140] sm:$0xff] }
 0x19e   :  { %v1918_v22 = vld [vmem:[#allocation13 + $0x160] sm:$0xff] }
 0x19f   :  { %13075 = vst [vmem:[#allocation96_spill] sm:$0xff] %v10867_v48  ;;  %v1258_v50 = vpack.c.bf16 %v10867_v48, %v10865_v3 }
 0x1a1   :  { %1676 = vmatmul.mubr.bf16.vlgmr.msra.gmra.mrb[40].mxu0 %v1258_v50  ;;  %1717 = vmatmul.mubr.bf16.vlgmr.msra.gmra.mrb[40].mxu1 %v1258_v50 }
 0x1a2   :  { %1726 = vmatpush1.bf16.msra.mxu0 %v10485_v46  ;;  %1767 = vmatpush1.bf16.msra.mxu1 %v10489_v51  ;;  %v13076_v46 = vld [vmem:[#allocation36_spill] sm:$0xff]  ;;  %v13077_v51 = vld [vmem:[#allocation37_spill] sm:$0xff] }
 0x1a3   :  { %1727 = vmatprep.subr.bf16.mxu0 %v10491_v52  ;;  %1768 = vmatprep.subr.bf16.mxu1 %v10494_v53  ;;  %v13078_v52 = vld [vmem:[#allocation38_spill] sm:$0xff]  ;;  %v13079_v53 = vld [vmem:[#allocation39_spill] sm:$0xff] }
 0x1a4   :  { %1757 = vmatprep.mubr.bf16.mxu0 %v13021_v21  ;;  %1798 = vmatprep.mubr.bf16.mxu1 %v13021_v21 }
 0x1a6   :  { %1728 = vmatpush1.bf16.msra.mxu0 %v10499_v62  ;;  %1769 = vmatpush1.bf16.msra.mxu1 %v10503_v4  ;;  %v13081_v62 = vld [vmem:[#allocation41_spill] sm:$0xff]  ;;  %v13082_v4 = vld [vmem:[#allocation42_spill] sm:$0xff] }
 0x1a7   :  { %1729 = vmatprep.subr.bf16.mxu0 %v10505_v5  ;;  %1770 = vmatprep.subr.bf16.mxu1 %v10508_v6  ;;  %v1874_v5 = vld [vmem:[#allocation13] sm:$0xff] }
 0x1a8   :  { %v1878_v6 = vld [vmem:[#allocation13 + $0x20] sm:$0xff] }
 0x1aa   :  { %1730 = vmatpush1.bf16.msra.mxu0 %v10513_v15  ;;  %1771 = vmatpush1.bf16.msra.mxu1 %v10517_v20  ;;  %v1875_v15 = vld [vmem:[#allocation13 + $0x8] sm:$0xff]  ;;  %v10905_v20 = vcombine.high %v1874_v5, %v1878_v6 }
 0x1ab   :  { %1731 = vmatprep.subr.bf16.mxu0 %v13076_v46  ;;  %1772 = vmatprep.subr.bf16.mxu1 %v13077_v51  ;;  %v10965_v46 = vcombine.low %v1914_v41, %v1918_v22  ;;  %v10967_v51 = vcombine.high %v1914_v41, %v1918_v22  ;;  %v11005_v22 = vcombine.high %v1877_v57, %v1881_v25 }
 0x1ae   :  { %1732 = vmatpush1.bf16.msra.mxu0 %v13078_v52  ;;  %1773 = vmatpush1.bf16.msra.mxu1 %v13079_v53  ;;  %v1919_v52 = vld [vmem:[#allocation13 + $0x168] sm:$0xff]  ;;  %v1922_v53 = vld [vmem:[#allocation13 + $0x180] sm:$0xff] }
 0x1af   :  { %1733 = vmatprep.subr.bf16.mxu0 %v13080_v55  ;;  %1774 = vmatprep.subr.bf16.mxu1 %v13081_v62  ;;  %v1926_v55 = vld [vmem:[#allocation13 + $0x1a0] sm:$0xff] }
 0x1b2   :  { %1734 = vmatpush1.bf16.msra.mxu0 %v10537_v61  ;;  %1775 = vmatpush1.bf16.msra.mxu1 %v10541_v7  ;;  %v1879_v61 = vld [vmem:[#allocation13 + $0x28] sm:$0xff]  ;;  %v10907_v7 = vcombine.low %v1874_v5, %v1878_v6  ;;  %v10973_v5 = vcombine.high %v1922_v53, %v1926_v55 }
 0x1b3   :  { %1735 = vmatprep.subr.bf16.mxu0 %v10543_v12  ;;  %1776 = vmatprep.subr.bf16.mxu1 %v13082_v4  ;;  %v10909_v12 = vcombine.low %v1875_v15, %v1879_v61  ;;  %v1923_v6 = vld [vmem:[#allocation13 + $0x188] sm:$0xff] }
 0x1b6   :  { %1736 = vmatpush1.bf16.msra.mxu0 %v10549_v24  ;;  %1777 = vmatpush1.bf16.msra.mxu1 %v10553_v30  ;;  %v10911_v24 = vcombine.high %v1875_v15, %v1879_v61  ;;  %v1886_v30 = vld [vmem:[#allocation13 + $0x60] sm:$0xff]  ;;  %v1927_v15 = vld [vmem:[#allocation13 + $0x1a8] sm:$0xff] }
 0x1b7   :  { %1737 = vmatprep.subr.bf16.mxu0 %v10555_v31  ;;  %1778 = vmatprep.subr.bf16.mxu1 %v10558_v32  ;;  %v1883_v31 = vld [vmem:[#allocation13 + $0x48] sm:$0xff]  ;;  %v1930_v61 = vld [vmem:[#allocation13 + $0x1c0] sm:$0xff]  ;;  %v10984_v19 = vcombine.low %v1923_v6, %v1927_v15 }
 0x1ba   :  { %1738 = vmatpush1.bf16.msra.mxu0 %v10561_v45  ;;  %1779 = vmatpush1.bf16.msra.mxu1 %v10565_v54  ;;  %v1887_v45 = vld [vmem:[#allocation13 + $0x68] sm:$0xff] }
 0x1bb   :  { %1739 = vmatprep.subr.bf16.mxu0 %v10567_v59  ;;  %1780 = vmatprep.subr.bf16.mxu1 %v10570_v60  ;;  %v10921_v59 = vcombine.low %v1883_v31, %v1887_v45  ;;  %v10923_v60 = vcombine.high %v1883_v31, %v1887_v45  ;;  %v1931_v31 = vld [vmem:[#allocation13 + $0x1c8] sm:$0xff] }
 0x1bc   :  { %v1935_v45 = vld [vmem:[#allocation13 + $0x1e8] sm:$0xff] }
 0x1bd   :  { %v10991_v44 = vcombine.high %v1931_v31, %v1935_v45  ;;  %v11000_v14 = vcombine.low %v1931_v31, %v1935_v45 }
 0x1be   :  { %1740 = vmatpush1.bf16.msra.mxu0 %v10573_v13  ;;  %1781 = vmatpush1.bf16.msra.mxu1 %v10577_v0  ;;  %v1882_v13 = vld [vmem:[#allocation13 + $0x40] sm:$0xff] }
 0x1bf   :  { %2258 = vmatprep.subr.bf16.mxu0 %v10905_v20  ;;  %2299 = vmatprep.subr.bf16.mxu1 %v10911_v24  ;;  %v10917_v32 = vcombine.high %v1882_v13, %v1886_v30  ;;  %v10919_v54 = vcombine.low %v1882_v13, %v1886_v30  ;;  %v1890_v0 = vld [vmem:[#allocation13 + $0x80] sm:$0xff]  ;;  %v10976_v13 = vcombine.high %v1923_v6, %v1927_v15 }
 0x1c0   :  { %v10929_v58 = vcombine.high %v1890_v0, %v1894_v49  ;;  %v10931_v1 = vcombine.low %v1890_v0, %v1894_v49  ;;  %v1934_v30 = vld [vmem:[#allocation13 + $0x1e0] sm:$0xff]  ;;  %v10980_v0 = vcombine.low %v1922_v53, %v1926_v55  ;;  %v1876_v49 = vld [vmem:[#allocation13 + $0x10] sm:$0xff] }
 0x1c1   :  { %1758 = vmatmul.mubr.bf16.vlgmr.msra.gmra.mrb[44].mxu0 %v1258_v50  ;;  %1799 = vmatmul.mubr.bf16.vlgmr.msra.gmra.mrb[44].mxu1 %v1258_v50  ;;  %v1915_v50 = vld [vmem:[#allocation13 + $0x148] sm:$0xff]  ;;  %v10986_v63 = vcombine.high %v1930_v61, %v1934_v30  ;;  %v10988_v23 = vcombine.low %v1876_v49, %v1880_v56  ;;  %v10996_v35 = vcombine.low %v1930_v61, %v1934_v30 }
 0x1c2   :  { %2290 = vmatprep.mubr.bf16.mxu0 %v13021_v21  ;;  %2331 = vmatprep.mubr.bf16.mxu1 %v13021_v21  ;;  %v10969_v62 = vcombine.low %v1915_v50, %v1919_v52  ;;  %v10971_v4 = vcombine.high %v1915_v50, %v1919_v52  ;;  %v11002_v41 = vcombine.high %v1876_v49, %v1880_v56 }
 0x1c3   :  { %2259 = vmatpush1.bf16.msra.mxu0 %v10907_v7  ;;  %2300 = vmatpush1.bf16.msra.mxu1 %v10909_v12 }
 0x1c4   :  { %2260 = vmatprep.subr.bf16.mxu0 %v10917_v32  ;;  %2301 = vmatprep.subr.bf16.mxu1 %v10923_v60 }
 0x1c7   :  { %2261 = vmatpush1.bf16.msra.mxu0 %v10919_v54  ;;  %2302 = vmatpush1.bf16.msra.mxu1 %v10921_v59 }
 0x1c8   :  { %2262 = vmatprep.subr.bf16.mxu0 %v10929_v58  ;;  %2303 = vmatprep.subr.bf16.mxu1 %v10935_v37 }
 0x1cb   :  { %2263 = vmatpush1.bf16.msra.mxu0 %v10931_v1  ;;  %2304 = vmatpush1.bf16.msra.mxu1 %v10933_v36 }
 0x1cc   :  { %2264 = vmatprep.subr.bf16.mxu0 %v10941_v39  ;;  %2305 = vmatprep.subr.bf16.mxu1 %v10947_v33 }
 0x1cf   :  { %2265 = vmatpush1.bf16.msra.mxu0 %v10943_v47  ;;  %2306 = vmatpush1.bf16.msra.mxu1 %v10945_v42 }
 0x1d0   :  { %2266 = vmatprep.subr.bf16.mxu0 %v10953_v40  ;;  %2307 = vmatprep.subr.bf16.mxu1 %v10959_v11 }
 0x1d3   :  { %2267 = vmatpush1.bf16.msra.mxu0 %v10955_v38  ;;  %2308 = vmatpush1.bf16.msra.mxu1 %v10957_v29 }
 0x1d4   :  { %2268 = vmatprep.subr.bf16.mxu0 %v10967_v51  ;;  %2309 = vmatprep.subr.bf16.mxu1 %v10971_v4 }
 0x1d7   :  { %2269 = vmatpush1.bf16.msra.mxu0 %v10965_v46  ;;  %2310 = vmatpush1.bf16.msra.mxu1 %v10969_v62 }
 0x1d8   :  { %2270 = vmatprep.subr.bf16.mxu0 %v10973_v5  ;;  %2311 = vmatprep.subr.bf16.mxu1 %v10976_v13 }
 0x1db   :  { %2271 = vmatpush1.bf16.msra.mxu0 %v10980_v0  ;;  %2312 = vmatpush1.bf16.msra.mxu1 %v10984_v19 }
 0x1dc   :  { %2272 = vmatprep.subr.bf16.mxu0 %v10986_v63  ;;  %2313 = vmatprep.subr.bf16.mxu1 %v10991_v44 }
 0x1df   :  { %2273 = vmatpush1.bf16.msra.mxu0 %v10996_v35  ;;  %2314 = vmatpush1.bf16.msra.mxu1 %v11000_v14 }
 0x1e0   :  { %2340 = vmatprep.subr.bf16.mxu0 %v11002_v41  ;;  %2381 = vmatprep.subr.bf16.mxu1 %v11005_v22 }
 0x274   :  { %v1677_v50 = vpop.f32.mrb[40].mxu0  ;;  %v1718_v52 = vpop.f32.mrb[40].mxu1 }
 0x275   :  { %v1811_v53 = vadd.f32 %v1677_v50, %v10664_v2  ;;  %v1813_v55 = vadd.f32 %v1718_v52, %v10670_v10  ;;  %v1679_v6 = vpop.f32.mrb[41].mxu0  ;;  %v1720_v15 = vpop.f32.mrb[41].mxu1 }
 0x276   :  { %v1812_v61 = vadd.f32 %v1679_v6, %v10667_v9  ;;  %v1814_v30 = vadd.f32 %v1720_v15, %v10673_v16  ;;  %v1681_v31 = vpop.f32.mrb[42].mxu0  ;;  %v1722_v45 = vpop.f32.mrb[42].mxu1 }
 0x277   :  { %v8744_v49 = vmul.f32 -1.442695, %v1811_v53  ;;  %v1682_v56 = vpop.f32.mrb[43].mxu0  ;;  %v1723_v57 = vpop.f32.mrb[43].mxu1 }
 0x278   :  { %v8746_v25 = vmul.f32 -1.442695, %v1812_v61 }
 0x279   :  { %9639 = vpow2.f32 %v8744_v49 }
 0x27a   :  { %9641 = vpow2.f32 %v8746_v25 }
 0x27b   :  { %9643 = vtanh.f32 %v1813_v55 }
 0x283   :  { %v9640_v48 = vpop.eup %9639 }
 0x284   :  { %v9642_v3 = vpop.eup %9641  ;;  %v1829_v18 = vadd.f32 1.0, %v9640_v48 }
 0x285   :  { %v1841_v2 = vadd.f32 1.0, %v9642_v3  ;;  %v9644_v10 = vpop.eup %9643 }
 0x286   :  { %9645 = vrcp.f32 %v1829_v18 }
 0x287   :  { %9647 = vrcp.f32 %v1841_v2  ;;  %v8748_v2 = vmul.f32 -1.442695, %v1814_v30 }
 0x290   :  { %v9646_v50 = vpop.eup %9645 }
 0x291   :  { %v9648_v9 = vpop.eup %9647  ;;  %v1863_v52 = vmul.f32 %v9646_v50, %v9644_v10 }
 0x292   :  { %v1861_v16 = vmul.f32 %v9648_v9, %v10855_v43 }
 0x294   :  { %v11016_v6 = vadd.f32 %v1863_v52, %v1861_v16  ;;  %v1759_v53 = vpop.f32.mrb[44].mxu0  ;;  %v1800_v15 = vpop.f32.mrb[44].mxu1 }
 0x295   :  { %v1760_v61 = vpop.f32.mrb[45].mxu0  ;;  %v1801_v31 = vpop.f32.mrb[45].mxu1 }
 0x296   :  { %v1761_v45 = vpop.f32.mrb[46].mxu0  ;;  %v1802_v49 = vpop.f32.mrb[46].mxu1 }
 0x297   :  { %v1819_v48 = vadd.f32 %v1761_v45, %v10836_v17  ;;  %v1821_v3 = vadd.f32 %v1802_v49, %v10842_v28  ;;  %v1763_v18 = vpop.f32.mrb[47].mxu0  ;;  %v1804_v55 = vpop.f32.mrb[47].mxu1 }
 0x298   :  { %v1820_v56 = vadd.f32 %v1763_v18, %v10839_v26  ;;  %v1822_v57 = vadd.f32 %v1804_v55, %v10845_v34  ;;  %v1884_v18 = vld [vmem:[#allocation13 + $0x50] sm:$0xff] }
 0x299   :  { %v8745_v25 = vmul.f32 -1.442695, %v1819_v48 }
 0x29a   :  { %v8747_v43 = vmul.f32 -1.442695, %v1820_v56  ;;  %v8749_v10 = vmul.f32 -1.442695, %v1822_v57  ;;  %v1888_v56 = vld [vmem:[#allocation13 + $0x70] sm:$0xff]  ;;  %v1885_v57 = vld [vmem:[#allocation13 + $0x58] sm:$0xff] }
 0x29b   :  { %9649 = vpow2.f32 %v8745_v25  ;;  %v1889_v25 = vld [vmem:[#allocation13 + $0x78] sm:$0xff] }
 0x29c   :  { %9651 = vpow2.f32 %v8747_v43 }
 0x29d   :  { %9653 = vpow2.f32 %v8748_v2 }
 0x29e   :  { %9655 = vpow2.f32 %v8749_v10  ;;  %v11035_v10 = vcombine.high %v1884_v18, %v1888_v56 }
 0x29f   :  { %9657 = vtanh.f32 %v1821_v3 }
 0x2a5   :  { %v9650_v50 = vpop.eup %9649 }
 0x2a6   :  { %v9652_v9 = vpop.eup %9651  ;;  %v1830_v52 = vadd.f32 1.0, %v9650_v50  ;;  %v11037_v50 = vcombine.high %v1885_v57, %v1889_v25 }
 0x2a7   :  { %v1842_v17 = vadd.f32 1.0, %v9652_v9  ;;  %v9654_v28 = vpop.eup %9653  ;;  %v1892_v9 = vld [vmem:[#allocation13 + $0x90] sm:$0xff] }
 0x2a8   :  { %9659 = vrcp.f32 %v1830_v52  ;;  %v9656_v16 = vpop.eup %9655  ;;  %v1855_v53 = vadd.f32 1.0, %v9654_v28  ;;  %v1896_v52 = vld [vmem:[#allocation13 + $0xb0] sm:$0xff]  ;;  %v1897_v28 = vld [vmem:[#allocation13 + $0xb8] sm:$0xff] }
 0x2a9   :  { %9661 = vrcp.f32 %v1842_v17  ;;  %v9658_v26 = vpop.eup %9657  ;;  %v1856_v31 = vadd.f32 1.0, %v9656_v16  ;;  %v1893_v17 = vld [vmem:[#allocation13 + $0x98] sm:$0xff]  ;;  %v11043_v16 = vcombine.low %v1884_v18, %v1888_v56  ;;  %v1912_v56 = vld [vmem:[#allocation13 + $0x130] sm:$0xff] }
 0x2aa   :  { %9663 = vrcp.f32 %v1855_v53  ;;  %v11049_v53 = vcombine.high %v1892_v9, %v1896_v52 }
 0x2ab   :  { %9665 = vtanh.f32 %v11016_v6 }
 0x2ac   :  { %9667 = vrcp.f32 %v1856_v31  ;;  %13085 = vst [vmem:[#allocation38_spill] sm:$0xff] %v11049_v53  ;;  %v1901_v31 = vld [vmem:[#allocation13 + $0xd8] sm:$0xff] }
 0x2b2   :  { %v9660_v34 = vpop.eup %9659 }
 0x2b3   :  { %v9662_v15 = vpop.eup %9661  ;;  %v1864_v61 = vmul.f32 %v9660_v34, %v9658_v26  ;;  %v11045_v26 = vcombine.low %v1885_v57, %v1889_v25  ;;  %v11051_v34 = vcombine.high %v1893_v17, %v1897_v28  ;;  %v1909_v57 = vld [vmem:[#allocation13 + $0x118] sm:$0xff] }
 0x2b4   :  { %v1862_v30 = vmul.f32 %v9662_v15, %v10862_v27  ;;  %v9664_v49 = vpop.eup %9663  ;;  %v1900_v15 = vld [vmem:[#allocation13 + $0xd0] sm:$0xff]  ;;  %v1913_v25 = vld [vmem:[#allocation13 + $0x138] sm:$0xff] }
 0x2b5   :  { %v9666_v48 = vpop.eup %9665  ;;  %13086 = vst [vmem:[#allocation39_spill] sm:$0xff] %v11051_v34 }
 0x2b6   :  { %v11024_v45 = vadd.f32 %v1864_v61, %v1862_v30  ;;  %v9668_v3 = vpop.eup %9667  ;;  %v11027_v43 = vmul.f32 %v9666_v48, %v9664_v49  ;;  %v1904_v61 = vld [vmem:[#allocation13 + $0xf0] sm:$0xff]  ;;  %v1905_v30 = vld [vmem:[#allocation13 + $0xf8] sm:$0xff]  ;;  %v11057_v49 = vcombine.low %v1892_v9, %v1896_v52  ;;  %v11059_v48 = vcombine.low %v1893_v17, %v1897_v28 }
 0x2b7   :  { %v11065_v18 = vcombine.high %v1901_v31, %v1905_v30  ;;  %v11069_v9 = vcombine.low %v1900_v15, %v1904_v61  ;;  %v11071_v52 = vcombine.low %v1901_v31, %v1905_v30  ;;  %v11077_v28 = vcombine.high %v1909_v57, %v1913_v25 }
 0x2b8   :  { %9669 = vtanh.f32 %v11024_v45  ;;  %13083 = vst [vmem:[#allocation36_spill] sm:$0xff] %v11027_v43  ;;  %13087 = vst [vmem:[#allocation40_spill] sm:$0xff] %v11057_v49 }
 0x2b9   :  { %13088 = vst [vmem:[#allocation41_spill] sm:$0xff] %v11059_v48  ;;  %13090 = vst [vmem:[#allocation97_spill] sm:$0xff] %v11065_v18 }
 0x2ba   :  { %13091 = vst [vmem:[#allocation98_spill] sm:$0xff] %v11069_v9  ;;  %13092 = vst [vmem:[#allocation99_spill] sm:$0xff] %v11071_v52 }
 0x2bb   :  { %13094 = vst [vmem:[#allocation101_spill] sm:$0xff] %v11077_v28 }
 0x2c2   :  { %v9670_v55 = vpop.eup %9669 }
 0x2c3   :  { %v11029_v2 = vmul.f32 %v9670_v55, %v9668_v3  ;;  %v11063_v3 = vcombine.high %v1900_v15, %v1904_v61  ;;  %v1908_v55 = vld [vmem:[#allocation13 + $0x110] sm:$0xff]  ;;  %v11083_v61 = vcombine.low %v1909_v57, %v1913_v25 }
 0x2c4   :  { %v11075_v17 = vcombine.high %v1908_v55, %v1912_v56  ;;  %v11081_v15 = vcombine.low %v1908_v55, %v1912_v56 }
 0x2c5   :  { %13084 = vst [vmem:[#allocation37_spill] sm:$0xff] %v11029_v2  ;;  %v11033_v27 = vpack.c.bf16 %v11029_v2, %v11027_v43  ;;  %13089 = vst [vmem:[#allocation42_spill] sm:$0xff] %v11063_v3  ;;  %v1916_v2 = vld [vmem:[#allocation13 + $0x150] sm:$0xff] }
 0x2c6   :  { %13093 = vst [vmem:[#allocation100_spill] sm:$0xff] %v11075_v17  ;;  %v1920_v43 = vld [vmem:[#allocation13 + $0x170] sm:$0xff] }
 0x2c7   :  { %2291 = vmatmul.mubr.bf16.vlgmr.msra.gmra.mrb[48].mxu0 %v11033_v27  ;;  %2332 = vmatmul.mubr.bf16.vlgmr.msra.gmra.mrb[48].mxu1 %v11033_v27  ;;  %v11087_v31 = vcombine.high %v1916_v2, %v1920_v43  ;;  %v11093_v55 = vcombine.low %v1916_v2, %v1920_v43 }
 0x2c8   :  { %2341 = vmatpush1.bf16.msra.mxu0 %v10988_v23  ;;  %2382 = vmatpush1.bf16.msra.mxu1 %v10993_v8 }
 0x2c9   :  { %2342 = vmatprep.subr.bf16.mxu0 %v11035_v10  ;;  %2383 = vmatprep.subr.bf16.mxu1 %v11037_v50  ;;  %13096 = vst [vmem:[#allocation103_spill] sm:$0xff] %v11093_v55 }
 0x2ca   :  { %2372 = vmatprep.mubr.bf16.mxu0 %v13021_v21  ;;  %2413 = vmatprep.mubr.bf16.mxu1 %v13021_v21 }
 0x2cc   :  { %2343 = vmatpush1.bf16.msra.mxu0 %v11043_v16  ;;  %2384 = vmatpush1.bf16.msra.mxu1 %v11045_v26 }
 0x2cd   :  { %2344 = vmatprep.subr.bf16.mxu0 %v11049_v53  ;;  %2385 = vmatprep.subr.bf16.mxu1 %v11051_v34  ;;  %v1917_v34 = vld [vmem:[#allocation13 + $0x158] sm:$0xff] }
 0x2ce   :  { %v1921_v53 = vld [vmem:[#allocation13 + $0x178] sm:$0xff] }
 0x2cf   :  { %v11089_v30 = vcombine.high %v1917_v34, %v1921_v53  ;;  %v11095_v56 = vcombine.low %v1917_v34, %v1921_v53 }
 0x2d0   :  { %2345 = vmatpush1.bf16.msra.mxu0 %v11057_v49  ;;  %2386 = vmatpush1.bf16.msra.mxu1 %v11059_v48  ;;  %v1925_v48 = vld [vmem:[#allocation13 + $0x198] sm:$0xff] }
 0x2d1   :  { %2346 = vmatprep.subr.bf16.mxu0 %v11063_v3  ;;  %2387 = vmatprep.subr.bf16.mxu1 %v11065_v18  ;;  %13095 = vst [vmem:[#allocation102_spill] sm:$0xff] %v11089_v30  ;;  %v1924_v18 = vld [vmem:[#allocation13 + $0x190] sm:$0xff]  ;;  %v1929_v49 = vld [vmem:[#allocation13 + $0x1b8] sm:$0xff] }
 0x2d2   :  { %v1928_v3 = vld [vmem:[#allocation13 + $0x1b0] sm:$0xff]  ;;  %v11101_v25 = vcombine.high %v1925_v48, %v1929_v49  ;;  %v11107_v2 = vcombine.low %v1925_v48, %v1929_v49 }
 0x2d3   :  { %v11099_v57 = vcombine.high %v1924_v18, %v1928_v3  ;;  %v11105_v43 = vcombine.low %v1924_v18, %v1928_v3  ;;  %v13102_v48 = vld [vmem:[#allocation93_spill] sm:$0xff] }
 0x2d4   :  { %2347 = vmatpush1.bf16.msra.mxu0 %v11069_v9  ;;  %2388 = vmatpush1.bf16.msra.mxu1 %v11071_v52  ;;  %v1933_v52 = vld [vmem:[#allocation13 + $0x1d8] sm:$0xff] }
 0x2d5   :  { %2348 = vmatprep.subr.bf16.mxu0 %v11075_v17  ;;  %2389 = vmatprep.subr.bf16.mxu1 %v11077_v28  ;;  %v1932_v28 = vld [vmem:[#allocation13 + $0x1d0] sm:$0xff]  ;;  %v1937_v9 = vld [vmem:[#allocation13 + $0x1f8] sm:$0xff] }
 0x2d6   :  { %v1936_v17 = vld [vmem:[#allocation13 + $0x1f0] sm:$0xff]  ;;  %v11113_v34 = vcombine.high %v1933_v52, %v1937_v9 }
 0x2d7   :  { %v11111_v53 = vcombine.high %v1932_v28, %v1936_v17 }
 0x2d8   :  { %2349 = vmatpush1.bf16.msra.mxu0 %v11081_v15  ;;  %2390 = vmatpush1.bf16.msra.mxu1 %v11083_v61 }
 0x2d9   :  { %2350 = vmatprep.subr.bf16.mxu0 %v11087_v31  ;;  %2391 = vmatprep.subr.bf16.mxu1 %v11089_v30  ;;  %v11117_v30 = vcombine.low %v1932_v28, %v1936_v17  ;;  %v13104_v28 = vld [vmem:[#allocation94_spill] sm:$0xff] }
 0x2dc   :  { %2351 = vmatpush1.bf16.msra.mxu0 %v11093_v55  ;;  %2392 = vmatpush1.bf16.msra.mxu1 %v11095_v56  ;;  %v11119_v55 = vcombine.low %v1933_v52, %v1937_v9  ;;  %v13103_v52 = vld [vmem:[#allocation92_spill] sm:$0xff] }
 0x2dd   :  { %2352 = vmatprep.subr.bf16.mxu0 %v11099_v57  ;;  %2393 = vmatprep.subr.bf16.mxu1 %v11101_v25 }
 0x2e0   :  { %2353 = vmatpush1.bf16.msra.mxu0 %v11105_v43  ;;  %2394 = vmatpush1.bf16.msra.mxu1 %v11107_v2 }
 0x2e1   :  { %2354 = vmatprep.subr.bf16.mxu0 %v11111_v53  ;;  %2395 = vmatprep.subr.bf16.mxu1 %v11113_v34 }
 0x2e4   :  { %2355 = vmatpush1.bf16.msra.mxu0 %v11117_v30  ;;  %2396 = vmatpush1.bf16.msra.mxu1 %v11119_v55 }
 0x2e5   :  { %2873 = vmatprep.subr.bf16.mxu0 %v10905_v20  ;;  %2914 = vmatprep.subr.bf16.mxu1 %v10911_v24 }
 0x2e7   :  { %2373 = vmatmul.mubr.bf16.vlgmr.msra.gmra.mrb[52].mxu0 %v11033_v27  ;;  %2414 = vmatmul.mubr.bf16.vlgmr.msra.gmra.mrb[52].mxu1 %v11033_v27  ;;  %v13101_v27 = vld [vmem:[#allocation90_spill] sm:$0xff] }
 0x2e8   :  { %2874 = vmatpush1.bf16.msra.mxu0 %v10907_v7  ;;  %2915 = vmatpush1.bf16.msra.mxu1 %v10909_v12  ;;  %v13097_v12 = vld [vmem:[#allocation47_spill] sm:$0xff] }
 0x2e9   :  { %2875 = vmatprep.subr.bf16.mxu0 %v10917_v32  ;;  %2916 = vmatprep.subr.bf16.mxu1 %v10923_v60  ;;  %v13098_v32 = vld [vmem:[#allocation49_spill] sm:$0xff] }
 0x2ea   :  { %2905 = vmatprep.mubr.bf16.mxu0 %v13021_v21  ;;  %2946 = vmatprep.mubr.bf16.mxu1 %v13021_v21 }
 0x2ec   :  { %2876 = vmatpush1.bf16.msra.mxu0 %v10919_v54  ;;  %2917 = vmatpush1.bf16.msra.mxu1 %v10921_v59 }
 0x2ed   :  { %2877 = vmatprep.subr.bf16.mxu0 %v10929_v58  ;;  %2918 = vmatprep.subr.bf16.mxu1 %v10935_v37  ;;  %v13099_v58 = vld [vmem:[#allocation48_spill] sm:$0xff] }
 0x2f0   :  { %2878 = vmatpush1.bf16.msra.mxu0 %v10931_v1  ;;  %2919 = vmatpush1.bf16.msra.mxu1 %v10933_v36  ;;  %v13100_v36 = vld [vmem:[#allocation51_spill] sm:$0xff] }
 0x2f1   :  { %2879 = vmatprep.subr.bf16.mxu0 %v10941_v39  ;;  %2920 = vmatprep.subr.bf16.mxu1 %v10947_v33 }
 0x2f4   :  { %2880 = vmatpush1.bf16.msra.mxu0 %v10943_v47  ;;  %2921 = vmatpush1.bf16.msra.mxu1 %v10945_v42 }
 0x2f5   :  { %2881 = vmatprep.subr.bf16.mxu0 %v10953_v40  ;;  %2922 = vmatprep.subr.bf16.mxu1 %v10959_v11 }
 0x2f8   :  { %2882 = vmatpush1.bf16.msra.mxu0 %v10955_v38  ;;  %2923 = vmatpush1.bf16.msra.mxu1 %v10957_v29 }
 0x2f9   :  { %2883 = vmatprep.subr.bf16.mxu0 %v10967_v51  ;;  %2924 = vmatprep.subr.bf16.mxu1 %v10971_v4 }
 0x2fc   :  { %2884 = vmatpush1.bf16.msra.mxu0 %v10965_v46  ;;  %2925 = vmatpush1.bf16.msra.mxu1 %v10969_v62 }
 0x2fd   :  { %2885 = vmatprep.subr.bf16.mxu0 %v10973_v5  ;;  %2926 = vmatprep.subr.bf16.mxu1 %v10976_v13 }
 0x300   :  { %2886 = vmatpush1.bf16.msra.mxu0 %v10980_v0  ;;  %2927 = vmatpush1.bf16.msra.mxu1 %v10984_v19 }
 0x301   :  { %2887 = vmatprep.subr.bf16.mxu0 %v10986_v63  ;;  %2928 = vmatprep.subr.bf16.mxu1 %v10991_v44 }
 0x304   :  { %2888 = vmatpush1.bf16.msra.mxu0 %v10996_v35  ;;  %2929 = vmatpush1.bf16.msra.mxu1 %v11000_v14 }
 0x305   :  { %2955 = vmatprep.subr.bf16.mxu0 %v11002_v41  ;;  %2996 = vmatprep.subr.bf16.mxu1 %v11005_v22 }
 0x39a   :  { %v2292_v20 = vpop.f32.mrb[48].mxu0  ;;  %v2333_v7 = vpop.f32.mrb[48].mxu1 }
 0x39b   :  { %v2426_v24 = vadd.f32 %v2292_v20, %v13097_v12  ;;  %v2428_v54 = vadd.f32 %v2333_v7, %v13098_v32  ;;  %v2294_v59 = vpop.f32.mrb[49].mxu0  ;;  %v2335_v60 = vpop.f32.mrb[49].mxu1 }
 0x39c   :  { %v2427_v1 = vadd.f32 %v2294_v59, %v13099_v58  ;;  %v2429_v37 = vadd.f32 %v2335_v60, %v13100_v36  ;;  %v2296_v39 = vpop.f32.mrb[50].mxu0  ;;  %v2337_v47 = vpop.f32.mrb[50].mxu1 }
 0x39d   :  { %v8814_v42 = vmul.f32 -1.442695, %v2426_v24  ;;  %v2297_v33 = vpop.f32.mrb[51].mxu0  ;;  %v2338_v40 = vpop.f32.mrb[51].mxu1 }
 0x39e   :  { %v8816_v38 = vmul.f32 -1.442695, %v2427_v1  ;;  %v8818_v12 = vmul.f32 -1.442695, %v2429_v37 }
 0x39f   :  { %9671 = vpow2.f32 %v8814_v42 }
 0x3a0   :  { %9673 = vpow2.f32 %v8816_v38 }
 0x3a1   :  { %9675 = vtanh.f32 %v2428_v54 }
 0x3a9   :  { %v9672_v29 = vpop.eup %9671 }
 0x3aa   :  { %v9674_v11 = vpop.eup %9673  ;;  %v2444_v46 = vadd.f32 1.0, %v9672_v29 }
 0x3ab   :  { %v2456_v51 = vadd.f32 1.0, %v9674_v11  ;;  %v9676_v62 = vpop.eup %9675 }
 0x3ac   :  { %9677 = vrcp.f32 %v2444_v46 }
 0x3ad   :  { %9679 = vrcp.f32 %v2456_v51 }
 0x3b6   :  { %v9678_v4 = vpop.eup %9677 }
 0x3b7   :  { %v9680_v5 = vpop.eup %9679  ;;  %v2478_v13 = vmul.f32 %v9678_v4, %v9676_v62 }
 0x3b8   :  { %v2476_v0 = vmul.f32 %v9680_v5, %v11016_v6 }
 0x3ba   :  { %v11168_v19 = vadd.f32 %v2478_v13, %v2476_v0  ;;  %v2374_v63 = vpop.f32.mrb[52].mxu0  ;;  %v2415_v44 = vpop.f32.mrb[52].mxu1  ;;  %v13108_v13 = vld [vmem:[#allocation39_spill] sm:$0xff]  ;;  %v13109_v0 = vld [vmem:[#allocation40_spill] sm:$0xff] }
 0x3bb   :  { %v2375_v35 = vpop.f32.mrb[53].mxu0  ;;  %v2416_v14 = vpop.f32.mrb[53].mxu1  ;;  %v13114_v63 = vld [vmem:[#allocation99_spill] sm:$0xff]  ;;  %v13115_v44 = vld [vmem:[#allocation100_spill] sm:$0xff] }
 0x3bc   :  { %v2376_v41 = vpop.f32.mrb[54].mxu0  ;;  %v2417_v22 = vpop.f32.mrb[54].mxu1  ;;  %v13118_v35 = vld [vmem:[#allocation103_spill] sm:$0xff]  ;;  %v3117_v14 = vld [vmem:[#allocation13 + $0x68] sm:$0xff] }
 0x3bd   :  { %v2434_v49 = vadd.f32 %v2376_v41, %v13101_v27  ;;  %v2436_v3 = vadd.f32 %v2417_v22, %v13102_v48  ;;  %v2378_v18 = vpop.f32.mrb[55].mxu0  ;;  %v2419_v9 = vpop.f32.mrb[55].mxu1  ;;  %v3124_v48 = vld [vmem:[#allocation13 + $0xa0] sm:$0xff] }
 0x3be   :  { %v2435_v17 = vadd.f32 %v2378_v18, %v13103_v52  ;;  %v2437_v20 = vadd.f32 %v2419_v9, %v13104_v28  ;;  %v3125_v9 = vld [vmem:[#allocation13 + $0xa8] sm:$0xff] }
 0x3bf   :  { %v8815_v7 = vmul.f32 -1.442695, %v2434_v49  ;;  %v3120_v49 = vld [vmem:[#allocation13 + $0x80] sm:$0xff] }
 0x3c0   :  { %v8817_v6 = vmul.f32 -1.442695, %v2435_v17  ;;  %v8819_v24 = vmul.f32 -1.442695, %v2437_v20  ;;  %v11243_v18 = vcombine.high %v3120_v49, %v3124_v48  ;;  %v11245_v52 = vcombine.low %v3120_v49, %v3124_v48  ;;  %v3128_v20 = vld [vmem:[#allocation13 + $0xc0] sm:$0xff] }
 0x3c1   :  { %9681 = vpow2.f32 %v8815_v7  ;;  %v3132_v7 = vld [vmem:[#allocation13 + $0xe0] sm:$0xff] }
 0x3c2   :  { %9683 = vpow2.f32 %v8817_v6  ;;  %v3129_v6 = vld [vmem:[#allocation13 + $0xc8] sm:$0xff] }
 0x3c3   :  { %9685 = vpow2.f32 %v8818_v12  ;;  %v11255_v12 = vcombine.high %v3128_v20, %v3132_v7 }
 0x3c4   :  { %9687 = vpow2.f32 %v8819_v24  ;;  %v3133_v24 = vld [vmem:[#allocation13 + $0xe8] sm:$0xff] }
 0x3c5   :  { %9689 = vtanh.f32 %v2436_v3  ;;  %v3121_v3 = vld [vmem:[#allocation13 + $0x88] sm:$0xff] }
 0x3c6   :  { %v11247_v17 = vcombine.low %v3121_v3, %v3125_v9  ;;  %v11249_v28 = vcombine.high %v3121_v3, %v3125_v9 }
 0x3cb   :  { %v9682_v32 = vpop.eup %9681 }
 0x3cc   :  { %v9684_v54 = vpop.eup %9683  ;;  %v2445_v59 = vadd.f32 1.0, %v9682_v32  ;;  %v11257_v32 = vcombine.low %v3128_v20, %v3132_v7 }
 0x3cd   :  { %v2457_v60 = vadd.f32 1.0, %v9684_v54  ;;  %v9686_v58 = vpop.eup %9685  ;;  %v11259_v54 = vcombine.low %v3129_v6, %v3133_v24 }
 0x3ce   :  { %9691 = vrcp.f32 %v2445_v59  ;;  %v9688_v1 = vpop.eup %9687  ;;  %v2470_v39 = vadd.f32 1.0, %v9686_v58  ;;  %v11261_v59 = vcombine.high %v3129_v6, %v3133_v24  ;;  %v3140_v58 = vld [vmem:[#allocation13 + $0x120] sm:$0xff]  ;;  %v13119_v24 = vld [vmem:[#allocation50_spill] sm:$0xff] }
 0x3cf   :  { %9693 = vrcp.f32 %v2457_v60  ;;  %v9690_v36 = vpop.eup %9689  ;;  %v2471_v40 = vadd.f32 1.0, %v9688_v1  ;;  %v3136_v60 = vld [vmem:[#allocation13 + $0x100] sm:$0xff]  ;;  %v3137_v1 = vld [vmem:[#allocation13 + $0x108] sm:$0xff] }
 0x3d0   :  { %9695 = vrcp.f32 %v2470_v39  ;;  %v3141_v39 = vld [vmem:[#allocation13 + $0x128] sm:$0xff] }
 0x3d1   :  { %9697 = vtanh.f32 %v11168_v19 }
 0x3d2   :  { %9699 = vrcp.f32 %v2471_v40  ;;  %v3144_v40 = vld [vmem:[#allocation13 + $0x140] sm:$0xff] }
 0x3d8   :  { %v9692_v47 = vpop.eup %9691 }
 0x3d9   :  { %v9694_v42 = vpop.eup %9693  ;;  %v2479_v33 = vmul.f32 %v9692_v47, %v9690_v36  ;;  %v11267_v36 = vcombine.high %v3136_v60, %v3140_v58  ;;  %v11269_v47 = vcombine.low %v3136_v60, %v3140_v58  ;;  %v13120_v58 = vld [vmem:[#allocation53_spill] sm:$0xff] }
 0x3da   :  { %v2477_v37 = vmul.f32 %v9694_v42, %v11024_v45  ;;  %v9696_v29 = vpop.eup %9695  ;;  %v13107_v45 = vld [vmem:[#allocation38_spill] sm:$0xff]  ;;  %v11271_v42 = vcombine.low %v3137_v1, %v3141_v39 }
 0x3db   :  { %v9698_v11 = vpop.eup %9697 }
 0x3dc   :  { %v11176_v38 = vadd.f32 %v2479_v33, %v2477_v37  ;;  %v9700_v46 = vpop.eup %9699  ;;  %v11179_v62 = vmul.f32 %v9698_v11, %v9696_v29  ;;  %v11273_v33 = vcombine.high %v3137_v1, %v3141_v39  ;;  %v3148_v37 = vld [vmem:[#allocation13 + $0x160] sm:$0xff]  ;;  %v3145_v29 = vld [vmem:[#allocation13 + $0x148] sm:$0xff] }
 0x3dd   :  { %v11279_v11 = vcombine.low %v3144_v40, %v3148_v37 }
 0x3de   :  { %9701 = vtanh.f32 %v11176_v38  ;;  %13105 = vst [vmem:[#allocation47_spill] sm:$0xff] %v11179_v62 }
 0x3e8   :  { %v9702_v51 = vpop.eup %9701 }
 0x3e9   :  { %v11181_v4 = vmul.f32 %v9702_v51, %v9700_v46  ;;  %v11281_v46 = vcombine.high %v3144_v40, %v3148_v37  ;;  %v3149_v51 = vld [vmem:[#allocation13 + $0x168] sm:$0xff] }
 0x3ea   :  { %v13121_v37 = vld [vmem:[#allocation52_spill] sm:$0xff] }
 0x3eb   :  { %13106 = vst [vmem:[#allocation49_spill] sm:$0xff] %v11181_v4  ;;  %v2488_v5 = vpack.c.bf16 %v11181_v4, %v11179_v62  ;;  %v3139_v4 = vld [vmem:[#allocation13 + $0x118] sm:$0xff]  ;;  %v3150_v62 = vld [vmem:[#allocation13 + $0x170] sm:$0xff] }
 0x3ed   :  { %2906 = vmatmul.mubr.bf16.vlgmr.msra.gmra.mrb[56].mxu0 %v2488_v5  ;;  %2947 = vmatmul.mubr.bf16.vlgmr.msra.gmra.mrb[56].mxu1 %v2488_v5 }
 0x3ee   :  { %2956 = vmatpush1.bf16.msra.mxu0 %v10988_v23  ;;  %2997 = vmatpush1.bf16.msra.mxu1 %v10993_v8  ;;  %v13110_v23 = vld [vmem:[#allocation41_spill] sm:$0xff]  ;;  %v13111_v8 = vld [vmem:[#allocation42_spill] sm:$0xff] }
 0x3ef   :  { %2957 = vmatprep.subr.bf16.mxu0 %v11035_v10  ;;  %2998 = vmatprep.subr.bf16.mxu1 %v11037_v50  ;;  %v13112_v10 = vld [vmem:[#allocation97_spill] sm:$0xff]  ;;  %v13113_v50 = vld [vmem:[#allocation98_spill] sm:$0xff] }
 0x3f0   :  { %2987 = vmatprep.mubr.bf16.mxu0 %v13021_v21  ;;  %3028 = vmatprep.mubr.bf16.mxu1 %v13021_v21 }
 0x3f2   :  { %2958 = vmatpush1.bf16.msra.mxu0 %v11043_v16  ;;  %2999 = vmatpush1.bf16.msra.mxu1 %v11045_v26  ;;  %v13116_v16 = vld [vmem:[#allocation101_spill] sm:$0xff]  ;;  %v13117_v26 = vld [vmem:[#allocation102_spill] sm:$0xff] }
 0x3f3   :  { %2959 = vmatprep.subr.bf16.mxu0 %v13107_v45  ;;  %3000 = vmatprep.subr.bf16.mxu1 %v13108_v13  ;;  %v3156_v45 = vld [vmem:[#allocation13 + $0x1a0] sm:$0xff]  ;;  %v11283_v13 = vcombine.low %v3145_v29, %v3149_v51 }
 0x3f6   :  { %2960 = vmatpush1.bf16.msra.mxu0 %v13109_v0  ;;  %3001 = vmatpush1.bf16.msra.mxu1 %v13110_v23  ;;  %v11285_v0 = vcombine.high %v3145_v29, %v3149_v51  ;;  %v13122_v51 = vld [vmem:[#allocation54_spill] sm:$0xff] }
 0x3f7   :  { %2961 = vmatprep.subr.bf16.mxu0 %v13111_v8  ;;  %3002 = vmatprep.subr.bf16.mxu1 %v13112_v10  ;;  %v3153_v8 = vld [vmem:[#allocation13 + $0x188] sm:$0xff] }
 0x3f8   :  { %v3157_v10 = vld [vmem:[#allocation13 + $0x1a8] sm:$0xff] }
 0x3fa   :  { %2962 = vmatpush1.bf16.msra.mxu0 %v13113_v50  ;;  %3003 = vmatpush1.bf16.msra.mxu1 %v13114_v63  ;;  %v3160_v50 = vld [vmem:[#allocation13 + $0x1c0] sm:$0xff]  ;;  %v11290_v63 = vcombine.high %v3153_v8, %v3157_v10 }
 0x3fb   :  { %2963 = vmatprep.subr.bf16.mxu0 %v13115_v44  ;;  %3004 = vmatprep.subr.bf16.mxu1 %v13116_v16  ;;  %v3164_v44 = vld [vmem:[#allocation13 + $0x1e0] sm:$0xff]  ;;  %v3161_v16 = vld [vmem:[#allocation13 + $0x1c8] sm:$0xff] }
 0x3fc   :  { %v11310_v48 = vcombine.low %v3160_v50, %v3164_v44 }
 0x3fe   :  { %2964 = vmatpush1.bf16.msra.mxu0 %v11081_v15  ;;  %3005 = vmatpush1.bf16.msra.mxu1 %v11083_v61  ;;  %v3104_v15 = vld [vmem:[#allocation13] sm:$0xff] }
 0x3ff   :  { %2965 = vmatprep.subr.bf16.mxu0 %v11087_v31  ;;  %3006 = vmatprep.subr.bf16.mxu1 %v13117_v26  ;;  %v3108_v61 = vld [vmem:[#allocation13 + $0x20] sm:$0xff]  ;;  %v3105_v31 = vld [vmem:[#allocation13 + $0x8] sm:$0xff] }
 0x400   :  { %v3165_v26 = vld [vmem:[#allocation13 + $0x1e8] sm:$0xff] }
 0x401   :  { %v11314_v3 = vcombine.low %v3161_v16, %v3165_v26 }
 0x402   :  { %2966 = vmatpush1.bf16.msra.mxu0 %v13118_v35  ;;  %3007 = vmatpush1.bf16.msra.mxu1 %v11095_v56  ;;  %v11219_v56 = vcombine.high %v3104_v15, %v3108_v61 }
 0x403   :  { %2967 = vmatprep.subr.bf16.mxu0 %v11099_v57  ;;  %3008 = vmatprep.subr.bf16.mxu1 %v11101_v25  ;;  %v3109_v57 = vld [vmem:[#allocation13 + $0x28] sm:$0xff]  ;;  %v11221_v25 = vcombine.low %v3104_v15, %v3108_v61  ;;  %v3106_v15 = vld [vmem:[#allocation13 + $0x10] sm:$0xff] }
 0x404   :  { %v3110_v61 = vld [vmem:[#allocation13 + $0x30] sm:$0xff] }
 0x405   :  { %v11316_v9 = vcombine.high %v3106_v15, %v3110_v61 }
 0x406   :  { %2968 = vmatpush1.bf16.msra.mxu0 %v11105_v43  ;;  %3009 = vmatpush1.bf16.msra.mxu1 %v11107_v2  ;;  %v11223_v43 = vcombine.low %v3105_v31, %v3109_v57  ;;  %v11225_v2 = vcombine.high %v3105_v31, %v3109_v57  ;;  %v3107_v31 = vld [vmem:[#allocation13 + $0x18] sm:$0xff]  ;;  %v11298_v57 = vcombine.low %v3153_v8, %v3157_v10 }
 0x407   :  { %2969 = vmatprep.subr.bf16.mxu0 %v11111_v53  ;;  %3010 = vmatprep.subr.bf16.mxu1 %v11113_v34  ;;  %v3113_v53 = vld [vmem:[#allocation13 + $0x48] sm:$0xff] }
 0x408   :  { %v11235_v22 = vcombine.low %v3113_v53, %v3117_v14  ;;  %v11237_v27 = vcombine.high %v3113_v53, %v3117_v14  ;;  %v3111_v53 = vld [vmem:[#allocation13 + $0x38] sm:$0xff]  ;;  %v11305_v14 = vcombine.high %v3161_v16, %v3165_v26 }
 0x409   :  { %v11307_v49 = vcombine.low %v3107_v31, %v3111_v53  ;;  %v11319_v20 = vcombine.high %v3107_v31, %v3111_v53 }
 0x40a   :  { %2970 = vmatpush1.bf16.msra.mxu0 %v11117_v30  ;;  %3011 = vmatpush1.bf16.msra.mxu1 %v11119_v55  ;;  %v3112_v30 = vld [vmem:[#allocation13 + $0x40] sm:$0xff] }
 0x40b   :  { %3488 = vmatprep.subr.bf16.mxu0 %v11219_v56  ;;  %3529 = vmatprep.subr.bf16.mxu1 %v11225_v2  ;;  %v3116_v55 = vld [vmem:[#allocation13 + $0x60] sm:$0xff] }
 0x40c   :  { %v11231_v34 = vcombine.high %v3112_v30, %v3116_v55  ;;  %v11233_v41 = vcombine.low %v3112_v30, %v3116_v55  ;;  %v11300_v30 = vcombine.high %v3160_v50, %v3164_v44  ;;  %v11302_v55 = vcombine.low %v3106_v15, %v3110_v61 }
 0x40d   :  { %2988 = vmatmul.mubr.bf16.vlgmr.msra.gmra.mrb[60].mxu0 %v2488_v5  ;;  %3029 = vmatmul.mubr.bf16.vlgmr.msra.gmra.mrb[60].mxu1 %v2488_v5  ;;  %v3152_v5 = vld [vmem:[#allocation13 + $0x180] sm:$0xff] }
 0x40e   :  { %3520 = vmatprep.mubr.bf16.mxu0 %v13021_v21  ;;  %3561 = vmatprep.mubr.bf16.mxu1 %v13021_v21  ;;  %v11287_v23 = vcombine.high %v3152_v5, %v3156_v45  ;;  %v11294_v35 = vcombine.low %v3152_v5, %v3156_v45 }
 0x40f   :  { %3489 = vmatpush1.bf16.msra.mxu0 %v11221_v25  ;;  %3530 = vmatpush1.bf16.msra.mxu1 %v11223_v43 }
 0x410   :  { %3490 = vmatprep.subr.bf16.mxu0 %v11231_v34  ;;  %3531 = vmatprep.subr.bf16.mxu1 %v11237_v27 }
 0x413   :  { %3491 = vmatpush1.bf16.msra.mxu0 %v11233_v41  ;;  %3532 = vmatpush1.bf16.msra.mxu1 %v11235_v22 }
 0x414   :  { %3492 = vmatprep.subr.bf16.mxu0 %v11243_v18  ;;  %3533 = vmatprep.subr.bf16.mxu1 %v11249_v28 }
 0x417   :  { %3493 = vmatpush1.bf16.msra.mxu0 %v11245_v52  ;;  %3534 = vmatpush1.bf16.msra.mxu1 %v11247_v17 }
 0x418   :  { %3494 = vmatprep.subr.bf16.mxu0 %v11255_v12  ;;  %3535 = vmatprep.subr.bf16.mxu1 %v11261_v59 }
 0x41b   :  { %3495 = vmatpush1.bf16.msra.mxu0 %v11257_v32  ;;  %3536 = vmatpush1.bf16.msra.mxu1 %v11259_v54 }
 0x41c   :  { %3496 = vmatprep.subr.bf16.mxu0 %v11267_v36  ;;  %3537 = vmatprep.subr.bf16.mxu1 %v11273_v33 }
 0x41f   :  { %3497 = vmatpush1.bf16.msra.mxu0 %v11269_v47  ;;  %3538 = vmatpush1.bf16.msra.mxu1 %v11271_v42 }
 0x420   :  { %3498 = vmatprep.subr.bf16.mxu0 %v11281_v46  ;;  %3539 = vmatprep.subr.bf16.mxu1 %v11285_v0 }
 0x423   :  { %3499 = vmatpush1.bf16.msra.mxu0 %v11279_v11  ;;  %3540 = vmatpush1.bf16.msra.mxu1 %v11283_v13 }
 0x424   :  { %3500 = vmatprep.subr.bf16.mxu0 %v11287_v23  ;;  %3541 = vmatprep.subr.bf16.mxu1 %v11290_v63 }
 0x427   :  { %3501 = vmatpush1.bf16.msra.mxu0 %v11294_v35  ;;  %3542 = vmatpush1.bf16.msra.mxu1 %v11298_v57 }
 0x428   :  { %3502 = vmatprep.subr.bf16.mxu0 %v11300_v30  ;;  %3543 = vmatprep.subr.bf16.mxu1 %v11305_v14 }
 0x42b   :  { %3503 = vmatpush1.bf16.msra.mxu0 %v11310_v48  ;;  %3544 = vmatpush1.bf16.msra.mxu1 %v11314_v3 }
 0x42c   :  { %3570 = vmatprep.subr.bf16.mxu0 %v11316_v9  ;;  %3611 = vmatprep.subr.bf16.mxu1 %v11319_v20 }
 0x4c0   :  { %v2907_v7 = vpop.f32.mrb[56].mxu0  ;;  %v2948_v6 = vpop.f32.mrb[56].mxu1 }
 0x4c1   :  { %v3041_v60 = vadd.f32 %v2907_v7, %v13119_v24  ;;  %v3043_v1 = vadd.f32 %v2948_v6, %v13120_v58  ;;  %v2909_v39 = vpop.f32.mrb[57].mxu0  ;;  %v2950_v40 = vpop.f32.mrb[57].mxu1 }
 0x4c2   :  { %v3042_v29 = vadd.f32 %v2909_v39, %v13121_v37  ;;  %v3044_v5 = vadd.f32 %v2950_v40, %v13122_v51  ;;  %v2911_v45 = vpop.f32.mrb[58].mxu0  ;;  %v2952_v8 = vpop.f32.mrb[58].mxu1 }
 0x4c3   :  { %v8884_v10 = vmul.f32 -1.442695, %v3041_v60  ;;  %v2912_v50 = vpop.f32.mrb[59].mxu0  ;;  %v2953_v44 = vpop.f32.mrb[59].mxu1  ;;  %v13123_v8 = vld [vmem:[#allocation87_spill] sm:$0xff] }
 0x4c4   :  { %v8886_v16 = vmul.f32 -1.442695, %v3042_v29 }
 0x4c5   :  { %9703 = vpow2.f32 %v8884_v10 }
 0x4c6   :  { %9705 = vpow2.f32 %v8886_v16 }
 0x4c7   :  { %9707 = vtanh.f32 %v3043_v1  ;;  %v13124_v1 = vld [vmem:[#allocation89_spill] sm:$0xff] }
 0x4cf   :  { %v9704_v26 = vpop.eup %9703 }
 0x4d0   :  { %v9706_v15 = vpop.eup %9705  ;;  %v3059_v61 = vadd.f32 1.0, %v9704_v26  ;;  %v13125_v26 = vld [vmem:[#allocation88_spill] sm:$0xff] }
 0x4d1   :  { %v3071_v31 = vadd.f32 1.0, %v9706_v15  ;;  %v9708_v53 = vpop.eup %9707 }
 0x4d2   :  { %9709 = vrcp.f32 %v3059_v61  ;;  %v13126_v61 = vld [vmem:[#allocation91_spill] sm:$0xff] }
 0x4d3   :  { %9711 = vrcp.f32 %v3071_v31 }
 0x4dc   :  { %v9710_v7 = vpop.eup %9709 }
 0x4dd   :  { %v9712_v6 = vpop.eup %9711  ;;  %v3093_v24 = vmul.f32 %v9710_v7, %v9708_v53  ;;  %v8888_v7 = vmul.f32 -1.442695, %v3044_v5 }
 0x4de   :  { %v3091_v58 = vmul.f32 %v9712_v6, %v11168_v19 }
 0x4e0   :  { %v11330_v39 = vadd.f32 %v3093_v24, %v3091_v58  ;;  %v2989_v60 = vpop.f32.mrb[60].mxu0  ;;  %v3030_v40 = vpop.f32.mrb[60].mxu1 }
 0x4e1   :  { %v2990_v37 = vpop.f32.mrb[61].mxu0  ;;  %v3031_v29 = vpop.f32.mrb[61].mxu1 }
 0x4e2   :  { %v2991_v51 = vpop.f32.mrb[62].mxu0  ;;  %v3032_v45 = vpop.f32.mrb[62].mxu1 }
 0x4e3   :  { %v3049_v10 = vadd.f32 %v2991_v51, %v13123_v8  ;;  %v3051_v50 = vadd.f32 %v3032_v45, %v13124_v1  ;;  %v2993_v44 = vpop.f32.mrb[63].mxu0  ;;  %v3034_v16 = vpop.f32.mrb[63].mxu1 }
 0x4e4   :  { %v3050_v15 = vadd.f32 %v2993_v44, %v13125_v26  ;;  %v3052_v31 = vadd.f32 %v3034_v16, %v13126_v61  ;;  %v3114_v61 = vld [vmem:[#allocation13 + $0x50] sm:$0xff] }
 0x4e5   :  { %v8885_v53 = vmul.f32 -1.442695, %v3049_v10 }
 0x4e6   :  { %v8887_v19 = vmul.f32 -1.442695, %v3050_v15  ;;  %v8889_v6 = vmul.f32 -1.442695, %v3052_v31 }
 0x4e7   :  { %9713 = vpow2.f32 %v8885_v53  ;;  %v3118_v53 = vld [vmem:[#allocation13 + $0x70] sm:$0xff] }
 0x4e8   :  { %9715 = vpow2.f32 %v8887_v19  ;;  %v3115_v19 = vld [vmem:[#allocation13 + $0x58] sm:$0xff] }
 0x4e9   :  { %9717 = vpow2.f32 %v8888_v7  ;;  %v3119_v7 = vld [vmem:[#allocation13 + $0x78] sm:$0xff] }
 0x4ea   :  { %9719 = vpow2.f32 %v8889_v6 }
 0x4eb   :  { %9721 = vtanh.f32 %v3051_v50 }
 0x4f1   :  { %v9714_v24 = vpop.eup %9713 }
 0x4f2   :  { %v9716_v58 = vpop.eup %9715  ;;  %v3060_v60 = vadd.f32 1.0, %v9714_v24 }
 0x4f3   :  { %v3072_v40 = vadd.f32 1.0, %v9716_v58  ;;  %v9718_v37 = vpop.eup %9717  ;;  %v11349_v58 = vcombine.high %v3114_v61, %v3118_v53 }
 0x4f4   :  { %9723 = vrcp.f32 %v3060_v60  ;;  %v9720_v29 = vpop.eup %9719  ;;  %v3085_v45 = vadd.f32 1.0, %v9718_v37  ;;  %v11351_v60 = vcombine.high %v3115_v19, %v3119_v7  ;;  %v3126_v37 = vld [vmem:[#allocation13 + $0xb0] sm:$0xff] }
 0x4f5   :  { %9725 = vrcp.f32 %v3072_v40  ;;  %v9722_v51 = vpop.eup %9721  ;;  %v3086_v44 = vadd.f32 1.0, %v9720_v29  ;;  %v3122_v40 = vld [vmem:[#allocation13 + $0x90] sm:$0xff]  ;;  %v3123_v29 = vld [vmem:[#allocation13 + $0x98] sm:$0xff] }
 0x4f6   :  { %9727 = vrcp.f32 %v3085_v45  ;;  %v11357_v45 = vcombine.low %v3114_v61, %v3118_v53 }
 0x4f7   :  { %9729 = vtanh.f32 %v11330_v39 }
 0x4f8   :  { %9731 = vrcp.f32 %v3086_v44  ;;  %v3130_v44 = vld [vmem:[#allocation13 + $0xd0] sm:$0xff] }
 0x4fe   :  { %v9724_v8 = vpop.eup %9723 }
 0x4ff   :  { %v9726_v10 = vpop.eup %9725  ;;  %v3094_v1 = vmul.f32 %v9724_v8, %v9722_v51  ;;  %v3127_v51 = vld [vmem:[#allocation13 + $0xb8] sm:$0xff]  ;;  %v11359_v8 = vcombine.low %v3115_v19, %v3119_v7  ;;  %v3138_v19 = vld [vmem:[#allocation13 + $0x110] sm:$0xff] }
 0x500   :  { %v3092_v5 = vmul.f32 %v9726_v10, %v11176_v38  ;;  %v9728_v50 = vpop.eup %9727  ;;  %v11363_v10 = vcombine.high %v3122_v40, %v3126_v37  ;;  %v11373_v61 = vcombine.low %v3123_v29, %v3127_v51  ;;  %v3142_v7 = vld [vmem:[#allocation13 + $0x130] sm:$0xff] }
 0x501   :  { %v9730_v26 = vpop.eup %9729 }
 0x502   :  { %v11338_v16 = vadd.f32 %v3094_v1, %v3092_v5  ;;  %v9732_v15 = vpop.eup %9731  ;;  %v11341_v6 = vmul.f32 %v9730_v26, %v9728_v50  ;;  %13129 = vst [vmem:[#allocation90_spill] sm:$0xff] %v11363_v10  ;;  %v11365_v1 = vcombine.high %v3123_v29, %v3127_v51  ;;  %v3134_v5 = vld [vmem:[#allocation13 + $0xf0] sm:$0xff]  ;;  %v3131_v50 = vld [vmem:[#allocation13 + $0xd8] sm:$0xff]  ;;  %13132 = vst [vmem:[#allocation94_spill] sm:$0xff] %v11373_v61 }
 0x503   :  { %v3135_v26 = vld [vmem:[#allocation13 + $0xf8] sm:$0xff]  ;;  %v11389_v29 = vcombine.high %v3138_v19, %v3142_v7 }
 0x504   :  { %9733 = vtanh.f32 %v11338_v16  ;;  %13127 = vst [vmem:[#allocation48_spill] sm:$0xff] %v11341_v6  ;;  %13130 = vst [vmem:[#allocation93_spill] sm:$0xff] %v11365_v1  ;;  %v11379_v53 = vcombine.high %v3131_v50, %v3135_v26 }
 0x505   :  { %13137 = vst [vmem:[#allocation42_spill] sm:$0xff] %v11389_v29 }
 0x506   :  { %13134 = vst [vmem:[#allocation39_spill] sm:$0xff] %v11379_v53 }
 0x50e   :  { %v9734_v31 = vpop.eup %9733 }
 0x50f   :  { %v11343_v24 = vmul.f32 %v9734_v31, %v9732_v15  ;;  %v11371_v15 = vcombine.low %v3122_v40, %v3126_v37  ;;  %v11377_v31 = vcombine.high %v3130_v44, %v3134_v5  ;;  %v11383_v40 = vcombine.low %v3130_v44, %v3134_v5 }
 0x510   :  { %v11385_v37 = vcombine.low %v3131_v50, %v3135_v26  ;;  %v11395_v44 = vcombine.low %v3138_v19, %v3142_v7 }
 0x511   :  { %13128 = vst [vmem:[#allocation51_spill] sm:$0xff] %v11343_v24  ;;  %v11347_v38 = vpack.c.bf16 %v11343_v24, %v11341_v6  ;;  %13131 = vst [vmem:[#allocation92_spill] sm:$0xff] %v11371_v15  ;;  %v3143_v24 = vld [vmem:[#allocation13 + $0x138] sm:$0xff]  ;;  %v3146_v6 = vld [vmem:[#allocation13 + $0x150] sm:$0xff] }
 0x512   :  { %13133 = vst [vmem:[#allocation38_spill] sm:$0xff] %v11377_v31  ;;  %13135 = vst [vmem:[#allocation40_spill] sm:$0xff] %v11383_v40  ;;  %v11391_v51 = vcombine.high %v3139_v4, %v3143_v24  ;;  %v11397_v5 = vcombine.low %v3139_v4, %v3143_v24  ;;  %v11401_v50 = vcombine.high %v3146_v6, %v3150_v62 }
 0x513   :  { %3521 = vmatmul.mubr.bf16.vlgmr.msra.gmra.mrb[64].mxu0 %v11347_v38  ;;  %3562 = vmatmul.mubr.bf16.vlgmr.msra.gmra.mrb[64].mxu1 %v11347_v38  ;;  %13136 = vst [vmem:[#allocation41_spill] sm:$0xff] %v11385_v37  ;;  %v11407_v19 = vcombine.low %v3146_v6, %v3150_v62 }
 0x514   :  { %3571 = vmatpush1.bf16.msra.mxu0 %v11302_v55  ;;  %3612 = vmatpush1.bf16.msra.mxu1 %v11307_v49  ;;  %13138 = vst [vmem:[#allocation97_spill] sm:$0xff] %v11391_v51 }
 0x515   :  { %3572 = vmatprep.subr.bf16.mxu0 %v11349_v58  ;;  %3613 = vmatprep.subr.bf16.mxu1 %v11351_v60  ;;  %13140 = vst [vmem:[#allocation99_spill] sm:$0xff] %v11407_v19 }
 0x516   :  { %3602 = vmatprep.mubr.bf16.mxu0 %v13021_v21  ;;  %3643 = vmatprep.mubr.bf16.mxu1 %v13021_v21 }
 0x518   :  { %3573 = vmatpush1.bf16.msra.mxu0 %v11357_v45  ;;  %3614 = vmatpush1.bf16.msra.mxu1 %v11359_v8 }
 0x519   :  { %3574 = vmatprep.subr.bf16.mxu0 %v11363_v10  ;;  %3615 = vmatprep.subr.bf16.mxu1 %v11365_v1  ;;  %v3147_v1 = vld [vmem:[#allocation13 + $0x158] sm:$0xff] }
 0x51a   :  { %v3151_v10 = vld [vmem:[#allocation13 + $0x178] sm:$0xff] }
 0x51b   :  { %v11403_v26 = vcombine.high %v3147_v1, %v3151_v10  ;;  %v11409_v4 = vcombine.low %v3147_v1, %v3151_v10 }
 0x51c   :  { %3575 = vmatpush1.bf16.msra.mxu0 %v11371_v15  ;;  %3616 = vmatpush1.bf16.msra.mxu1 %v11373_v61  ;;  %v3155_v61 = vld [vmem:[#allocation13 + $0x198] sm:$0xff] }
 0x51d   :  { %3576 = vmatprep.subr.bf16.mxu0 %v11377_v31  ;;  %3617 = vmatprep.subr.bf16.mxu1 %v11379_v53  ;;  %13139 = vst [vmem:[#allocation98_spill] sm:$0xff] %v11403_v26  ;;  %v3154_v53 = vld [vmem:[#allocation13 + $0x190] sm:$0xff]  ;;  %v3159_v15 = vld [vmem:[#allocation13 + $0x1b8] sm:$0xff] }
 0x51e   :  { %v3158_v31 = vld [vmem:[#allocation13 + $0x1b0] sm:$0xff]  ;;  %v11415_v7 = vcombine.high %v3155_v61, %v3159_v15  ;;  %v11421_v6 = vcombine.low %v3155_v61, %v3159_v15 }
 0x51f   :  { %v11413_v24 = vcombine.high %v3154_v53, %v3158_v31  ;;  %v11419_v62 = vcombine.low %v3154_v53, %v3158_v31  ;;  %v13146_v61 = vld [vmem:[#allocation85_spill] sm:$0xff] }
 0x520   :  { %3577 = vmatpush1.bf16.msra.mxu0 %v11383_v40  ;;  %3618 = vmatpush1.bf16.msra.mxu1 %v11385_v37  ;;  %v3163_v37 = vld [vmem:[#allocation13 + $0x1d8] sm:$0xff] }
 0x521   :  { %3578 = vmatprep.subr.bf16.mxu0 %v11389_v29  ;;  %3619 = vmatprep.subr.bf16.mxu1 %v11391_v51  ;;  %v3162_v51 = vld [vmem:[#allocation13 + $0x1d0] sm:$0xff]  ;;  %v3167_v40 = vld [vmem:[#allocation13 + $0x1f8] sm:$0xff] }
 0x522   :  { %v3166_v29 = vld [vmem:[#allocation13 + $0x1f0] sm:$0xff]  ;;  %v11427_v1 = vcombine.high %v3163_v37, %v3167_v40 }
 0x523   :  { %v11425_v10 = vcombine.high %v3162_v51, %v3166_v29 }
 0x524   :  { %3579 = vmatpush1.bf16.msra.mxu0 %v11395_v44  ;;  %3620 = vmatpush1.bf16.msra.mxu1 %v11397_v5 }
 0x525   :  { %3580 = vmatprep.subr.bf16.mxu0 %v11401_v50  ;;  %3621 = vmatprep.subr.bf16.mxu1 %v11403_v26  ;;  %v11431_v26 = vcombine.low %v3162_v51, %v3166_v29  ;;  %v13148_v51 = vld [vmem:[#allocation86_spill] sm:$0xff] }
 0x528   :  { %3581 = vmatpush1.bf16.msra.mxu0 %v11407_v19  ;;  %3622 = vmatpush1.bf16.msra.mxu1 %v11409_v4  ;;  %v11433_v19 = vcombine.low %v3163_v37, %v3167_v40  ;;  %v13147_v37 = vld [vmem:[#allocation84_spill] sm:$0xff] }
 0x529   :  { %3582 = vmatprep.subr.bf16.mxu0 %v11413_v24  ;;  %3623 = vmatprep.subr.bf16.mxu1 %v11415_v7 }
 0x52c   :  { %3583 = vmatpush1.bf16.msra.mxu0 %v11419_v62  ;;  %3624 = vmatpush1.bf16.msra.mxu1 %v11421_v6 }
 0x52d   :  { %3584 = vmatprep.subr.bf16.mxu0 %v11425_v10  ;;  %3625 = vmatprep.subr.bf16.mxu1 %v11427_v1 }
 0x530   :  { %3585 = vmatpush1.bf16.msra.mxu0 %v11431_v26  ;;  %3626 = vmatpush1.bf16.msra.mxu1 %v11433_v19 }
 0x531   :  { %4103 = vmatprep.subr.bf16.mxu0 %v11219_v56  ;;  %4144 = vmatprep.subr.bf16.mxu1 %v11225_v2 }
 0x533   :  { %3603 = vmatmul.mubr.bf16.vlgmr.msra.gmra.mrb[68].mxu0 %v11347_v38  ;;  %3644 = vmatmul.mubr.bf16.vlgmr.msra.gmra.mrb[68].mxu1 %v11347_v38  ;;  %v13145_v38 = vld [vmem:[#allocation82_spill] sm:$0xff] }
 0x534   :  { %4104 = vmatpush1.bf16.msra.mxu0 %v11221_v25  ;;  %4145 = vmatpush1.bf16.msra.mxu1 %v11223_v43  ;;  %v13141_v43 = vld [vmem:[#allocation55_spill] sm:$0xff] }
 0x535   :  { %4105 = vmatprep.subr.bf16.mxu0 %v11231_v34  ;;  %4146 = vmatprep.subr.bf16.mxu1 %v11237_v27  ;;  %v13142_v34 = vld [vmem:[#allocation57_spill] sm:$0xff] }
 0x536   :  { %4135 = vmatprep.mubr.bf16.mxu0 %v13021_v21  ;;  %4176 = vmatprep.mubr.bf16.mxu1 %v13021_v21 }
 0x538   :  { %4106 = vmatpush1.bf16.msra.mxu0 %v11233_v41  ;;  %4147 = vmatpush1.bf16.msra.mxu1 %v11235_v22 }
 0x539   :  { %4107 = vmatprep.subr.bf16.mxu0 %v11243_v18  ;;  %4148 = vmatprep.subr.bf16.mxu1 %v11249_v28  ;;  %v13143_v18 = vld [vmem:[#allocation56_spill] sm:$0xff] }
 0x53c   :  { %4108 = vmatpush1.bf16.msra.mxu0 %v11245_v52  ;;  %4149 = vmatpush1.bf16.msra.mxu1 %v11247_v17  ;;  %v13144_v17 = vld [vmem:[#allocation59_spill] sm:$0xff] }
 0x53d   :  { %4109 = vmatprep.subr.bf16.mxu0 %v11255_v12  ;;  %4150 = vmatprep.subr.bf16.mxu1 %v11261_v59 }
 0x540   :  { %4110 = vmatpush1.bf16.msra.mxu0 %v11257_v32  ;;  %4151 = vmatpush1.bf16.msra.mxu1 %v11259_v54 }
 0x541   :  { %4111 = vmatprep.subr.bf16.mxu0 %v11267_v36  ;;  %4152 = vmatprep.subr.bf16.mxu1 %v11273_v33 }
 0x544   :  { %4112 = vmatpush1.bf16.msra.mxu0 %v11269_v47  ;;  %4153 = vmatpush1.bf16.msra.mxu1 %v11271_v42 }
 0x545   :  { %4113 = vmatprep.subr.bf16.mxu0 %v11281_v46  ;;  %4154 = vmatprep.subr.bf16.mxu1 %v11285_v0 }
 0x548   :  { %4114 = vmatpush1.bf16.msra.mxu0 %v11279_v11  ;;  %4155 = vmatpush1.bf16.msra.mxu1 %v11283_v13 }
 0x549   :  { %4115 = vmatprep.subr.bf16.mxu0 %v11287_v23  ;;  %4156 = vmatprep.subr.bf16.mxu1 %v11290_v63 }
 0x54c   :  { %4116 = vmatpush1.bf16.msra.mxu0 %v11294_v35  ;;  %4157 = vmatpush1.bf16.msra.mxu1 %v11298_v57 }
 0x54d   :  { %4117 = vmatprep.subr.bf16.mxu0 %v11300_v30  ;;  %4158 = vmatprep.subr.bf16.mxu1 %v11305_v14 }
 0x550   :  { %4118 = vmatpush1.bf16.msra.mxu0 %v11310_v48  ;;  %4159 = vmatpush1.bf16.msra.mxu1 %v11314_v3 }
 0x551   :  { %4185 = vmatprep.subr.bf16.mxu0 %v11316_v9  ;;  %4226 = vmatprep.subr.bf16.mxu1 %v11319_v20 }
 0x5e6   :  { %v3522_v56 = vpop.f32.mrb[64].mxu0  ;;  %v3563_v25 = vpop.f32.mrb[64].mxu1 }
 0x5e7   :  { %v3656_v2 = vadd.f32 %v3522_v56, %v13141_v43  ;;  %v3658_v41 = vadd.f32 %v3563_v25, %v13142_v34  ;;  %v3524_v22 = vpop.f32.mrb[65].mxu0  ;;  %v3565_v27 = vpop.f32.mrb[65].mxu1 }
 0x5e8   :  { %v3657_v52 = vadd.f32 %v3524_v22, %v13143_v18  ;;  %v3659_v28 = vadd.f32 %v3565_v27, %v13144_v17  ;;  %v3526_v12 = vpop.f32.mrb[66].mxu0  ;;  %v3567_v32 = vpop.f32.mrb[66].mxu1 }
 0x5e9   :  { %v8954_v54 = vmul.f32 -1.442695, %v3656_v2  ;;  %v3527_v59 = vpop.f32.mrb[67].mxu0  ;;  %v3568_v36 = vpop.f32.mrb[67].mxu1 }
 0x5ea   :  { %v8956_v47 = vmul.f32 -1.442695, %v3657_v52  ;;  %v8958_v43 = vmul.f32 -1.442695, %v3659_v28 }
 0x5eb   :  { %9735 = vpow2.f32 %v8954_v54 }
 0x5ec   :  { %9737 = vpow2.f32 %v8956_v47 }
 0x5ed   :  { %9739 = vtanh.f32 %v3658_v41 }
 0x5f5   :  { %v9736_v42 = vpop.eup %9735 }
 0x5f6   :  { %v9738_v33 = vpop.eup %9737  ;;  %v3674_v11 = vadd.f32 1.0, %v9736_v42 }
 0x5f7   :  { %v3686_v46 = vadd.f32 1.0, %v9738_v33  ;;  %v9740_v13 = vpop.eup %9739 }
 0x5f8   :  { %9741 = vrcp.f32 %v3674_v11 }
 0x5f9   :  { %9743 = vrcp.f32 %v3686_v46 }
 0x602   :  { %v9742_v0 = vpop.eup %9741 }
 0x603   :  { %v9744_v23 = vpop.eup %9743  ;;  %v3708_v63 = vmul.f32 %v9742_v0, %v9740_v13 }
 0x604   :  { %v3706_v35 = vmul.f32 %v9744_v23, %v11330_v39 }
 0x606   :  { %v11482_v57 = vadd.f32 %v3708_v63, %v3706_v35  ;;  %v3604_v30 = vpop.f32.mrb[68].mxu0  ;;  %v3645_v14 = vpop.f32.mrb[68].mxu1  ;;  %v13152_v63 = vld [vmem:[#allocation93_spill] sm:$0xff]  ;;  %v13153_v35 = vld [vmem:[#allocation92_spill] sm:$0xff] }
 0x607   :  { %v3605_v48 = vpop.f32.mrb[69].mxu0  ;;  %v3646_v3 = vpop.f32.mrb[69].mxu1  ;;  %v13158_v30 = vld [vmem:[#allocation41_spill] sm:$0xff]  ;;  %v13159_v14 = vld [vmem:[#allocation42_spill] sm:$0xff] }
 0x608   :  { %v3606_v9 = vpop.f32.mrb[70].mxu0  ;;  %v3647_v20 = vpop.f32.mrb[70].mxu1  ;;  %v13162_v48 = vld [vmem:[#allocation99_spill] sm:$0xff]  ;;  %v4347_v3 = vld [vmem:[#allocation13 + $0x68] sm:$0xff] }
 0x609   :  { %v3664_v15 = vadd.f32 %v3606_v9, %v13145_v38  ;;  %v3666_v31 = vadd.f32 %v3647_v20, %v13146_v61  ;;  %v3608_v53 = vpop.f32.mrb[71].mxu0  ;;  %v3649_v40 = vpop.f32.mrb[71].mxu1  ;;  %v4354_v61 = vld [vmem:[#allocation13 + $0xa0] sm:$0xff] }
 0x60a   :  { %v3665_v29 = vadd.f32 %v3608_v53, %v13147_v37  ;;  %v3667_v56 = vadd.f32 %v3649_v40, %v13148_v51  ;;  %v4355_v40 = vld [vmem:[#allocation13 + $0xa8] sm:$0xff] }
 0x60b   :  { %v8955_v25 = vmul.f32 -1.442695, %v3664_v15  ;;  %v4350_v15 = vld [vmem:[#allocation13 + $0x80] sm:$0xff] }
 0x60c   :  { %v8957_v39 = vmul.f32 -1.442695, %v3665_v29  ;;  %v8959_v2 = vmul.f32 -1.442695, %v3667_v56  ;;  %v11557_v53 = vcombine.high %v4350_v15, %v4354_v61  ;;  %v11559_v37 = vcombine.low %v4350_v15, %v4354_v61  ;;  %v4358_v56 = vld [vmem:[#allocation13 + $0xc0] sm:$0xff] }
 0x60d   :  { %9745 = vpow2.f32 %v8955_v25  ;;  %v4362_v25 = vld [vmem:[#allocation13 + $0xe0] sm:$0xff] }
 0x60e   :  { %9747 = vpow2.f32 %v8957_v39  ;;  %v4359_v39 = vld [vmem:[#allocation13 + $0xc8] sm:$0xff] }
 0x60f   :  { %9749 = vpow2.f32 %v8958_v43  ;;  %v11569_v43 = vcombine.high %v4358_v56, %v4362_v25 }
 0x610   :  { %9751 = vpow2.f32 %v8959_v2  ;;  %v4363_v2 = vld [vmem:[#allocation13 + $0xe8] sm:$0xff] }
 0x611   :  { %9753 = vtanh.f32 %v3666_v31  ;;  %v4351_v31 = vld [vmem:[#allocation13 + $0x88] sm:$0xff] }
 0x612   :  { %v11561_v29 = vcombine.low %v4351_v31, %v4355_v40  ;;  %v11563_v51 = vcombine.high %v4351_v31, %v4355_v40 }
 0x617   :  { %v9746_v34 = vpop.eup %9745 }
 0x618   :  { %v9748_v41 = vpop.eup %9747  ;;  %v3675_v22 = vadd.f32 1.0, %v9746_v34  ;;  %v11571_v34 = vcombine.low %v4358_v56, %v4362_v25 }
 0x619   :  { %v3687_v27 = vadd.f32 1.0, %v9748_v41  ;;  %v9750_v18 = vpop.eup %9749  ;;  %v11573_v41 = vcombine.low %v4359_v39, %v4363_v2 }
 0x61a   :  { %9755 = vrcp.f32 %v3675_v22  ;;  %v9752_v52 = vpop.eup %9751  ;;  %v3700_v12 = vadd.f32 1.0, %v9750_v18  ;;  %v11575_v22 = vcombine.high %v4359_v39, %v4363_v2  ;;  %v4370_v18 = vld [vmem:[#allocation13 + $0x120] sm:$0xff]  ;;  %v13163_v2 = vld [vmem:[#allocation58_spill] sm:$0xff] }
 0x61b   :  { %9757 = vrcp.f32 %v3687_v27  ;;  %v9754_v17 = vpop.eup %9753  ;;  %v3701_v36 = vadd.f32 1.0, %v9752_v52  ;;  %v4366_v27 = vld [vmem:[#allocation13 + $0x100] sm:$0xff]  ;;  %v4367_v52 = vld [vmem:[#allocation13 + $0x108] sm:$0xff] }
 0x61c   :  { %9759 = vrcp.f32 %v3700_v12  ;;  %v4371_v12 = vld [vmem:[#allocation13 + $0x128] sm:$0xff] }
 0x61d   :  { %9761 = vtanh.f32 %v11482_v57 }
 0x61e   :  { %9763 = vrcp.f32 %v3701_v36  ;;  %v4374_v36 = vld [vmem:[#allocation13 + $0x140] sm:$0xff] }
 0x624   :  { %v9756_v32 = vpop.eup %9755 }
 0x625   :  { %v9758_v54 = vpop.eup %9757  ;;  %v3709_v59 = vmul.f32 %v9756_v32, %v9754_v17  ;;  %v11581_v17 = vcombine.high %v4366_v27, %v4370_v18  ;;  %v11583_v32 = vcombine.low %v4366_v27, %v4370_v18  ;;  %v13164_v18 = vld [vmem:[#allocation61_spill] sm:$0xff] }
 0x626   :  { %v3707_v28 = vmul.f32 %v9758_v54, %v11338_v16  ;;  %v9760_v42 = vpop.eup %9759  ;;  %v13151_v16 = vld [vmem:[#allocation90_spill] sm:$0xff]  ;;  %v11585_v54 = vcombine.low %v4367_v52, %v4371_v12 }
 0x627   :  { %v9762_v33 = vpop.eup %9761 }
 0x628   :  { %v11490_v47 = vadd.f32 %v3709_v59, %v3707_v28  ;;  %v9764_v11 = vpop.eup %9763  ;;  %v11493_v13 = vmul.f32 %v9762_v33, %v9760_v42  ;;  %v11587_v59 = vcombine.high %v4367_v52, %v4371_v12  ;;  %v4378_v28 = vld [vmem:[#allocation13 + $0x160] sm:$0xff]  ;;  %v4375_v42 = vld [vmem:[#allocation13 + $0x148] sm:$0xff] }
 0x629   :  { %v11593_v33 = vcombine.low %v4374_v36, %v4378_v28 }
 0x62a   :  { %9765 = vtanh.f32 %v11490_v47  ;;  %13149 = vst [vmem:[#allocation100_spill] sm:$0xff] %v11493_v13 }
 0x634   :  { %v9766_v46 = vpop.eup %9765 }
 0x635   :  { %v11495_v0 = vmul.f32 %v9766_v46, %v9764_v11  ;;  %v11595_v11 = vcombine.high %v4374_v36, %v4378_v28  ;;  %v4379_v46 = vld [vmem:[#allocation13 + $0x168] sm:$0xff] }
 0x636   :  { %v13165_v28 = vld [vmem:[#allocation60_spill] sm:$0xff] }
 0x637   :  { %13150 = vst [vmem:[#allocation101_spill] sm:$0xff] %v11495_v0  ;;  %v3718_v23 = vpack.c.bf16 %v11495_v0, %v11493_v13  ;;  %v4373_v13 = vld [vmem:[#allocation13 + $0x138] sm:$0xff]  ;;  %v4376_v0 = vld [vmem:[#allocation13 + $0x150] sm:$0xff] }
 0x639   :  { %4136 = vmatmul.mubr.bf16.vlgmr.msra.gmra.mrb[72].mxu0 %v3718_v23  ;;  %4177 = vmatmul.mubr.bf16.vlgmr.msra.gmra.mrb[72].mxu1 %v3718_v23 }
 0x63a   :  { %4186 = vmatpush1.bf16.msra.mxu0 %v11302_v55  ;;  %4227 = vmatpush1.bf16.msra.mxu1 %v11307_v49  ;;  %v13154_v55 = vld [vmem:[#allocation94_spill] sm:$0xff] }
 0x63b   :  { %4187 = vmatprep.subr.bf16.mxu0 %v11349_v58  ;;  %4228 = vmatprep.subr.bf16.mxu1 %v11351_v60  ;;  %v13155_v49 = vld [vmem:[#allocation38_spill] sm:$0xff]  ;;  %v13156_v58 = vld [vmem:[#allocation39_spill] sm:$0xff]  ;;  %v13157_v60 = vld [vmem:[#allocation40_spill] sm:$0xff] }
 0x63c   :  { %4217 = vmatprep.mubr.bf16.mxu0 %v13021_v21  ;;  %4258 = vmatprep.mubr.bf16.mxu1 %v13021_v21 }
 0x63e   :  { %4188 = vmatpush1.bf16.msra.mxu0 %v11357_v45  ;;  %4229 = vmatpush1.bf16.msra.mxu1 %v11359_v8  ;;  %v13160_v45 = vld [vmem:[#allocation97_spill] sm:$0xff]  ;;  %v13161_v8 = vld [vmem:[#allocation98_spill] sm:$0xff] }
 0x63f   :  { %4189 = vmatprep.subr.bf16.mxu0 %v13151_v16  ;;  %4230 = vmatprep.subr.bf16.mxu1 %v13152_v63  ;;  %v4386_v16 = vld [vmem:[#allocation13 + $0x1a0] sm:$0xff]  ;;  %v11597_v63 = vcombine.low %v4375_v42, %v4379_v46 }
 0x642   :  { %4190 = vmatpush1.bf16.msra.mxu0 %v13153_v35  ;;  %4231 = vmatpush1.bf16.msra.mxu1 %v13154_v55  ;;  %v11599_v35 = vcombine.high %v4375_v42, %v4379_v46  ;;  %v13166_v46 = vld [vmem:[#allocation62_spill] sm:$0xff] }
 0x643   :  { %4191 = vmatprep.subr.bf16.mxu0 %v13155_v49  ;;  %4232 = vmatprep.subr.bf16.mxu1 %v13156_v58  ;;  %v4383_v49 = vld [vmem:[#allocation13 + $0x188] sm:$0xff] }
 0x644   :  { %v4387_v58 = vld [vmem:[#allocation13 + $0x1a8] sm:$0xff] }
 0x646   :  { %4192 = vmatpush1.bf16.msra.mxu0 %v13157_v60  ;;  %4233 = vmatpush1.bf16.msra.mxu1 %v13158_v30  ;;  %v4390_v60 = vld [vmem:[#allocation13 + $0x1c0] sm:$0xff]  ;;  %v11604_v30 = vcombine.high %v4383_v49, %v4387_v58 }
 0x647   :  { %4193 = vmatprep.subr.bf16.mxu0 %v13159_v14  ;;  %4234 = vmatprep.subr.bf16.mxu1 %v13160_v45  ;;  %v4394_v14 = vld [vmem:[#allocation13 + $0x1e0] sm:$0xff]  ;;  %v4391_v45 = vld [vmem:[#allocation13 + $0x1c8] sm:$0xff] }
 0x648   :  { %v11624_v61 = vcombine.low %v4390_v60, %v4394_v14 }
 0x64a   :  { %4194 = vmatpush1.bf16.msra.mxu0 %v11395_v44  ;;  %4235 = vmatpush1.bf16.msra.mxu1 %v11397_v5  ;;  %v4334_v44 = vld [vmem:[#allocation13] sm:$0xff] }
 0x64b   :  { %4195 = vmatprep.subr.bf16.mxu0 %v11401_v50  ;;  %4236 = vmatprep.subr.bf16.mxu1 %v13161_v8  ;;  %v4338_v5 = vld [vmem:[#allocation13 + $0x20] sm:$0xff]  ;;  %v4335_v50 = vld [vmem:[#allocation13 + $0x8] sm:$0xff] }
 0x64c   :  { %v4395_v8 = vld [vmem:[#allocation13 + $0x1e8] sm:$0xff] }
 0x64d   :  { %v11628_v31 = vcombine.low %v4391_v45, %v4395_v8 }
 0x64e   :  { %4196 = vmatpush1.bf16.msra.mxu0 %v13162_v48  ;;  %4237 = vmatpush1.bf16.msra.mxu1 %v11409_v4  ;;  %v11533_v4 = vcombine.high %v4334_v44, %v4338_v5 }
 0x64f   :  { %4197 = vmatprep.subr.bf16.mxu0 %v11413_v24  ;;  %4238 = vmatprep.subr.bf16.mxu1 %v11415_v7  ;;  %v4339_v24 = vld [vmem:[#allocation13 + $0x28] sm:$0xff]  ;;  %v11535_v7 = vcombine.low %v4334_v44, %v4338_v5  ;;  %v4336_v44 = vld [vmem:[#allocation13 + $0x10] sm:$0xff] }
 0x650   :  { %v4340_v5 = vld [vmem:[#allocation13 + $0x30] sm:$0xff] }
 0x651   :  { %v11630_v40 = vcombine.high %v4336_v44, %v4340_v5 }
 0x652   :  { %4198 = vmatpush1.bf16.msra.mxu0 %v11419_v62  ;;  %4239 = vmatpush1.bf16.msra.mxu1 %v11421_v6  ;;  %v11537_v62 = vcombine.low %v4335_v50, %v4339_v24  ;;  %v11539_v6 = vcombine.high %v4335_v50, %v4339_v24  ;;  %v4337_v50 = vld [vmem:[#allocation13 + $0x18] sm:$0xff]  ;;  %v11612_v24 = vcombine.low %v4383_v49, %v4387_v58 }
 0x653   :  { %4199 = vmatprep.subr.bf16.mxu0 %v11425_v10  ;;  %4240 = vmatprep.subr.bf16.mxu1 %v11427_v1  ;;  %v4343_v10 = vld [vmem:[#allocation13 + $0x48] sm:$0xff] }
 0x654   :  { %v11549_v20 = vcombine.low %v4343_v10, %v4347_v3  ;;  %v11551_v38 = vcombine.high %v4343_v10, %v4347_v3  ;;  %v4341_v10 = vld [vmem:[#allocation13 + $0x38] sm:$0xff]  ;;  %v11619_v3 = vcombine.high %v4391_v45, %v4395_v8 }
 0x655   :  { %v11621_v15 = vcombine.low %v4337_v50, %v4341_v10  ;;  %v11633_v56 = vcombine.high %v4337_v50, %v4341_v10 }
 0x656   :  { %4200 = vmatpush1.bf16.msra.mxu0 %v11431_v26  ;;  %4241 = vmatpush1.bf16.msra.mxu1 %v11433_v19  ;;  %v4342_v26 = vld [vmem:[#allocation13 + $0x40] sm:$0xff] }
 0x657   :  { %4718 = vmatprep.subr.bf16.mxu0 %v11533_v4  ;;  %4759 = vmatprep.subr.bf16.mxu1 %v11539_v6  ;;  %v4346_v19 = vld [vmem:[#allocation13 + $0x60] sm:$0xff] }
 0x658   :  { %v11545_v1 = vcombine.high %v4342_v26, %v4346_v19  ;;  %v11547_v9 = vcombine.low %v4342_v26, %v4346_v19  ;;  %v11614_v26 = vcombine.high %v4390_v60, %v4394_v14  ;;  %v11616_v19 = vcombine.low %v4336_v44, %v4340_v5 }
 0x659   :  { %4218 = vmatmul.mubr.bf16.vlgmr.msra.gmra.mrb[76].mxu0 %v3718_v23  ;;  %4259 = vmatmul.mubr.bf16.vlgmr.msra.gmra.mrb[76].mxu1 %v3718_v23  ;;  %v4382_v23 = vld [vmem:[#allocation13 + $0x180] sm:$0xff] }
 0x65a   :  { %4750 = vmatprep.mubr.bf16.mxu0 %v13021_v21  ;;  %4791 = vmatprep.mubr.bf16.mxu1 %v13021_v21  ;;  %v11601_v55 = vcombine.high %v4382_v23, %v4386_v16  ;;  %v11608_v48 = vcombine.low %v4382_v23, %v4386_v16 }
 0x65b   :  { %4719 = vmatpush1.bf16.msra.mxu0 %v11535_v7  ;;  %4760 = vmatpush1.bf16.msra.mxu1 %v11537_v62 }
 0x65c   :  { %4720 = vmatprep.subr.bf16.mxu0 %v11545_v1  ;;  %4761 = vmatprep.subr.bf16.mxu1 %v11551_v38 }
 0x65f   :  { %4721 = vmatpush1.bf16.msra.mxu0 %v11547_v9  ;;  %4762 = vmatpush1.bf16.msra.mxu1 %v11549_v20 }
 0x660   :  { %4722 = vmatprep.subr.bf16.mxu0 %v11557_v53  ;;  %4763 = vmatprep.subr.bf16.mxu1 %v11563_v51 }
 0x663   :  { %4723 = vmatpush1.bf16.msra.mxu0 %v11559_v37  ;;  %4764 = vmatpush1.bf16.msra.mxu1 %v11561_v29 }
 0x664   :  { %4724 = vmatprep.subr.bf16.mxu0 %v11569_v43  ;;  %4765 = vmatprep.subr.bf16.mxu1 %v11575_v22 }
 0x667   :  { %4725 = vmatpush1.bf16.msra.mxu0 %v11571_v34  ;;  %4766 = vmatpush1.bf16.msra.mxu1 %v11573_v41 }
 0x668   :  { %4726 = vmatprep.subr.bf16.mxu0 %v11581_v17  ;;  %4767 = vmatprep.subr.bf16.mxu1 %v11587_v59 }
 0x66b   :  { %4727 = vmatpush1.bf16.msra.mxu0 %v11583_v32  ;;  %4768 = vmatpush1.bf16.msra.mxu1 %v11585_v54 }
 0x66c   :  { %4728 = vmatprep.subr.bf16.mxu0 %v11595_v11  ;;  %4769 = vmatprep.subr.bf16.mxu1 %v11599_v35 }
 0x66f   :  { %4729 = vmatpush1.bf16.msra.mxu0 %v11593_v33  ;;  %4770 = vmatpush1.bf16.msra.mxu1 %v11597_v63 }
 0x670   :  { %4730 = vmatprep.subr.bf16.mxu0 %v11601_v55  ;;  %4771 = vmatprep.subr.bf16.mxu1 %v11604_v30 }
 0x673   :  { %4731 = vmatpush1.bf16.msra.mxu0 %v11608_v48  ;;  %4772 = vmatpush1.bf16.msra.mxu1 %v11612_v24 }
 0x674   :  { %4732 = vmatprep.subr.bf16.mxu0 %v11614_v26  ;;  %4773 = vmatprep.subr.bf16.mxu1 %v11619_v3 }
 0x677   :  { %4733 = vmatpush1.bf16.msra.mxu0 %v11624_v61  ;;  %4774 = vmatpush1.bf16.msra.mxu1 %v11628_v31 }
 0x678   :  { %4800 = vmatprep.subr.bf16.mxu0 %v11630_v40  ;;  %4841 = vmatprep.subr.bf16.mxu1 %v11633_v56 }
 0x70c   :  { %v4137_v25 = vpop.f32.mrb[72].mxu0  ;;  %v4178_v39 = vpop.f32.mrb[72].mxu1 }
 0x70d   :  { %v4271_v27 = vadd.f32 %v4137_v25, %v13163_v2  ;;  %v4273_v52 = vadd.f32 %v4178_v39, %v13164_v18  ;;  %v4139_v12 = vpop.f32.mrb[73].mxu0  ;;  %v4180_v36 = vpop.f32.mrb[73].mxu1 }
 0x70e   :  { %v4272_v42 = vadd.f32 %v4139_v12, %v13165_v28  ;;  %v4274_v23 = vadd.f32 %v4180_v36, %v13166_v46  ;;  %v4141_v16 = vpop.f32.mrb[74].mxu0  ;;  %v4182_v49 = vpop.f32.mrb[74].mxu1 }
 0x70f   :  { %v9024_v58 = vmul.f32 -1.442695, %v4271_v27  ;;  %v4142_v60 = vpop.f32.mrb[75].mxu0  ;;  %v4183_v14 = vpop.f32.mrb[75].mxu1  ;;  %v13167_v49 = vld [vmem:[#allocation79_spill] sm:$0xff] }
 0x710   :  { %v9026_v45 = vmul.f32 -1.442695, %v4272_v42 }
 0x711   :  { %9767 = vpow2.f32 %v9024_v58 }
 0x712   :  { %9769 = vpow2.f32 %v9026_v45 }
 0x713   :  { %9771 = vtanh.f32 %v4273_v52  ;;  %v13168_v52 = vld [vmem:[#allocation81_spill] sm:$0xff] }
 0x71b   :  { %v9768_v8 = vpop.eup %9767 }
 0x71c   :  { %v9770_v44 = vpop.eup %9769  ;;  %v4289_v5 = vadd.f32 1.0, %v9768_v8  ;;  %v13169_v8 = vld [vmem:[#allocation80_spill] sm:$0xff] }
 0x71d   :  { %v4301_v50 = vadd.f32 1.0, %v9770_v44  ;;  %v9772_v10 = vpop.eup %9771 }
 0x71e   :  { %9773 = vrcp.f32 %v4289_v5  ;;  %v13170_v5 = vld [vmem:[#allocation83_spill] sm:$0xff] }
 0x71f   :  { %9775 = vrcp.f32 %v4301_v50 }
 0x728   :  { %v9774_v25 = vpop.eup %9773 }
 0x729   :  { %v9776_v39 = vpop.eup %9775  ;;  %v4323_v2 = vmul.f32 %v9774_v25, %v9772_v10  ;;  %v9028_v25 = vmul.f32 -1.442695, %v4274_v23 }
 0x72a   :  { %v4321_v18 = vmul.f32 %v9776_v39, %v11482_v57 }
 0x72c   :  { %v11644_v12 = vadd.f32 %v4323_v2, %v4321_v18  ;;  %v4219_v27 = vpop.f32.mrb[76].mxu0  ;;  %v4260_v36 = vpop.f32.mrb[76].mxu1 }
 0x72d   :  { %v4220_v28 = vpop.f32.mrb[77].mxu0  ;;  %v4261_v42 = vpop.f32.mrb[77].mxu1 }
 0x72e   :  { %v4221_v46 = vpop.f32.mrb[78].mxu0  ;;  %v4262_v16 = vpop.f32.mrb[78].mxu1 }
 0x72f   :  { %v4279_v58 = vadd.f32 %v4221_v46, %v13167_v49  ;;  %v4281_v60 = vadd.f32 %v4262_v16, %v13168_v52  ;;  %v4223_v14 = vpop.f32.mrb[79].mxu0  ;;  %v4264_v45 = vpop.f32.mrb[79].mxu1 }
 0x730   :  { %v4280_v44 = vadd.f32 %v4223_v14, %v13169_v8  ;;  %v4282_v50 = vadd.f32 %v4264_v45, %v13170_v5  ;;  %v4344_v5 = vld [vmem:[#allocation13 + $0x50] sm:$0xff] }
 0x731   :  { %v9025_v10 = vmul.f32 -1.442695, %v4279_v58 }
 0x732   :  { %v9027_v57 = vmul.f32 -1.442695, %v4280_v44  ;;  %v9029_v39 = vmul.f32 -1.442695, %v4282_v50 }
 0x733   :  { %9777 = vpow2.f32 %v9025_v10  ;;  %v4348_v10 = vld [vmem:[#allocation13 + $0x70] sm:$0xff] }
 0x734   :  { %9779 = vpow2.f32 %v9027_v57  ;;  %v4345_v57 = vld [vmem:[#allocation13 + $0x58] sm:$0xff] }
 0x735   :  { %9781 = vpow2.f32 %v9028_v25  ;;  %v4349_v25 = vld [vmem:[#allocation13 + $0x78] sm:$0xff] }
 0x736   :  { %9783 = vpow2.f32 %v9029_v39 }
 0x737   :  { %9785 = vtanh.f32 %v4281_v60 }
 0x73d   :  { %v9778_v2 = vpop.eup %9777 }
 0x73e   :  { %v9780_v18 = vpop.eup %9779  ;;  %v4290_v27 = vadd.f32 1.0, %v9778_v2 }
 0x73f   :  { %v4302_v36 = vadd.f32 1.0, %v9780_v18  ;;  %v9782_v28 = vpop.eup %9781  ;;  %v11663_v18 = vcombine.high %v4344_v5, %v4348_v10 }
 0x740   :  { %9787 = vrcp.f32 %v4290_v27  ;;  %v9784_v42 = vpop.eup %9783  ;;  %v4315_v16 = vadd.f32 1.0, %v9782_v28  ;;  %v11665_v27 = vcombine.high %v4345_v57, %v4349_v25  ;;  %v4356_v28 = vld [vmem:[#allocation13 + $0xb0] sm:$0xff] }
 0x741   :  { %9789 = vrcp.f32 %v4302_v36  ;;  %v9786_v46 = vpop.eup %9785  ;;  %v4316_v14 = vadd.f32 1.0, %v9784_v42  ;;  %v4352_v36 = vld [vmem:[#allocation13 + $0x90] sm:$0xff]  ;;  %v4353_v42 = vld [vmem:[#allocation13 + $0x98] sm:$0xff] }
 0x742   :  { %9791 = vrcp.f32 %v4315_v16  ;;  %v11671_v16 = vcombine.low %v4344_v5, %v4348_v10 }
 0x743   :  { %9793 = vtanh.f32 %v11644_v12 }
 0x744   :  { %9795 = vrcp.f32 %v4316_v14  ;;  %v4360_v14 = vld [vmem:[#allocation13 + $0xd0] sm:$0xff] }
 0x74a   :  { %v9788_v49 = vpop.eup %9787 }
 0x74b   :  { %v9790_v58 = vpop.eup %9789  ;;  %v4324_v52 = vmul.f32 %v9788_v49, %v9786_v46  ;;  %v4357_v46 = vld [vmem:[#allocation13 + $0xb8] sm:$0xff]  ;;  %v11673_v49 = vcombine.low %v4345_v57, %v4349_v25  ;;  %v4368_v57 = vld [vmem:[#allocation13 + $0x110] sm:$0xff] }
 0x74c   :  { %v4322_v23 = vmul.f32 %v9790_v58, %v11490_v47  ;;  %v9792_v60 = vpop.eup %9791  ;;  %v11677_v58 = vcombine.high %v4352_v36, %v4356_v28  ;;  %v11687_v5 = vcombine.low %v4353_v42, %v4357_v46  ;;  %v4372_v25 = vld [vmem:[#allocation13 + $0x130] sm:$0xff] }
 0x74d   :  { %v9794_v8 = vpop.eup %9793 }
 0x74e   :  { %v11652_v45 = vadd.f32 %v4324_v52, %v4322_v23  ;;  %v9796_v44 = vpop.eup %9795  ;;  %v11655_v39 = vmul.f32 %v9794_v8, %v9792_v60  ;;  %13173 = vst [vmem:[#allocation50_spill] sm:$0xff] %v11677_v58  ;;  %v11679_v52 = vcombine.high %v4353_v42, %v4357_v46  ;;  %v4364_v23 = vld [vmem:[#allocation13 + $0xf0] sm:$0xff]  ;;  %v4361_v60 = vld [vmem:[#allocation13 + $0xd8] sm:$0xff]  ;;  %13176 = vst [vmem:[#allocation54_spill] sm:$0xff] %v11687_v5 }
 0x74f   :  { %v4365_v8 = vld [vmem:[#allocation13 + $0xf8] sm:$0xff]  ;;  %v11703_v42 = vcombine.high %v4368_v57, %v4372_v25 }
 0x750   :  { %9797 = vtanh.f32 %v11652_v45  ;;  %13171 = vst [vmem:[#allocation102_spill] sm:$0xff] %v11655_v39  ;;  %13174 = vst [vmem:[#allocation53_spill] sm:$0xff] %v11679_v52  ;;  %v11693_v10 = vcombine.high %v4361_v60, %v4365_v8 }
 0x751   :  { %13181 = vst [vmem:[#allocation55_spill] sm:$0xff] %v11703_v42 }
 0x752   :  { %13178 = vst [vmem:[#allocation89_spill] sm:$0xff] %v11693_v10 }
 0x75a   :  { %v9798_v50 = vpop.eup %9797 }
 0x75b   :  { %v11657_v2 = vmul.f32 %v9798_v50, %v9796_v44  ;;  %v11685_v44 = vcombine.low %v4352_v36, %v4356_v28  ;;  %v11691_v50 = vcombine.high %v4360_v14, %v4364_v23  ;;  %v11697_v36 = vcombine.low %v4360_v14, %v4364_v23 }
 0x75c   :  { %v11699_v28 = vcombine.low %v4361_v60, %v4365_v8  ;;  %v11709_v14 = vcombine.low %v4368_v57, %v4372_v25 }
 0x75d   :  { %13172 = vst [vmem:[#allocation103_spill] sm:$0xff] %v11657_v2  ;;  %v11661_v47 = vpack.c.bf16 %v11657_v2, %v11655_v39  ;;  %13175 = vst [vmem:[#allocation52_spill] sm:$0xff] %v11685_v44  ;;  %v4369_v39 = vld [vmem:[#allocation13 + $0x118] sm:$0xff]  ;;  %v4380_v2 = vld [vmem:[#allocation13 + $0x170] sm:$0xff] }
 0x75e   :  { %13177 = vst [vmem:[#allocation87_spill] sm:$0xff] %v11691_v50  ;;  %13179 = vst [vmem:[#allocation88_spill] sm:$0xff] %v11697_v36  ;;  %v11705_v46 = vcombine.high %v4369_v39, %v4373_v13  ;;  %v11711_v23 = vcombine.low %v4369_v39, %v4373_v13  ;;  %v11715_v60 = vcombine.high %v4376_v0, %v4380_v2 }
 0x75f   :  { %4751 = vmatmul.mubr.bf16.vlgmr.msra.gmra.mrb[80].mxu0 %v11661_v47  ;;  %4792 = vmatmul.mubr.bf16.vlgmr.msra.gmra.mrb[80].mxu1 %v11661_v47  ;;  %13180 = vst [vmem:[#allocation91_spill] sm:$0xff] %v11699_v28  ;;  %v11721_v57 = vcombine.low %v4376_v0, %v4380_v2 }
 0x760   :  { %4801 = vmatpush1.bf16.msra.mxu0 %v11616_v19  ;;  %4842 = vmatpush1.bf16.msra.mxu1 %v11621_v15  ;;  %13182 = vst [vmem:[#allocation57_spill] sm:$0xff] %v11705_v46 }
 0x761   :  { %4802 = vmatprep.subr.bf16.mxu0 %v11663_v18  ;;  %4843 = vmatprep.subr.bf16.mxu1 %v11665_v27  ;;  %13184 = vst [vmem:[#allocation59_spill] sm:$0xff] %v11721_v57 }
 0x762   :  { %4832 = vmatprep.mubr.bf16.mxu0 %v13021_v21  ;;  %4873 = vmatprep.mubr.bf16.mxu1 %v13021_v21 }
 0x764   :  { %4803 = vmatpush1.bf16.msra.mxu0 %v11671_v16  ;;  %4844 = vmatpush1.bf16.msra.mxu1 %v11673_v49 }
 0x765   :  { %4804 = vmatprep.subr.bf16.mxu0 %v11677_v58  ;;  %4845 = vmatprep.subr.bf16.mxu1 %v11679_v52  ;;  %v4377_v52 = vld [vmem:[#allocation13 + $0x158] sm:$0xff] }
 0x766   :  { %v4381_v58 = vld [vmem:[#allocation13 + $0x178] sm:$0xff] }
 0x767   :  { %v11717_v8 = vcombine.high %v4377_v52, %v4381_v58  ;;  %v11723_v13 = vcombine.low %v4377_v52, %v4381_v58 }
 0x768   :  { %4805 = vmatpush1.bf16.msra.mxu0 %v11685_v44  ;;  %4846 = vmatpush1.bf16.msra.mxu1 %v11687_v5  ;;  %v4385_v5 = vld [vmem:[#allocation13 + $0x198] sm:$0xff] }
 0x769   :  { %4806 = vmatprep.subr.bf16.mxu0 %v11691_v50  ;;  %4847 = vmatprep.subr.bf16.mxu1 %v11693_v10  ;;  %13183 = vst [vmem:[#allocation56_spill] sm:$0xff] %v11717_v8  ;;  %v4384_v10 = vld [vmem:[#allocation13 + $0x190] sm:$0xff]  ;;  %v4389_v44 = vld [vmem:[#allocation13 + $0x1b8] sm:$0xff] }
 0x76a   :  { %v4388_v50 = vld [vmem:[#allocation13 + $0x1b0] sm:$0xff]  ;;  %v11729_v25 = vcombine.high %v4385_v5, %v4389_v44  ;;  %v11735_v2 = vcombine.low %v4385_v5, %v4389_v44 }
 0x76b   :  { %v11727_v39 = vcombine.high %v4384_v10, %v4388_v50  ;;  %v11733_v0 = vcombine.low %v4384_v10, %v4388_v50  ;;  %v13190_v5 = vld [vmem:[#allocation77_spill] sm:$0xff] }
 0x76c   :  { %4807 = vmatpush1.bf16.msra.mxu0 %v11697_v36  ;;  %4848 = vmatpush1.bf16.msra.mxu1 %v11699_v28  ;;  %v4393_v28 = vld [vmem:[#allocation13 + $0x1d8] sm:$0xff] }
 0x76d   :  { %4808 = vmatprep.subr.bf16.mxu0 %v11703_v42  ;;  %4849 = vmatprep.subr.bf16.mxu1 %v11705_v46  ;;  %v4392_v46 = vld [vmem:[#allocation13 + $0x1d0] sm:$0xff]  ;;  %v4397_v36 = vld [vmem:[#allocation13 + $0x1f8] sm:$0xff] }
 0x76e   :  { %v4396_v42 = vld [vmem:[#allocation13 + $0x1f0] sm:$0xff]  ;;  %v11741_v52 = vcombine.high %v4393_v28, %v4397_v36 }
 0x76f   :  { %v11739_v58 = vcombine.high %v4392_v46, %v4396_v42 }
 0x770   :  { %4809 = vmatpush1.bf16.msra.mxu0 %v11709_v14  ;;  %4850 = vmatpush1.bf16.msra.mxu1 %v11711_v23 }
 0x771   :  { %4810 = vmatprep.subr.bf16.mxu0 %v11715_v60  ;;  %4851 = vmatprep.subr.bf16.mxu1 %v11717_v8  ;;  %v11745_v8 = vcombine.low %v4392_v46, %v4396_v42  ;;  %v13192_v46 = vld [vmem:[#allocation78_spill] sm:$0xff] }
 0x774   :  { %4811 = vmatpush1.bf16.msra.mxu0 %v11721_v57  ;;  %4852 = vmatpush1.bf16.msra.mxu1 %v11723_v13  ;;  %v11747_v57 = vcombine.low %v4393_v28, %v4397_v36  ;;  %v13191_v28 = vld [vmem:[#allocation76_spill] sm:$0xff] }
 0x775   :  { %4812 = vmatprep.subr.bf16.mxu0 %v11727_v39  ;;  %4853 = vmatprep.subr.bf16.mxu1 %v11729_v25 }
 0x778   :  { %4813 = vmatpush1.bf16.msra.mxu0 %v11733_v0  ;;  %4854 = vmatpush1.bf16.msra.mxu1 %v11735_v2 }
 0x779   :  { %4814 = vmatprep.subr.bf16.mxu0 %v11739_v58  ;;  %4855 = vmatprep.subr.bf16.mxu1 %v11741_v52 }
 0x77c   :  { %4815 = vmatpush1.bf16.msra.mxu0 %v11745_v8  ;;  %4856 = vmatpush1.bf16.msra.mxu1 %v11747_v57 }
 0x77d   :  { %5333 = vmatprep.subr.bf16.mxu0 %v11533_v4  ;;  %5374 = vmatprep.subr.bf16.mxu1 %v11539_v6 }
 0x77f   :  { %4833 = vmatmul.mubr.bf16.vlgmr.msra.gmra.mrb[84].mxu0 %v11661_v47  ;;  %4874 = vmatmul.mubr.bf16.vlgmr.msra.gmra.mrb[84].mxu1 %v11661_v47  ;;  %v13189_v47 = vld [vmem:[#allocation74_spill] sm:$0xff] }
 0x780   :  { %5334 = vmatpush1.bf16.msra.mxu0 %v11535_v7  ;;  %5375 = vmatpush1.bf16.msra.mxu1 %v11537_v62  ;;  %v13185_v62 = vld [vmem:[#allocation63_spill] sm:$0xff] }
 0x781   :  { %5335 = vmatprep.subr.bf16.mxu0 %v11545_v1  ;;  %5376 = vmatprep.subr.bf16.mxu1 %v11551_v38  ;;  %v13186_v1 = vld [vmem:[#allocation65_spill] sm:$0xff] }
 0x782   :  { %5365 = vmatprep.mubr.bf16.mxu0 %v13021_v21  ;;  %5406 = vmatprep.mubr.bf16.mxu1 %v13021_v21 }
 0x784   :  { %5336 = vmatpush1.bf16.msra.mxu0 %v11547_v9  ;;  %5377 = vmatpush1.bf16.msra.mxu1 %v11549_v20 }
 0x785   :  { %5337 = vmatprep.subr.bf16.mxu0 %v11557_v53  ;;  %5378 = vmatprep.subr.bf16.mxu1 %v11563_v51  ;;  %v13187_v53 = vld [vmem:[#allocation64_spill] sm:$0xff] }
 0x788   :  { %5338 = vmatpush1.bf16.msra.mxu0 %v11559_v37  ;;  %5379 = vmatpush1.bf16.msra.mxu1 %v11561_v29  ;;  %v13188_v29 = vld [vmem:[#allocation67_spill] sm:$0xff] }
 0x789   :  { %5339 = vmatprep.subr.bf16.mxu0 %v11569_v43  ;;  %5380 = vmatprep.subr.bf16.mxu1 %v11575_v22 }
 0x78c   :  { %5340 = vmatpush1.bf16.msra.mxu0 %v11571_v34  ;;  %5381 = vmatpush1.bf16.msra.mxu1 %v11573_v41 }
 0x78d   :  { %5341 = vmatprep.subr.bf16.mxu0 %v11581_v17  ;;  %5382 = vmatprep.subr.bf16.mxu1 %v11587_v59 }
 0x790   :  { %5342 = vmatpush1.bf16.msra.mxu0 %v11583_v32  ;;  %5383 = vmatpush1.bf16.msra.mxu1 %v11585_v54 }
 0x791   :  { %5343 = vmatprep.subr.bf16.mxu0 %v11595_v11  ;;  %5384 = vmatprep.subr.bf16.mxu1 %v11599_v35 }
 0x794   :  { %5344 = vmatpush1.bf16.msra.mxu0 %v11593_v33  ;;  %5385 = vmatpush1.bf16.msra.mxu1 %v11597_v63 }
 0x795   :  { %5345 = vmatprep.subr.bf16.mxu0 %v11601_v55  ;;  %5386 = vmatprep.subr.bf16.mxu1 %v11604_v30 }
 0x798   :  { %5346 = vmatpush1.bf16.msra.mxu0 %v11608_v48  ;;  %5387 = vmatpush1.bf16.msra.mxu1 %v11612_v24 }
 0x799   :  { %5347 = vmatprep.subr.bf16.mxu0 %v11614_v26  ;;  %5388 = vmatprep.subr.bf16.mxu1 %v11619_v3 }
 0x79c   :  { %5348 = vmatpush1.bf16.msra.mxu0 %v11624_v61  ;;  %5389 = vmatpush1.bf16.msra.mxu1 %v11628_v31 }
 0x79d   :  { %5415 = vmatprep.subr.bf16.mxu0 %v11630_v40  ;;  %5456 = vmatprep.subr.bf16.mxu1 %v11633_v56 }
 0x832   :  { %v4752_v4 = vpop.f32.mrb[80].mxu0  ;;  %v4793_v7 = vpop.f32.mrb[80].mxu1 }
 0x833   :  { %v4886_v6 = vadd.f32 %v4752_v4, %v13185_v62  ;;  %v4888_v9 = vadd.f32 %v4793_v7, %v13186_v1  ;;  %v4754_v20 = vpop.f32.mrb[81].mxu0  ;;  %v4795_v38 = vpop.f32.mrb[81].mxu1 }
 0x834   :  { %v4887_v37 = vadd.f32 %v4754_v20, %v13187_v53  ;;  %v4889_v51 = vadd.f32 %v4795_v38, %v13188_v29  ;;  %v4756_v43 = vpop.f32.mrb[82].mxu0  ;;  %v4797_v34 = vpop.f32.mrb[82].mxu1 }
 0x835   :  { %v9094_v41 = vmul.f32 -1.442695, %v4886_v6  ;;  %v4757_v22 = vpop.f32.mrb[83].mxu0  ;;  %v4798_v17 = vpop.f32.mrb[83].mxu1 }
 0x836   :  { %v9096_v32 = vmul.f32 -1.442695, %v4887_v37  ;;  %v9098_v62 = vmul.f32 -1.442695, %v4889_v51 }
 0x837   :  { %9799 = vpow2.f32 %v9094_v41 }
 0x838   :  { %9801 = vpow2.f32 %v9096_v32 }
 0x839   :  { %9803 = vtanh.f32 %v4888_v9 }
 0x841   :  { %v9800_v54 = vpop.eup %9799 }
 0x842   :  { %v9802_v59 = vpop.eup %9801  ;;  %v4904_v33 = vadd.f32 1.0, %v9800_v54 }
 0x843   :  { %v4916_v11 = vadd.f32 1.0, %v9802_v59  ;;  %v9804_v63 = vpop.eup %9803 }
 0x844   :  { %9805 = vrcp.f32 %v4904_v33 }
 0x845   :  { %9807 = vrcp.f32 %v4916_v11 }
 0x84e   :  { %v9806_v35 = vpop.eup %9805 }
 0x84f   :  { %v9808_v55 = vpop.eup %9807  ;;  %v4938_v30 = vmul.f32 %v9806_v35, %v9804_v63 }
 0x850   :  { %v4936_v48 = vmul.f32 %v9808_v55, %v11644_v12 }
 0x852   :  { %v11796_v24 = vadd.f32 %v4938_v30, %v4936_v48  ;;  %v4834_v26 = vpop.f32.mrb[84].mxu0  ;;  %v4875_v3 = vpop.f32.mrb[84].mxu1  ;;  %v13194_v30 = vld [vmem:[#allocation53_spill] sm:$0xff]  ;;  %v13195_v48 = vld [vmem:[#allocation52_spill] sm:$0xff] }
 0x853   :  { %v4835_v61 = vpop.f32.mrb[85].mxu0  ;;  %v4876_v31 = vpop.f32.mrb[85].mxu1  ;;  %v13200_v26 = vld [vmem:[#allocation91_spill] sm:$0xff] }
 0x854   :  { %v4836_v40 = vpop.f32.mrb[86].mxu0  ;;  %v4877_v56 = vpop.f32.mrb[86].mxu1  ;;  %v13201_v3 = vld [vmem:[#allocation55_spill] sm:$0xff] }
 0x855   :  { %v4894_v44 = vadd.f32 %v4836_v40, %v13189_v47  ;;  %v4896_v50 = vadd.f32 %v4877_v56, %v13190_v5  ;;  %v4838_v10 = vpop.f32.mrb[87].mxu0  ;;  %v4879_v36 = vpop.f32.mrb[87].mxu1  ;;  %v13204_v61 = vld [vmem:[#allocation59_spill] sm:$0xff] }
 0x856   :  { %v4895_v42 = vadd.f32 %v4838_v10, %v13191_v28  ;;  %v4897_v4 = vadd.f32 %v4879_v36, %v13192_v46 }
 0x857   :  { %v9095_v7 = vmul.f32 -1.442695, %v4894_v44 }
 0x858   :  { %v9097_v12 = vmul.f32 -1.442695, %v4895_v42  ;;  %v9099_v6 = vmul.f32 -1.442695, %v4897_v4 }
 0x859   :  { %9809 = vpow2.f32 %v9095_v7 }
 0x85a   :  { %9811 = vpow2.f32 %v9097_v12 }
 0x85b   :  { %9813 = vpow2.f32 %v9098_v62 }
 0x85c   :  { %9815 = vpow2.f32 %v9099_v6 }
 0x85d   :  { %9817 = vtanh.f32 %v4896_v50 }
 0x863   :  { %v9810_v1 = vpop.eup %9809 }
 0x864   :  { %v9812_v9 = vpop.eup %9811  ;;  %v4905_v20 = vadd.f32 1.0, %v9810_v1 }
 0x865   :  { %v4917_v38 = vadd.f32 1.0, %v9812_v9  ;;  %v9814_v53 = vpop.eup %9813 }
 0x866   :  { %9819 = vrcp.f32 %v4905_v20  ;;  %v9816_v37 = vpop.eup %9815  ;;  %v4930_v43 = vadd.f32 1.0, %v9814_v53 }
 0x867   :  { %9821 = vrcp.f32 %v4917_v38  ;;  %v9818_v29 = vpop.eup %9817  ;;  %v4931_v17 = vadd.f32 1.0, %v9816_v37 }
 0x868   :  { %9823 = vrcp.f32 %v4930_v43 }
 0x869   :  { %9825 = vtanh.f32 %v11796_v24 }
 0x86a   :  { %9827 = vrcp.f32 %v4931_v17 }
 0x870   :  { %v9820_v34 = vpop.eup %9819 }
 0x871   :  { %v9822_v41 = vpop.eup %9821  ;;  %v4939_v22 = vmul.f32 %v9820_v34, %v9818_v29 }
 0x872   :  { %v4937_v51 = vmul.f32 %v9822_v41, %v11652_v45  ;;  %v9824_v54 = vpop.eup %9823  ;;  %v13193_v45 = vld [vmem:[#allocation50_spill] sm:$0xff] }
 0x873   :  { %v9826_v59 = vpop.eup %9825 }
 0x874   :  { %v11804_v32 = vadd.f32 %v4939_v22, %v4937_v51  ;;  %v9828_v33 = vpop.eup %9827  ;;  %v11807_v63 = vmul.f32 %v9826_v59, %v9824_v54 }
 0x876   :  { %9829 = vtanh.f32 %v11804_v32 }
 0x880   :  { %v9830_v11 = vpop.eup %9829 }
 0x881   :  { %v11809_v35 = vmul.f32 %v9830_v11, %v9828_v33 }
 0x883   :  { %v4948_v55 = vpack.c.bf16 %v11809_v35, %v11807_v63 }
 0x885   :  { %5366 = vmatmul.mubr.bf16.vlgmr.msra.gmra.mrb[88].mxu0 %v4948_v55  ;;  %5407 = vmatmul.mubr.bf16.vlgmr.msra.gmra.mrb[88].mxu1 %v4948_v55 }
 0x886   :  { %5416 = vmatpush1.bf16.msra.mxu0 %v11616_v19  ;;  %5457 = vmatpush1.bf16.msra.mxu1 %v11621_v15  ;;  %v13196_v19 = vld [vmem:[#allocation54_spill] sm:$0xff]  ;;  %v13197_v15 = vld [vmem:[#allocation87_spill] sm:$0xff] }
 0x887   :  { %5417 = vmatprep.subr.bf16.mxu0 %v11663_v18  ;;  %5458 = vmatprep.subr.bf16.mxu1 %v11665_v27  ;;  %v13198_v18 = vld [vmem:[#allocation89_spill] sm:$0xff]  ;;  %v13199_v27 = vld [vmem:[#allocation88_spill] sm:$0xff] }
 0x888   :  { %5447 = vmatprep.mubr.bf16.mxu0 %v13021_v21  ;;  %5488 = vmatprep.mubr.bf16.mxu1 %v13021_v21 }
 0x88a   :  { %5418 = vmatpush1.bf16.msra.mxu0 %v11671_v16  ;;  %5459 = vmatpush1.bf16.msra.mxu1 %v11673_v49  ;;  %v13202_v16 = vld [vmem:[#allocation57_spill] sm:$0xff]  ;;  %v13203_v49 = vld [vmem:[#allocation56_spill] sm:$0xff] }
 0x88b   :  { %5419 = vmatprep.subr.bf16.mxu0 %v13193_v45  ;;  %5460 = vmatprep.subr.bf16.mxu1 %v13194_v30 }
 0x88e   :  { %5420 = vmatpush1.bf16.msra.mxu0 %v13195_v48  ;;  %5461 = vmatpush1.bf16.msra.mxu1 %v13196_v19 }
 0x88f   :  { %5421 = vmatprep.subr.bf16.mxu0 %v13197_v15  ;;  %5462 = vmatprep.subr.bf16.mxu1 %v13198_v18 }
 0x892   :  { %5422 = vmatpush1.bf16.msra.mxu0 %v13199_v27  ;;  %5463 = vmatpush1.bf16.msra.mxu1 %v13200_v26 }
 0x893   :  { %5423 = vmatprep.subr.bf16.mxu0 %v13201_v3  ;;  %5464 = vmatprep.subr.bf16.mxu1 %v13202_v16 }
 0x896   :  { %5424 = vmatpush1.bf16.msra.mxu0 %v11709_v14  ;;  %5465 = vmatpush1.bf16.msra.mxu1 %v11711_v23 }
 0x897   :  { %5425 = vmatprep.subr.bf16.mxu0 %v11715_v60  ;;  %5466 = vmatprep.subr.bf16.mxu1 %v13203_v49 }
 0x89a   :  { %5426 = vmatpush1.bf16.msra.mxu0 %v13204_v61  ;;  %5467 = vmatpush1.bf16.msra.mxu1 %v11723_v13 }
 0x89b   :  { %5427 = vmatprep.subr.bf16.mxu0 %v11727_v39  ;;  %5468 = vmatprep.subr.bf16.mxu1 %v11729_v25 }
 0x89e   :  { %5428 = vmatpush1.bf16.msra.mxu0 %v11733_v0  ;;  %5469 = vmatpush1.bf16.msra.mxu1 %v11735_v2 }
 0x89f   :  { %5429 = vmatprep.subr.bf16.mxu0 %v11739_v58  ;;  %5470 = vmatprep.subr.bf16.mxu1 %v11741_v52 }
 0x8a2   :  { %5430 = vmatpush1.bf16.msra.mxu0 %v11745_v8  ;;  %5471 = vmatpush1.bf16.msra.mxu1 %v11747_v57 }
 0x8a5   :  { %5448 = vmatmul.mubr.bf16.vlgmr.msra.gmra.mrb[92].mxu0 %v4948_v55  ;;  %5489 = vmatmul.mubr.bf16.vlgmr.msra.gmra.mrb[92].mxu1 %v4948_v55 }
 0x8a6   :  { %10086 = shalt.err (!%p10083_p10)  }
 0x8a7   :  { %s10087_s7 = scalar_lea.vmem %s158_s8, 18432  ;;  %p10092_p12 = scmp.lt.s32.totalorder %s158_s8, %s158_s8 }
 0x8a8   :  { %p10088_p11 = scmp.ne.s32.totalorder %s158_s8, %s10087_s7  ;;  %p10093_p13 = scmp.lt.s32.totalorder %s10087_s7, %s10087_s7 }
 0x8aa   :  { %p10094_p0 = por %p10093_p13, %p10092_p12 }
 0x8ac   :  { %p10095_p1 = pnand %p10094_p0, %p10088_p11 }
 0x8ae   :  { %10098 = shalt.err (!%p10095_p1)  }
 0x8af   :  { %160 = dma.hbm_to_vmem [thread:$0]  %s12944_s9, 18432, %s158_s8, [#allocation7 + $0x3] }
 0x8b0   :  { %s10099_s21 = scalar_lea.hbm %s12945_s10, 9216 }
 0x8b1   :  { %p10100_p2 = scmp.ne.s32.totalorder %s12945_s10, %s10099_s21  ;;  %p10103_p3 = scmp.lt.u32.totalorder %s10099_s21, %s12945_s10 }
 0x8b3   :  { %p10105_p4 = pnand %p10103_p3, %p10100_p2 }
 0x8b5   :  { %10108 = shalt.err (!%p10105_p4)  }
 0x8b6   :  { %s10109_s20 = scalar_lea.vmem %s170_s25, 9216  ;;  %p10114_p6 = scmp.lt.s32.totalorder %s170_s25, %s170_s25 }
 0x8b7   :  { %p10110_p5 = scmp.ne.s32.totalorder %s170_s25, %s10109_s20  ;;  %p10115_p7 = scmp.lt.s32.totalorder %s10109_s20, %s10109_s20 }
 0x8b9   :  { %p10116_p8 = por %p10115_p7, %p10114_p6 }
 0x8bb   :  { %p10117_p9 = pnand %p10116_p8, %p10110_p5 }
 0x8bd   :  { %10120 = shalt.err (!%p10117_p9)  }
 0x8be   :  { %172 = dma.hbm_to_vmem [thread:$0]  %s12945_s10, 9216, %s170_s25, [#allocation7 + $0x4]  ;;  %v13205_v60 = vld [vmem:[#allocation66_spill] sm:$0xff]  ;;  %v13206_v57 = vld [vmem:[#allocation69_spill] sm:$0xff]  ;;  %v13207_v0 = vld [vmem:[#allocation68_spill] sm:$0xff] }
 0x8bf   :  { %v13208_v58 = vld [vmem:[#allocation70_spill] sm:$0xff]  ;;  %v13209_v34 = vld [vmem:[#allocation71_spill] sm:$0xff]  ;;  %v13210_v22 = vld [vmem:[#allocation73_spill] sm:$0xff] }
 0x8c0   :  { %v13211_v59 = vld [vmem:[#allocation72_spill] sm:$0xff]  ;;  %v13212_v11 = vld [vmem:[#allocation75_spill] sm:$0xff] }
 0x958   :  { %v5367_v14 = vpop.f32.mrb[88].mxu0  ;;  %v5408_v23 = vpop.f32.mrb[88].mxu1 }
 0x959   :  { %v5501_v8 = vadd.f32 %v5367_v14, %v13205_v60  ;;  %v5503_v13 = vadd.f32 %v5408_v23, %v13206_v57  ;;  %v5369_v39 = vpop.f32.mrb[89].mxu0  ;;  %v5410_v25 = vpop.f32.mrb[89].mxu1 }
 0x95a   :  { %v5502_v2 = vadd.f32 %v5369_v39, %v13207_v0  ;;  %v5504_v52 = vadd.f32 %v5410_v25, %v13208_v58  ;;  %v5371_v31 = vpop.f32.mrb[90].mxu0  ;;  %v5412_v40 = vpop.f32.mrb[90].mxu1 }
 0x95b   :  { %v9164_v56 = vmul.f32 -1.442695, %v5501_v8  ;;  %v5372_v47 = vpop.f32.mrb[91].mxu0  ;;  %v5413_v44 = vpop.f32.mrb[91].mxu1 }
 0x95c   :  { %v9166_v5 = vmul.f32 -1.442695, %v5502_v2  ;;  %v9168_v50 = vmul.f32 -1.442695, %v5504_v52 }
 0x95d   :  { %9831 = vpow2.f32 %v9164_v56 }
 0x95e   :  { %9833 = vpow2.f32 %v9166_v5 }
 0x95f   :  { %9835 = vpow2.f32 %v9168_v50 }
 0x960   :  { %9837 = vtanh.f32 %v5503_v13 }
 0x967   :  { %v9832_v10 = vpop.eup %9831 }
 0x968   :  { %v9834_v36 = vpop.eup %9833  ;;  %v5519_v28 = vadd.f32 1.0, %v9832_v10 }
 0x969   :  { %v5531_v42 = vadd.f32 1.0, %v9834_v36  ;;  %v9836_v46 = vpop.eup %9835 }
 0x96a   :  { %9839 = vrcp.f32 %v5519_v28  ;;  %v9838_v4 = vpop.eup %9837  ;;  %v5545_v6 = vadd.f32 1.0, %v9836_v46 }
 0x96b   :  { %9841 = vrcp.f32 %v5531_v42 }
 0x96c   :  { %9843 = vrcp.f32 %v5545_v6 }
 0x974   :  { %v9840_v7 = vpop.eup %9839 }
 0x975   :  { %v9842_v12 = vpop.eup %9841  ;;  %v5553_v62 = vmul.f32 %v9840_v7, %v9838_v4 }
 0x976   :  { %v5551_v1 = vmul.f32 %v9842_v12, %v11796_v24  ;;  %v9844_v30 = vpop.eup %9843 }
 0x978   :  { %v5555_v9 = vadd.f32 %v5553_v62, %v5551_v1  ;;  %v5449_v20 = vpop.f32.mrb[92].mxu0  ;;  %v5490_v38 = vpop.f32.mrb[92].mxu1 }
 0x979   :  { %v5450_v53 = vpop.f32.mrb[93].mxu0  ;;  %v5491_v37 = vpop.f32.mrb[93].mxu1 }
 0x97a   :  { %9845 = vtanh.f32 %v5555_v9  ;;  %v5451_v29 = vpop.f32.mrb[94].mxu0  ;;  %v5492_v43 = vpop.f32.mrb[94].mxu1 }
 0x97b   :  { %v5509_v41 = vadd.f32 %v5451_v29, %v13209_v34  ;;  %v5511_v17 = vadd.f32 %v5492_v43, %v13210_v22  ;;  %v5453_v51 = vpop.f32.mrb[95].mxu0  ;;  %v5494_v54 = vpop.f32.mrb[95].mxu1 }
 0x97c   :  { %v5510_v33 = vadd.f32 %v5453_v51, %v13211_v59  ;;  %v5512_v55 = vadd.f32 %v5494_v54, %v13212_v11 }
 0x97d   :  { %v9165_v24 = vmul.f32 -1.442695, %v5509_v41 }
 0x97e   :  { %v9167_v45 = vmul.f32 -1.442695, %v5510_v33  ;;  %v9169_v15 = vmul.f32 -1.442695, %v5512_v55 }
 0x97f   :  { %9847 = vpow2.f32 %v9165_v24 }
 0x980   :  { %9849 = vpow2.f32 %v9167_v45 }
 0x981   :  { %9851 = vpow2.f32 %v9169_v15 }
 0x982   :  { %9853 = vtanh.f32 %v5511_v17 }
 0x984   :  { %v9846_v48 = vpop.eup %9845 }
 0x985   :  { %v11878_v19 = vmul.f32 %v9846_v48, %v9844_v30 }
 0x987   :  { %13213 = vst [vmem:[#allocation82_spill] sm:$0xff] %v11878_v19 }
 0x989   :  { %v9848_v18 = vpop.eup %9847 }
 0x98a   :  { %v9850_v27 = vpop.eup %9849  ;;  %v5520_v26 = vadd.f32 1.0, %v9848_v18 }
 0x98b   :  { %v5532_v3 = vadd.f32 1.0, %v9850_v27  ;;  %v9852_v16 = vpop.eup %9851 }
 0x98c   :  { %9855 = vrcp.f32 %v5520_v26  ;;  %v9854_v49 = vpop.eup %9853  ;;  %v5546_v60 = vadd.f32 1.0, %v9852_v16 }
 0x98d   :  { %9857 = vrcp.f32 %v5532_v3 }
 0x98e   :  { %9859 = vrcp.f32 %v5546_v60 }
 0x996   :  { %v9856_v61 = vpop.eup %9855 }
 0x997   :  { %v9858_v14 = vpop.eup %9857  ;;  %v5554_v23 = vmul.f32 %v9856_v61, %v9854_v49 }
 0x998   :  { %v5552_v8 = vmul.f32 %v9858_v14, %v11804_v32  ;;  %v9860_v13 = vpop.eup %9859 }
 0x99a   :  { %v5556_v57 = vadd.f32 %v5554_v23, %v5552_v8 }
 0x99c   :  { %9861 = vtanh.f32 %v5556_v57 }
 0x9a6   :  { %v9862_v39 = vpop.eup %9861 }
 0x9a7   :  { %v5560_v25 = vmul.f32 %v9862_v39, %v9860_v13 }
 0x9a8   :  { %10145 = dma.done.wait [#allocation7], 8192 }
 0x9a9   :  { %10146 = vsyncadd [#allocation7], 4294959104 }
 0x9aa   :  { %10147 = dma.done.wait [#allocation7 + $0x1], 4096 }
 0x9ab   :  { %10148 = vsyncadd [#allocation7 + $0x1], 4294963200  ;;  %v5588_v0 = vpack.c.bf16 %v11809_v35, %v5560_v25  ;;  %v5596_v2 = vld [vmem:[#allocation2 + $0x8] sm:$0xff]  ;;  %v5598_v58 = vld [vmem:[#allocation2 + $0x18] sm:$0xff] }
 0x9ac   :  { %v5595_v52 = vld [vmem:[#allocation2] sm:$0xff]  ;;  %5681 = vmatprep.subr.bf16.mxu0 %v5596_v2  ;;  %5754 = vmatprep.subr.bf16.mxu1 %v5598_v58  ;;  %v5597_v32 = vld [vmem:[#allocation2 + $0x10] sm:$0xff]  ;;  %v5600_v31 = vld [vmem:[#allocation2 + $0x28] sm:$0xff] }
 0x9ad   :  { %5713 = vmatprep.mubr.bf16.mxu0 %v5588_v0  ;;  %5786 = vmatprep.mubr.bf16.mxu1 %v5588_v0  ;;  %v5602_v40 = vld [vmem:[#allocation2 + $0x38] sm:$0xff]  ;;  %v5599_v56 = vld [vmem:[#allocation2 + $0x20] sm:$0xff]  ;;  %v5601_v47 = vld [vmem:[#allocation2 + $0x30] sm:$0xff] }
 0x9ae   :  { %5682 = vmatpush1.bf16.msra.mxu0 %v5595_v52  ;;  %5755 = vmatpush1.bf16.msra.mxu1 %v5597_v32  ;;  %v5604_v44 = vld [vmem:[#allocation2 + $0x48] sm:$0xff]  ;;  %v5606_v5 = vld [vmem:[#allocation2 + $0x58] sm:$0xff]  ;;  %v5603_v35 = vld [vmem:[#allocation2 + $0x40] sm:$0xff] }
 0x9af   :  { %5683 = vmatprep.subr.bf16.mxu0 %v5600_v31  ;;  %5756 = vmatprep.subr.bf16.mxu1 %v5602_v40  ;;  %v5605_v50 = vld [vmem:[#allocation2 + $0x50] sm:$0xff]  ;;  %v5608_v10 = vld [vmem:[#allocation2 + $0x68] sm:$0xff]  ;;  %v5610_v36 = vld [vmem:[#allocation2 + $0x78] sm:$0xff] }
 0x9b0   :  { %v5607_v28 = vld [vmem:[#allocation2 + $0x60] sm:$0xff]  ;;  %v5609_v42 = vld [vmem:[#allocation2 + $0x70] sm:$0xff]  ;;  %v5612_v46 = vld [vmem:[#allocation2 + $0x88] sm:$0xff] }
 0x9b1   :  { %v5614_v4 = vld [vmem:[#allocation2 + $0x98] sm:$0xff]  ;;  %v5611_v7 = vld [vmem:[#allocation2 + $0x80] sm:$0xff]  ;;  %v5613_v12 = vld [vmem:[#allocation2 + $0x90] sm:$0xff] }
 0x9b2   :  { %5684 = vmatpush1.bf16.msra.mxu0 %v5599_v56  ;;  %5757 = vmatpush1.bf16.msra.mxu1 %v5601_v47  ;;  %v5616_v62 = vld [vmem:[#allocation2 + $0xa8] sm:$0xff]  ;;  %v5618_v6 = vld [vmem:[#allocation2 + $0xb8] sm:$0xff]  ;;  %v5615_v1 = vld [vmem:[#allocation2 + $0xa0] sm:$0xff] }
 0x9b3   :  { %5685 = vmatprep.subr.bf16.mxu0 %v5604_v44  ;;  %5758 = vmatprep.subr.bf16.mxu1 %v5606_v5  ;;  %v5617_v9 = vld [vmem:[#allocation2 + $0xb0] sm:$0xff]  ;;  %v5620_v20 = vld [vmem:[#allocation2 + $0xc8] sm:$0xff]  ;;  %v5622_v38 = vld [vmem:[#allocation2 + $0xd8] sm:$0xff] }
 0x9b4   :  { %v5619_v53 = vld [vmem:[#allocation2 + $0xc0] sm:$0xff]  ;;  %v5621_v37 = vld [vmem:[#allocation2 + $0xd0] sm:$0xff]  ;;  %v5624_v29 = vld [vmem:[#allocation2 + $0xe8] sm:$0xff] }
 0x9b5   :  { %v5626_v43 = vld [vmem:[#allocation2 + $0xf8] sm:$0xff]  ;;  %v5623_v34 = vld [vmem:[#allocation2 + $0xe0] sm:$0xff]  ;;  %v5625_v41 = vld [vmem:[#allocation2 + $0xf0] sm:$0xff] }
 0x9b6   :  { %5686 = vmatpush1.bf16.msra.mxu0 %v5603_v35  ;;  %5759 = vmatpush1.bf16.msra.mxu1 %v5605_v50  ;;  %v5628_v22 = vld [vmem:[#allocation2 + $0x108] sm:$0xff]  ;;  %v5630_v17 = vld [vmem:[#allocation2 + $0x118] sm:$0xff]  ;;  %v5627_v51 = vld [vmem:[#allocation2 + $0x100] sm:$0xff] }
 0x9b7   :  { %5687 = vmatprep.subr.bf16.mxu0 %v5608_v10  ;;  %5760 = vmatprep.subr.bf16.mxu1 %v5610_v36  ;;  %v5629_v54 = vld [vmem:[#allocation2 + $0x110] sm:$0xff]  ;;  %v5632_v59 = vld [vmem:[#allocation2 + $0x128] sm:$0xff]  ;;  %v5634_v33 = vld [vmem:[#allocation2 + $0x138] sm:$0xff] }
 0x9b8   :  { %v5631_v11 = vld [vmem:[#allocation2 + $0x120] sm:$0xff]  ;;  %v5633_v55 = vld [vmem:[#allocation2 + $0x130] sm:$0xff]  ;;  %v5636_v24 = vld [vmem:[#allocation2 + $0x148] sm:$0xff] }
 0x9b9   :  { %v5638_v45 = vld [vmem:[#allocation2 + $0x158] sm:$0xff]  ;;  %v5635_v30 = vld [vmem:[#allocation2 + $0x140] sm:$0xff]  ;;  %v5637_v48 = vld [vmem:[#allocation2 + $0x150] sm:$0xff] }
 0x9ba   :  { %5688 = vmatpush1.bf16.msra.mxu0 %v5607_v28  ;;  %5761 = vmatpush1.bf16.msra.mxu1 %v5609_v42  ;;  %v5640_v15 = vld [vmem:[#allocation2 + $0x168] sm:$0xff]  ;;  %v5642_v18 = vld [vmem:[#allocation2 + $0x178] sm:$0xff]  ;;  %v5639_v27 = vld [vmem:[#allocation2 + $0x160] sm:$0xff] }
 0x9bb   :  { %5689 = vmatprep.subr.bf16.mxu0 %v5612_v46  ;;  %5762 = vmatprep.subr.bf16.mxu1 %v5614_v4  ;;  %v5641_v26 = vld [vmem:[#allocation2 + $0x170] sm:$0xff]  ;;  %v5644_v3 = vld [vmem:[#allocation2 + $0x188] sm:$0xff]  ;;  %v5646_v16 = vld [vmem:[#allocation2 + $0x198] sm:$0xff] }
 0x9bc   :  { %v5643_v49 = vld [vmem:[#allocation2 + $0x180] sm:$0xff]  ;;  %v5645_v61 = vld [vmem:[#allocation2 + $0x190] sm:$0xff]  ;;  %v5648_v14 = vld [vmem:[#allocation2 + $0x1a8] sm:$0xff] }
 0x9bd   :  { %v5650_v23 = vld [vmem:[#allocation2 + $0x1b8] sm:$0xff]  ;;  %v5647_v60 = vld [vmem:[#allocation2 + $0x1a0] sm:$0xff]  ;;  %v5649_v8 = vld [vmem:[#allocation2 + $0x1b0] sm:$0xff] }
 0x9be   :  { %5690 = vmatpush1.bf16.msra.mxu0 %v5611_v7  ;;  %5763 = vmatpush1.bf16.msra.mxu1 %v5613_v12  ;;  %v5652_v57 = vld [vmem:[#allocation2 + $0x1c8] sm:$0xff]  ;;  %v5654_v13 = vld [vmem:[#allocation2 + $0x1d8] sm:$0xff]  ;;  %v5651_v39 = vld [vmem:[#allocation2 + $0x1c0] sm:$0xff] }
 0x9bf   :  { %5691 = vmatprep.subr.bf16.mxu0 %v5616_v62  ;;  %5764 = vmatprep.subr.bf16.mxu1 %v5618_v6  ;;  %v5653_v25 = vld [vmem:[#allocation2 + $0x1d0] sm:$0xff]  ;;  %v5656_v0 = vld [vmem:[#allocation2 + $0x1e8] sm:$0xff]  ;;  %v5658_v2 = vld [vmem:[#allocation2 + $0x1f8] sm:$0xff] }
 0x9c0   :  { %v5655_v58 = vld [vmem:[#allocation2 + $0x1e0] sm:$0xff]  ;;  %v5657_v52 = vld [vmem:[#allocation2 + $0x1f0] sm:$0xff]  ;;  %v11882_v32 = vld [vmem:[#allocation3 + $0x8] sm:$0xff] }
 0x9c1   :  { %v11884_v31 = vld [vmem:[#allocation3 + $0x18] sm:$0xff]  ;;  %v13214_v40 = vld [vmem:[#allocation95_spill] sm:$0xff]  ;;  %v13215_v56 = vld [vmem:[#allocation36_spill] sm:$0xff] }
 0x9c2   :  { %5692 = vmatpush1.bf16.msra.mxu0 %v5615_v1  ;;  %5765 = vmatpush1.bf16.msra.mxu1 %v5617_v9  ;;  %v5587_v47 = vpack.c.bf16 %v13215_v56, %v13214_v40  ;;  %v11890_v44 = vld [vmem:[#allocation3] sm:$0xff]  ;;  %v11892_v5 = vld [vmem:[#allocation3 + $0x10] sm:$0xff]  ;;  %v11894_v35 = vld [vmem:[#allocation3 + $0x28] sm:$0xff] }
 0x9c3   :  { %5693 = vmatprep.subr.bf16.mxu0 %v5620_v20  ;;  %5766 = vmatprep.subr.bf16.mxu1 %v5622_v38  ;;  %v11896_v50 = vld [vmem:[#allocation3 + $0x38] sm:$0xff]  ;;  %v13216_v10 = vld [vmem:[#allocation103_spill] sm:$0xff]  ;;  %v13217_v36 = vld [vmem:[#allocation101_spill] sm:$0xff] }
 0x9c4   :  { %v5590_v28 = vpack.c.bf16 %v13217_v36, %v13216_v10  ;;  %v11904_v42 = vld [vmem:[#allocation3 + $0x20] sm:$0xff]  ;;  %v11906_v46 = vld [vmem:[#allocation3 + $0x30] sm:$0xff]  ;;  %v11908_v4 = vld [vmem:[#allocation3 + $0x48] sm:$0xff] }
 0x9c5   :  { %v11910_v7 = vld [vmem:[#allocation3 + $0x58] sm:$0xff]  ;;  %v13218_v12 = vld [vmem:[#allocation47_spill] sm:$0xff]  ;;  %v13219_v62 = vld [vmem:[#allocation48_spill] sm:$0xff] }
 0x9c6   :  { %5694 = vmatpush1.bf16.msra.mxu0 %v5619_v53  ;;  %5767 = vmatpush1.bf16.msra.mxu1 %v5621_v37  ;;  %v5589_v6 = vpack.c.bf16 %v13219_v62, %v13218_v12  ;;  %v11918_v1 = vld [vmem:[#allocation3 + $0x40] sm:$0xff]  ;;  %v11920_v9 = vld [vmem:[#allocation3 + $0x50] sm:$0xff]  ;;  %v11922_v20 = vld [vmem:[#allocation3 + $0x68] sm:$0xff] }
 0x9c7   :  { %5695 = vmatprep.subr.bf16.mxu0 %v5624_v29  ;;  %5768 = vmatprep.subr.bf16.mxu1 %v5626_v43  ;;  %v11924_v38 = vld [vmem:[#allocation3 + $0x78] sm:$0xff]  ;;  %v13220_v53 = vld [vmem:[#allocation51_spill] sm:$0xff]  ;;  %v13221_v37 = vld [vmem:[#allocation49_spill] sm:$0xff] }
 0x9c8   :  { %v5592_v29 = vpack.c.bf16 %v13221_v37, %v13220_v53  ;;  %v11932_v43 = vld [vmem:[#allocation3 + $0x60] sm:$0xff]  ;;  %v13229_v40 = vld [vmem:[#allocation46_spill] sm:$0xff] }
 0x9ca   :  { %5696 = vmatpush1.bf16.msra.mxu0 %v5623_v34  ;;  %5769 = vmatpush1.bf16.msra.mxu1 %v5625_v41  ;;  %v11934_v34 = vld [vmem:[#allocation3 + $0x70] sm:$0xff]  ;;  %v11936_v41 = vld [vmem:[#allocation3 + $0x88] sm:$0xff] }
 0x9cb   :  { %5697 = vmatprep.subr.bf16.mxu0 %v5628_v22  ;;  %5770 = vmatprep.subr.bf16.mxu1 %v5630_v17  ;;  %v11938_v22 = vld [vmem:[#allocation3 + $0x98] sm:$0xff]  ;;  %v13222_v17 = vld [vmem:[#allocation100_spill] sm:$0xff] }
 0x9ce   :  { %5698 = vmatpush1.bf16.msra.mxu0 %v5627_v51  ;;  %5771 = vmatpush1.bf16.msra.mxu1 %v5629_v54  ;;  %v13223_v51 = vld [vmem:[#allocation102_spill] sm:$0xff] }
 0x9cf   :  { %5699 = vmatprep.subr.bf16.mxu0 %v5632_v59  ;;  %5772 = vmatprep.subr.bf16.mxu1 %v5634_v33  ;;  %v5591_v54 = vpack.c.bf16 %v13223_v51, %v13222_v17  ;;  %v11946_v59 = vld [vmem:[#allocation3 + $0x80] sm:$0xff]  ;;  %v11948_v33 = vld [vmem:[#allocation3 + $0x90] sm:$0xff] }
 0x9d2   :  { %5700 = vmatpush1.bf16.msra.mxu0 %v5631_v11  ;;  %5773 = vmatpush1.bf16.msra.mxu1 %v5633_v55  ;;  %v11950_v11 = vld [vmem:[#allocation3 + $0xa8] sm:$0xff]  ;;  %v11952_v55 = vld [vmem:[#allocation3 + $0xb8] sm:$0xff] }
 0x9d3   :  { %5701 = vmatprep.subr.bf16.mxu0 %v5636_v24  ;;  %5774 = vmatprep.subr.bf16.mxu1 %v5638_v45  ;;  %v13224_v24 = vld [vmem:[#allocation37_spill] sm:$0xff]  ;;  %v13225_v45 = vld [vmem:[#allocation96_spill] sm:$0xff] }
 0x9d6   :  { %5702 = vmatpush1.bf16.msra.mxu0 %v5635_v30  ;;  %5775 = vmatpush1.bf16.msra.mxu1 %v5637_v48  ;;  %v5594_v30 = vpack.c.bf16 %v13225_v45, %v13224_v24  ;;  %v11960_v48 = vld [vmem:[#allocation3 + $0xa0] sm:$0xff] }
 0x9d7   :  { %5703 = vmatprep.subr.bf16.mxu0 %v5640_v15  ;;  %5776 = vmatprep.subr.bf16.mxu1 %v5642_v18  ;;  %v11962_v15 = vld [vmem:[#allocation3 + $0xb0] sm:$0xff]  ;;  %v11964_v18 = vld [vmem:[#allocation3 + $0xc8] sm:$0xff] }
 0x9da   :  { %5704 = vmatpush1.bf16.msra.mxu0 %v5639_v27  ;;  %5777 = vmatpush1.bf16.msra.mxu1 %v5641_v26  ;;  %v11966_v27 = vld [vmem:[#allocation3 + $0xd8] sm:$0xff]  ;;  %v5593_v26 = vpack.c.bf16 %v11878_v19, %v11807_v63  ;;  %v11986_v63 = vld [vmem:[#allocation3 + $0xe0] sm:$0xff] }
 0x9db   :  { %5705 = vmatprep.subr.bf16.mxu0 %v5644_v3  ;;  %5778 = vmatprep.subr.bf16.mxu1 %v5646_v16  ;;  %v11974_v3 = vld [vmem:[#allocation3 + $0xc0] sm:$0xff]  ;;  %v11976_v16 = vld [vmem:[#allocation3 + $0xd0] sm:$0xff] }
 0x9de   :  { %5706 = vmatpush1.bf16.msra.mxu0 %v5643_v49  ;;  %5779 = vmatpush1.bf16.msra.mxu1 %v5645_v61  ;;  %v11978_v49 = vld [vmem:[#allocation3 + $0xe8] sm:$0xff]  ;;  %v11980_v61 = vld [vmem:[#allocation3 + $0xf8] sm:$0xff] }
 0x9df   :  { %5707 = vmatprep.subr.bf16.mxu0 %v5648_v14  ;;  %5780 = vmatprep.subr.bf16.mxu1 %v5650_v23  ;;  %v11988_v14 = vld [vmem:[#allocation3 + $0xf0] sm:$0xff]  ;;  %v5659_v23 = vld [vmem:[%s12939_s4] sm:$0xf] }
 0x9e0   :  { %v5668_v56 = vrot.slane %v5659_v23, %v13229_v40 }
 0x9e2   :  { %5708 = vmatpush1.bf16.msra.mxu0 %v5647_v60  ;;  %5781 = vmatpush1.bf16.msra.mxu1 %v5649_v8  ;;  %v13226_v60 = vld [vmem:[#allocation43_spill] sm:$0xff] }
 0x9e3   :  { %5709 = vmatprep.subr.bf16.mxu0 %v5652_v57  ;;  %5782 = vmatprep.subr.bf16.mxu1 %v5654_v13  ;;  %v12036_v8 = vrot.slane %v5659_v23, %v13226_v60 }
 0x9e6   :  { %5710 = vmatpush1.bf16.msra.mxu0 %v5651_v39  ;;  %5783 = vmatpush1.bf16.msra.mxu1 %v5653_v25  ;;  %v13227_v39 = vld [vmem:[#allocation45_spill] sm:$0xff] }
 0x9e7   :  { %5711 = vmatprep.subr.bf16.mxu0 %v5656_v0  ;;  %5784 = vmatprep.subr.bf16.mxu1 %v5658_v2  ;;  %v12043_v25 = vrot.slane %v5659_v23, %v13227_v39  ;;  %v13228_v0 = vld [vmem:[#allocation44_spill] sm:$0xff] }
 0x9e8   :  { %v5664_v2 = vrot.slane %v5659_v23, %v13228_v0 }
 0x9ea   :  { %5712 = vmatpush1.bf16.msra.mxu0 %v5655_v58  ;;  %5785 = vmatpush1.bf16.msra.mxu1 %v5657_v52 }
 0x9eb   :  { %5895 = vmatprep.subr.bf16.mxu0 %v11882_v32  ;;  %5936 = vmatprep.subr.bf16.mxu1 %v11884_v31 }
 0x9ed   :  { %5714 = vmatmul.mubr.bf16.vlgmr.msra.gmra.mrb[96].mxu0 %v5587_v47  ;;  %5787 = vmatmul.mubr.bf16.vlgmr.msra.gmra.mrb[96].mxu1 %v5587_v47 }
 0x9ee   :  { %5896 = vmatpush1.bf16.msra.mxu0 %v11890_v44  ;;  %5937 = vmatpush1.bf16.msra.mxu1 %v11892_v5 }
 0x9ef   :  { %5897 = vmatprep.subr.bf16.mxu0 %v11894_v35  ;;  %5938 = vmatprep.subr.bf16.mxu1 %v11896_v50 }
 0x9f0   :  { %5723 = vmatprep.mubr.bf16.mxu0 %v5590_v28  ;;  %5796 = vmatprep.mubr.bf16.mxu1 %v5590_v28 }
 0x9f2   :  { %5898 = vmatpush1.bf16.msra.mxu0 %v11904_v42  ;;  %5939 = vmatpush1.bf16.msra.mxu1 %v11906_v46 }
 0x9f3   :  { %5899 = vmatprep.subr.bf16.mxu0 %v11908_v4  ;;  %5940 = vmatprep.subr.bf16.mxu1 %v11910_v7 }
 0x9f5   :  { %5724 = vmatmul.mubr.bf16.gmra.mrb[100].mxu0 %v5589_v6  ;;  %5797 = vmatmul.mubr.bf16.gmra.mrb[100].mxu1 %v5589_v6 }
 0x9f6   :  { %5900 = vmatpush1.bf16.msra.mxu0 %v11918_v1  ;;  %5941 = vmatpush1.bf16.msra.mxu1 %v11920_v9 }
 0x9f7   :  { %5901 = vmatprep.subr.bf16.mxu0 %v11922_v20  ;;  %5942 = vmatprep.subr.bf16.mxu1 %v11924_v38 }
 0x9f8   :  { %5733 = vmatprep.mubr.bf16.mxu0 %v5592_v29  ;;  %5806 = vmatprep.mubr.bf16.mxu1 %v5592_v29 }
 0x9fa   :  { %5902 = vmatpush1.bf16.msra.mxu0 %v11932_v43  ;;  %5943 = vmatpush1.bf16.msra.mxu1 %v11934_v34 }
 0x9fb   :  { %5903 = vmatprep.subr.bf16.mxu0 %v11936_v41  ;;  %5944 = vmatprep.subr.bf16.mxu1 %v11938_v22 }
 0x9fd   :  { %5734 = vmatmul.mubr.bf16.gmra.mrb[104].mxu0 %v5591_v54  ;;  %5807 = vmatmul.mubr.bf16.gmra.mrb[104].mxu1 %v5591_v54 }
 0x9fe   :  { %5904 = vmatpush1.bf16.msra.mxu0 %v11946_v59  ;;  %5945 = vmatpush1.bf16.msra.mxu1 %v11948_v33 }
 0x9ff   :  { %5905 = vmatprep.subr.bf16.mxu0 %v11950_v11  ;;  %5946 = vmatprep.subr.bf16.mxu1 %v11952_v55 }
 0xa00   :  { %5743 = vmatprep.mubr.bf16.mxu0 %v5594_v30  ;;  %5816 = vmatprep.mubr.bf16.mxu1 %v5594_v30 }
 0xa02   :  { %5906 = vmatpush1.bf16.msra.mxu0 %v11960_v48  ;;  %5947 = vmatpush1.bf16.msra.mxu1 %v11962_v15 }
 0xa03   :  { %5907 = vmatprep.subr.bf16.mxu0 %v11964_v18  ;;  %5948 = vmatprep.subr.bf16.mxu1 %v11966_v27 }
 0xa05   :  { %5744 = vmatmul.mubr.bf16.gmra.mrb[108].mxu0 %v5593_v26  ;;  %5817 = vmatmul.mubr.bf16.gmra.mrb[108].mxu1 %v5593_v26 }
 0xa06   :  { %5908 = vmatpush1.bf16.msra.mxu0 %v11974_v3  ;;  %5949 = vmatpush1.bf16.msra.mxu1 %v11976_v16 }
 0xa07   :  { %5909 = vmatprep.subr.bf16.mxu0 %v11978_v49  ;;  %5950 = vmatprep.subr.bf16.mxu1 %v11980_v61 }
 0xa08   :  { %5927 = vmatprep.mubr.bf16.mxu0 %v13021_v21  ;;  %5968 = vmatprep.mubr.bf16.mxu1 %v13021_v21 }
 0xa0a   :  { %5910 = vmatpush1.bf16.msra.mxu0 %v11986_v63  ;;  %5951 = vmatpush1.bf16.msra.mxu1 %v11988_v14 }
 0xa0b   :  { %6010 = vmatprep.subr.bf16.mxu0 %v11882_v32  ;;  %6051 = vmatprep.subr.bf16.mxu1 %v11884_v31 }
 0xa0d   :  { %5928 = vmatmul.mubr.bf16.vlgmr.msra.gmra.mrb[112].mxu0 %v13021_v21  ;;  %5969 = vmatmul.mubr.bf16.vlgmr.msra.gmra.mrb[112].mxu1 %v13021_v21 }
 0xa0e   :  { %6011 = vmatpush1.bf16.msra.mxu0 %v11890_v44  ;;  %6052 = vmatpush1.bf16.msra.mxu1 %v11892_v5 }
 0xa0f   :  { %6012 = vmatprep.subr.bf16.mxu0 %v11894_v35  ;;  %6053 = vmatprep.subr.bf16.mxu1 %v11896_v50 }
 0xa10   :  { %6042 = vmatprep.mubr.bf16.mxu0 %v13021_v21  ;;  %6083 = vmatprep.mubr.bf16.mxu1 %v13021_v21 }
 0xa12   :  { %6013 = vmatpush1.bf16.msra.mxu0 %v11904_v42  ;;  %6054 = vmatpush1.bf16.msra.mxu1 %v11906_v46 }
 0xa13   :  { %6014 = vmatprep.subr.bf16.mxu0 %v11908_v4  ;;  %6055 = vmatprep.subr.bf16.mxu1 %v11910_v7 }
 0xa16   :  { %6015 = vmatpush1.bf16.msra.mxu0 %v11918_v1  ;;  %6056 = vmatpush1.bf16.msra.mxu1 %v11920_v9 }
 0xa17   :  { %6016 = vmatprep.subr.bf16.mxu0 %v11922_v20  ;;  %6057 = vmatprep.subr.bf16.mxu1 %v11924_v38 }
 0xa1a   :  { %6017 = vmatpush1.bf16.msra.mxu0 %v11932_v43  ;;  %6058 = vmatpush1.bf16.msra.mxu1 %v11934_v34 }
 0xa1b   :  { %6018 = vmatprep.subr.bf16.mxu0 %v11936_v41  ;;  %6059 = vmatprep.subr.bf16.mxu1 %v11938_v22 }
 0xa1e   :  { %6019 = vmatpush1.bf16.msra.mxu0 %v11946_v59  ;;  %6060 = vmatpush1.bf16.msra.mxu1 %v11948_v33 }
 0xa1f   :  { %6020 = vmatprep.subr.bf16.mxu0 %v11950_v11  ;;  %6061 = vmatprep.subr.bf16.mxu1 %v11952_v55 }
 0xa22   :  { %6021 = vmatpush1.bf16.msra.mxu0 %v11960_v48  ;;  %6062 = vmatpush1.bf16.msra.mxu1 %v11962_v15 }
 0xa23   :  { %6022 = vmatprep.subr.bf16.mxu0 %v11964_v18  ;;  %6063 = vmatprep.subr.bf16.mxu1 %v11966_v27 }
 0xa26   :  { %6023 = vmatpush1.bf16.msra.mxu0 %v11974_v3  ;;  %6064 = vmatpush1.bf16.msra.mxu1 %v11976_v16 }
 0xa27   :  { %6024 = vmatprep.subr.bf16.mxu0 %v11978_v49  ;;  %6065 = vmatprep.subr.bf16.mxu1 %v11980_v61 }
 0xa2a   :  { %6025 = vmatpush1.bf16.msra.mxu0 %v11986_v63  ;;  %6066 = vmatpush1.bf16.msra.mxu1 %v11988_v14 }
 0xa2b   :  { %6125 = vmatprep.subr.bf16.mxu0 %v11882_v32  ;;  %6166 = vmatprep.subr.bf16.mxu1 %v11884_v31 }
 0xac0   :  { %v12038_v57 = vpop.f32.mrb[96].mxu0  ;;  %v12040_v13 = vpop.f32.mrb[96].mxu1 }
 0xac1   :  { %v5717_v58 = vpop.f32.mrb[97].mxu0  ;;  %v5790_v52 = vpop.f32.mrb[97].mxu1 }
 0xac2   :  { %v5719_v47 = vpop.f32.mrb[98].mxu0  ;;  %v5792_v10 = vpop.f32.mrb[98].mxu1 }
 0xac3   :  { %v12047_v36 = vadd.f32 %v5719_v47, %v5664_v2  ;;  %v5721_v28 = vpop.f32.mrb[99].mxu0  ;;  %v12050_v12 = vadd.f32 %v5792_v10, %v12036_v8  ;;  %v5794_v62 = vpop.f32.mrb[99].mxu1 }
 0xac4   :  { %v12052_v6 = vadd.f32 %v5721_v28, %v5668_v56  ;;  %v12055_v53 = vadd.f32 %v5794_v62, %v12043_v25 }
 0xac8   :  { %v5725_v37 = vpop.f32.mrb[100].mxu0  ;;  %v5798_v29 = vpop.f32.mrb[100].mxu1 }
 0xac9   :  { %v12057_v17 = vadd.f32 %v5725_v37, %v5664_v2  ;;  %v5727_v51 = vpop.f32.mrb[101].mxu0  ;;  %v12060_v54 = vadd.f32 %v5798_v29, %v12036_v8  ;;  %v5800_v24 = vpop.f32.mrb[101].mxu1 }
 0xaca   :  { %v12062_v30 = vadd.f32 %v5727_v51, %v5668_v56  ;;  %v5729_v26 = vpop.f32.mrb[102].mxu0  ;;  %v12065_v23 = vadd.f32 %v5800_v24, %v12043_v25  ;;  %v5802_v47 = vpop.f32.mrb[102].mxu1 }
 0xacb   :  { %v12067_v10 = vadd.f32 %v5729_v26, %v5664_v2  ;;  %v5731_v28 = vpop.f32.mrb[103].mxu0  ;;  %v12070_v62 = vadd.f32 %v5802_v47, %v12036_v8  ;;  %v5804_v37 = vpop.f32.mrb[103].mxu1 }
 0xacc   :  { %13230 = vst [vmem:[#allocation85_spill] sm:$0xff] %v12062_v30  ;;  %13231 = vst [vmem:[#allocation84_spill] sm:$0xff] %v12065_v23  ;;  %v12072_v60 = vadd.f32 %v5731_v28, %v5668_v56  ;;  %v12075_v29 = vadd.f32 %v5804_v37, %v12043_v25 }
 0xacd   :  { %13232 = vst [vmem:[#allocation86_spill] sm:$0xff] %v12067_v10  ;;  %13233 = vst [vmem:[#allocation90_spill] sm:$0xff] %v12070_v62 }
 0xace   :  { %13234 = vst [vmem:[#allocation93_spill] sm:$0xff] %v12072_v60  ;;  %13235 = vst [vmem:[#allocation92_spill] sm:$0xff] %v12075_v29 }
 0xad0   :  { %v5735_v39 = vpop.f32.mrb[104].mxu0  ;;  %v5808_v51 = vpop.f32.mrb[104].mxu1 }
 0xad1   :  { %v12077_v40 = vadd.f32 %v5735_v39, %v5664_v2  ;;  %v5737_v0 = vpop.f32.mrb[105].mxu0  ;;  %v12080_v24 = vadd.f32 %v5808_v51, %v12036_v8  ;;  %v5810_v26 = vpop.f32.mrb[105].mxu1 }
 0xad2   :  { %v12082_v19 = vadd.f32 %v5737_v0, %v5668_v56  ;;  %v5739_v45 = vpop.f32.mrb[106].mxu0  ;;  %v12085_v47 = vadd.f32 %v5810_v26, %v12043_v25  ;;  %v5812_v28 = vpop.f32.mrb[106].mxu1 }
 0xad3   :  { %13236 = vst [vmem:[#allocation94_spill] sm:$0xff] %v12077_v40  ;;  %13237 = vst [vmem:[#allocation38_spill] sm:$0xff] %v12080_v24  ;;  %v12087_v60 = vadd.f32 %v5739_v45, %v5664_v2  ;;  %v5741_v37 = vpop.f32.mrb[107].mxu0  ;;  %v12090_v29 = vadd.f32 %v5812_v28, %v12036_v8  ;;  %v5814_v39 = vpop.f32.mrb[107].mxu1 }
 0xad4   :  { %13238 = vst [vmem:[#allocation39_spill] sm:$0xff] %v12082_v19  ;;  %13239 = vst [vmem:[#allocation40_spill] sm:$0xff] %v12085_v47  ;;  %v12092_v40 = vadd.f32 %v5741_v37, %v5668_v56  ;;  %v12095_v51 = vadd.f32 %v5814_v39, %v12043_v25 }
 0xad5   :  { %13240 = vst [vmem:[#allocation41_spill] sm:$0xff] %v12087_v60  ;;  %13241 = vst [vmem:[#allocation42_spill] sm:$0xff] %v12090_v29 }
 0xad6   :  { %13242 = vst [vmem:[#allocation97_spill] sm:$0xff] %v12092_v40  ;;  %13243 = vst [vmem:[#allocation98_spill] sm:$0xff] %v12095_v51 }
 0xad8   :  { %v5745_v24 = vpop.f32.mrb[108].mxu0  ;;  %v5818_v0 = vpop.f32.mrb[108].mxu1 }
 0xad9   :  { %v12097_v19 = vadd.f32 %v5745_v24, %v5664_v2  ;;  %v5747_v62 = vpop.f32.mrb[109].mxu0  ;;  %v12100_v26 = vadd.f32 %v5818_v0, %v12036_v8  ;;  %v5820_v45 = vpop.f32.mrb[109].mxu1 }
 0xada   :  { %v12102_v60 = vadd.f32 %v5747_v62, %v5668_v56  ;;  %v5749_v47 = vpop.f32.mrb[110].mxu0  ;;  %v12105_v28 = vadd.f32 %v5820_v45, %v12043_v25  ;;  %v5822_v37 = vpop.f32.mrb[110].mxu1  ;;  %v5716_v62 = vadd.f32 %v12038_v57, %v5664_v2  ;;  %v5718_v45 = vadd.f32 %v5717_v58, %v5668_v56 }
 0xadb   :  { %13244 = vst [vmem:[#allocation99_spill] sm:$0xff] %v12097_v19  ;;  %13245 = vst [vmem:[#allocation58_spill] sm:$0xff] %v12100_v26  ;;  %v12107_v40 = vadd.f32 %v5749_v47, %v5664_v2  ;;  %v5751_v39 = vpop.f32.mrb[111].mxu0  ;;  %v12110_v51 = vadd.f32 %v5822_v37, %v12036_v8  ;;  %v5824_v24 = vpop.f32.mrb[111].mxu1 }
 0xadc   :  { %13246 = vst [vmem:[#allocation61_spill] sm:$0xff] %v12102_v60  ;;  %13247 = vst [vmem:[#allocation60_spill] sm:$0xff] %v12105_v28  ;;  %v12112_v19 = vadd.f32 %v5751_v39, %v5668_v56  ;;  %v12115_v0 = vadd.f32 %v5824_v24, %v12043_v25  ;;  %v5789_v60 = vadd.f32 %v12040_v13, %v12036_v8 }
 0xadd   :  { %13248 = vst [vmem:[#allocation62_spill] sm:$0xff] %v12107_v40  ;;  %13249 = vst [vmem:[#allocation79_spill] sm:$0xff] %v12110_v51  ;;  %v5791_v28 = vadd.f32 %v5790_v52, %v12043_v25 }
 0xade   :  { %13250 = vst [vmem:[#allocation81_spill] sm:$0xff] %v12112_v19  ;;  %13251 = vst [vmem:[#allocation80_spill] sm:$0xff] %v12115_v0 }
 0xae0   :  { %v5929_v47 = vpop.f32.mrb[112].mxu0  ;;  %v5970_v40 = vpop.f32.mrb[112].mxu1 }
 0xae1   :  { %v5977_v26 = vadd.f32 %v5929_v47, %v5716_v62  ;;  %v5979_v29 = vadd.f32 %v5970_v40, %v5789_v60  ;;  %v5931_v37 = vpop.f32.mrb[113].mxu0  ;;  %v5972_v51 = vpop.f32.mrb[113].mxu1 }
 0xae2   :  { %v5978_v10 = vadd.f32 %v5931_v37, %v5718_v45  ;;  %v5980_v39 = vadd.f32 %v5972_v51, %v5791_v28  ;;  %v5933_v19 = vpop.f32.mrb[114].mxu0  ;;  %v5974_v23 = vpop.f32.mrb[114].mxu1 }
 0xae3   :  { %v9170_v24 = vmul.f32 -1.442695, %v5977_v26  ;;  %v5934_v0 = vpop.f32.mrb[115].mxu0  ;;  %v5975_v30 = vpop.f32.mrb[115].mxu1 }
 0xae4   :  { %v9171_v57 = vmul.f32 -1.442695, %v5978_v10  ;;  %v9172_v8 = vmul.f32 -1.442695, %v5980_v39 }
 0xae5   :  { %9863 = vpow2.f32 %v9170_v24 }
 0xae6   :  { %9865 = vpow2.f32 %v9171_v57 }
 0xae7   :  { %9867 = vpow2.f32 %v9172_v8 }
 0xae8   :  { %9869 = vtanh.f32 %v5979_v29 }
 0xaef   :  { %v9864_v13 = vpop.eup %9863 }
 0xaf0   :  { %v9866_v2 = vpop.eup %9865  ;;  %v5984_v25 = vadd.f32 1.0, %v9864_v13 }
 0xaf1   :  { %v5990_v58 = vadd.f32 1.0, %v9866_v2  ;;  %v9868_v60 = vpop.eup %9867 }
 0xaf2   :  { %9871 = vrcp.f32 %v5984_v25  ;;  %v9870_v52 = vpop.eup %9869  ;;  %v5997_v23 = vadd.f32 1.0, %v9868_v60 }
 0xaf3   :  { %9873 = vrcp.f32 %v5990_v58 }
 0xaf4   :  { %9875 = vrcp.f32 %v5997_v23 }
 0xafc   :  { %v9872_v40 = vpop.eup %9871 }
 0xafd   :  { %v9874_v19 = vpop.eup %9873  ;;  %v6001_v56 = vmul.f32 %v9872_v40, %v9870_v52 }
 0xafe   :  { %v6000_v51 = vmul.f32 0.0, %v9874_v19  ;;  %v9876_v10 = vpop.eup %9875 }
 0xb00   :  { %v12121_v30 = vadd.f32 %v6001_v56, %v6000_v51 }
 0xb02   :  { %9877 = vtanh.f32 %v12121_v30 }
 0xb0c   :  { %v9878_v26 = vpop.eup %9877 }
 0xb0d   :  { %v6004_v28 = vmul.f32 %v9878_v26, %v9876_v10 }
 0xb0f   :  { %v6009_v0 = vpack.c.bf16 %v6004_v28, %v6004_v28 }
 0xb11   :  { %6043 = vmatmul.mubr.bf16.vlgmr.msra.gmra.mrb[116].mxu0 %v6009_v0  ;;  %6084 = vmatmul.mubr.bf16.vlgmr.msra.gmra.mrb[116].mxu1 %v6009_v0 }
 0xb12   :  { %6126 = vmatpush1.bf16.msra.mxu0 %v11890_v44  ;;  %6167 = vmatpush1.bf16.msra.mxu1 %v11892_v5 }
 0xb13   :  { %6127 = vmatprep.subr.bf16.mxu0 %v11894_v35  ;;  %6168 = vmatprep.subr.bf16.mxu1 %v11896_v50 }
 0xb14   :  { %6157 = vmatprep.mubr.bf16.mxu0 %v13021_v21  ;;  %6198 = vmatprep.mubr.bf16.mxu1 %v13021_v21 }
 0xb16   :  { %6128 = vmatpush1.bf16.msra.mxu0 %v11904_v42  ;;  %6169 = vmatpush1.bf16.msra.mxu1 %v11906_v46 }
 0xb17   :  { %6129 = vmatprep.subr.bf16.mxu0 %v11908_v4  ;;  %6170 = vmatprep.subr.bf16.mxu1 %v11910_v7 }
 0xb1a   :  { %6130 = vmatpush1.bf16.msra.mxu0 %v11918_v1  ;;  %6171 = vmatpush1.bf16.msra.mxu1 %v11920_v9 }
 0xb1b   :  { %6131 = vmatprep.subr.bf16.mxu0 %v11922_v20  ;;  %6172 = vmatprep.subr.bf16.mxu1 %v11924_v38 }
 0xb1e   :  { %6132 = vmatpush1.bf16.msra.mxu0 %v11932_v43  ;;  %6173 = vmatpush1.bf16.msra.mxu1 %v11934_v34 }
 0xb1f   :  { %6133 = vmatprep.subr.bf16.mxu0 %v11936_v41  ;;  %6174 = vmatprep.subr.bf16.mxu1 %v11938_v22 }
 0xb22   :  { %6134 = vmatpush1.bf16.msra.mxu0 %v11946_v59  ;;  %6175 = vmatpush1.bf16.msra.mxu1 %v11948_v33 }
 0xb23   :  { %6135 = vmatprep.subr.bf16.mxu0 %v11950_v11  ;;  %6176 = vmatprep.subr.bf16.mxu1 %v11952_v55 }
 0xb26   :  { %6136 = vmatpush1.bf16.msra.mxu0 %v11960_v48  ;;  %6177 = vmatpush1.bf16.msra.mxu1 %v11962_v15 }
 0xb27   :  { %6137 = vmatprep.subr.bf16.mxu0 %v11964_v18  ;;  %6178 = vmatprep.subr.bf16.mxu1 %v11966_v27 }
 0xb2a   :  { %6138 = vmatpush1.bf16.msra.mxu0 %v11974_v3  ;;  %6179 = vmatpush1.bf16.msra.mxu1 %v11976_v16 }
 0xb2b   :  { %6139 = vmatprep.subr.bf16.mxu0 %v11978_v49  ;;  %6180 = vmatprep.subr.bf16.mxu1 %v11980_v61 }
 0xb2e   :  { %6140 = vmatpush1.bf16.msra.mxu0 %v11986_v63  ;;  %6181 = vmatpush1.bf16.msra.mxu1 %v11988_v14 }
 0xb2f   :  { %6240 = vmatprep.subr.bf16.mxu0 %v11882_v32  ;;  %6281 = vmatprep.subr.bf16.mxu1 %v11884_v31 }
 0xbe4   :  { %v6044_v29 = vpop.f32.mrb[116].mxu0  ;;  %v6085_v62 = vpop.f32.mrb[116].mxu1 }
 0xbe5   :  { %v6092_v45 = vadd.f32 %v6044_v29, %v12047_v36  ;;  %v6094_v47 = vadd.f32 %v6085_v62, %v12050_v12  ;;  %v6046_v37 = vpop.f32.mrb[117].mxu0  ;;  %v6087_v39 = vpop.f32.mrb[117].mxu1 }
 0xbe6   :  { %v6093_v24 = vadd.f32 %v6046_v37, %v12052_v6  ;;  %v6095_v57 = vadd.f32 %v6087_v39, %v12055_v53  ;;  %v6048_v8 = vpop.f32.mrb[118].mxu0  ;;  %v6089_v13 = vpop.f32.mrb[118].mxu1 }
 0xbe7   :  { %v9173_v2 = vmul.f32 -1.442695, %v6092_v45  ;;  %v6049_v25 = vpop.f32.mrb[119].mxu0  ;;  %v6090_v58 = vpop.f32.mrb[119].mxu1  ;;  %v13252_v8 = vld [vmem:[#allocation85_spill] sm:$0xff] }
 0xbe8   :  { %v9174_v60 = vmul.f32 -1.442695, %v6093_v24  ;;  %v9175_v52 = vmul.f32 -1.442695, %v6095_v57 }
 0xbe9   :  { %9879 = vpow2.f32 %v9173_v2  ;;  %v13253_v2 = vld [vmem:[#allocation84_spill] sm:$0xff] }
 0xbea   :  { %9881 = vpow2.f32 %v9174_v60 }
 0xbeb   :  { %9883 = vpow2.f32 %v9175_v52 }
 0xbec   :  { %9885 = vtanh.f32 %v6094_v47 }
 0xbf3   :  { %v9880_v40 = vpop.eup %9879 }
 0xbf4   :  { %v9882_v19 = vpop.eup %9881  ;;  %v6099_v36 = vadd.f32 1.0, %v9880_v40 }
 0xbf5   :  { %v6105_v12 = vadd.f32 1.0, %v9882_v19  ;;  %v9884_v6 = vpop.eup %9883 }
 0xbf6   :  { %9887 = vrcp.f32 %v6099_v36  ;;  %v9886_v56 = vpop.eup %9885  ;;  %v6112_v10 = vadd.f32 1.0, %v9884_v6 }
 0xbf7   :  { %9889 = vrcp.f32 %v6105_v12 }
 0xbf8   :  { %9891 = vrcp.f32 %v6112_v10 }
 0xc00   :  { %v9888_v53 = vpop.eup %9887 }
 0xc01   :  { %v9890_v23 = vpop.eup %9889  ;;  %v6116_v51 = vmul.f32 %v9888_v53, %v9886_v56 }
 0xc02   :  { %v6115_v26 = vmul.f32 %v9890_v23, %v12121_v30  ;;  %v9892_v0 = vpop.eup %9891 }
 0xc04   :  { %v12163_v28 = vadd.f32 %v6116_v51, %v6115_v26 }
 0xc06   :  { %9893 = vtanh.f32 %v12163_v28 }
 0xc10   :  { %v9894_v29 = vpop.eup %9893 }
 0xc11   :  { %v6119_v62 = vmul.f32 %v9894_v29, %v9892_v0 }
 0xc13   :  { %v6124_v45 = vpack.c.bf16 %v6119_v62, %v6119_v62 }
 0xc15   :  { %6158 = vmatmul.mubr.bf16.vlgmr.msra.gmra.mrb[120].mxu0 %v6124_v45  ;;  %6199 = vmatmul.mubr.bf16.vlgmr.msra.gmra.mrb[120].mxu1 %v6124_v45 }
 0xc16   :  { %6241 = vmatpush1.bf16.msra.mxu0 %v11890_v44  ;;  %6282 = vmatpush1.bf16.msra.mxu1 %v11892_v5 }
 0xc17   :  { %6242 = vmatprep.subr.bf16.mxu0 %v11894_v35  ;;  %6283 = vmatprep.subr.bf16.mxu1 %v11896_v50 }
 0xc18   :  { %6272 = vmatprep.mubr.bf16.mxu0 %v13021_v21  ;;  %6313 = vmatprep.mubr.bf16.mxu1 %v13021_v21 }
 0xc1a   :  { %6243 = vmatpush1.bf16.msra.mxu0 %v11904_v42  ;;  %6284 = vmatpush1.bf16.msra.mxu1 %v11906_v46 }
 0xc1b   :  { %6244 = vmatprep.subr.bf16.mxu0 %v11908_v4  ;;  %6285 = vmatprep.subr.bf16.mxu1 %v11910_v7 }
 0xc1e   :  { %6245 = vmatpush1.bf16.msra.mxu0 %v11918_v1  ;;  %6286 = vmatpush1.bf16.msra.mxu1 %v11920_v9 }
 0xc1f   :  { %6246 = vmatprep.subr.bf16.mxu0 %v11922_v20  ;;  %6287 = vmatprep.subr.bf16.mxu1 %v11924_v38 }
 0xc22   :  { %6247 = vmatpush1.bf16.msra.mxu0 %v11932_v43  ;;  %6288 = vmatpush1.bf16.msra.mxu1 %v11934_v34 }
 0xc23   :  { %6248 = vmatprep.subr.bf16.mxu0 %v11936_v41  ;;  %6289 = vmatprep.subr.bf16.mxu1 %v11938_v22 }
 0xc26   :  { %6249 = vmatpush1.bf16.msra.mxu0 %v11946_v59  ;;  %6290 = vmatpush1.bf16.msra.mxu1 %v11948_v33 }
 0xc27   :  { %6250 = vmatprep.subr.bf16.mxu0 %v11950_v11  ;;  %6291 = vmatprep.subr.bf16.mxu1 %v11952_v55 }
 0xc2a   :  { %6251 = vmatpush1.bf16.msra.mxu0 %v11960_v48  ;;  %6292 = vmatpush1.bf16.msra.mxu1 %v11962_v15 }
 0xc2b   :  { %6252 = vmatprep.subr.bf16.mxu0 %v11964_v18  ;;  %6293 = vmatprep.subr.bf16.mxu1 %v11966_v27 }
 0xc2e   :  { %6253 = vmatpush1.bf16.msra.mxu0 %v11974_v3  ;;  %6294 = vmatpush1.bf16.msra.mxu1 %v11976_v16 }
 0xc2f   :  { %6254 = vmatprep.subr.bf16.mxu0 %v11978_v49  ;;  %6295 = vmatprep.subr.bf16.mxu1 %v11980_v61 }
 0xc32   :  { %6255 = vmatpush1.bf16.msra.mxu0 %v11986_v63  ;;  %6296 = vmatpush1.bf16.msra.mxu1 %v11988_v14 }
 0xc33   :  { %6355 = vmatprep.subr.bf16.mxu0 %v11882_v32  ;;  %6396 = vmatprep.subr.bf16.mxu1 %v11884_v31 }
 0xce8   :  { %v6159_v30 = vpop.f32.mrb[120].mxu0  ;;  %v6200_v47 = vpop.f32.mrb[120].mxu1 }
 0xce9   :  { %v6207_v37 = vadd.f32 %v6159_v30, %v12057_v17  ;;  %v6209_v39 = vadd.f32 %v6200_v47, %v12060_v54  ;;  %v6161_v24 = vpop.f32.mrb[121].mxu0  ;;  %v6202_v57 = vpop.f32.mrb[121].mxu1 }
 0xcea   :  { %v6208_v13 = vadd.f32 %v6161_v24, %v13252_v8  ;;  %v6210_v25 = vadd.f32 %v6202_v57, %v13253_v2  ;;  %v6163_v58 = vpop.f32.mrb[122].mxu0  ;;  %v6204_v60 = vpop.f32.mrb[122].mxu1  ;;  %v13254_v24 = vld [vmem:[#allocation86_spill] sm:$0xff] }
 0xceb   :  { %v9176_v52 = vmul.f32 -1.442695, %v6207_v37  ;;  %v6164_v40 = vpop.f32.mrb[123].mxu0  ;;  %v6205_v19 = vpop.f32.mrb[123].mxu1  ;;  %v13255_v8 = vld [vmem:[#allocation90_spill] sm:$0xff]  ;;  %v13256_v58 = vld [vmem:[#allocation93_spill] sm:$0xff] }
 0xcec   :  { %v9177_v36 = vmul.f32 -1.442695, %v6208_v13  ;;  %v9178_v12 = vmul.f32 -1.442695, %v6210_v25 }
 0xced   :  { %9895 = vpow2.f32 %v9176_v52  ;;  %v13257_v52 = vld [vmem:[#allocation92_spill] sm:$0xff] }
 0xcee   :  { %9897 = vpow2.f32 %v9177_v36 }
 0xcef   :  { %9899 = vpow2.f32 %v9178_v12 }
 0xcf0   :  { %9901 = vtanh.f32 %v6209_v39 }
 0xcf7   :  { %v9896_v6 = vpop.eup %9895 }
 0xcf8   :  { %v9898_v56 = vpop.eup %9897  ;;  %v6214_v17 = vadd.f32 1.0, %v9896_v6 }
 0xcf9   :  { %v6220_v54 = vadd.f32 1.0, %v9898_v56  ;;  %v9900_v53 = vpop.eup %9899 }
 0xcfa   :  { %9903 = vrcp.f32 %v6214_v17  ;;  %v9902_v23 = vpop.eup %9901  ;;  %v6227_v0 = vadd.f32 1.0, %v9900_v53 }
 0xcfb   :  { %9905 = vrcp.f32 %v6220_v54 }
 0xcfc   :  { %9907 = vrcp.f32 %v6227_v0 }
 0xd04   :  { %v9904_v51 = vpop.eup %9903 }
 0xd05   :  { %v9906_v10 = vpop.eup %9905  ;;  %v6231_v26 = vmul.f32 %v9904_v51, %v9902_v23 }
 0xd06   :  { %v6230_v29 = vmul.f32 %v9906_v10, %v12163_v28  ;;  %v9908_v45 = vpop.eup %9907 }
 0xd08   :  { %v12205_v62 = vadd.f32 %v6231_v26, %v6230_v29 }
 0xd0a   :  { %9909 = vtanh.f32 %v12205_v62 }
 0xd14   :  { %v9910_v30 = vpop.eup %9909 }
 0xd15   :  { %v6234_v47 = vmul.f32 %v9910_v30, %v9908_v45 }
 0xd17   :  { %v6239_v37 = vpack.c.bf16 %v6234_v47, %v6234_v47 }
 0xd19   :  { %6273 = vmatmul.mubr.bf16.vlgmr.msra.gmra.mrb[124].mxu0 %v6239_v37  ;;  %6314 = vmatmul.mubr.bf16.vlgmr.msra.gmra.mrb[124].mxu1 %v6239_v37 }
 0xd1a   :  { %6356 = vmatpush1.bf16.msra.mxu0 %v11890_v44  ;;  %6397 = vmatpush1.bf16.msra.mxu1 %v11892_v5 }
 0xd1b   :  { %6357 = vmatprep.subr.bf16.mxu0 %v11894_v35  ;;  %6398 = vmatprep.subr.bf16.mxu1 %v11896_v50 }
 0xd1c   :  { %6387 = vmatprep.mubr.bf16.mxu0 %v13021_v21  ;;  %6428 = vmatprep.mubr.bf16.mxu1 %v13021_v21 }
 0xd1e   :  { %6358 = vmatpush1.bf16.msra.mxu0 %v11904_v42  ;;  %6399 = vmatpush1.bf16.msra.mxu1 %v11906_v46 }
 0xd1f   :  { %6359 = vmatprep.subr.bf16.mxu0 %v11908_v4  ;;  %6400 = vmatprep.subr.bf16.mxu1 %v11910_v7 }
 0xd22   :  { %6360 = vmatpush1.bf16.msra.mxu0 %v11918_v1  ;;  %6401 = vmatpush1.bf16.msra.mxu1 %v11920_v9 }
 0xd23   :  { %6361 = vmatprep.subr.bf16.mxu0 %v11922_v20  ;;  %6402 = vmatprep.subr.bf16.mxu1 %v11924_v38 }
 0xd26   :  { %6362 = vmatpush1.bf16.msra.mxu0 %v11932_v43  ;;  %6403 = vmatpush1.bf16.msra.mxu1 %v11934_v34 }
 0xd27   :  { %6363 = vmatprep.subr.bf16.mxu0 %v11936_v41  ;;  %6404 = vmatprep.subr.bf16.mxu1 %v11938_v22 }
 0xd2a   :  { %6364 = vmatpush1.bf16.msra.mxu0 %v11946_v59  ;;  %6405 = vmatpush1.bf16.msra.mxu1 %v11948_v33 }
 0xd2b   :  { %6365 = vmatprep.subr.bf16.mxu0 %v11950_v11  ;;  %6406 = vmatprep.subr.bf16.mxu1 %v11952_v55 }
 0xd2e   :  { %6366 = vmatpush1.bf16.msra.mxu0 %v11960_v48  ;;  %6407 = vmatpush1.bf16.msra.mxu1 %v11962_v15 }
 0xd2f   :  { %6367 = vmatprep.subr.bf16.mxu0 %v11964_v18  ;;  %6408 = vmatprep.subr.bf16.mxu1 %v11966_v27 }
 0xd32   :  { %6368 = vmatpush1.bf16.msra.mxu0 %v11974_v3  ;;  %6409 = vmatpush1.bf16.msra.mxu1 %v11976_v16 }
 0xd33   :  { %6369 = vmatprep.subr.bf16.mxu0 %v11978_v49  ;;  %6410 = vmatprep.subr.bf16.mxu1 %v11980_v61 }
 0xd36   :  { %6370 = vmatpush1.bf16.msra.mxu0 %v11986_v63  ;;  %6411 = vmatpush1.bf16.msra.mxu1 %v11988_v14 }
 0xd37   :  { %6470 = vmatprep.subr.bf16.mxu0 %v11882_v32  ;;  %6511 = vmatprep.subr.bf16.mxu1 %v11884_v31 }
 0xdec   :  { %v6274_v28 = vpop.f32.mrb[124].mxu0  ;;  %v6315_v39 = vpop.f32.mrb[124].mxu1 }
 0xded   :  { %v6322_v57 = vadd.f32 %v6274_v28, %v13254_v24  ;;  %v6324_v13 = vadd.f32 %v6315_v39, %v13255_v8  ;;  %v6276_v2 = vpop.f32.mrb[125].mxu0  ;;  %v6317_v25 = vpop.f32.mrb[125].mxu1 }
 0xdee   :  { %v6323_v60 = vadd.f32 %v6276_v2, %v13256_v58  ;;  %v6325_v40 = vadd.f32 %v6317_v25, %v13257_v52  ;;  %v6278_v19 = vpop.f32.mrb[126].mxu0  ;;  %v6319_v36 = vpop.f32.mrb[126].mxu1 }
 0xdef   :  { %v9179_v12 = vmul.f32 -1.442695, %v6322_v57  ;;  %v6279_v6 = vpop.f32.mrb[127].mxu0  ;;  %v6320_v56 = vpop.f32.mrb[127].mxu1 }
 0xdf0   :  { %v9180_v17 = vmul.f32 -1.442695, %v6323_v60  ;;  %v9181_v54 = vmul.f32 -1.442695, %v6325_v40 }
 0xdf1   :  { %9911 = vpow2.f32 %v9179_v12 }
 0xdf2   :  { %9913 = vpow2.f32 %v9180_v17 }
 0xdf3   :  { %9915 = vpow2.f32 %v9181_v54 }
 0xdf4   :  { %9917 = vtanh.f32 %v6324_v13 }
 0xdfb   :  { %v9912_v53 = vpop.eup %9911 }
 0xdfc   :  { %v9914_v23 = vpop.eup %9913  ;;  %v6329_v51 = vadd.f32 1.0, %v9912_v53 }
 0xdfd   :  { %v6335_v10 = vadd.f32 1.0, %v9914_v23  ;;  %v9916_v26 = vpop.eup %9915 }
 0xdfe   :  { %9919 = vrcp.f32 %v6329_v51  ;;  %v9918_v0 = vpop.eup %9917  ;;  %v6342_v47 = vadd.f32 1.0, %v9916_v26 }
 0xdff   :  { %9921 = vrcp.f32 %v6335_v10 }
 0xe00   :  { %9923 = vrcp.f32 %v6342_v47  ;;  %v12301_v47 = vld [vmem:[#allocation3 + $0x38] sm:$0xff] }
 0xe08   :  { %v9920_v29 = vpop.eup %9919 }
 0xe09   :  { %v9922_v45 = vpop.eup %9921  ;;  %v6346_v30 = vmul.f32 %v9920_v29, %v9918_v0  ;;  %v12292_v29 = vld [vmem:[#allocation3] sm:$0xff] }
 0xe0a   :  { %v6345_v37 = vmul.f32 %v9922_v45, %v12205_v62  ;;  %v9924_v39 = vpop.eup %9923  ;;  %v12295_v45 = vld [vmem:[#allocation3 + $0x10] sm:$0xff] }
 0xe0c   :  { %v12247_v28 = vadd.f32 %v6346_v30, %v6345_v37  ;;  %v12298_v30 = vld [vmem:[#allocation3 + $0x28] sm:$0xff]  ;;  %v12306_v37 = vld [vmem:[#allocation3 + $0x20] sm:$0xff] }
 0xe0e   :  { %9925 = vtanh.f32 %v12247_v28 }
 0xe18   :  { %v9926_v24 = vpop.eup %9925 }
 0xe19   :  { %v6349_v57 = vmul.f32 %v9926_v24, %v9924_v39  ;;  %v12312_v39 = vld [vmem:[#allocation3 + $0x48] sm:$0xff]  ;;  %v12315_v24 = vld [vmem:[#allocation3 + $0x58] sm:$0xff] }
 0xe1b   :  { %v6354_v8 = vpack.c.bf16 %v6349_v57, %v6349_v57  ;;  %v12318_v57 = vld [vmem:[#allocation3 + $0x40] sm:$0xff] }
 0xe1d   :  { %6388 = vmatmul.mubr.bf16.vlgmr.msra.gmra.mrb[128].mxu0 %v6354_v8  ;;  %6429 = vmatmul.mubr.bf16.vlgmr.msra.gmra.mrb[128].mxu1 %v6354_v8  ;;  %v12321_v8 = vld [vmem:[#allocation3 + $0x50] sm:$0xff] }
 0xe1e   :  { %6471 = vmatpush1.bf16.msra.mxu0 %v11890_v44  ;;  %6512 = vmatpush1.bf16.msra.mxu1 %v11892_v5 }
 0xe1f   :  { %6472 = vmatprep.subr.bf16.mxu0 %v11894_v35  ;;  %6513 = vmatprep.subr.bf16.mxu1 %v11896_v50  ;;  %v13258_v35 = vld [vmem:[#allocation94_spill] sm:$0xff] }
 0xe20   :  { %6502 = vmatprep.mubr.bf16.mxu0 %v13021_v21  ;;  %6543 = vmatprep.mubr.bf16.mxu1 %v13021_v21 }
 0xe22   :  { %6473 = vmatpush1.bf16.msra.mxu0 %v11904_v42  ;;  %6514 = vmatpush1.bf16.msra.mxu1 %v11906_v46  ;;  %v13259_v42 = vld [vmem:[#allocation38_spill] sm:$0xff] }
 0xe23   :  { %6474 = vmatprep.subr.bf16.mxu0 %v11908_v4  ;;  %6515 = vmatprep.subr.bf16.mxu1 %v11910_v7 }
 0xe26   :  { %6475 = vmatpush1.bf16.msra.mxu0 %v11918_v1  ;;  %6516 = vmatpush1.bf16.msra.mxu1 %v11920_v9  ;;  %v13260_v1 = vld [vmem:[#allocation39_spill] sm:$0xff] }
 0xe27   :  { %6476 = vmatprep.subr.bf16.mxu0 %v11922_v20  ;;  %6517 = vmatprep.subr.bf16.mxu1 %v11924_v38  ;;  %v13261_v20 = vld [vmem:[#allocation40_spill] sm:$0xff] }
 0xe2a   :  { %6477 = vmatpush1.bf16.msra.mxu0 %v11932_v43  ;;  %6518 = vmatpush1.bf16.msra.mxu1 %v11934_v34 }
 0xe2b   :  { %6478 = vmatprep.subr.bf16.mxu0 %v11936_v41  ;;  %6519 = vmatprep.subr.bf16.mxu1 %v11938_v22 }
 0xe2e   :  { %6479 = vmatpush1.bf16.msra.mxu0 %v11946_v59  ;;  %6520 = vmatpush1.bf16.msra.mxu1 %v11948_v33 }
 0xe2f   :  { %6480 = vmatprep.subr.bf16.mxu0 %v11950_v11  ;;  %6521 = vmatprep.subr.bf16.mxu1 %v11952_v55 }
 0xe32   :  { %6481 = vmatpush1.bf16.msra.mxu0 %v11960_v48  ;;  %6522 = vmatpush1.bf16.msra.mxu1 %v11962_v15 }
 0xe33   :  { %6482 = vmatprep.subr.bf16.mxu0 %v11964_v18  ;;  %6523 = vmatprep.subr.bf16.mxu1 %v11966_v27 }
 0xe36   :  { %6483 = vmatpush1.bf16.msra.mxu0 %v11974_v3  ;;  %6524 = vmatpush1.bf16.msra.mxu1 %v11976_v16 }
 0xe37   :  { %6484 = vmatprep.subr.bf16.mxu0 %v11978_v49  ;;  %6525 = vmatprep.subr.bf16.mxu1 %v11980_v61 }
 0xe3a   :  { %6485 = vmatpush1.bf16.msra.mxu0 %v11986_v63  ;;  %6526 = vmatpush1.bf16.msra.mxu1 %v11988_v14 }
 0xe3b   :  { %6585 = vmatprep.subr.bf16.mxu0 %v11882_v32  ;;  %6626 = vmatprep.subr.bf16.mxu1 %v11884_v31 }
 0xef0   :  { %v6389_v44 = vpop.f32.mrb[128].mxu0  ;;  %v6430_v5 = vpop.f32.mrb[128].mxu1 }
 0xef1   :  { %v6437_v50 = vadd.f32 %v6389_v44, %v13258_v35  ;;  %v6439_v46 = vadd.f32 %v6430_v5, %v13259_v42  ;;  %v6391_v4 = vpop.f32.mrb[129].mxu0  ;;  %v6432_v7 = vpop.f32.mrb[129].mxu1  ;;  %v12324_v44 = vld [vmem:[#allocation3 + $0x68] sm:$0xff]  ;;  %v12327_v5 = vld [vmem:[#allocation3 + $0x78] sm:$0xff] }
 0xef2   :  { %v6438_v9 = vadd.f32 %v6391_v4, %v13260_v1  ;;  %v6440_v38 = vadd.f32 %v6432_v7, %v13261_v20  ;;  %v6393_v62 = vpop.f32.mrb[130].mxu0  ;;  %v6434_v13 = vpop.f32.mrb[130].mxu1 }
 0xef3   :  { %v9182_v2 = vmul.f32 -1.442695, %v6437_v50  ;;  %v6394_v25 = vpop.f32.mrb[131].mxu0  ;;  %v6435_v58 = vpop.f32.mrb[131].mxu1 }
 0xef4   :  { %v9183_v32 = vmul.f32 -1.442695, %v6438_v9  ;;  %v9184_v31 = vmul.f32 -1.442695, %v6440_v38 }
 0xef5   :  { %9927 = vpow2.f32 %v9182_v2 }
 0xef6   :  { %9929 = vpow2.f32 %v9183_v32 }
 0xef7   :  { %9931 = vpow2.f32 %v9184_v31 }
 0xef8   :  { %9933 = vtanh.f32 %v6439_v46 }
 0xeff   :  { %v9928_v60 = vpop.eup %9927 }
 0xf00   :  { %v9930_v52 = vpop.eup %9929  ;;  %v6444_v40 = vadd.f32 1.0, %v9928_v60 }
 0xf01   :  { %v6450_v19 = vadd.f32 1.0, %v9930_v52  ;;  %v9932_v36 = vpop.eup %9931 }
 0xf02   :  { %9935 = vrcp.f32 %v6444_v40  ;;  %v9934_v12 = vpop.eup %9933  ;;  %v6457_v54 = vadd.f32 1.0, %v9932_v36  ;;  %v10005_v40 = vld [vmem:[#allocation3 + $0x60] sm:$0xff]  ;;  %v10008_v36 = vld [vmem:[#allocation3 + $0x98] sm:$0xff] }
 0xf03   :  { %9937 = vrcp.f32 %v6450_v19  ;;  %v10006_v19 = vld [vmem:[#allocation3 + $0x70] sm:$0xff] }
 0xf04   :  { %9939 = vrcp.f32 %v6457_v54  ;;  %v10013_v54 = vld [vmem:[#allocation3 + $0xa0] sm:$0xff] }
 0xf0c   :  { %v9936_v6 = vpop.eup %9935 }
 0xf0d   :  { %v9938_v56 = vpop.eup %9937  ;;  %v6461_v17 = vmul.f32 %v9936_v6, %v9934_v12  ;;  %v10009_v12 = vld [vmem:[#allocation3 + $0x80] sm:$0xff]  ;;  %v10010_v6 = vld [vmem:[#allocation3 + $0x90] sm:$0xff] }
 0xf0e   :  { %v6460_v53 = vmul.f32 %v9938_v56, %v12247_v28  ;;  %v9940_v51 = vpop.eup %9939  ;;  %v12309_v28 = vld [vmem:[#allocation3 + $0x30] sm:$0xff]  ;;  %v10011_v56 = vld [vmem:[#allocation3 + $0xa8] sm:$0xff] }
 0xf10   :  { %v12289_v23 = vadd.f32 %v6461_v17, %v6460_v53  ;;  %v10012_v17 = vld [vmem:[#allocation3 + $0xb8] sm:$0xff]  ;;  %v10014_v53 = vld [vmem:[#allocation3 + $0xb0] sm:$0xff] }
 0xf12   :  { %9941 = vtanh.f32 %v12289_v23 }
 0xf1c   :  { %v9942_v10 = vpop.eup %9941 }
 0xf1d   :  { %v6464_v26 = vmul.f32 %v9942_v10, %v9940_v51  ;;  %v10016_v51 = vld [vmem:[#allocation3 + $0xd8] sm:$0xff]  ;;  %v10017_v10 = vld [vmem:[#allocation3 + $0xc0] sm:$0xff] }
 0xf1f   :  { %v6469_v0 = vpack.c.bf16 %v6464_v26, %v6464_v26  ;;  %v10018_v26 = vld [vmem:[#allocation3 + $0xd0] sm:$0xff] }
 0xf21   :  { %6503 = vmatmul.mubr.bf16.vlgmr.msra.gmra.mrb[132].mxu0 %v6469_v0  ;;  %6544 = vmatmul.mubr.bf16.vlgmr.msra.gmra.mrb[132].mxu1 %v6469_v0  ;;  %v10019_v0 = vld [vmem:[#allocation3 + $0xe8] sm:$0xff] }
 0xf22   :  { %6586 = vmatpush1.bf16.msra.mxu0 %v12292_v29  ;;  %6627 = vmatpush1.bf16.msra.mxu1 %v12295_v45 }
 0xf23   :  { %6587 = vmatprep.subr.bf16.mxu0 %v12298_v30  ;;  %6628 = vmatprep.subr.bf16.mxu1 %v12301_v47 }
 0xf24   :  { %6617 = vmatprep.mubr.bf16.mxu0 %v13021_v21  ;;  %6658 = vmatprep.mubr.bf16.mxu1 %v13021_v21 }
 0xf26   :  { %6588 = vmatpush1.bf16.msra.mxu0 %v12306_v37  ;;  %6629 = vmatpush1.bf16.msra.mxu1 %v12309_v28 }
 0xf27   :  { %6589 = vmatprep.subr.bf16.mxu0 %v12312_v39  ;;  %6630 = vmatprep.subr.bf16.mxu1 %v12315_v24 }
 0xf2a   :  { %6590 = vmatpush1.bf16.msra.mxu0 %v12318_v57  ;;  %6631 = vmatpush1.bf16.msra.mxu1 %v12321_v8 }
 0xf2b   :  { %6591 = vmatprep.subr.bf16.mxu0 %v12324_v44  ;;  %6632 = vmatprep.subr.bf16.mxu1 %v12327_v5 }
 0xf2e   :  { %6592 = vmatpush1.bf16.msra.mxu0 %v11932_v43  ;;  %6633 = vmatpush1.bf16.msra.mxu1 %v11934_v34  ;;  %v10003_v43 = vld [vmem:[#allocation3 + $0x8] sm:$0xff]  ;;  %v10004_v34 = vld [vmem:[#allocation3 + $0x18] sm:$0xff] }
 0xf2f   :  { %6593 = vmatprep.subr.bf16.mxu0 %v11936_v41  ;;  %6634 = vmatprep.subr.bf16.mxu1 %v11938_v22 }
 0xf32   :  { %6594 = vmatpush1.bf16.msra.mxu0 %v11946_v59  ;;  %6635 = vmatpush1.bf16.msra.mxu1 %v11948_v33  ;;  %v13262_v59 = vld [vmem:[#allocation41_spill] sm:$0xff] }
 0xf33   :  { %6595 = vmatprep.subr.bf16.mxu0 %v11950_v11  ;;  %6636 = vmatprep.subr.bf16.mxu1 %v11952_v55  ;;  %v13263_v11 = vld [vmem:[#allocation42_spill] sm:$0xff] }
 0xf36   :  { %6596 = vmatpush1.bf16.msra.mxu0 %v11960_v48  ;;  %6637 = vmatpush1.bf16.msra.mxu1 %v11962_v15 }
 0xf37   :  { %6597 = vmatprep.subr.bf16.mxu0 %v11964_v18  ;;  %6638 = vmatprep.subr.bf16.mxu1 %v11966_v27  ;;  %v13264_v18 = vld [vmem:[#allocation97_spill] sm:$0xff] }
 0xf3a   :  { %6598 = vmatpush1.bf16.msra.mxu0 %v11974_v3  ;;  %6639 = vmatpush1.bf16.msra.mxu1 %v11976_v16  ;;  %v13265_v3 = vld [vmem:[#allocation98_spill] sm:$0xff] }
 0xf3b   :  { %6599 = vmatprep.subr.bf16.mxu0 %v11978_v49  ;;  %6640 = vmatprep.subr.bf16.mxu1 %v11980_v61 }
 0xf3e   :  { %6600 = vmatpush1.bf16.msra.mxu0 %v11986_v63  ;;  %6641 = vmatpush1.bf16.msra.mxu1 %v11988_v14 }
 0xf3f   :  { %6700 = vmatprep.subr.bf16.mxu0 %v10003_v43  ;;  %6741 = vmatprep.subr.bf16.mxu1 %v10004_v34  ;;  %v13269_v34 = vld [vmem:[#allocation60_spill] sm:$0xff] }
 0xff4   :  { %v6504_v41 = vpop.f32.mrb[132].mxu0  ;;  %v6545_v22 = vpop.f32.mrb[132].mxu1 }
 0xff5   :  { %v6552_v33 = vadd.f32 %v6504_v41, %v13262_v59  ;;  %v6554_v55 = vadd.f32 %v6545_v22, %v13263_v11  ;;  %v6506_v48 = vpop.f32.mrb[133].mxu0  ;;  %v6547_v15 = vpop.f32.mrb[133].mxu1 }
 0xff6   :  { %v6553_v27 = vadd.f32 %v6506_v48, %v13264_v18  ;;  %v6555_v16 = vadd.f32 %v6547_v15, %v13265_v3  ;;  %v6508_v49 = vpop.f32.mrb[134].mxu0  ;;  %v6549_v61 = vpop.f32.mrb[134].mxu1 }
 0xff7   :  { %v9185_v63 = vmul.f32 -1.442695, %v6552_v33  ;;  %v6509_v14 = vpop.f32.mrb[135].mxu0  ;;  %v6550_v35 = vpop.f32.mrb[135].mxu1 }
 0xff8   :  { %v9186_v50 = vmul.f32 -1.442695, %v6553_v27  ;;  %v9187_v42 = vmul.f32 -1.442695, %v6555_v16 }
 0xff9   :  { %9943 = vpow2.f32 %v9185_v63 }
 0xffa   :  { %9945 = vpow2.f32 %v9186_v50 }
 0xffb   :  { %9947 = vpow2.f32 %v9187_v42 }
 0xffc   :  { %9949 = vtanh.f32 %v6554_v55 }
0x1003   :  { %v9944_v46 = vpop.eup %9943 }
0x1004   :  { %v9946_v4 = vpop.eup %9945  ;;  %v6559_v7 = vadd.f32 1.0, %v9944_v46 }
0x1005   :  { %v6565_v1 = vadd.f32 1.0, %v9946_v4  ;;  %v9948_v9 = vpop.eup %9947 }
0x1006   :  { %9951 = vrcp.f32 %v6559_v7  ;;  %v9950_v20 = vpop.eup %9949  ;;  %v6572_v2 = vadd.f32 1.0, %v9948_v9 }
0x1007   :  { %9953 = vrcp.f32 %v6565_v1 }
0x1008   :  { %9955 = vrcp.f32 %v6572_v2  ;;  %v13271_v2 = vld [vmem:[#allocation79_spill] sm:$0xff] }
0x1010   :  { %v9952_v38 = vpop.eup %9951 }
0x1011   :  { %v9954_v62 = vpop.eup %9953  ;;  %v6576_v13 = vmul.f32 %v9952_v38, %v9950_v20 }
0x1012   :  { %v6575_v25 = vmul.f32 %v9954_v62, %v12289_v23  ;;  %v9956_v32 = vpop.eup %9955  ;;  %v10015_v23 = vld [vmem:[#allocation3 + $0xc8] sm:$0xff]  ;;  %v13270_v62 = vld [vmem:[#allocation62_spill] sm:$0xff] }
0x1014   :  { %v12353_v58 = vadd.f32 %v6576_v13, %v6575_v25 }
0x1016   :  { %9957 = vtanh.f32 %v12353_v58 }
0x1020   :  { %v9958_v31 = vpop.eup %9957 }
0x1021   :  { %v6579_v60 = vmul.f32 %v9958_v31, %v9956_v32 }
0x1023   :  { %v6584_v52 = vpack.c.bf16 %v6579_v60, %v6579_v60  ;;  %v13272_v60 = vld [vmem:[#allocation81_spill] sm:$0xff] }
0x1025   :  { %6618 = vmatmul.mubr.bf16.vlgmr.msra.gmra.mrb[136].mxu0 %v6584_v52  ;;  %6659 = vmatmul.mubr.bf16.vlgmr.msra.gmra.mrb[136].mxu1 %v6584_v52 }
0x1026   :  { %6701 = vmatpush1.bf16.msra.mxu0 %v12292_v29  ;;  %6742 = vmatpush1.bf16.msra.mxu1 %v12295_v45  ;;  %v10020_v29 = vld [vmem:[#allocation3 + $0xf8] sm:$0xff]  ;;  %v10021_v45 = vld [vmem:[#allocation3 + $0xe0] sm:$0xff] }
0x1027   :  { %6702 = vmatprep.subr.bf16.mxu0 %v12298_v30  ;;  %6743 = vmatprep.subr.bf16.mxu1 %v12301_v47  ;;  %v10022_v30 = vld [vmem:[#allocation3 + $0xf0] sm:$0xff] }
0x1028   :  { %6732 = vmatprep.mubr.bf16.mxu0 %v13021_v21  ;;  %6773 = vmatprep.mubr.bf16.mxu1 %v13021_v21  ;;  %v10007_v21 = vld [vmem:[#allocation3 + $0x88] sm:$0xff] }
0x102a   :  { %6703 = vmatpush1.bf16.msra.mxu0 %v12306_v37  ;;  %6744 = vmatpush1.bf16.msra.mxu1 %v12309_v28  ;;  %v13266_v28 = vld [vmem:[#allocation99_spill] sm:$0xff] }
0x102b   :  { %6704 = vmatprep.subr.bf16.mxu0 %v12312_v39  ;;  %6745 = vmatprep.subr.bf16.mxu1 %v12315_v24  ;;  %v13267_v24 = vld [vmem:[#allocation58_spill] sm:$0xff] }
0x102e   :  { %6705 = vmatpush1.bf16.msra.mxu0 %v12318_v57  ;;  %6746 = vmatpush1.bf16.msra.mxu1 %v12321_v8 }
0x102f   :  { %6706 = vmatprep.subr.bf16.mxu0 %v12324_v44  ;;  %6747 = vmatprep.subr.bf16.mxu1 %v12327_v5  ;;  %v13268_v5 = vld [vmem:[#allocation61_spill] sm:$0xff] }
0x1032   :  { %6707 = vmatpush1.bf16.msra.mxu0 %v10005_v40  ;;  %6748 = vmatpush1.bf16.msra.mxu1 %v10006_v19 }
0x1033   :  { %6708 = vmatprep.subr.bf16.mxu0 %v10007_v21  ;;  %6749 = vmatprep.subr.bf16.mxu1 %v10008_v36 }
0x1036   :  { %6709 = vmatpush1.bf16.msra.mxu0 %v10009_v12  ;;  %6750 = vmatpush1.bf16.msra.mxu1 %v10010_v6 }
0x1037   :  { %6710 = vmatprep.subr.bf16.mxu0 %v10011_v56  ;;  %6751 = vmatprep.subr.bf16.mxu1 %v10012_v17 }
0x103a   :  { %6711 = vmatpush1.bf16.msra.mxu0 %v10013_v54  ;;  %6752 = vmatpush1.bf16.msra.mxu1 %v10014_v53 }
0x103b   :  { %6712 = vmatprep.subr.bf16.mxu0 %v10015_v23  ;;  %6753 = vmatprep.subr.bf16.mxu1 %v10016_v51 }
0x103e   :  { %6713 = vmatpush1.bf16.msra.mxu0 %v10017_v10  ;;  %6754 = vmatpush1.bf16.msra.mxu1 %v10018_v26 }
0x103f   :  { %6714 = vmatprep.subr.bf16.mxu0 %v10019_v0  ;;  %6755 = vmatprep.subr.bf16.mxu1 %v10020_v29 }
0x1042   :  { %6715 = vmatpush1.bf16.msra.mxu0 %v10021_v45  ;;  %6756 = vmatpush1.bf16.msra.mxu1 %v10022_v30 }
0x10f8   :  { %v6619_v47 = vpop.f32.mrb[136].mxu0  ;;  %v6660_v37 = vpop.f32.mrb[136].mxu1 }
0x10f9   :  { %v6667_v39 = vadd.f32 %v6619_v47, %v13266_v28  ;;  %v6669_v57 = vadd.f32 %v6660_v37, %v13267_v24  ;;  %v6621_v8 = vpop.f32.mrb[137].mxu0  ;;  %v6662_v44 = vpop.f32.mrb[137].mxu1 }
0x10fa   :  { %v6668_v43 = vadd.f32 %v6621_v8, %v13268_v5  ;;  %v6670_v41 = vadd.f32 %v6662_v44, %v13269_v34  ;;  %v6623_v22 = vpop.f32.mrb[138].mxu0  ;;  %v6664_v59 = vpop.f32.mrb[138].mxu1 }
0x10fb   :  { %v9188_v33 = vmul.f32 -1.442695, %v6667_v39  ;;  %v6624_v11 = vpop.f32.mrb[139].mxu0  ;;  %v6665_v55 = vpop.f32.mrb[139].mxu1 }
0x10fc   :  { %v9189_v48 = vmul.f32 -1.442695, %v6668_v43  ;;  %v9190_v15 = vmul.f32 -1.442695, %v6670_v41 }
0x10fd   :  { %9959 = vpow2.f32 %v9188_v33 }
0x10fe   :  { %9961 = vpow2.f32 %v9189_v48 }
0x10ff   :  { %9963 = vpow2.f32 %v9190_v15 }
0x1100   :  { %9965 = vtanh.f32 %v6669_v57 }
0x1107   :  { %v9960_v18 = vpop.eup %9959 }
0x1108   :  { %v9962_v27 = vpop.eup %9961  ;;  %v6674_v3 = vadd.f32 1.0, %v9960_v18 }
0x1109   :  { %v6680_v16 = vadd.f32 1.0, %v9962_v27  ;;  %v9964_v49 = vpop.eup %9963 }
0x110a   :  { %9967 = vrcp.f32 %v6674_v3  ;;  %v9966_v61 = vpop.eup %9965  ;;  %v6687_v50 = vadd.f32 1.0, %v9964_v49 }
0x110b   :  { %9969 = vrcp.f32 %v6680_v16 }
0x110c   :  { %9971 = vrcp.f32 %v6687_v50 }
0x1114   :  { %v9968_v63 = vpop.eup %9967 }
0x1115   :  { %v9970_v14 = vpop.eup %9969  ;;  %v6691_v35 = vmul.f32 %v9968_v63, %v9966_v61 }
0x1116   :  { %v6690_v42 = vmul.f32 %v9970_v14, %v12353_v58  ;;  %v9972_v4 = vpop.eup %9971  ;;  %v13273_v58 = vld [vmem:[#allocation80_spill] sm:$0xff] }
0x1118   :  { %v6692_v46 = vadd.f32 %v6691_v35, %v6690_v42 }
0x111a   :  { %9973 = vtanh.f32 %v6692_v46 }
0x1124   :  { %v9974_v7 = vpop.eup %9973 }
0x1125   :  { %v6694_v1 = vmul.f32 %v9974_v7, %v9972_v4 }
0x1127   :  { %v6699_v9 = vpack.c.bf16 %v6694_v1, %v6694_v1 }
0x1129   :  { %6733 = vmatmul.mubr.bf16.vlgmr.msra.gmra.mrb[140].mxu0 %v6699_v9  ;;  %6774 = vmatmul.mubr.bf16.vlgmr.msra.gmra.mrb[140].mxu1 %v6699_v9 }
0x11fc   :  { %v6734_v20 = vpop.f32.mrb[140].mxu0  ;;  %v6775_v38 = vpop.f32.mrb[140].mxu1 }
0x11fd   :  { %v6782_v13 = vadd.f32 %v6734_v20, %v13270_v62  ;;  %v6784_v25 = vadd.f32 %v6775_v38, %v13271_v2  ;;  %v6736_v32 = vpop.f32.mrb[141].mxu0  ;;  %v6777_v31 = vpop.f32.mrb[141].mxu1 }
0x11fe   :  { %v6783_v52 = vadd.f32 %v6736_v32, %v13272_v60  ;;  %v6785_v40 = vadd.f32 %v6777_v31, %v13273_v58  ;;  %v6738_v19 = vpop.f32.mrb[142].mxu0  ;;  %v6779_v21 = vpop.f32.mrb[142].mxu1 }
0x11ff   :  { %v9191_v36 = vmul.f32 -1.442695, %v6782_v13  ;;  %v6739_v12 = vpop.f32.mrb[143].mxu0  ;;  %v6780_v6 = vpop.f32.mrb[143].mxu1 }
0x1200   :  { %v9192_v56 = vmul.f32 -1.442695, %v6783_v52  ;;  %v9193_v17 = vmul.f32 -1.442695, %v6785_v40 }
0x1201   :  { %9975 = vpow2.f32 %v9191_v36 }
0x1202   :  { %9977 = vpow2.f32 %v9192_v56 }
0x1203   :  { %9979 = vpow2.f32 %v9193_v17 }
0x1204   :  { %9981 = vtanh.f32 %v6784_v25 }
0x120b   :  { %v9976_v54 = vpop.eup %9975 }
0x120c   :  { %v9978_v53 = vpop.eup %9977  ;;  %v6789_v23 = vadd.f32 1.0, %v9976_v54 }
0x120d   :  { %v6795_v51 = vadd.f32 1.0, %v9978_v53  ;;  %v9980_v10 = vpop.eup %9979 }
0x120e   :  { %9983 = vrcp.f32 %v6789_v23  ;;  %v9982_v26 = vpop.eup %9981  ;;  %v6802_v30 = vadd.f32 1.0, %v9980_v10 }
0x120f   :  { %9985 = vrcp.f32 %v6795_v51 }
0x1210   :  { %9987 = vrcp.f32 %v6802_v30 }
0x1218   :  { %v9984_v0 = vpop.eup %9983 }
0x1219   :  { %v9986_v29 = vpop.eup %9985  ;;  %v6806_v45 = vmul.f32 %v9984_v0, %v9982_v26 }
0x121a   :  { %v6805_v47 = vmul.f32 %v9986_v29, %v6692_v46  ;;  %v9988_v28 = vpop.eup %9987 }
0x121c   :  { %v6807_v37 = vadd.f32 %v6806_v45, %v6805_v47 }
0x121e   :  { %9989 = vtanh.f32 %v6807_v37 }
0x1228   :  { %v9990_v39 = vpop.eup %9989 }
0x1229   :  { %v12379_v24 = vmul.f32 %v9990_v39, %v9988_v28 }
0x122a   :  { %10149 = dma.done.wait [#allocation7 + $0x2], 8192 }
0x122b   :  { %10150 = vsyncadd [#allocation7 + $0x2], 4294959104  ;;  %v13274_v57 = vld [vmem:[#allocation96_spill] sm:$0xff]  ;;  %v6816_v5 = vld [vmem:[#allocation4] sm:$0xff] }
0x122c   :  { %v6815_v8 = vpack.c.bf16 %v13274_v57, %v13274_v57  ;;  %v6817_v44 = vld [vmem:[#allocation4 + $0x8] sm:$0xff]  ;;  %v6819_v34 = vld [vmem:[#allocation4 + $0x18] sm:$0xff]  ;;  %v6820_v41 = vld [vmem:[#allocation4 + $0x20] sm:$0xff] }
0x122d   :  { %v6821_v43 = vld [vmem:[#allocation4 + $0x28] sm:$0xff]  ;;  %6902 = vmatprep.subr.bf16.mxu0 %v6817_v44  ;;  %6943 = vmatprep.subr.bf16.mxu1 %v6819_v34  ;;  %v6818_v22 = vld [vmem:[#allocation4 + $0x10] sm:$0xff]  ;;  %v6823_v59 = vld [vmem:[#allocation4 + $0x38] sm:$0xff] }
0x122e   :  { %6934 = vmatprep.mubr.bf16.mxu0 %v6815_v8  ;;  %6975 = vmatprep.mubr.bf16.mxu1 %v6815_v8  ;;  %v6825_v33 = vld [vmem:[#allocation4 + $0x48] sm:$0xff]  ;;  %v6822_v11 = vld [vmem:[#allocation4 + $0x30] sm:$0xff]  ;;  %v6827_v55 = vld [vmem:[#allocation4 + $0x58] sm:$0xff] }
0x122f   :  { %6903 = vmatpush1.bf16.msra.mxu0 %v6816_v5  ;;  %6944 = vmatpush1.bf16.msra.mxu1 %v6818_v22  ;;  %v6824_v48 = vld [vmem:[#allocation4 + $0x40] sm:$0xff]  ;;  %v6829_v15 = vld [vmem:[#allocation4 + $0x68] sm:$0xff]  ;;  %v6826_v18 = vld [vmem:[#allocation4 + $0x50] sm:$0xff] }
0x1230   :  { %6904 = vmatprep.subr.bf16.mxu0 %v6821_v43  ;;  %6945 = vmatprep.subr.bf16.mxu1 %v6823_v59  ;;  %v6831_v27 = vld [vmem:[#allocation4 + $0x78] sm:$0xff]  ;;  %v6828_v3 = vld [vmem:[#allocation4 + $0x60] sm:$0xff]  ;;  %v6833_v16 = vld [vmem:[#allocation4 + $0x88] sm:$0xff] }
0x1231   :  { %v6830_v49 = vld [vmem:[#allocation4 + $0x70] sm:$0xff]  ;;  %v6835_v61 = vld [vmem:[#allocation4 + $0x98] sm:$0xff]  ;;  %v6832_v63 = vld [vmem:[#allocation4 + $0x80] sm:$0xff] }
0x1232   :  { %v6837_v14 = vld [vmem:[#allocation4 + $0xa8] sm:$0xff]  ;;  %v6834_v35 = vld [vmem:[#allocation4 + $0x90] sm:$0xff]  ;;  %v6839_v50 = vld [vmem:[#allocation4 + $0xb8] sm:$0xff] }
0x1233   :  { %6905 = vmatpush1.bf16.msra.mxu0 %v6820_v41  ;;  %6946 = vmatpush1.bf16.msra.mxu1 %v6822_v11  ;;  %v6836_v42 = vld [vmem:[#allocation4 + $0xa0] sm:$0xff]  ;;  %v6841_v46 = vld [vmem:[#allocation4 + $0xc8] sm:$0xff]  ;;  %v6838_v4 = vld [vmem:[#allocation4 + $0xb0] sm:$0xff] }
0x1234   :  { %6906 = vmatprep.subr.bf16.mxu0 %v6825_v33  ;;  %6947 = vmatprep.subr.bf16.mxu1 %v6827_v55  ;;  %v6843_v7 = vld [vmem:[#allocation4 + $0xd8] sm:$0xff]  ;;  %v6840_v1 = vld [vmem:[#allocation4 + $0xc0] sm:$0xff]  ;;  %v6845_v9 = vld [vmem:[#allocation4 + $0xe8] sm:$0xff] }
0x1235   :  { %v6842_v20 = vld [vmem:[#allocation4 + $0xd0] sm:$0xff]  ;;  %v6847_v38 = vld [vmem:[#allocation4 + $0xf8] sm:$0xff]  ;;  %v6844_v62 = vld [vmem:[#allocation4 + $0xe0] sm:$0xff] }
0x1236   :  { %v6849_v13 = vld [vmem:[#allocation4 + $0x108] sm:$0xff]  ;;  %v6846_v2 = vld [vmem:[#allocation4 + $0xf0] sm:$0xff]  ;;  %v6851_v25 = vld [vmem:[#allocation4 + $0x118] sm:$0xff] }
0x1237   :  { %6907 = vmatpush1.bf16.msra.mxu0 %v6824_v48  ;;  %6948 = vmatpush1.bf16.msra.mxu1 %v6826_v18  ;;  %v6848_v32 = vld [vmem:[#allocation4 + $0x100] sm:$0xff]  ;;  %v6853_v31 = vld [vmem:[#allocation4 + $0x128] sm:$0xff]  ;;  %v6850_v60 = vld [vmem:[#allocation4 + $0x110] sm:$0xff] }
0x1238   :  { %6908 = vmatprep.subr.bf16.mxu0 %v6829_v15  ;;  %6949 = vmatprep.subr.bf16.mxu1 %v6831_v27  ;;  %v6855_v52 = vld [vmem:[#allocation4 + $0x138] sm:$0xff]  ;;  %v6852_v58 = vld [vmem:[#allocation4 + $0x120] sm:$0xff]  ;;  %v6857_v40 = vld [vmem:[#allocation4 + $0x148] sm:$0xff] }
0x1239   :  { %v6854_v19 = vld [vmem:[#allocation4 + $0x130] sm:$0xff]  ;;  %v6859_v21 = vld [vmem:[#allocation4 + $0x158] sm:$0xff]  ;;  %v6856_v36 = vld [vmem:[#allocation4 + $0x140] sm:$0xff] }
0x123a   :  { %v6861_v12 = vld [vmem:[#allocation4 + $0x168] sm:$0xff]  ;;  %v6858_v6 = vld [vmem:[#allocation4 + $0x150] sm:$0xff]  ;;  %v6863_v56 = vld [vmem:[#allocation4 + $0x178] sm:$0xff] }
0x123b   :  { %6909 = vmatpush1.bf16.msra.mxu0 %v6828_v3  ;;  %6950 = vmatpush1.bf16.msra.mxu1 %v6830_v49  ;;  %v6860_v17 = vld [vmem:[#allocation4 + $0x160] sm:$0xff]  ;;  %v6865_v54 = vld [vmem:[#allocation4 + $0x188] sm:$0xff]  ;;  %v6862_v53 = vld [vmem:[#allocation4 + $0x170] sm:$0xff] }
0x123c   :  { %6910 = vmatprep.subr.bf16.mxu0 %v6833_v16  ;;  %6951 = vmatprep.subr.bf16.mxu1 %v6835_v61  ;;  %v6867_v23 = vld [vmem:[#allocation4 + $0x198] sm:$0xff]  ;;  %v6864_v51 = vld [vmem:[#allocation4 + $0x180] sm:$0xff]  ;;  %v6869_v10 = vld [vmem:[#allocation4 + $0x1a8] sm:$0xff] }
0x123d   :  { %v6866_v26 = vld [vmem:[#allocation4 + $0x190] sm:$0xff]  ;;  %v6871_v0 = vld [vmem:[#allocation4 + $0x1b8] sm:$0xff]  ;;  %v6868_v29 = vld [vmem:[#allocation4 + $0x1a0] sm:$0xff] }
0x123e   :  { %v6873_v45 = vld [vmem:[#allocation4 + $0x1c8] sm:$0xff]  ;;  %v6870_v30 = vld [vmem:[#allocation4 + $0x1b0] sm:$0xff]  ;;  %v6875_v47 = vld [vmem:[#allocation4 + $0x1d8] sm:$0xff] }
0x123f   :  { %6911 = vmatpush1.bf16.msra.mxu0 %v6832_v63  ;;  %6952 = vmatpush1.bf16.msra.mxu1 %v6834_v35  ;;  %v6872_v37 = vld [vmem:[#allocation4 + $0x1c0] sm:$0xff]  ;;  %v6877_v28 = vld [vmem:[#allocation4 + $0x1e8] sm:$0xff]  ;;  %v6874_v39 = vld [vmem:[#allocation4 + $0x1d0] sm:$0xff] }
0x1240   :  { %6912 = vmatprep.subr.bf16.mxu0 %v6837_v14  ;;  %6953 = vmatprep.subr.bf16.mxu1 %v6839_v50  ;;  %v6879_v57 = vld [vmem:[#allocation4 + $0x1f8] sm:$0xff]  ;;  %v6876_v8 = vld [vmem:[#allocation4 + $0x1e0] sm:$0xff]  ;;  %v6878_v43 = vld [vmem:[#allocation4 + $0x1f0] sm:$0xff] }
0x1241   :  { %v13275_v44 = vld [vmem:[#allocation82_spill] sm:$0xff]  ;;  %v6880_v34 = vld [vmem:[%s12940_s5] sm:$0xf]  ;;  %v13276_v41 = vld [vmem:[#allocation44_spill] sm:$0xff] }
0x1242   :  { %v6814_v5 = vpack.c.bf16 %v13275_v44, %v13275_v44  ;;  %v6885_v22 = vrot.slane %v6880_v34, %v13276_v41  ;;  %v13277_v59 = vld [vmem:[#allocation46_spill] sm:$0xff]  ;;  %v13278_v49 = vld [vmem:[#allocation45_spill] sm:$0xff] }
0x1243   :  { %6913 = vmatpush1.bf16.msra.mxu0 %v6836_v42  ;;  %6954 = vmatpush1.bf16.msra.mxu1 %v6838_v4  ;;  %v6889_v33 = vrot.slane %v6880_v34, %v13277_v59  ;;  %v6897_v61 = vrot.slane %v6880_v34, %v13278_v49 }
0x1244   :  { %6914 = vmatprep.subr.bf16.mxu0 %v6841_v46  ;;  %6955 = vmatprep.subr.bf16.mxu1 %v6843_v7  ;;  %v13279_v46 = vld [vmem:[#allocation43_spill] sm:$0xff] }
0x1245   :  { %v6893_v4 = vrot.slane %v6880_v34, %v13279_v46 }
0x1247   :  { %6915 = vmatpush1.bf16.msra.mxu0 %v6840_v1  ;;  %6956 = vmatpush1.bf16.msra.mxu1 %v6842_v20 }
0x1248   :  { %6916 = vmatprep.subr.bf16.mxu0 %v6845_v9  ;;  %6957 = vmatprep.subr.bf16.mxu1 %v6847_v38 }
0x124b   :  { %6917 = vmatpush1.bf16.msra.mxu0 %v6844_v62  ;;  %6958 = vmatpush1.bf16.msra.mxu1 %v6846_v2 }
0x124c   :  { %6918 = vmatprep.subr.bf16.mxu0 %v6849_v13  ;;  %6959 = vmatprep.subr.bf16.mxu1 %v6851_v25 }
0x124f   :  { %6919 = vmatpush1.bf16.msra.mxu0 %v6848_v32  ;;  %6960 = vmatpush1.bf16.msra.mxu1 %v6850_v60 }
0x1250   :  { %6920 = vmatprep.subr.bf16.mxu0 %v6853_v31  ;;  %6961 = vmatprep.subr.bf16.mxu1 %v6855_v52 }
0x1253   :  { %6921 = vmatpush1.bf16.msra.mxu0 %v6852_v58  ;;  %6962 = vmatpush1.bf16.msra.mxu1 %v6854_v19 }
0x1254   :  { %6922 = vmatprep.subr.bf16.mxu0 %v6857_v40  ;;  %6963 = vmatprep.subr.bf16.mxu1 %v6859_v21 }
0x1257   :  { %6923 = vmatpush1.bf16.msra.mxu0 %v6856_v36  ;;  %6964 = vmatpush1.bf16.msra.mxu1 %v6858_v6 }
0x1258   :  { %6924 = vmatprep.subr.bf16.mxu0 %v6861_v12  ;;  %6965 = vmatprep.subr.bf16.mxu1 %v6863_v56 }
0x125b   :  { %6925 = vmatpush1.bf16.msra.mxu0 %v6860_v17  ;;  %6966 = vmatpush1.bf16.msra.mxu1 %v6862_v53 }
0x125c   :  { %6926 = vmatprep.subr.bf16.mxu0 %v6865_v54  ;;  %6967 = vmatprep.subr.bf16.mxu1 %v6867_v23 }
0x125f   :  { %6927 = vmatpush1.bf16.msra.mxu0 %v6864_v51  ;;  %6968 = vmatpush1.bf16.msra.mxu1 %v6866_v26 }
0x1260   :  { %6928 = vmatprep.subr.bf16.mxu0 %v6869_v10  ;;  %6969 = vmatprep.subr.bf16.mxu1 %v6871_v0 }
0x1263   :  { %6929 = vmatpush1.bf16.msra.mxu0 %v6868_v29  ;;  %6970 = vmatpush1.bf16.msra.mxu1 %v6870_v30 }
0x1264   :  { %6930 = vmatprep.subr.bf16.mxu0 %v6873_v45  ;;  %6971 = vmatprep.subr.bf16.mxu1 %v6875_v47 }
0x1267   :  { %6931 = vmatpush1.bf16.msra.mxu0 %v6872_v37  ;;  %6972 = vmatpush1.bf16.msra.mxu1 %v6874_v39 }
0x1268   :  { %6932 = vmatprep.subr.bf16.mxu0 %v6877_v28  ;;  %6973 = vmatprep.subr.bf16.mxu1 %v6879_v57 }
0x126b   :  { %6933 = vmatpush1.bf16.msra.mxu0 %v6876_v8  ;;  %6974 = vmatpush1.bf16.msra.mxu1 %v6878_v43 }
0x126e   :  { %6935 = vmatmul.mubr.bf16.vlgmr.msra.gmra.mrb[144].mxu0 %v6814_v5  ;;  %6976 = vmatmul.mubr.bf16.vlgmr.msra.gmra.mrb[144].mxu1 %v6814_v5 }
0x1341   :  { %v6936_v11 = vpop.f32.mrb[144].mxu0  ;;  %v6977_v27 = vpop.f32.mrb[144].mxu1 }
0x1342   :  { %v6937_v55 = vadd.f32 %v6936_v11, %v6885_v22  ;;  %v6938_v48 = vpop.f32.mrb[145].mxu0  ;;  %v6979_v63 = vpop.f32.mrb[145].mxu1  ;;  %v6978_v1 = vadd.f32 %v6977_v27, %v6893_v4 }
0x1343   :  { %v6939_v15 = vadd.f32 %v6938_v48, %v6889_v33  ;;  %v6940_v18 = vpop.f32.mrb[146].mxu0  ;;  %v6981_v35 = vpop.f32.mrb[146].mxu1  ;;  %v6980_v42 = vadd.f32 %v6979_v63, %v6897_v61 }
0x1344   :  { %v9194_v3 = vmul.f32 -1.442695, %v6937_v55  ;;  %v6941_v16 = vpop.f32.mrb[147].mxu0  ;;  %v6982_v50 = vpop.f32.mrb[147].mxu1 }
0x1345   :  { %v9195_v14 = vmul.f32 -1.442695, %v6939_v15  ;;  %v9196_v7 = vmul.f32 -1.442695, %v6980_v42 }
0x1346   :  { %10023 = vpow2.f32 %v9194_v3 }
0x1347   :  { %10025 = vpow2.f32 %v9195_v14 }
0x1348   :  { %10027 = vpow2.f32 %v9196_v7 }
0x1349   :  { %10029 = vtanh.f32 %v6978_v1 }
0x1350   :  { %v10024_v9 = vpop.eup %10023 }
0x1351   :  { %v10026_v20 = vpop.eup %10025  ;;  %v6987_v38 = vadd.f32 1.0, %v10024_v9 }
0x1352   :  { %v6993_v62 = vadd.f32 1.0, %v10026_v20  ;;  %v10028_v13 = vpop.eup %10027 }
0x1353   :  { %10031 = vrcp.f32 %v6987_v38  ;;  %v10030_v2 = vpop.eup %10029  ;;  %v7000_v32 = vadd.f32 1.0, %v10028_v13 }
0x1354   :  { %10033 = vrcp.f32 %v6993_v62 }
0x1355   :  { %10035 = vrcp.f32 %v7000_v32 }
0x135d   :  { %v10032_v25 = vpop.eup %10031 }
0x135e   :  { %v10034_v31 = vpop.eup %10033  ;;  %v7004_v60 = vmul.f32 %v10032_v25, %v10030_v2 }
0x135f   :  { %v7003_v52 = vmul.f32 0.0, %v10034_v31  ;;  %v10036_v40 = vpop.eup %10035 }
0x1361   :  { %v7005_v58 = vadd.f32 %v7004_v60, %v7003_v52 }
0x1363   :  { %10037 = vtanh.f32 %v7005_v58 }
0x136d   :  { %v10038_v19 = vpop.eup %10037 }
0x136e   :  { %v12392_v21 = vmul.f32 %v10038_v19, %v10036_v40 }
0x136f   :  { %10151 = dma.done.wait [#allocation7 + $0x3], 18432 }
0x1370   :  { %10152 = vsyncadd [#allocation7 + $0x3], 4294948864 }
0x1371   :  { %10153 = dma.done.wait [#allocation7 + $0x4], 9216 }
0x1372   :  { %10154 = vsyncadd [#allocation7 + $0x4], 4294958080  ;;  %v9198_v36 = vmul.f32 -1.442695, %v12392_v21  ;;  %vm7033_vm1 = vcmp.ge.f32.partialorder %v12392_v21, -2.2 }
0x1373   :  { %vm7035_vm2 = vcmp.lt.f32.partialorder %v12392_v21, -1.8  ;;  %vm7043_vm3 = vcmp.ge.f32.partialorder %v12392_v21, -1.8  ;;  %vm7055_vm4 = vcmp.lt.f32.partialorder %v12392_v21, -1.0  ;;  %vm7063_vm8 = vcmp.ge.f32.partialorder %v12392_v21, -1.0 }
0x1374   :  { %10039 = vpow2.f32 %v9198_v36  ;;  %vm7037_vm5 = vmand %vm7033_vm1, %vm7035_vm2  ;;  %vm7045_vm6 = vcmp.lt.f32.partialorder %v12392_v21, -1.4  ;;  %vm7053_vm7 = vcmp.ge.f32.partialorder %v12392_v21, -1.4  ;;  %vm7065_vm10 = vcmp.lt.f32.partialorder %v12392_v21, -0.6 }
0x1375   :  { %vm7047_vm9 = vmand %vm7043_vm3, %vm7045_vm6  ;;  %v9222_v12 = vadd.f32 2.2, %v12392_v21  ;;  %v7163_v6 = vsub.f32 -1.0, %v12392_v21  ;;  %v10177_v56 = vmov 0.0   ;;  %v7149_v53 = vsub.f32 -1.4, %v12392_v21 }
0x1376   :  { %v9200_v17 = vsel %vm7037_vm5, 1.0, %v10177_v56  ;;  %v9202_v54 = vsel %vm7047_vm9, 1.0, %v10177_v56  ;;  %vm7057_vm11 = vmand %vm7053_vm7, %vm7055_vm4  ;;  %v12409_v23 = vadd.f32 1.8, %v12392_v21  ;;  %v12413_v0 = vadd.f32 1.4, %v12392_v21 }
0x1377   :  { %v9204_v51 = vsel %vm7057_vm11, 1.0, %v10177_v56  ;;  %vm7067_vm12 = vmand %vm7063_vm8, %vm7065_vm10  ;;  %v7145_v10 = vmul.f32 2.5, %v9222_v12  ;;  %v7165_v26 = vmul.f32 2.5, %v7163_v6  ;;  %v7151_v29 = vmul.f32 2.5, %v7149_v53  ;;  %v7512_v47 = vld [vmem:[#allocation5 + $0x40] sm:$0xff]  ;;  %v7513_v43 = vld [vmem:[#allocation5 + $0x48] sm:$0xff] }
0x1378   :  { %v7159_v45 = vmul.f32 2.5, %v12409_v23  ;;  %v7177_v30 = vsub.f32 -0.6, %v12392_v21  ;;  %v7528_v37 = vld [vmem:[#allocation5 + $0xc0] sm:$0xff]  ;;  %v12418_v39 = vsel %vm7067_vm12, 1.0, %v10177_v56  ;;  %v7173_v44 = vmul.f32 2.5, %v12413_v0  ;;  %9269 = vmatprep.subr.bf16.mxu0 %v7512_v47 }
0x1379   :  { %v7504_v28 = vld [vmem:[#allocation5] sm:$0xff]  ;;  %v7147_v57 = vmul.f32 %v9200_v17, %v7145_v10  ;;  %v7167_v8 = vmul.f32 %v9204_v51, %v7165_v26  ;;  %9291 = vmatprep.subr.bf16.mxu1 %v7528_v37  ;;  %v7529_v34 = vld [vmem:[#allocation5 + $0xc8] sm:$0xff]  ;;  %v7153_v41 = vmul.f32 %v9202_v54, %v7151_v29  ;;  %v7283_v33 = vmul.f32 1.25, %v9222_v12  ;;  %v7514_v61 = vld [vmem:[#allocation5 + $0x50] sm:$0xff]  ;;  %s10179_s5 = smov [#allocation16]  }
0x137a   :  { %v7520_v5 = vld [vmem:[#allocation5 + $0x80] sm:$0xff]  ;;  %v7161_v22 = vmul.f32 %v9202_v54, %v7159_v45  ;;  %v7179_v59 = vmul.f32 2.5, %v7177_v30  ;;  %9270 = vmatpush3.bf16.msra.mxu0 %v7504_v28  ;;  %v7175_v11 = vmul.f32 %v9204_v51, %v7173_v44  ;;  %v7287_v55 = vmul.f32 1.25, %v7163_v6  ;;  %v7505_v15 = vld [vmem:[#allocation5 + $0x8] sm:$0xff]  ;;  %v7530_v63 = vld [vmem:[#allocation5 + $0xd0] sm:$0xff]  ;;  %s8537_s24 = sshll.u32 %s10179_s5, 4  ;;  %s8538_s24 = int_to_ptr.vmem [resolvable:$true] %s8537_s24 }
0x137b   :  { %9292 = vmatpush3.bf16.msra.mxu1 %v7520_v5  ;;  %v7293_v48 = vmul.f32 1.25, %v12409_v23  ;;  %9271 = vmatprep.subr.bf16.mxu0 %v7513_v43  ;;  %v7521_v18 = vld [vmem:[#allocation5 + $0x88] sm:$0xff]  ;;  %v7155_v27 = vadd.f32 %v7153_v41, %v7147_v57  ;;  %v7297_v49 = vmul.f32 1.25, %v7177_v30  ;;  %v7373_v14 = vmul.f32 0.8333333, %v9222_v12  ;;  %v7506_v1 = vld [vmem:[#allocation5 + $0x10] sm:$0xff]  ;;  %p10126_p11 = scmp.lt.s32.totalorder %s8538_s24, %s8538_s24 }
0x137c   :  { %9293 = vmatprep.subr.bf16.mxu1 %v7529_v34  ;;  %v7169_v3 = vadd.f32 %v7167_v8, %v7161_v22  ;;  %v7181_v16 = vmul.f32 %v12418_v39, %v7179_v59  ;;  %v7522_v9 = vld [vmem:[#allocation5 + $0x90] sm:$0xff]  ;;  %v7377_v62 = vmul.f32 0.8333333, %v7177_v30  ;;  %v9197_v13 = vmul.f32 -1.442695, %v12379_v24  ;;  %v7515_v2 = vld [vmem:[#allocation5 + $0x58] sm:$0xff] }
0x137d   :  { %v7285_v42 = vmul.f32 %v7283_v33, %v7155_v27  ;;  %v7531_v25 = vld [vmem:[#allocation5 + $0xd8] sm:$0xff]  ;;  %vm7032_vm13 = vcmp.ge.f32.partialorder %v12379_v24, -2.2  ;;  %vm7054_vm14 = vcmp.lt.f32.partialorder %v12379_v24, -1.0  ;;  %v7162_v32 = vsub.f32 -1.0, %v12379_v24  ;;  %v7516_v40 = vld [vmem:[#allocation5 + $0x60] sm:$0xff] }
0x137e   :  { %v10040_v35 = vpop.eup %10039  ;;  %v12423_v50 = vadd.f32 %v7181_v16, %v7175_v11  ;;  %v7289_v46 = vmul.f32 %v7287_v55, %v7169_v3  ;;  %v7295_v4 = vmul.f32 %v7293_v48, %v7169_v3  ;;  %9272 = vmatpush3.bf16.msra.mxu0 %v7505_v15  ;;  %v7507_v31 = vld [vmem:[#allocation5 + $0x18] sm:$0xff]  ;;  %vm7034_vm15 = vcmp.lt.f32.partialorder %v12379_v24, -1.8  ;;  %v7532_v19 = vld [vmem:[#allocation5 + $0xe0] sm:$0xff]  ;;  %v7517_v34 = vld [vmem:[#allocation5 + $0x68] sm:$0xff]  ;;  %s10121_s3 = scalar_lea.vmem %s8538_s24, 128 }
0x137f   :  { %9294 = vmatpush3.bf16.msra.mxu1 %v7521_v18  ;;  %v7023_v7 = vadd.f32 1.0, %v10040_v35  ;;  %9273 = vmatprep.subr.bf16.mxu0 %v7514_v61  ;;  %v7523_v60 = vld [vmem:[#allocation5 + $0x98] sm:$0xff]  ;;  %vm7036_vm0 = vmand %vm7032_vm13, %vm7034_vm15  ;;  %vm7042_vm1 = vcmp.ge.f32.partialorder %v12379_v24, -1.8  ;;  %vm7044_vm2 = vcmp.lt.f32.partialorder %v12379_v24, -1.4  ;;  %p10122_p10 = scmp.ne.s32.totalorder %s8538_s24, %s10121_s3  ;;  %p10127_p12 = scmp.lt.s32.totalorder %s10121_s3, %s10121_s3 }
0x1380   :  { %9295 = vmatprep.subr.bf16.mxu1 %v7530_v63  ;;  %v7291_v20 = vadd.f32 %v7289_v46, %v7285_v42  ;;  %v7299_v38 = vmul.f32 %v7297_v49, %v12423_v50  ;;  %vm7062_vm3 = vcmp.ge.f32.partialorder %v12379_v24, -1.0  ;;  %v9199_v12 = vsel %vm7036_vm0, 1.0, %v10177_v56  ;;  %vm7046_vm4 = vmand %vm7042_vm1, %vm7044_vm2  ;;  %v7508_v28 = vld [vmem:[#allocation5 + $0x20] sm:$0xff]  ;;  %v7533_v41 = vld [vmem:[#allocation5 + $0xe8] sm:$0xff] }
0x1381   :  { %10041 = vrcp.f32 %v7023_v7  ;;  %vm7052_vm5 = vcmp.ge.f32.partialorder %v12379_v24, -1.4  ;;  %vm7064_vm6 = vcmp.lt.f32.partialorder %v12379_v24, -0.6  ;;  %v9201_v6 = vsel %vm7046_vm4, 1.0, %v10177_v56  ;;  %v7524_v57 = vld [vmem:[#allocation5 + $0xa0] sm:$0xff]  ;;  %p10128_p13 = por %p10127_p12, %p10126_p11 }
0x1382   :  { %v12430_v52 = vadd.f32 %v7299_v38, %v7295_v4  ;;  %v7375_v58 = vmul.f32 %v7373_v14, %v7291_v20  ;;  %10043 = vpow2.f32 %v9197_v13  ;;  %9274 = vmatpush3.bf16.msra.mxu0 %v7506_v1  ;;  %vm7056_vm7 = vmand %vm7052_vm5, %vm7054_vm14  ;;  %v9221_v17 = vadd.f32 2.2, %v12379_v24  ;;  %v7509_v63 = vld [vmem:[#allocation5 + $0x28] sm:$0xff]  ;;  %v7518_v7 = vld [vmem:[#allocation5 + $0x70] sm:$0xff] }
0x1383   :  { %9296 = vmatpush3.bf16.msra.mxu1 %v7522_v9  ;;  %9275 = vmatprep.subr.bf16.mxu0 %v7515_v2  ;;  %v7148_v54 = vsub.f32 -1.4, %v12379_v24  ;;  %v7164_v53 = vmul.f32 2.5, %v7162_v32  ;;  %v9203_v10 = vsel %vm7056_vm7, 1.0, %v10177_v56  ;;  %vm12448_vm8 = vmand %vm7062_vm3, %vm7064_vm6  ;;  %v12453_v29 = vadd.f32 1.8, %v12379_v24  ;;  %p10129_p0 = pnand %p10128_p13, %p10122_p10 }
0x1384   :  { %9297 = vmatprep.subr.bf16.mxu1 %v7531_v25  ;;  %v7379_v36 = vmul.f32 %v7377_v62, %v12430_v52  ;;  %v12456_v45 = vadd.f32 1.4, %v12379_v24  ;;  %v7144_v30 = vmul.f32 2.5, %v9221_v17  ;;  %v7176_v43 = vsub.f32 -0.6, %v12379_v24  ;;  %v7525_v14 = vld [vmem:[#allocation5 + $0xa8] sm:$0xff] }
0x1385   :  { %v7150_v47 = vmul.f32 2.5, %v7148_v54  ;;  %v7166_v37 = vmul.f32 %v9203_v10, %v7164_v53  ;;  %v7158_v44 = vmul.f32 2.5, %v12453_v29  ;;  %v12464_v22 = vsel %vm12448_vm8, 1.0, %v10177_v56  ;;  %v7534_v1 = vld [vmem:[#allocation5 + $0xf0] sm:$0xff] }
0x1386   :  { %v7381_v51 = vadd.f32 %v7379_v36, %v7375_v58  ;;  %9276 = vmatpush3.bf16.msra.mxu0 %v7507_v31  ;;  %v7172_v5 = vmul.f32 2.5, %v12456_v45  ;;  %v7146_v59 = vmul.f32 %v9199_v12, %v7144_v30  ;;  %v7282_v11 = vmul.f32 1.25, %v9221_v17  ;;  %v7510_v31 = vld [vmem:[#allocation5 + $0x30] sm:$0xff]  ;;  %v7519_v36 = vld [vmem:[#allocation5 + $0x78] sm:$0xff] }
0x1387   :  { %9298 = vmatpush3.bf16.msra.mxu1 %v7523_v60  ;;  %9277 = vmatprep.subr.bf16.mxu0 %v7516_v40  ;;  %v7152_v33 = vmul.f32 %v9201_v6, %v7150_v47  ;;  %v7160_v55 = vmul.f32 %v9201_v6, %v7158_v44  ;;  %v7178_v15 = vmul.f32 2.5, %v7176_v43  ;;  %v7286_v18 = vmul.f32 1.25, %v7162_v32  ;;  %v7526_v60 = vld [vmem:[#allocation5 + $0xb0] sm:$0xff]  ;;  %v7535_v12 = vld [vmem:[#allocation5 + $0xf8] sm:$0xff]  ;;  %v7544_v47 = vld [vmem:[#allocation5 + $0x140] sm:$0xff] }
0x1388   :  { %9299 = vmatprep.subr.bf16.mxu1 %v7532_v19  ;;  %v7489_v8 = vpack.c.bf16 %v7381_v51, %v7381_v51  ;;  %v7174_v48 = vmul.f32 %v9203_v10, %v7172_v5  ;;  %v12467_v3 = vadd.f32 1.0, %v12392_v21  ;;  %v7292_v49 = vmul.f32 1.25, %v12453_v29  ;;  %v7511_v51 = vld [vmem:[#allocation5 + $0x38] sm:$0xff] }
0x1389   :  { %v7154_v16 = vadd.f32 %v7152_v33, %v7146_v59  ;;  %v7168_v42 = vadd.f32 %v7166_v37, %v7160_v55  ;;  %v7180_v46 = vmul.f32 %v12464_v22, %v7178_v15  ;;  %v7296_v4 = vmul.f32 1.25, %v7176_v43  ;;  %v7527_v10 = vld [vmem:[#allocation5 + $0xb8] sm:$0xff]  ;;  %v7552_v55 = vld [vmem:[#allocation5 + $0x180] sm:$0xff] }
0x138a   :  { %7720 = vmatprep.mubr.bf16.mxu1 %v7489_v8  ;;  %9278 = vmatpush3.bf16.msra.mxu0 %v7508_v28  ;;  %v7372_v38 = vmul.f32 0.8333333, %v9221_v17  ;;  %v7187_v32 = vmul.f32 2.5, %v12467_v3  ;;  %vm7073_vm9 = vcmp.ge.f32.partialorder %v12392_v21, -0.6  ;;  %v12484_v30 = vadd.f32 1.0, %v12379_v24 }
0x138b   :  { %v10042_v27 = vpop.eup %10041  ;;  %9300 = vmatpush3.bf16.msra.mxu1 %v7524_v57  ;;  %9279 = vmatprep.subr.bf16.mxu0 %v7517_v34  ;;  %v7284_v20 = vmul.f32 %v7282_v11, %v7154_v16  ;;  %v12472_v13 = vadd.f32 %v7180_v46, %v7174_v48  ;;  %v7288_v2 = vmul.f32 %v7286_v18, %v7168_v42  ;;  %v7376_v19 = vmul.f32 0.8333333, %v7176_v43  ;;  %v7560_v8 = vld [vmem:[#allocation5 + $0x1c0] sm:$0xff]  ;;  %v7555_v48 = vld [vmem:[#allocation5 + $0x198] sm:$0xff] }
0x138c   :  { %v10044_v61 = vpop.eup %10043  ;;  %9301 = vmatprep.subr.bf16.mxu1 %v7533_v41  ;;  %v7029_v35 = vmul.f32 %v10042_v27, %v12392_v21  ;;  %v7294_v25 = vmul.f32 %v7292_v49, %v7168_v42  ;;  %vm7075_vm10 = vcmp.lt.f32.partialorder %v12392_v21, -0.2  ;;  %v7191_v6 = vsub.f32 -0.2, %v12392_v21  ;;  %v7561_v27 = vld [vmem:[#allocation5 + $0x1c8] sm:$0xff] }
0x138d   :  { %v7022_v9 = vadd.f32 1.0, %v10044_v61  ;;  %v7290_v58 = vadd.f32 %v7288_v2, %v7284_v20  ;;  %v7298_v40 = vmul.f32 %v7296_v4, %v12472_v13  ;;  %vm7077_vm11 = vmand %vm7073_vm9, %vm7075_vm10  ;;  %v7189_v26 = vmul.f32 %v12418_v39, %v7187_v32  ;;  %v7536_v4 = vld [vmem:[#allocation5 + $0x100] sm:$0xff]  ;;  %v7545_v20 = vld [vmem:[#allocation5 + $0x148] sm:$0xff] }
0x138e   :  { %v7487_v62 = vpack.c.bf16 %v7029_v35, %v7029_v35  ;;  %9280 = vmatpush3.bf16.msra.mxu0 %v7509_v63  ;;  %v9208_v53 = vsel %vm7077_vm11, 1.0, %v10177_v56  ;;  %v7193_v37 = vmul.f32 2.5, %v7191_v6  ;;  %v7303_v28 = vmul.f32 1.25, %v12413_v0 }
0x138f   :  { %9302 = vmatpush3.bf16.msra.mxu1 %v7525_v14  ;;  %10045 = vrcp.f32 %v7022_v9  ;;  %9281 = vmatprep.subr.bf16.mxu0 %v7518_v7  ;;  %v12479_v17 = vadd.f32 %v7298_v40, %v7294_v25  ;;  %v7374_v54 = vmul.f32 %v7372_v38, %v7290_v58  ;;  %v7307_v44 = vmul.f32 1.25, %v7191_v6  ;;  %v7553_v38 = vld [vmem:[#allocation5 + $0x188] sm:$0xff] }
0x1390   :  { %9303 = vmatprep.subr.bf16.mxu1 %v7534_v1  ;;  %7680 = vmatprep.mubr.bf16.mxu0 %v7487_v62  ;;  %v7383_v5 = vmul.f32 0.8333333, %v12409_v23  ;;  %vm7072_vm12 = vcmp.ge.f32.partialorder %v12379_v24, -0.6  ;;  %v7195_v43 = vmul.f32 %v9208_v53, %v7193_v37  ;;  %vm7074_vm13 = vcmp.lt.f32.partialorder %v12379_v24, -0.2 }
0x1391   :  { %v7378_v57 = vmul.f32 %v7376_v19, %v12479_v17  ;;  %vm7083_vm14 = vcmp.ge.f32.partialorder %v12392_v21, -0.2  ;;  %vm7085_vm15 = vcmp.lt.f32.partialorder %v12392_v21, 0.2  ;;  %v7305_v59 = vmul.f32 %v7303_v28, %v12423_v50  ;;  %vm12506_vm1 = vmand %vm7072_vm12, %vm7074_vm13  ;;  %v7562_v62 = vld [vmem:[#allocation5 + $0x1d0] sm:$0xff] }
0x1392   :  { %9282 = vmatpush3.bf16.msra.mxu0 %v7510_v31  ;;  %vm12493_vm0 = vmand %vm7083_vm14, %vm7085_vm15  ;;  %v7197_v41 = vadd.f32 %v7195_v43, %v7189_v26  ;;  %v12499_v23 = vsub.f32 -0.2, %v12379_v24  ;;  %v7186_v33 = vmul.f32 2.5, %v12484_v30  ;;  %v12511_v15 = vadd.f32 0.6, %v12392_v21  ;;  %v7546_v28 = vld [vmem:[#allocation5 + $0x150] sm:$0xff] }
0x1393   :  { %9304 = vmatpush3.bf16.msra.mxu1 %v7526_v60  ;;  %9283 = vmatprep.subr.bf16.mxu0 %v7519_v36  ;;  %v7380_v39 = vadd.f32 %v7378_v57, %v7374_v54  ;;  %v7205_v50 = vsub.f32 0.2, %v12392_v21  ;;  %v7385_v49 = vmul.f32 %v7383_v5, %v12430_v52  ;;  %v7387_v61 = vmul.f32 0.8333333, %v7191_v6  ;;  %v7563_v57 = vld [vmem:[#allocation5 + $0x1d8] sm:$0xff] }
0x1394   :  { %9305 = vmatprep.subr.bf16.mxu1 %v7535_v12  ;;  %v7309_v16 = vmul.f32 %v7307_v44, %v7197_v41  ;;  %v12518_v63 = vsel %vm12493_vm0, 1.0, %v10177_v56  ;;  %v7201_v35 = vmul.f32 2.5, %v12511_v15  ;;  %v7313_v46 = vmul.f32 1.25, %v12467_v3 }
0x1395   :  { %v7488_v11 = vpack.c.bf16 %v7380_v39, %v7380_v39  ;;  %v7207_v42 = vmul.f32 2.5, %v7205_v50  ;;  %v9207_v52 = vsel %vm12506_vm1, 1.0, %v10177_v56  ;;  %v7192_v1 = vmul.f32 2.5, %v12499_v23 }
0x1396   :  { %9284 = vmatpush3.bf16.msra.mxu0 %v7511_v51  ;;  %v7311_v7 = vadd.f32 %v7309_v16, %v7305_v59  ;;  %vm7082_vm2 = vcmp.ge.f32.partialorder %v12379_v24, -0.2  ;;  %v7203_v2 = vmul.f32 %v9208_v53, %v7201_v35  ;;  %v7317_v32 = vmul.f32 1.25, %v7205_v50  ;;  %v7554_v51 = vld [vmem:[#allocation5 + $0x190] sm:$0xff]  ;;  %v7547_v16 = vld [vmem:[#allocation5 + $0x158] sm:$0xff] }
0x1397   :  { %9306 = vmatpush3.bf16.msra.mxu1 %v7527_v10  ;;  %9313 = vmatprep.subr.bf16.mxu0 %v7544_v47  ;;  %v7209_v25 = vmul.f32 %v12518_v63, %v7207_v42  ;;  %v7393_v60 = vmul.f32 0.8333333, %v12413_v0  ;;  %vm7084_vm3 = vcmp.lt.f32.partialorder %v12379_v24, 0.2  ;;  %v12532_v58 = vadd.f32 0.6, %v12379_v24 }
0x1398   :  { %9335 = vmatprep.subr.bf16.mxu1 %v7560_v8  ;;  %v7389_v31 = vmul.f32 %v7387_v61, %v7311_v7  ;;  %v7188_v40 = vmul.f32 %v12464_v22, %v7186_v33  ;;  %v7315_v36 = vmul.f32 %v7313_v46, %v7197_v41  ;;  %vm7086_vm4 = vmand %vm7082_vm2, %vm7084_vm3  ;;  %v12540_v12 = vsub.f32 0.2, %v12379_v24  ;;  %v7537_v22 = vld [vmem:[#allocation5 + $0x108] sm:$0xff] }
0x1399   :  { %v10046_v18 = vpop.eup %10045  ;;  %v12535_v19 = vadd.f32 %v7209_v25, %v7203_v2  ;;  %v7194_v6 = vmul.f32 %v9207_v52, %v7192_v1  ;;  %v12543_v54 = vsel %vm7086_vm4, 1.0, %v10177_v56  ;;  %v7200_v53 = vmul.f32 2.5, %v12532_v58 }
0x139a   :  { %v7028_v14 = vmul.f32 %v10046_v18, %v12379_v24  ;;  %7721 = vmatmul.mubr.bf16.vlgmr.msra.gmra.mrb[148].mxu1 %v7488_v11  ;;  %v7391_v0 = vadd.f32 %v7389_v31, %v7385_v49  ;;  %v7302_v10 = vmul.f32 1.25, %v12456_v45  ;;  %v7397_v47 = vmul.f32 0.8333333, %v7205_v50  ;;  %v7564_v49 = vld [vmem:[#allocation5 + $0x1e0] sm:$0xff]  ;;  %v7565_v31 = vld [vmem:[#allocation5 + $0x1e8] sm:$0xff] }
0x139b   :  { %9336 = vmatpush3.bf16.msra.mxu1 %v7552_v55  ;;  %v7319_v26 = vmul.f32 %v7317_v32, %v12535_v19  ;;  %v7206_v37 = vmul.f32 2.5, %v12540_v12  ;;  %v7306_v44 = vmul.f32 1.25, %v12499_v23  ;;  %v7395_v5 = vmul.f32 %v7393_v60, %v7311_v7  ;;  %v7538_v55 = vld [vmem:[#allocation5 + $0x110] sm:$0xff]  ;;  %v7548_v32 = vld [vmem:[#allocation5 + $0x160] sm:$0xff] }
0x139c   :  { %v7486_v9 = vpack.c.bf16 %v7028_v14, %v7028_v14  ;;  %9337 = vmatprep.subr.bf16.mxu1 %v7561_v27  ;;  %v7491_v8 = vpack.c.bf16 %v7391_v0, %v7391_v0  ;;  %v7202_v43 = vmul.f32 %v9207_v52, %v7200_v53  ;;  %v7312_v41 = vmul.f32 1.25, %v12484_v30  ;;  %v7540_v53 = vld [vmem:[#allocation5 + $0x120] sm:$0xff] }
0x139d   :  { %v12550_v39 = vadd.f32 %v7319_v26, %v7315_v36  ;;  %v7208_v34 = vmul.f32 %v12543_v54, %v7206_v37  ;;  %v7316_v59 = vmul.f32 1.25, %v12540_v12  ;;  %v7196_v33 = vadd.f32 %v7194_v6, %v7188_v40  ;;  %v7549_v26 = vld [vmem:[#allocation5 + $0x168] sm:$0xff] }
0x139e   :  { %7681 = vmatmul.mubr.bf16.vlgmr.msra.gmra.mrb[148].mxu0 %v7486_v9  ;;  %vm7093_vm5 = vcmp.ge.f32.partialorder %v12392_v21, 0.2  ;;  %vm7095_vm6 = vcmp.lt.f32.partialorder %v12392_v21, 0.6  ;;  %v12558_v11 = vadd.f32 0.2, %v12392_v21  ;;  %v7304_v7 = vmul.f32 %v7302_v10, %v12472_v13 }
0x139f   :  { %9314 = vmatpush3.bf16.msra.mxu0 %v7536_v4  ;;  %9338 = vmatpush3.bf16.msra.mxu1 %v7553_v38  ;;  %v7399_v50 = vmul.f32 %v7397_v47, %v12550_v39  ;;  %v12561_v18 = vadd.f32 %v7208_v34, %v7202_v43  ;;  %vm7097_vm7 = vmand %vm7093_vm5, %vm7095_vm6  ;;  %v7219_v27 = vsub.f32 0.6, %v12392_v21  ;;  %v7314_v42 = vmul.f32 %v7312_v41, %v7196_v33  ;;  %v7539_v9 = vld [vmem:[#allocation5 + $0x118] sm:$0xff]  ;;  %v7566_v47 = vld [vmem:[#allocation5 + $0x1f0] sm:$0xff] }
0x13a0   :  { %9315 = vmatprep.subr.bf16.mxu0 %v7545_v20  ;;  %9339 = vmatprep.subr.bf16.mxu1 %v7562_v62  ;;  %v12565_v61 = vsel %vm7097_vm7, 1.0, %v10177_v56  ;;  %v7215_v14 = vmul.f32 2.5, %v12558_v11  ;;  %v7308_v52 = vmul.f32 %v7306_v44, %v7196_v33  ;;  %v7556_v20 = vld [vmem:[#allocation5 + $0x1a0] sm:$0xff]  ;;  %v7323_v2 = vmul.f32 1.25, %v12511_v15  ;;  %v7550_v41 = vld [vmem:[#allocation5 + $0x170] sm:$0xff] }
0x13a1   :  { %7760 = vmatprep.mubr.bf16.mxu0 %v7491_v8  ;;  %v7401_v35 = vadd.f32 %v7399_v50, %v7395_v5  ;;  %v7318_v46 = vmul.f32 %v7316_v59, %v12561_v18  ;;  %v7221_v4 = vmul.f32 2.5, %v7219_v27  ;;  %v7327_v25 = vmul.f32 1.25, %v7219_v27  ;;  %v7558_v8 = vld [vmem:[#allocation5 + $0x1b0] sm:$0xff]  ;;  %v7567_v59 = vld [vmem:[#allocation5 + $0x1f8] sm:$0xff] }
0x13a2   :  { %v7217_v1 = vmul.f32 %v12518_v63, %v7215_v14  ;;  %v7392_v13 = vmul.f32 0.8333333, %v12456_v45  ;;  %v7396_v40 = vmul.f32 0.8333333, %v12540_v12  ;;  %v7310_v36 = vadd.f32 %v7308_v52, %v7304_v7 }
0x13a3   :  { %9316 = vmatpush3.bf16.msra.mxu0 %v7537_v22  ;;  %9340 = vmatpush3.bf16.msra.mxu1 %v7554_v51  ;;  %v7493_v38 = vpack.c.bf16 %v7401_v35, %v7401_v35  ;;  %v7223_v62 = vmul.f32 %v12565_v61, %v7221_v4  ;;  %v12573_v60 = vadd.f32 %v7318_v46, %v7314_v42  ;;  %v7382_v0 = vmul.f32 0.8333333, %v12453_v29  ;;  %v7557_v22 = vld [vmem:[#allocation5 + $0x1a8] sm:$0xff]  ;;  %v7551_v46 = vld [vmem:[#allocation5 + $0x178] sm:$0xff]  ;;  %v7592_v4 = vld [vmem:[#allocation5 + $0x2c0] sm:$0xff] }
0x13a4   :  { %9317 = vmatprep.subr.bf16.mxu0 %v7546_v28  ;;  %9341 = vmatprep.subr.bf16.mxu1 %v7563_v57  ;;  %v7386_v6 = vmul.f32 0.8333333, %v12499_v23  ;;  %v7325_v51 = vmul.f32 %v7323_v2, %v12535_v19  ;;  %vm7103_vm8 = vcmp.ge.f32.partialorder %v12392_v21, 0.6  ;;  %v7394_v45 = vmul.f32 %v7392_v13, %v7310_v36  ;;  %v7541_v57 = vld [vmem:[#allocation5 + $0x128] sm:$0xff] }
0x13a5   :  { %7800 = vmatprep.mubr.bf16.mxu1 %v7493_v38  ;;  %v7225_v63 = vadd.f32 %v7223_v62, %v7217_v1  ;;  %v7398_v12 = vmul.f32 %v7396_v40, %v12573_v60  ;;  %vm7105_vm9 = vcmp.lt.f32.partialorder %v12392_v21, 1.0  ;;  %v12584_v29 = vadd.f32 -0.2, %v12392_v21  ;;  %v7584_v62 = vld [vmem:[#allocation5 + $0x280] sm:$0xff]  ;;  %v7593_v13 = vld [vmem:[#allocation5 + $0x2c8] sm:$0xff] }
0x13a6   :  { %v7384_v23 = vmul.f32 %v7382_v0, %v12479_v17  ;;  %v7388_v37 = vmul.f32 %v7386_v6, %v7310_v36  ;;  %v7403_v19 = vmul.f32 0.8333333, %v12467_v3  ;;  %vm7107_vm10 = vmand %vm7103_vm8, %vm7105_vm9  ;;  %v7233_v28 = vsub.f32 1.0, %v12392_v21 }
0x13a7   :  { %9318 = vmatpush3.bf16.msra.mxu0 %v7538_v55  ;;  %9342 = vmatpush3.bf16.msra.mxu1 %v7555_v48  ;;  %v7329_v10 = vmul.f32 %v7327_v25, %v7225_v63  ;;  %v7407_v5 = vmul.f32 0.8333333, %v7219_v27  ;;  %v12590_v43 = vsel %vm7107_vm10, 1.0, %v10177_v56  ;;  %v7229_v34 = vmul.f32 2.5, %v12584_v29  ;;  %v7542_v27 = vld [vmem:[#allocation5 + $0x130] sm:$0xff] }
0x13a8   :  { %9319 = vmatprep.subr.bf16.mxu0 %v7547_v16  ;;  %9343 = vmatprep.subr.bf16.mxu1 %v7564_v49  ;;  %v7235_v17 = vmul.f32 2.5, %v7233_v28  ;;  %v7333_v33 = vmul.f32 1.25, %v12558_v11  ;;  %v7400_v3 = vadd.f32 %v7398_v12, %v7394_v45  ;;  %v7390_v48 = vadd.f32 %v7388_v37, %v7384_v23  ;;  %v7559_v49 = vld [vmem:[#allocation5 + $0x1b8] sm:$0xff]  ;;  %v7585_v45 = vld [vmem:[#allocation5 + $0x288] sm:$0xff] }
0x13a9   :  { %v7331_v44 = vadd.f32 %v7329_v10, %v7325_v51  ;;  %v7231_v55 = vmul.f32 %v12565_v61, %v7229_v34  ;;  %v7337_v16 = vmul.f32 1.25, %v7233_v28  ;;  %v7405_v14 = vmul.f32 %v7403_v19, %v12550_v39  ;;  %v7577_v37 = vld [vmem:[#allocation5 + $0x248] sm:$0xff]  ;;  %v7594_v19 = vld [vmem:[#allocation5 + $0x2d0] sm:$0xff] }
0x13aa   :  { %v7237_v50 = vmul.f32 %v12590_v43, %v7235_v17  ;;  %v7413_v42 = vmul.f32 0.8333333, %v12511_v15  ;;  %vm7102_vm11 = vcmp.ge.f32.partialorder %v12379_v24, 0.6  ;;  %v7335_v7 = vmul.f32 %v7333_v33, %v7225_v63  ;;  %v7569_v17 = vld [vmem:[#allocation5 + $0x208] sm:$0xff]  ;;  %v7586_v33 = vld [vmem:[#allocation5 + $0x290] sm:$0xff] }
0x13ab   :  { %9320 = vmatpush3.bf16.msra.mxu0 %v7539_v9  ;;  %9344 = vmatpush3.bf16.msra.mxu1 %v7556_v20  ;;  %v7409_v35 = vmul.f32 %v7407_v5, %v7331_v44  ;;  %vm7104_vm12 = vcmp.lt.f32.partialorder %v12379_v24, 1.0  ;;  %v12603_v52 = vadd.f32 -0.2, %v12379_v24  ;;  %v7492_v1 = vpack.c.bf16 %v7400_v3, %v7400_v3  ;;  %v7543_v20 = vld [vmem:[#allocation5 + $0x138] sm:$0xff] }
0x13ac   :  { %9321 = vmatprep.subr.bf16.mxu0 %v7548_v32  ;;  %9345 = vmatprep.subr.bf16.mxu1 %v7565_v31  ;;  %v12599_v61 = vadd.f32 %v7237_v50, %v7231_v55  ;;  %v12606_v9 = vsub.f32 1.0, %v12379_v24  ;;  %vm7092_vm13 = vcmp.ge.f32.partialorder %v12379_v24, 0.2  ;;  %vm7094_vm14 = vcmp.lt.f32.partialorder %v12379_v24, 0.6  ;;  %vm12621_vm15 = vmand %vm7102_vm11, %vm7104_vm12  ;;  %v7576_v31 = vld [vmem:[#allocation5 + $0x240] sm:$0xff] }
0x13ad   :  { %v7417_v39 = vmul.f32 0.8333333, %v7233_v28  ;;  %v7490_v38 = vpack.c.bf16 %v7390_v48, %v7390_v48  ;;  %v12612_v2 = vadd.f32 0.2, %v12379_v24  ;;  %v12615_v25 = vsub.f32 0.6, %v12379_v24  ;;  %vm12632_vm0 = vmand %vm7092_vm13, %vm7094_vm14 }
0x13ae   :  { %v7339_v15 = vmul.f32 %v7337_v16, %v12599_v61  ;;  %v7411_v40 = vadd.f32 %v7409_v35, %v7405_v14  ;;  %v7415_v36 = vmul.f32 %v7413_v42, %v7331_v44  ;;  %v7228_v0 = vmul.f32 2.5, %v12603_v52  ;;  %v7578_v50 = vld [vmem:[#allocation5 + $0x250] sm:$0xff]  ;;  %v7595_v16 = vld [vmem:[#allocation5 + $0x2d8] sm:$0xff] }
0x13af   :  { %9322 = vmatpush3.bf16.msra.mxu0 %v7540_v53  ;;  %9346 = vmatpush3.bf16.msra.mxu1 %v7557_v22  ;;  %v7234_v53 = vmul.f32 2.5, %v12606_v9  ;;  %vm7113_vm1 = vcmp.ge.f32.partialorder %v12392_v21, 1.0  ;;  %vm7115_vm2 = vcmp.lt.f32.partialorder %v12392_v21, 1.4  ;;  %v12640_v22 = vadd.f32 -0.6, %v12392_v21 }
0x13b0   :  { %9323 = vmatprep.subr.bf16.mxu0 %v7549_v26  ;;  %9347 = vmatprep.subr.bf16.mxu1 %v7566_v47  ;;  %v12625_v63 = vadd.f32 %v7339_v15, %v7335_v7  ;;  %v12646_v10 = vsel %vm12621_vm15, 1.0, %v10177_v56  ;;  %v12649_v26 = vsub.f32 1.4, %v12392_v21  ;;  %v7568_v47 = vld [vmem:[#allocation5 + $0x200] sm:$0xff]  ;;  %v7214_v12 = vmul.f32 2.5, %v12612_v2  ;;  %vm7117_vm3 = vmand %vm7113_vm1, %vm7115_vm2  ;;  %v7587_v7 = vld [vmem:[#allocation5 + $0x298] sm:$0xff] }
0x13b1   :  { %v7220_v23 = vmul.f32 2.5, %v12615_v25  ;;  %v7495_v28 = vpack.c.bf16 %v7411_v40, %v7411_v40  ;;  %v7236_v5 = vmul.f32 %v12646_v10, %v7234_v53  ;;  %v7243_v34 = vmul.f32 2.5, %v12640_v22 }
0x13b2   :  { %v7419_v51 = vmul.f32 %v7417_v39, %v12625_v63  ;;  %v7216_v3 = vmul.f32 %v12543_v54, %v7214_v12  ;;  %v9216_v48 = vsel %vm7117_vm3, 1.0, %v10177_v56  ;;  %v7336_v14 = vmul.f32 1.25, %v12606_v9  ;;  %v7579_v39 = vld [vmem:[#allocation5 + $0x258] sm:$0xff]  ;;  %v7588_v12 = vld [vmem:[#allocation5 + $0x2a0] sm:$0xff] }
0x13b3   :  { %9324 = vmatpush3.bf16.msra.mxu0 %v7541_v57  ;;  %9348 = vmatpush3.bf16.msra.mxu1 %v7558_v8  ;;  %v9211_v57 = vsel %vm12632_vm0, 1.0, %v10177_v56  ;;  %v7245_v35 = vmul.f32 %v12590_v43, %v7243_v34  ;;  %vm7123_vm4 = vcmp.ge.f32.partialorder %v12392_v21, 1.4  ;;  %vm7125_vm5 = vcmp.lt.f32.partialorder %v12392_v21, 1.8 }
0x13b4   :  { %9325 = vmatprep.subr.bf16.mxu0 %v7550_v41  ;;  %9349 = vmatprep.subr.bf16.mxu1 %v7567_v59  ;;  %v7421_v8 = vadd.f32 %v7419_v51, %v7415_v36  ;;  %v7230_v44 = vmul.f32 %v9211_v57, %v7228_v0  ;;  %v7249_v59 = vmul.f32 2.5, %v12649_v26  ;;  %v7222_v55 = vmul.f32 %v9211_v57, %v7220_v23  ;;  %vm7127_vm6 = vmand %vm7123_vm4, %vm7125_vm5 }
0x13b5   :  { %v12673_v42 = vadd.f32 -1.0, %v12392_v21  ;;  %v7322_v15 = vmul.f32 1.25, %v12532_v58  ;;  %v7326_v43 = vmul.f32 1.25, %v12615_v25  ;;  %v7343_v36 = vmul.f32 1.25, %v12584_v29 }
0x13b6   :  { %v7497_v41 = vpack.c.bf16 %v7421_v8, %v7421_v8  ;;  %v7251_v54 = vmul.f32 %v9216_v48, %v7249_v59  ;;  %v7347_v0 = vmul.f32 1.25, %v12649_v26  ;;  %v7416_v34 = vmul.f32 0.8333333, %v12606_v9 }
0x13b7   :  { %9326 = vmatpush3.bf16.msra.mxu0 %v7542_v27  ;;  %9350 = vmatpush3.bf16.msra.mxu1 %v7559_v49  ;;  %v7332_v27 = vmul.f32 1.25, %v12612_v2  ;;  %v12666_v49 = vadd.f32 %v7236_v5, %v7230_v44  ;;  %v7324_v23 = vmul.f32 %v7322_v15, %v12561_v18  ;;  %v7412_v5 = vmul.f32 0.8333333, %v12532_v58  ;;  %v7572_v18 = vld [vmem:[#allocation5 + $0x220] sm:$0xff]  ;;  %v7598_v58 = vld [vmem:[#allocation5 + $0x2f0] sm:$0xff]  ;;  %v7599_v15 = vld [vmem:[#allocation5 + $0x2f8] sm:$0xff] }
0x13b8   :  { %9327 = vmatprep.subr.bf16.mxu0 %v7551_v46  ;;  %9379 = vmatprep.subr.bf16.mxu1 %v7592_v4  ;;  %v7261_v46 = vsub.f32 1.8, %v12392_v21  ;;  %v7570_v4 = vld [vmem:[#allocation5 + $0x210] sm:$0xff]  ;;  %v7253_v6 = vadd.f32 %v7251_v54, %v7245_v35  ;;  %v7433_v9 = vmul.f32 0.8333333, %v12584_v29  ;;  %v7573_v54 = vld [vmem:[#allocation5 + $0x228] sm:$0xff] }
0x13b9   :  { %v7338_v40 = vmul.f32 %v7336_v14, %v12666_v49  ;;  %v7427_v29 = vmul.f32 0.8333333, %v12649_v26  ;;  %vm7122_vm7 = vcmp.ge.f32.partialorder %v12379_v24, 1.4  ;;  %vm7124_vm8 = vcmp.lt.f32.partialorder %v12379_v24, 1.8 }
0x13ba   :  { %7801 = vmatmul.mubr.bf16.vlgmr.msra.gmra.mrb[152].mxu1 %v7492_v1  ;;  %v7224_v1 = vadd.f32 %v7222_v55, %v7216_v3  ;;  %v7263_v32 = vmul.f32 2.5, %v7261_v46  ;;  %v7349_v59 = vmul.f32 %v7347_v0, %v7253_v6  ;;  %v7402_v55 = vmul.f32 0.8333333, %v12484_v30  ;;  %vm7126_vm11 = vmand %vm7122_vm7, %vm7124_vm8 }
0x13bb   :  { %9328 = vmatpush3.bf16.msra.mxu0 %v7543_v20  ;;  %9380 = vmatpush3.bf16.msra.mxu1 %v7584_v62  ;;  %v7596_v20 = vld [vmem:[#allocation5 + $0x2e0] sm:$0xff]  ;;  %v7257_v62 = vmul.f32 2.5, %v12673_v42  ;;  %v12713_v0 = vsub.f32 1.8, %v12379_v24  ;;  %vm7112_vm9 = vcmp.ge.f32.partialorder %v12379_v24, 1.0 }
0x13bc   :  { %9357 = vmatprep.subr.bf16.mxu0 %v7576_v31  ;;  %9381 = vmatprep.subr.bf16.mxu1 %v7593_v13  ;;  %v7353_v31 = vmul.f32 1.25, %v12640_v22  ;;  %v7334_v13 = vmul.f32 %v7332_v27, %v7224_v1  ;;  %v7437_v27 = vmul.f32 0.8333333, %v7261_v46  ;;  %v7404_v30 = vmul.f32 %v7402_v55, %v12573_v60  ;;  %v7626_v55 = vld [vmem:[#allocation5 + $0x3d0] sm:$0xff] }
0x13bd   :  { %7880 = vmatprep.mubr.bf16.mxu1 %v7497_v41  ;;  %v7259_v53 = vmul.f32 %v9216_v48, %v7257_v62  ;;  %v7345_v41 = vmul.f32 %v7343_v36, %v12599_v61  ;;  %v7406_v48 = vmul.f32 0.8333333, %v12615_v25  ;;  %v7591_v62 = vld [vmem:[#allocation5 + $0x2b8] sm:$0xff]  ;;  %v12710_v36 = vadd.f32 -1.0, %v12379_v24 }
0x13be   :  { %7761 = vmatmul.mubr.bf16.vlgmr.msra.gmra.mrb[152].mxu0 %v7490_v38  ;;  %v12679_v38 = vsel %vm7127_vm6, 1.0, %v10177_v56  ;;  %v7355_v8 = vmul.f32 %v7353_v31, %v7253_v6  ;;  %v12690_v44 = vadd.f32 %v7338_v40, %v7334_v13  ;;  %v7583_v31 = vld [vmem:[#allocation5 + $0x278] sm:$0xff]  ;;  %v7624_v13 = vld [vmem:[#allocation5 + $0x3c0] sm:$0xff]  ;;  %vm7114_vm10 = vcmp.lt.f32.partialorder %v12379_v24, 1.4 }
0x13bf   :  { %9358 = vmatpush3.bf16.msra.mxu0 %v7568_v47  ;;  %9382 = vmatpush3.bf16.msra.mxu1 %v7585_v45  ;;  %v7265_v51 = vmul.f32 %v12679_v38, %v7263_v32  ;;  %v7357_v47 = vmul.f32 1.25, %v7261_v46  ;;  %v7571_v45 = vld [vmem:[#allocation5 + $0x218] sm:$0xff]  ;;  %v7351_v35 = vadd.f32 %v7349_v59, %v7345_v41  ;;  %v7616_v6 = vld [vmem:[#allocation5 + $0x380] sm:$0xff]  ;;  %vm12727_vm12 = vmand %vm7112_vm9, %vm7114_vm10  ;;  %vm7133_vm13 = vcmp.ge.f32.partialorder %v12392_v21, 1.8 }
0x13c0   :  { %9359 = vmatprep.subr.bf16.mxu0 %v7577_v37  ;;  %9383 = vmatprep.subr.bf16.mxu1 %v7594_v19  ;;  %v7328_v37 = vmul.f32 %v7326_v43, %v7224_v1  ;;  %v7580_v19 = vld [vmem:[#allocation5 + $0x260] sm:$0xff]  ;;  %v7418_v14 = vmul.f32 %v7416_v34, %v12690_v44  ;;  %v7582_v1 = vld [vmem:[#allocation5 + $0x270] sm:$0xff]  ;;  %vm7135_vm14 = vcmp.lt.f32.partialorder %v12392_v21, 2.2  ;;  %v9240_v34 = vadd.f32 -1.4, %v12392_v21 }
0x13c1   :  { %7840 = vmatprep.mubr.bf16.mxu0 %v7495_v28  ;;  %v7597_v28 = vld [vmem:[#allocation5 + $0x2e8] sm:$0xff]  ;;  %v12688_v57 = vadd.f32 %v7265_v51, %v7259_v53  ;;  %v7435_v46 = vmul.f32 %v7433_v9, %v7351_v35  ;;  %v12718_v53 = vadd.f32 -0.6, %v12379_v24  ;;  %v12721_v51 = vsub.f32 1.4, %v12379_v24  ;;  %v7600_v59 = vld [vmem:[#allocation5 + $0x300] sm:$0xff]  ;;  %vm7137_vm15 = vmand %vm7133_vm13, %vm7135_vm14 }
0x13c2   :  { %v7330_v3 = vadd.f32 %v7328_v37, %v7324_v23  ;;  %v12740_v41 = vsub.f32 2.2, %v12392_v21  ;;  %v7610_v21 = vld [vmem:[#allocation5 + $0x350] sm:$0xff]  ;;  %vm7132_vm0 = vcmp.ge.f32.partialorder %v12379_v24, 1.8 }
0x13c3   :  { %9360 = vmatpush3.bf16.msra.mxu0 %v7569_v17  ;;  %9384 = vmatpush3.bf16.msra.mxu1 %v7586_v33  ;;  %v7359_v17 = vmul.f32 %v7357_v47, %v12688_v57  ;;  %v7589_v33 = vld [vmem:[#allocation5 + $0x2a8] sm:$0xff]  ;;  %vm7134_vm1 = vcmp.lt.f32.partialorder %v12379_v24, 2.2 }
0x13c4   :  { %9361 = vmatprep.subr.bf16.mxu0 %v7578_v50  ;;  %9385 = vmatprep.subr.bf16.mxu1 %v7595_v16  ;;  %v7581_v50 = vld [vmem:[#allocation5 + $0x268] sm:$0xff]  ;;  %v7414_v61 = vmul.f32 %v7412_v5, %v7330_v3  ;;  %v7408_v25 = vmul.f32 %v7406_v48, %v7330_v3  ;;  %v12736_v5 = vsel %vm7126_vm11, 1.0, %v10177_v56  ;;  %vm7136_vm2 = vmand %vm7132_vm0, %vm7134_vm1 }
0x13c5   :  { %v12698_v16 = vadd.f32 %v7359_v17, %v7355_v8  ;;  %v7262_v8 = vmul.f32 2.5, %v12713_v0  ;;  %v7617_v17 = vld [vmem:[#allocation5 + $0x388] sm:$0xff] }
0x13c6   :  { %v7410_v32 = vadd.f32 %v7408_v25, %v7404_v30  ;;  %v7609_v3 = vld [vmem:[#allocation5 + $0x348] sm:$0xff]  ;;  %v9220_v30 = vsel %vm7137_vm15, 1.0, %v10177_v56  ;;  %v7627_v25 = vld [vmem:[#allocation5 + $0x3d8] sm:$0xff] }
0x13c7   :  { %9362 = vmatpush3.bf16.msra.mxu0 %v7570_v4  ;;  %9386 = vmatpush3.bf16.msra.mxu1 %v7587_v7  ;;  %v7590_v4 = vld [vmem:[#allocation5 + $0x2b0] sm:$0xff]  ;;  %v7423_v7 = vmul.f32 0.8333333, %v12558_v11  ;;  %v7439_v43 = vmul.f32 %v7437_v27, %v12698_v16  ;;  %v7429_v11 = vmul.f32 %v7427_v29, %v7351_v35  ;;  %v7264_v9 = vmul.f32 %v12736_v5, %v7262_v8  ;;  %v7604_v8 = vld [vmem:[#allocation5 + $0x320] sm:$0xff] }
0x13c8   :  { %9363 = vmatprep.subr.bf16.mxu0 %v7579_v39  ;;  %9387 = vmatprep.subr.bf16.mxu1 %v7596_v20  ;;  %v7420_v39 = vadd.f32 %v7418_v14, %v7414_v61  ;;  %v7574_v20 = vld [vmem:[#allocation5 + $0x230] sm:$0xff]  ;;  %v7494_v47 = vpack.c.bf16 %v7410_v32, %v7410_v32  ;;  %v7271_v27 = vmul.f32 2.5, %v9240_v34  ;;  %v7277_v61 = vmul.f32 2.5, %v12740_v41  ;;  %v7601_v14 = vld [vmem:[#allocation5 + $0x308] sm:$0xff]  ;;  %v7611_v32 = vld [vmem:[#allocation5 + $0x358] sm:$0xff] }
0x13c9   :  { %v7425_v60 = vmul.f32 %v7423_v7, %v12625_v63  ;;  %v7441_v40 = vadd.f32 %v7439_v43, %v7435_v46  ;;  %v7575_v63 = vld [vmem:[#allocation5 + $0x238] sm:$0xff]  ;;  %v7618_v35 = vld [vmem:[#allocation5 + $0x390] sm:$0xff]  ;;  %v7621_v34 = vld [vmem:[#allocation5 + $0x3a8] sm:$0xff] }
0x13ca   :  { %v7496_v26 = vpack.c.bf16 %v7420_v39, %v7420_v39  ;;  %v7273_v29 = vmul.f32 %v12679_v38, %v7271_v27  ;;  %v7279_v46 = vmul.f32 %v9220_v30, %v7277_v61  ;;  %v7602_v43 = vld [vmem:[#allocation5 + $0x310] sm:$0xff]  ;;  %v7363_v38 = vmul.f32 1.25, %v12673_v42 }
0x13cb   :  { %9364 = vmatpush3.bf16.msra.mxu0 %v7571_v45  ;;  %9388 = vmatpush3.bf16.msra.mxu1 %v7588_v12  ;;  %v7608_v45 = vld [vmem:[#allocation5 + $0x340] sm:$0xff]  ;;  %v7625_v12 = vld [vmem:[#allocation5 + $0x3c8] sm:$0xff]  ;;  %v7431_v23 = vadd.f32 %v7429_v11, %v7425_v60  ;;  %v7501_v37 = vpack.c.bf16 %v7441_v40, %v7441_v40  ;;  %v7367_v40 = vmul.f32 1.25, %v12740_v41 }
0x13cc   :  { %9365 = vmatprep.subr.bf16.mxu0 %v7580_v19  ;;  %9389 = vmatprep.subr.bf16.mxu1 %v7597_v28  ;;  %v7256_v28 = vmul.f32 2.5, %v12710_v36  ;;  %v7628_v60 = vld [vmem:[#allocation5 + $0x3e0] sm:$0xff]  ;;  %v7281_v11 = vadd.f32 %v7279_v46, %v7273_v29  ;;  %v7436_v19 = vmul.f32 0.8333333, %v12713_v0  ;;  %v7365_v42 = vmul.f32 %v7363_v38, %v12688_v57  ;;  %v7641_v46 = vld [vmem:[#allocation5 + $0x448] sm:$0xff] }
0x13cd   :  { %v7499_v48 = vpack.c.bf16 %v7431_v23, %v7431_v23  ;;  %v7443_v57 = vmul.f32 0.8333333, %v12640_v22  ;;  %v7623_v22 = vld [vmem:[#allocation5 + $0x3b8] sm:$0xff]  ;;  %v7632_v29 = vld [vmem:[#allocation5 + $0x400] sm:$0xff] }
0x13cf   :  { %9366 = vmatpush3.bf16.msra.mxu0 %v7572_v18  ;;  %9390 = vmatpush3.bf16.msra.mxu1 %v7589_v33  ;;  %v7242_v18 = vmul.f32 2.5, %v12718_v53  ;;  %v7248_v33 = vmul.f32 2.5, %v12721_v51  ;;  %v7445_v61 = vmul.f32 %v7443_v57, %v12698_v16  ;;  %v9239_v16 = vadd.f32 -1.4, %v12379_v24 }
0x13d0   :  { %9367 = vmatprep.subr.bf16.mxu0 %v7581_v50  ;;  %9391 = vmatprep.subr.bf16.mxu1 %v7598_v58  ;;  %v9215_v50 = vsel %vm12727_vm12, 1.0, %v10177_v56 }
0x13d1   :  { %v7258_v58 = vmul.f32 %v9215_v50, %v7256_v28  ;;  %v7369_v28 = vmul.f32 %v7367_v40, %v7281_v11  ;;  %v7362_v11 = vmul.f32 1.25, %v12710_v36  ;;  %v7635_v40 = vld [vmem:[#allocation5 + $0x418] sm:$0xff]  ;;  %v7646_v36 = vld [vmem:[#allocation5 + $0x470] sm:$0xff] }
0x13d3   :  { %9368 = vmatpush3.bf16.msra.mxu0 %v7573_v54  ;;  %9392 = vmatpush3.bf16.msra.mxu1 %v7590_v4  ;;  %v7244_v54 = vmul.f32 %v12646_v10, %v7242_v18  ;;  %v7250_v4 = vmul.f32 %v9215_v50, %v7248_v33  ;;  %v12755_v7 = vadd.f32 %v7264_v9, %v7258_v58  ;;  %v7619_v10 = vld [vmem:[#allocation5 + $0x398] sm:$0xff]  ;;  %v7422_v18 = vmul.f32 0.8333333, %v12612_v2  ;;  %v7622_v50 = vld [vmem:[#allocation5 + $0x3b0] sm:$0xff] }
0x13d4   :  { %9369 = vmatprep.subr.bf16.mxu0 %v7582_v1  ;;  %9393 = vmatprep.subr.bf16.mxu1 %v7599_v15  ;;  %v7352_v1 = vmul.f32 1.25, %v12718_v53  ;;  %v7356_v15 = vmul.f32 1.25, %v12713_v0  ;;  %v7426_v33 = vmul.f32 0.8333333, %v12721_v51  ;;  %v7371_v0 = vadd.f32 %v7369_v28, %v7365_v42  ;;  %v7614_v58 = vld [vmem:[#allocation5 + $0x370] sm:$0xff]  ;;  %v7631_v9 = vld [vmem:[#allocation5 + $0x3f8] sm:$0xff] }
0x13d5   :  { %v7252_v39 = vadd.f32 %v7250_v4, %v7244_v54  ;;  %v7424_v2 = vmul.f32 %v7422_v18, %v12690_v44  ;;  %v7640_v44 = vld [vmem:[#allocation5 + $0x440] sm:$0xff]  ;;  %v8277_v18 = vld [vmem:[#allocation6 + $0xc8] sm:$0xff] }
0x13d7   :  { %9370 = vmatpush3.bf16.msra.mxu0 %v7574_v20  ;;  %9394 = vmatpush3.bf16.msra.mxu1 %v7591_v62  ;;  %v7342_v20 = vmul.f32 1.25, %v12603_v52  ;;  %v7346_v62 = vmul.f32 1.25, %v12721_v51 }
0x13d8   :  { %9371 = vmatprep.subr.bf16.mxu0 %v7583_v31  ;;  %9423 = vmatprep.subr.bf16.mxu1 %v7624_v13  ;;  %v7354_v31 = vmul.f32 %v7352_v1, %v7252_v39  ;;  %v7358_v13 = vmul.f32 %v7356_v15, %v12755_v7  ;;  %v7274_v1 = vsub.f32 2.2, %v12379_v24  ;;  %v7634_v24 = vld [vmem:[#allocation5 + $0x410] sm:$0xff] }
0x13da   :  { %7881 = vmatmul.mubr.bf16.vlgmr.msra.gmra.mrb[156].mxu1 %v7496_v26  ;;  %v7603_v26 = vld [vmem:[#allocation5 + $0x318] sm:$0xff]  ;;  %v12766_v23 = vadd.f32 %v7358_v13, %v7354_v31  ;;  %v7366_v38 = vmul.f32 1.25, %v7274_v1 }
0x13db   :  { %9372 = vmatpush3.bf16.msra.mxu0 %v7575_v63  ;;  %9424 = vmatpush3.bf16.msra.mxu1 %v7616_v6  ;;  %v7620_v63 = vld [vmem:[#allocation5 + $0x3a0] sm:$0xff]  ;;  %v7344_v6 = vmul.f32 %v7342_v20, %v12666_v49  ;;  %v7613_v49 = vld [vmem:[#allocation5 + $0x368] sm:$0xff]  ;;  %v7643_v31 = vld [vmem:[#allocation5 + $0x458] sm:$0xff] }
0x13dc   :  { %9401 = vmatprep.subr.bf16.mxu0 %v7608_v45  ;;  %9425 = vmatprep.subr.bf16.mxu1 %v7625_v12  ;;  %v7612_v45 = vld [vmem:[#allocation5 + $0x360] sm:$0xff]  ;;  %v7629_v12 = vld [vmem:[#allocation5 + $0x3e8] sm:$0xff] }
0x13dd   :  { %7960 = vmatprep.mubr.bf16.mxu1 %v7501_v37  ;;  %v7432_v37 = vmul.f32 0.8333333, %v12603_v52  ;;  %v7438_v52 = vmul.f32 %v7436_v19, %v12766_v23  ;;  %v7633_v20 = vld [vmem:[#allocation5 + $0x408] sm:$0xff] }
0x13de   :  { %7841 = vmatmul.mubr.bf16.vlgmr.msra.gmra.mrb[156].mxu0 %v7494_v47  ;;  %v7348_v47 = vmul.f32 %v7346_v62, %v7252_v39  ;;  %v9219_v39 = vsel %vm7136_vm2, 1.0, %v10177_v56  ;;  %v7642_v62 = vld [vmem:[#allocation5 + $0x450] sm:$0xff]  ;;  %v7637_v19 = vld [vmem:[#allocation5 + $0x428] sm:$0xff] }
0x13df   :  { %9402 = vmatpush3.bf16.msra.mxu0 %v7600_v59  ;;  %9426 = vmatpush3.bf16.msra.mxu1 %v7617_v17  ;;  %v7630_v17 = vld [vmem:[#allocation5 + $0x3f0] sm:$0xff] }
0x13e0   :  { %9403 = vmatprep.subr.bf16.mxu0 %v7609_v3  ;;  %9427 = vmatprep.subr.bf16.mxu1 %v7626_v55  ;;  %v7350_v59 = vadd.f32 %v7348_v47, %v7344_v6  ;;  %v7447_v55 = vmul.f32 0.8333333, %v12740_v41  ;;  %v7615_v41 = vld [vmem:[#allocation5 + $0x378] sm:$0xff]  ;;  %v7636_v47 = vld [vmem:[#allocation5 + $0x420] sm:$0xff] }
0x13e1   :  { %7920 = vmatprep.mubr.bf16.mxu0 %v7499_v48  ;;  %v7605_v48 = vld [vmem:[#allocation5 + $0x328] sm:$0xff] }
0x13e2   :  { %v7434_v3 = vmul.f32 %v7432_v37, %v7350_v59  ;;  %v7428_v27 = vmul.f32 %v7426_v33, %v7350_v59  ;;  %v7446_v37 = vmul.f32 0.8333333, %v7274_v1  ;;  %v7639_v59 = vld [vmem:[#allocation5 + $0x438] sm:$0xff]  ;;  %v8269_v33 = vld [vmem:[#allocation6 + $0x88] sm:$0xff] }
0x13e3   :  { %9404 = vmatpush3.bf16.msra.mxu0 %v7601_v14  ;;  %9428 = vmatpush3.bf16.msra.mxu1 %v7618_v35  ;;  %v7449_v14 = vmul.f32 %v7447_v55, %v7371_v0  ;;  %v7606_v35 = vld [vmem:[#allocation5 + $0x330] sm:$0xff] }
0x13e4   :  { %9405 = vmatprep.subr.bf16.mxu0 %v7610_v21  ;;  %9429 = vmatprep.subr.bf16.mxu1 %v7627_v25  ;;  %v7440_v51 = vadd.f32 %v7438_v52, %v7434_v3  ;;  %v7430_v54 = vadd.f32 %v7428_v27, %v7424_v2  ;;  %v7607_v21 = vld [vmem:[#allocation5 + $0x338] sm:$0xff]  ;;  %v8278_v55 = vld [vmem:[#allocation6 + $0xd0] sm:$0xff]  ;;  %v8260_v27 = vld [vmem:[#allocation6 + $0x40] sm:$0xff] }
0x13e5   :  { %v7451_v30 = vadd.f32 %v7449_v14, %v7445_v61  ;;  %v8252_v61 = vld [vmem:[#allocation6] sm:$0xff]  ;;  %v8279_v14 = vld [vmem:[#allocation6 + $0xd8] sm:$0xff] }
0x13e6   :  { %v7500_v4 = vpack.c.bf16 %v7440_v51, %v7440_v51  ;;  %v7498_v25 = vpack.c.bf16 %v7430_v54, %v7430_v54  ;;  %v8253_v54 = vld [vmem:[#allocation6 + $0x8] sm:$0xff] }
0x13e7   :  { %9406 = vmatpush3.bf16.msra.mxu0 %v7602_v43  ;;  %9430 = vmatpush3.bf16.msra.mxu1 %v7619_v10  ;;  %v7503_v15 = vpack.c.bf16 %v7451_v30, %v7451_v30  ;;  %v7270_v43 = vmul.f32 2.5, %v9239_v16  ;;  %v7276_v10 = vmul.f32 2.5, %v7274_v1  ;;  %v8272_v30 = vld [vmem:[#allocation6 + $0xa0] sm:$0xff]  ;;  %v8273_v16 = vld [vmem:[#allocation6 + $0xa8] sm:$0xff]  ;;  %v8263_v1 = vld [vmem:[#allocation6 + $0x58] sm:$0xff] }
0x13e8   :  { %9407 = vmatprep.subr.bf16.mxu0 %v7611_v32  ;;  %9431 = vmatprep.subr.bf16.mxu1 %v7628_v60 }
0x13e9   :  { %v7272_v32 = vmul.f32 %v12736_v5, %v7270_v43  ;;  %v7278_v60 = vmul.f32 %v9219_v39, %v7276_v10  ;;  %v7645_v5 = vld [vmem:[#allocation5 + $0x468] sm:$0xff]  ;;  %v8264_v43 = vld [vmem:[#allocation6 + $0x60] sm:$0xff]  ;;  %v8283_v10 = vld [vmem:[#allocation6 + $0xf8] sm:$0xff] }
0x13ea   :  { %v8256_v39 = vld [vmem:[#allocation6 + $0x20] sm:$0xff] }
0x13eb   :  { %9408 = vmatpush3.bf16.msra.mxu0 %v7603_v26  ;;  %9432 = vmatpush3.bf16.msra.mxu1 %v7620_v63  ;;  %v7280_v13 = vadd.f32 %v7278_v60, %v7272_v32  ;;  %v7644_v26 = vld [vmem:[#allocation5 + $0x460] sm:$0xff]  ;;  %v7364_v63 = vmul.f32 %v7362_v11, %v12755_v7  ;;  %v7647_v7 = vld [vmem:[#allocation5 + $0x478] sm:$0xff]  ;;  %v8257_v32 = vld [vmem:[#allocation6 + $0x28] sm:$0xff] }
0x13ec   :  { %9409 = vmatprep.subr.bf16.mxu0 %v7612_v45  ;;  %9433 = vmatprep.subr.bf16.mxu1 %v7629_v12  ;;  %v7442_v12 = vmul.f32 0.8333333, %v12718_v53  ;;  %v8276_v53 = vld [vmem:[#allocation6 + $0xc0] sm:$0xff] }
0x13ed   :  { %v7368_v6 = vmul.f32 %v7366_v38, %v7280_v13 }
0x13ee   :  { %v7444_v42 = vmul.f32 %v7442_v12, %v12766_v23  ;;  %v8266_v12 = vld [vmem:[#allocation6 + $0x70] sm:$0xff] }
0x13ef   :  { %9410 = vmatpush3.bf16.msra.mxu0 %v7604_v8  ;;  %9434 = vmatpush3.bf16.msra.mxu1 %v7621_v34  ;;  %v7370_v45 = vadd.f32 %v7368_v6, %v7364_v63  ;;  %v7638_v8 = vld [vmem:[#allocation5 + $0x430] sm:$0xff] }
0x13f0   :  { %9411 = vmatprep.subr.bf16.mxu0 %v7613_v49  ;;  %9435 = vmatprep.subr.bf16.mxu1 %v7630_v17  ;;  %v8268_v17 = vld [vmem:[#allocation6 + $0x80] sm:$0xff] }
0x13f1   :  { %v7448_v28 = vmul.f32 %v7446_v37, %v7370_v45  ;;  %v8258_v37 = vld [vmem:[#allocation6 + $0x30] sm:$0xff] }
0x13f3   :  { %9412 = vmatpush3.bf16.msra.mxu0 %v7605_v48  ;;  %9436 = vmatpush3.bf16.msra.mxu1 %v7622_v50  ;;  %v7450_v34 = vadd.f32 %v7448_v28, %v7444_v42  ;;  %v8270_v50 = vld [vmem:[#allocation6 + $0x90] sm:$0xff]  ;;  %v8292_v42 = vld [vmem:[#allocation6 + $0x140] sm:$0xff] }
0x13f4   :  { %9413 = vmatprep.subr.bf16.mxu0 %v7614_v58  ;;  %9437 = vmatprep.subr.bf16.mxu1 %v7631_v9 }
0x13f5   :  { %v7502_v49 = vpack.c.bf16 %v7450_v34, %v7450_v34 }
0x13f7   :  { %9414 = vmatpush3.bf16.msra.mxu0 %v7606_v35  ;;  %9438 = vmatpush3.bf16.msra.mxu1 %v7623_v22  ;;  %v8271_v22 = vld [vmem:[#allocation6 + $0x98] sm:$0xff] }
0x13f8   :  { %9415 = vmatprep.subr.bf16.mxu0 %v7615_v41  ;;  %9467 = vmatprep.subr.bf16.mxu1 %v8260_v27  ;;  %v8261_v41 = vld [vmem:[#allocation6 + $0x48] sm:$0xff] }
0x13fa   :  { %7961 = vmatmul.mubr.bf16.vlgmr.msra.gmra.mrb[160].mxu1 %v7500_v4  ;;  %v8280_v4 = vld [vmem:[#allocation6 + $0xe0] sm:$0xff] }
0x13fb   :  { %9416 = vmatpush3.bf16.msra.mxu0 %v7607_v21  ;;  %9468 = vmatpush3.bf16.msra.mxu1 %v8252_v61  ;;  %v8262_v21 = vld [vmem:[#allocation6 + $0x50] sm:$0xff] }
0x13fc   :  { %9445 = vmatprep.subr.bf16.mxu0 %v7640_v44  ;;  %9469 = vmatprep.subr.bf16.mxu1 %v8261_v41  ;;  %v8281_v44 = vld [vmem:[#allocation6 + $0xe8] sm:$0xff] }
0x13fe   :  { %7921 = vmatmul.mubr.bf16.vlgmr.msra.gmra.mrb[160].mxu0 %v7498_v25  ;;  %v8254_v25 = vld [vmem:[#allocation6 + $0x10] sm:$0xff] }
0x13ff   :  { %9446 = vmatpush3.bf16.msra.mxu0 %v7632_v29  ;;  %8000 = vmatprep.mubr.bf16.mxu0 %v7503_v15  ;;  %v8282_v15 = vld [vmem:[#allocation6 + $0xf0] sm:$0xff]  ;;  %v8255_v29 = vld [vmem:[#allocation6 + $0x18] sm:$0xff] }
0x1400   :  { %9447 = vmatprep.subr.bf16.mxu0 %v7641_v46  ;;  %9470 = vmatpush3.bf16.msra.mxu1 %v8253_v54  ;;  %v8274_v46 = vld [vmem:[#allocation6 + $0xb0] sm:$0xff] }
0x1401   :  { %9471 = vmatprep.subr.bf16.mxu1 %v8262_v21 }
0x1403   :  { %9448 = vmatpush3.bf16.msra.mxu0 %v7633_v20  ;;  %v8275_v20 = vld [vmem:[#allocation6 + $0xb8] sm:$0xff] }
0x1404   :  { %9449 = vmatprep.subr.bf16.mxu0 %v7642_v62  ;;  %9472 = vmatpush3.bf16.msra.mxu1 %v8254_v25  ;;  %v8265_v62 = vld [vmem:[#allocation6 + $0x68] sm:$0xff] }
0x1405   :  { %9473 = vmatprep.subr.bf16.mxu1 %v8263_v1 }
0x1407   :  { %9450 = vmatpush3.bf16.msra.mxu0 %v7634_v24 }
0x1408   :  { %9451 = vmatprep.subr.bf16.mxu0 %v7643_v31  ;;  %9474 = vmatpush3.bf16.msra.mxu1 %v8255_v29 }
0x1409   :  { %9475 = vmatprep.subr.bf16.mxu1 %v8264_v43 }
0x140b   :  { %9452 = vmatpush3.bf16.msra.mxu0 %v7635_v40 }
0x140c   :  { %9453 = vmatprep.subr.bf16.mxu0 %v7644_v26  ;;  %9476 = vmatpush3.bf16.msra.mxu1 %v8256_v39 }
0x140d   :  { %9477 = vmatprep.subr.bf16.mxu1 %v8265_v62 }
0x140f   :  { %9454 = vmatpush3.bf16.msra.mxu0 %v7636_v47 }
0x1410   :  { %9455 = vmatprep.subr.bf16.mxu0 %v7645_v5  ;;  %9478 = vmatpush3.bf16.msra.mxu1 %v8257_v32  ;;  %v8308_v5 = vld [vmem:[#allocation6 + $0x1c0] sm:$0xff] }
0x1411   :  { %9479 = vmatprep.subr.bf16.mxu1 %v8266_v12 }
0x1413   :  { %9456 = vmatpush3.bf16.msra.mxu0 %v7637_v19  ;;  %v8267_v19 = vld [vmem:[#allocation6 + $0x78] sm:$0xff] }
0x1414   :  { %9457 = vmatprep.subr.bf16.mxu0 %v7646_v36  ;;  %9480 = vmatpush3.bf16.msra.mxu1 %v8258_v37  ;;  %v8259_v36 = vld [vmem:[#allocation6 + $0x38] sm:$0xff] }
0x1415   :  { %9481 = vmatprep.subr.bf16.mxu1 %v8267_v19 }
0x1417   :  { %9458 = vmatpush3.bf16.msra.mxu0 %v7638_v8 }
0x1418   :  { %9459 = vmatprep.subr.bf16.mxu0 %v7647_v7  ;;  %9482 = vmatpush3.bf16.msra.mxu1 %v8259_v36 }
0x1419   :  { %9511 = vmatprep.subr.bf16.mxu1 %v8292_v42 }
0x141b   :  { %9460 = vmatpush3.bf16.msra.mxu0 %v7639_v59 }
0x141c   :  { %9489 = vmatprep.subr.bf16.mxu0 %v8276_v53 }
0x141e   :  { %8001 = vmatmul.mubr.bf16.vlgmr.msra.gmra.mrb[164].mxu0 %v7502_v49 }
0x141f   :  { %9490 = vmatpush3.bf16.msra.mxu0 %v8268_v17 }
0x1420   :  { %9491 = vmatprep.subr.bf16.mxu0 %v8277_v18 }
0x1423   :  { %9492 = vmatpush3.bf16.msra.mxu0 %v8269_v33 }
0x1424   :  { %9493 = vmatprep.subr.bf16.mxu0 %v8278_v55 }
0x1427   :  { %9494 = vmatpush3.bf16.msra.mxu0 %v8270_v50 }
0x1428   :  { %9495 = vmatprep.subr.bf16.mxu0 %v8279_v14 }
0x142b   :  { %9496 = vmatpush3.bf16.msra.mxu0 %v8271_v22 }
0x142c   :  { %9497 = vmatprep.subr.bf16.mxu0 %v8280_v4 }
0x142f   :  { %9498 = vmatpush3.bf16.msra.mxu0 %v8272_v30 }
0x1430   :  { %9499 = vmatprep.subr.bf16.mxu0 %v8281_v44 }
0x1433   :  { %9500 = vmatpush3.bf16.msra.mxu0 %v8273_v16 }
0x1434   :  { %9501 = vmatprep.subr.bf16.mxu0 %v8282_v15 }
0x1437   :  { %9502 = vmatpush3.bf16.msra.mxu0 %v8274_v46 }
0x1438   :  { %9503 = vmatprep.subr.bf16.mxu0 %v8283_v10 }
0x143b   :  { %9504 = vmatpush3.bf16.msra.mxu0 %v8275_v20 }
0x143c   :  { %9533 = vmatprep.subr.bf16.mxu0 %v8308_v5 }
0x146d   :  { %v9307_v23 = vpop.f32.mrb[148].mxu1 }
0x146e   :  { %v9308_v3 = vpop.f32.mrb[149].mxu1 }
0x146f   :  { %v9309_v52 = vadd.f32 %v9308_v3, %v9307_v23  ;;  %v9310_v0 = vpop.f32.mrb[150].mxu1 }
0x1470   :  { %v9311_v57 = vpop.f32.mrb[151].mxu1 }
0x1471   :  { %v9285_v48 = vpop.f32.mrb[148].mxu0 }
0x1472   :  { %v9286_v58 = vpop.f32.mrb[149].mxu0 }
0x1473   :  { %v9287_v9 = vadd.f32 %v9286_v58, %v9285_v48  ;;  %v9288_v2 = vpop.f32.mrb[150].mxu0 }
0x1474   :  { %v9289_v51 = vpop.f32.mrb[151].mxu0 }
0x1475   :  { %v7723_v35 = vadd.f32 %v9309_v52, %v9287_v9 }
0x148d   :  { %v9351_v60 = vpop.f32.mrb[152].mxu1 }
0x148e   :  { %v9352_v24 = vpop.f32.mrb[153].mxu1 }
0x148f   :  { %v9353_v31 = vadd.f32 %v9352_v24, %v9351_v60  ;;  %v9354_v13 = vpop.f32.mrb[154].mxu1 }
0x1490   :  { %v9355_v11 = vpop.f32.mrb[155].mxu1 }
0x1491   :  { %v9329_v38 = vpop.f32.mrb[152].mxu0 }
0x1492   :  { %v9330_v40 = vpop.f32.mrb[153].mxu0 }
0x1493   :  { %v9331_v26 = vadd.f32 %v9330_v40, %v9329_v38  ;;  %v9332_v63 = vpop.f32.mrb[154].mxu0 }
0x1494   :  { %v9333_v6 = vpop.f32.mrb[155].mxu0 }
0x1495   :  { %v7763_v47 = vadd.f32 %v9331_v26, %v7723_v35 }
0x1497   :  { %v7803_v45 = vadd.f32 %v9353_v31, %v7763_v47 }
0x14ad   :  { %v9395_v28 = vpop.f32.mrb[156].mxu1 }
0x14ae   :  { %v9396_v8 = vpop.f32.mrb[157].mxu1 }
0x14af   :  { %v9397_v7 = vadd.f32 %v9396_v8, %v9395_v28  ;;  %v9398_v34 = vpop.f32.mrb[158].mxu1 }
0x14b0   :  { %v9399_v59 = vpop.f32.mrb[159].mxu1 }
0x14b1   :  { %v9373_v49 = vpop.f32.mrb[156].mxu0 }
0x14b2   :  { %v9374_v53 = vpop.f32.mrb[157].mxu0 }
0x14b3   :  { %v9375_v17 = vadd.f32 %v9374_v53, %v9373_v49  ;;  %v9376_v18 = vpop.f32.mrb[158].mxu0 }
0x14b4   :  { %v9377_v33 = vpop.f32.mrb[159].mxu0 }
0x14b5   :  { %v7843_v23 = vadd.f32 %v9375_v17, %v7803_v45 }
0x14b7   :  { %v7883_v3 = vadd.f32 %v9397_v7, %v7843_v23 }
0x14cd   :  { %v9439_v52 = vpop.f32.mrb[160].mxu1 }
0x14ce   :  { %v9440_v0 = vpop.f32.mrb[161].mxu1 }
0x14cf   :  { %v9441_v57 = vadd.f32 %v9440_v0, %v9439_v52  ;;  %v9442_v55 = vpop.f32.mrb[162].mxu1 }
0x14d0   :  { %v9443_v48 = vpop.f32.mrb[163].mxu1 }
0x14d1   :  { %v9417_v50 = vpop.f32.mrb[160].mxu0 }
0x14d2   :  { %v9418_v58 = vpop.f32.mrb[161].mxu0 }
0x14d3   :  { %v9419_v9 = vadd.f32 %v9418_v58, %v9417_v50  ;;  %v9420_v2 = vpop.f32.mrb[162].mxu0 }
0x14d4   :  { %v9421_v27 = vpop.f32.mrb[163].mxu0 }
0x14d5   :  { %v7923_v51 = vadd.f32 %v9419_v9, %v7883_v3 }
0x14d7   :  { %v7963_v61 = vadd.f32 %v9441_v57, %v7923_v51 }
0x14f1   :  { %v9461_v14 = vpop.f32.mrb[164].mxu0 }
0x14f2   :  { %v9462_v35 = vpop.f32.mrb[165].mxu0 }
0x14f3   :  { %v9463_v22 = vadd.f32 %v9462_v35, %v9461_v14  ;;  %v9464_v41 = vpop.f32.mrb[166].mxu0 }
0x14f4   :  { %v9465_v54 = vpop.f32.mrb[167].mxu0 }
0x14f5   :  { %v12788_v4 = vadd.f32 %v9463_v22, %v7963_v61 }
0x14f7   :  { %vm8016_vm3 = vcmp.ge.f32.partialorder %v12788_v4, -2.2  ;;  %vm8017_vm4 = vcmp.lt.f32.partialorder %v12788_v4, -1.8  ;;  %vm8021_vm5 = vcmp.ge.f32.partialorder %v12788_v4, -1.8 }
0x14f8   :  { %vm8018_vm6 = vmand %vm8016_vm3, %vm8017_vm4  ;;  %vm8022_vm7 = vcmp.lt.f32.partialorder %v12788_v4, -1.4  ;;  %vm8026_vm8 = vcmp.ge.f32.partialorder %v12788_v4, -1.4  ;;  %vm8027_vm9 = vcmp.lt.f32.partialorder %v12788_v4, -1.0  ;;  %vm8031_vm10 = vcmp.ge.f32.partialorder %v12788_v4, -1.0 }
0x14f9   :  { %v9242_v30 = vsel %vm8018_vm6, 1.0, %v10177_v56  ;;  %vm8023_vm11 = vmand %vm8021_vm5, %vm8022_vm7  ;;  %vm8032_vm12 = vcmp.lt.f32.partialorder %v12788_v4, -0.6  ;;  %v9253_v21 = vadd.f32 2.2, %v12788_v4  ;;  %v8081_v44 = vsub.f32 -1.0, %v12788_v4 }
0x14fa   :  { %v9243_v25 = vsel %vm8023_vm11, 1.0, %v10177_v56  ;;  %vm8028_vm13 = vmand %vm8026_vm8, %vm8027_vm9  ;;  %v8074_v16 = vsub.f32 -1.4, %v12788_v4  ;;  %v9254_v1 = vadd.f32 1.8, %v12788_v4  ;;  %v12805_v15 = vadd.f32 1.0, %v12788_v4 }
0x14fb   :  { %v9244_v29 = vsel %vm8028_vm13, 1.0, %v10177_v56  ;;  %vm8033_vm14 = vmand %vm8031_vm10, %vm8032_vm12  ;;  %v8072_v46 = vmul.f32 2.5, %v9253_v21  ;;  %v8082_v43 = vmul.f32 2.5, %v8081_v44  ;;  %v9255_v10 = vadd.f32 1.4, %v12788_v4 }
0x14fc   :  { %v9245_v39 = vsel %vm8033_vm14, 1.0, %v10177_v56  ;;  %v8075_v20 = vmul.f32 2.5, %v8074_v16  ;;  %v8079_v62 = vmul.f32 2.5, %v9254_v1  ;;  %v8088_v32 = vsub.f32 -0.6, %v12788_v4 }
0x14fd   :  { %v8073_v60 = vmul.f32 %v9242_v30, %v8072_v46  ;;  %v8083_v24 = vmul.f32 %v9244_v29, %v8082_v43  ;;  %v8086_v31 = vmul.f32 2.5, %v9255_v10  ;;  %v8141_v13 = vmul.f32 1.25, %v9253_v21 }
0x14fe   :  { %v8076_v11 = vmul.f32 %v9243_v25, %v8075_v20  ;;  %v8080_v38 = vmul.f32 %v9243_v25, %v8079_v62  ;;  %v8089_v40 = vmul.f32 2.5, %v8088_v32  ;;  %v8143_v26 = vmul.f32 1.25, %v8081_v44 }
0x14ff   :  { %v8087_v63 = vmul.f32 %v9244_v29, %v8086_v31  ;;  %v8146_v6 = vmul.f32 1.25, %v9254_v1  ;;  %v8148_v47 = vmul.f32 1.25, %v8088_v32  ;;  %v8186_v5 = vmul.f32 0.8333333, %v9253_v21 }
0x1500   :  { %v8077_v45 = vadd.f32 %v8076_v11, %v8073_v60  ;;  %v8084_v12 = vadd.f32 %v8083_v24, %v8080_v38  ;;  %v8090_v37 = vmul.f32 %v9245_v39, %v8089_v40  ;;  %v8188_v19 = vmul.f32 0.8333333, %v8088_v32 }
0x1501   :  { %vm8036_vm15 = vcmp.ge.f32.partialorder %v12788_v4, -0.6  ;;  %vm8037_vm0 = vcmp.lt.f32.partialorder %v12788_v4, -0.2  ;;  %vm8041_vm1 = vcmp.ge.f32.partialorder %v12788_v4, -0.2 }
0x1502   :  { %v8091_v36 = vadd.f32 %v8090_v37, %v8087_v63  ;;  %v8142_v42 = vmul.f32 %v8141_v13, %v8077_v45  ;;  %v8144_v28 = vmul.f32 %v8143_v26, %v8084_v12  ;;  %v8147_v8 = vmul.f32 %v8146_v6, %v8084_v12  ;;  %vm8038_vm2 = vmand %vm8036_vm15, %vm8037_vm0 }
0x1503   :  { %v9246_v7 = vsel %vm8038_vm2, 1.0, %v10177_v56  ;;  %vm8042_vm3 = vcmp.lt.f32.partialorder %v12788_v4, 0.2  ;;  %v8093_v34 = vmul.f32 2.5, %v12805_v15  ;;  %v8095_v59 = vsub.f32 -0.2, %v12788_v4 }
0x1504   :  { %v8145_v49 = vadd.f32 %v8144_v28, %v8142_v42  ;;  %v8149_v53 = vmul.f32 %v8148_v47, %v8091_v36  ;;  %vm8043_vm4 = vmand %vm8041_vm1, %vm8042_vm3  ;;  %v12819_v17 = vadd.f32 0.6, %v12788_v4  ;;  %v8102_v18 = vsub.f32 0.2, %v12788_v4 }
0x1505   :  { %v12823_v33 = vsel %vm8043_vm4, 1.0, %v10177_v56  ;;  %v8094_v23 = vmul.f32 %v9245_v39, %v8093_v34  ;;  %v8096_v3 = vmul.f32 2.5, %v8095_v59  ;;  %v8151_v52 = vmul.f32 1.25, %v9255_v10 }
0x1506   :  { %v8150_v0 = vadd.f32 %v8149_v53, %v8147_v8  ;;  %v8187_v57 = vmul.f32 %v8186_v5, %v8145_v49  ;;  %v8100_v55 = vmul.f32 2.5, %v12819_v17  ;;  %v8103_v48 = vmul.f32 2.5, %v8102_v18 }
0x1507   :  { %v8097_v50 = vmul.f32 %v9246_v7, %v8096_v3  ;;  %v8152_v58 = vmul.f32 %v8151_v52, %v8091_v36  ;;  %v8153_v9 = vmul.f32 1.25, %v8095_v59  ;;  %v8156_v2 = vmul.f32 1.25, %v12805_v15 }
0x1508   :  { %v8189_v27 = vmul.f32 %v8188_v19, %v8150_v0  ;;  %v8101_v51 = vmul.f32 %v9246_v7, %v8100_v55  ;;  %v8104_v61 = vmul.f32 %v12823_v33, %v8103_v48  ;;  %v8158_v14 = vmul.f32 1.25, %v8102_v18 }
0x1509   :  { %v8098_v35 = vadd.f32 %v8097_v50, %v8094_v23  ;;  %v8196_v22 = vmul.f32 0.8333333, %v9255_v10  ;;  %v8198_v41 = vmul.f32 0.8333333, %v8102_v18  ;;  %v8191_v54 = vmul.f32 0.8333333, %v9254_v1 }
0x150a   :  { %v8190_v30 = vadd.f32 %v8189_v27, %v8187_v57  ;;  %v12828_v21 = vadd.f32 %v8104_v61, %v8101_v51  ;;  %v8193_v44 = vmul.f32 0.8333333, %v8095_v59  ;;  %vm8046_vm5 = vcmp.ge.f32.partialorder %v12788_v4, 0.2  ;;  %v8300_v59 = vld [vmem:[#allocation6 + $0x180] sm:$0xff] }
0x150b   :  { %v8154_v25 = vmul.f32 %v8153_v9, %v8098_v35  ;;  %v8157_v16 = vmul.f32 %v8156_v2, %v8098_v35  ;;  %v8192_v29 = vmul.f32 %v8191_v54, %v8150_v0  ;;  %vm8047_vm6 = vcmp.lt.f32.partialorder %v12788_v4, 0.6  ;;  %v8309_v0 = vld [vmem:[#allocation6 + $0x1c8] sm:$0xff]  ;;  %v8310_v54 = vld [vmem:[#allocation6 + $0x1d0] sm:$0xff] }
0x150c   :  { %v8244_v46 = vpack.c.bf16 %v8190_v30, %v8190_v30  ;;  %v8159_v43 = vmul.f32 %v8158_v14, %v12828_v21  ;;  %vm8048_vm7 = vmand %vm8046_vm5, %vm8047_vm6  ;;  %vm8051_vm8 = vcmp.ge.f32.partialorder %v12788_v4, 0.6  ;;  %vm8052_vm9 = vcmp.lt.f32.partialorder %v12788_v4, 1.0  ;;  %v8301_v35 = vld [vmem:[#allocation6 + $0x188] sm:$0xff] }
0x150d   :  { %v8155_v1 = vadd.f32 %v8154_v25, %v8152_v58  ;;  %v12836_v10 = vsel %vm8048_vm7, 1.0, %v10177_v56  ;;  %vm8053_vm10 = vmand %vm8051_vm8, %vm8052_vm9  ;;  %vm8056_vm11 = vcmp.ge.f32.partialorder %v12788_v4, 1.0  ;;  %vm8057_vm12 = vcmp.lt.f32.partialorder %v12788_v4, 1.4 }
0x150e   :  { %8356 = vmatprep.mubr.bf16.mxu1 %v8244_v46  ;;  %v12840_v39 = vadd.f32 %v8159_v43, %v8157_v16  ;;  %v9249_v20 = vsel %vm8053_vm10, 1.0, %v10177_v56  ;;  %vm8058_vm13 = vmand %vm8056_vm11, %vm8057_vm12  ;;  %vm8061_vm14 = vcmp.ge.f32.partialorder %v12788_v4, 1.4  ;;  %vm8062_vm15 = vcmp.lt.f32.partialorder %v12788_v4, 1.8 }
0x150f   :  { %v8197_v62 = vmul.f32 %v8196_v22, %v8155_v1  ;;  %v8194_v32 = vmul.f32 %v8193_v44, %v8155_v1  ;;  %v9250_v60 = vsel %vm8058_vm13, 1.0, %v10177_v56  ;;  %vm8063_vm0 = vmand %vm8061_vm14, %vm8062_vm15  ;;  %v9259_v24 = vadd.f32 -0.2, %v12788_v4 }
0x1510   :  { %v8199_v31 = vmul.f32 %v8198_v41, %v12840_v39  ;;  %v9251_v13 = vsel %vm8063_vm0, 1.0, %v10177_v56  ;;  %v12850_v11 = vsub.f32 1.0, %v12788_v4  ;;  %v12853_v38 = vadd.f32 -0.6, %v12788_v4 }
0x1511   :  { %v8195_v40 = vadd.f32 %v8194_v32, %v8192_v29  ;;  %v8114_v26 = vmul.f32 2.5, %v9259_v24  ;;  %v12856_v63 = vsub.f32 1.4, %v12788_v4  ;;  %v12859_v6 = vadd.f32 -1.0, %v12788_v4 }
0x1512   :  { %v8200_v47 = vadd.f32 %v8199_v31, %v8197_v62  ;;  %v8117_v5 = vmul.f32 2.5, %v12850_v11  ;;  %v8121_v45 = vmul.f32 2.5, %v12853_v38  ;;  %v8130_v12 = vsub.f32 1.8, %v12788_v4  ;;  %v8311_v31 = vld [vmem:[#allocation6 + $0x1d8] sm:$0xff] }
0x1513   :  { %v8245_v37 = vpack.c.bf16 %v8195_v40, %v8195_v40  ;;  %v8115_v19 = vmul.f32 %v12836_v10, %v8114_v26  ;;  %v8124_v36 = vmul.f32 2.5, %v12856_v63  ;;  %v8128_v42 = vmul.f32 2.5, %v12859_v6 }
0x1514   :  { %v8246_v28 = vpack.c.bf16 %v8200_v47, %v8200_v47  ;;  %v8118_v8 = vmul.f32 %v9249_v20, %v8117_v5  ;;  %v8122_v7 = vmul.f32 %v9249_v20, %v8121_v45  ;;  %v8131_v34 = vmul.f32 2.5, %v8130_v12  ;;  %v8302_v20 = vld [vmem:[#allocation6 + $0x190] sm:$0xff] }
0x1515   :  { %v8125_v49 = vmul.f32 %v9250_v60, %v8124_v36  ;;  %v8129_v53 = vmul.f32 %v9250_v60, %v8128_v42  ;;  %v9262_v18 = vadd.f32 -1.4, %v12788_v4  ;;  %v8171_v52 = vmul.f32 1.25, %v9259_v24 }
0x1516   :  { %8396 = vmatprep.mubr.bf16.mxu0 %v8246_v28  ;;  %v12868_v23 = vadd.f32 %v8118_v8, %v8115_v19  ;;  %v8132_v3 = vmul.f32 %v9251_v13, %v8131_v34  ;;  %v8173_v48 = vmul.f32 1.25, %v12856_v63  ;;  %v8176_v50 = vmul.f32 1.25, %v12853_v38  ;;  %v8312_v19 = vld [vmem:[#allocation6 + $0x1e0] sm:$0xff] }
0x1517   :  { %8397 = vmatmul.mubr.bf16.vlgmr.msra.gmra.mrb[168].mxu0 %v8245_v37  ;;  %v8126_v57 = vadd.f32 %v8125_v49, %v8122_v7  ;;  %v8135_v55 = vmul.f32 2.5, %v9262_v18  ;;  %v8178_v2 = vmul.f32 1.25, %v8130_v12  ;;  %v9241_v27 = vmul.f32 -1.442695, %v12788_v4  ;;  %v8304_v18 = vld [vmem:[#allocation6 + $0x1a0] sm:$0xff] }
0x1518   :  { %9534 = vmatpush3.bf16.msra.mxu0 %v8300_v59  ;;  %v8133_v58 = vadd.f32 %v8132_v3, %v8129_v53  ;;  %v8172_v9 = vmul.f32 %v8171_v52, %v12868_v23  ;;  %v12877_v22 = vadd.f32 0.2, %v12788_v4  ;;  %v8109_v30 = vsub.f32 0.6, %v12788_v4 }
0x1519   :  { %v12874_v51 = vmul.f32 %v9251_v13, %v8135_v55  ;;  %v8174_v61 = vmul.f32 %v8173_v48, %v8126_v57  ;;  %v8177_v14 = vmul.f32 %v8176_v50, %v8126_v57  ;;  %9535 = vmatprep.subr.bf16.mxu0 %v8309_v0  ;;  %10047 = vpow2.f32 %v9241_v27  ;;  %v8313_v0 = vld [vmem:[#allocation6 + $0x1e8] sm:$0xff] }
0x151a   :  { %v8179_v41 = vmul.f32 %v8178_v2, %v8133_v58  ;;  %v8216_v25 = vmul.f32 0.8333333, %v9259_v24  ;;  %v8107_v16 = vmul.f32 2.5, %v12877_v22  ;;  %v8218_v46 = vmul.f32 0.8333333, %v8130_v12 }
0x151b   :  { %v12880_v44 = vadd.f32 %v8174_v61, %v8172_v9  ;;  %v8110_v43 = vmul.f32 2.5, %v8109_v30  ;;  %v8161_v32 = vmul.f32 1.25, %v12819_v17  ;;  %v8163_v40 = vmul.f32 1.25, %v8109_v30  ;;  %v8314_v9 = vld [vmem:[#allocation6 + $0x1f0] sm:$0xff] }
0x151c   :  { %v8180_v29 = vadd.f32 %v8179_v41, %v8177_v14  ;;  %9536 = vmatpush3.bf16.msra.mxu0 %v8301_v35  ;;  %v8108_v62 = vmul.f32 %v12823_v33, %v8107_v16  ;;  %v8201_v26 = vmul.f32 0.8333333, %v12805_v15  ;;  %vm8066_vm1 = vcmp.ge.f32.partialorder %v12788_v4, 1.8  ;;  %v8303_v33 = vld [vmem:[#allocation6 + $0x198] sm:$0xff] }
0x151d   :  { %v8217_v1 = vmul.f32 %v8216_v25, %v12880_v44  ;;  %9537 = vmatprep.subr.bf16.mxu0 %v8310_v54  ;;  %v8111_v13 = vmul.f32 %v12836_v10, %v8110_v43  ;;  %v8162_v24 = vmul.f32 %v8161_v32, %v12828_v21  ;;  %vm8067_vm2 = vcmp.lt.f32.partialorder %v12788_v4, 2.2  ;;  %v8315_v16 = vld [vmem:[#allocation6 + $0x1f8] sm:$0xff] }
0x151e   :  { %v8219_v60 = vmul.f32 %v8218_v46, %v8180_v29  ;;  %v8202_v45 = vmul.f32 %v8201_v26, %v12840_v39  ;;  %vm8068_vm3 = vmand %vm8066_vm1, %vm8067_vm2  ;;  %v8137_v12 = vsub.f32 2.2, %v12788_v4  ;;  %v8181_v10 = vmul.f32 1.25, %v12859_v6  ;;  %v8296_v26 = vld [vmem:[#allocation6 + $0x160] sm:$0xff] }
0x151f   :  { %v8112_v5 = vadd.f32 %v8111_v13, %v8108_v62  ;;  %v8168_v15 = vmul.f32 1.25, %v12850_v11  ;;  %v9252_v36 = vsel %vm8068_vm3, 1.0, %v10177_v56  ;;  %v8166_v42 = vmul.f32 1.25, %v12877_v22  ;;  %v8284_v62 = vld [vmem:[#allocation6 + $0x100] sm:$0xff]  ;;  %v8294_v13 = vld [vmem:[#allocation6 + $0x150] sm:$0xff] }
0x1520   :  { %v8220_v47 = vadd.f32 %v8219_v60, %v8217_v1  ;;  %9538 = vmatpush3.bf16.msra.mxu0 %v8302_v20  ;;  %v8138_v28 = vmul.f32 2.5, %v8137_v12  ;;  %v8182_v8 = vmul.f32 %v8181_v10, %v8133_v58  ;;  %v8221_v7 = vmul.f32 0.8333333, %v12853_v38  ;;  %v8307_v1 = vld [vmem:[#allocation6 + $0x1b8] sm:$0xff]  ;;  %v8293_v60 = vld [vmem:[#allocation6 + $0x148] sm:$0xff] }
0x1521   :  { %9539 = vmatprep.subr.bf16.mxu0 %v8311_v31  ;;  %v8164_v37 = vmul.f32 %v8163_v40, %v8112_v5  ;;  %v8169_v59 = vmul.f32 %v8168_v15, %v12868_v23  ;;  %v8203_v6 = vmul.f32 0.8333333, %v8109_v30  ;;  %v8167_v53 = vmul.f32 %v8166_v42, %v8112_v5  ;;  %v8305_v23 = vld [vmem:[#allocation6 + $0x1a8] sm:$0xff]  ;;  %v8306_v30 = vld [vmem:[#allocation6 + $0x1b0] sm:$0xff]  ;;  %v8295_v40 = vld [vmem:[#allocation6 + $0x158] sm:$0xff] }
0x1522   :  { %v8250_v21 = vpack.c.bf16 %v8220_v47, %v8220_v47  ;;  %v8139_v3 = vmul.f32 %v9252_v36, %v8138_v28  ;;  %v8222_v52 = vmul.f32 %v8221_v7, %v8180_v29  ;;  %v8183_v48 = vmul.f32 1.25, %v8137_v12  ;;  %v8288_v47 = vld [vmem:[#allocation6 + $0x120] sm:$0xff]  ;;  %v8297_v5 = vld [vmem:[#allocation6 + $0x168] sm:$0xff]  ;;  %v8299_v10 = vld [vmem:[#allocation6 + $0x178] sm:$0xff] }
0x1523   :  { %v10048_v34 = vpop.eup %10047  ;;  %v8165_v39 = vadd.f32 %v8164_v37, %v8162_v24  ;;  %v8170_v50 = vadd.f32 %v8169_v59, %v8167_v53  ;;  %v8206_v2 = vmul.f32 0.8333333, %v12819_v17  ;;  %v8208_v27 = vmul.f32 0.8333333, %v12850_v11  ;;  %v8286_v24 = vld [vmem:[#allocation6 + $0x110] sm:$0xff]  ;;  %v8316_v15 = vld [vmem:[#allocation6 + $0x200] sm:$0xff] }
0x1524   :  { %8476 = vmatprep.mubr.bf16.mxu0 %v8250_v21  ;;  %9540 = vmatpush3.bf16.msra.mxu0 %v8303_v33  ;;  %v8011_v49 = vadd.f32 1.0, %v10048_v34  ;;  %v8140_v55 = vadd.f32 %v8139_v3, %v12874_v51  ;;  %v8223_v14 = vmul.f32 0.8333333, %v8137_v12  ;;  %v8211_v35 = vmul.f32 0.8333333, %v12877_v22  ;;  %v8289_v33 = vld [vmem:[#allocation6 + $0x128] sm:$0xff] }
0x1525   :  { %9541 = vmatprep.subr.bf16.mxu0 %v8312_v19  ;;  %v8204_v57 = vmul.f32 %v8203_v6, %v8165_v39  ;;  %v8213_v51 = vmul.f32 0.8333333, %v12856_v63  ;;  %v8207_v41 = vmul.f32 %v8206_v2, %v8165_v39  ;;  %v8209_v54 = vmul.f32 %v8208_v27, %v8170_v50  ;;  %v8290_v12 = vld [vmem:[#allocation6 + $0x130] sm:$0xff]  ;;  %v8291_v21 = vld [vmem:[#allocation6 + $0x138] sm:$0xff]  ;;  %v8317_v19 = vld [vmem:[#allocation6 + $0x208] sm:$0xff] }
0x1526   :  { %10049 = vrcp.f32 %v8011_v49  ;;  %v8184_v58 = vmul.f32 %v8183_v48, %v8140_v55  ;;  %v8212_v29 = vmul.f32 %v8211_v35, %v8170_v50  ;;  %vm10178_vm4 = vmmov 0   ;;  %v8318_v36 = vld [vmem:[#allocation6 + $0x210] sm:$0xff]  ;;  %v8319_v42 = vld [vmem:[#allocation6 + $0x218] sm:$0xff]  ;;  %v8320_v28 = vld [vmem:[#allocation6 + $0x220] sm:$0xff] }
0x1527   :  { %v12900_v38 = vadd.f32 %v8204_v57, %v8202_v45  ;;  %v8214_v46 = vmul.f32 %v8213_v51, %v12880_v44  ;;  %v8210_v11 = vadd.f32 %v8209_v54, %v8207_v41  ;;  %v8285_v44 = vld [vmem:[#allocation6 + $0x108] sm:$0xff]  ;;  %v8298_v45 = vld [vmem:[#allocation6 + $0x170] sm:$0xff]  ;;  %v8323_v34 = vld [vmem:[#allocation6 + $0x238] sm:$0xff] }
0x1528   :  { %9542 = vmatpush3.bf16.msra.mxu0 %v8304_v18  ;;  %v8185_v61 = vadd.f32 %v8184_v58, %v8182_v8  ;;  %v8321_v8 = vld [vmem:[#allocation6 + $0x228] sm:$0xff]  ;;  %v8322_v7 = vld [vmem:[#allocation6 + $0x230] sm:$0xff] }
0x1529   :  { %9543 = vmatprep.subr.bf16.mxu0 %v8313_v0  ;;  %v8215_v20 = vadd.f32 %v8214_v46, %v8212_v29  ;;  %v8248_v32 = vpack.c.bf16 %v8210_v11, %v8210_v11  ;;  %v8247_v37 = vpack.c.bf16 %v12900_v38, %v12900_v38 }
0x152a   :  { %v8224_v25 = vmul.f32 %v8223_v14, %v8185_v61 }
0x152b   :  { %v8249_v31 = vpack.c.bf16 %v8215_v20, %v8215_v20 }
0x152c   :  { %9544 = vmatpush3.bf16.msra.mxu0 %v8305_v23  ;;  %v12907_v43 = vadd.f32 %v8224_v25, %v8222_v52 }
0x152d   :  { %9545 = vmatprep.subr.bf16.mxu0 %v8314_v9 }
0x152e   :  { %v8251_v39 = vpack.c.bf16 %v12907_v43, %v12907_v43 }
0x1530   :  { %9546 = vmatpush3.bf16.msra.mxu0 %v8306_v30  ;;  %v10050_v17 = vpop.eup %10049 }
0x1531   :  { %9547 = vmatprep.subr.bf16.mxu0 %v8315_v16  ;;  %v8014_v22 = vmul.f32 %v10050_v17, %v12788_v4  ;;  %v8287_v4 = vld [vmem:[#allocation6 + $0x118] sm:$0xff] }
0x1533   :  { %v8243_v63 = vpack.c.bf16 %v8014_v22, %v8014_v22 }
0x1534   :  { %9548 = vmatpush3.bf16.msra.mxu0 %v8307_v1 }
0x1535   :  { %8357 = vmatmul.mubr.bf16.vlgmr.msra.gmra.mrb[164].mxu1 %v8243_v63 }
0x1536   :  { %9512 = vmatpush3.bf16.msra.mxu1 %v8284_v62  ;;  %8436 = vmatprep.mubr.bf16.mxu1 %v8248_v32 }
0x1537   :  { %9513 = vmatprep.subr.bf16.mxu1 %v8293_v60  ;;  %8477 = vmatmul.mubr.bf16.vlgmr.msra.gmra.mrb[172].mxu0 %v8249_v31 }
0x153a   :  { %9514 = vmatpush3.bf16.msra.mxu1 %v8285_v44 }
0x153b   :  { %9515 = vmatprep.subr.bf16.mxu1 %v8294_v13 }
0x153e   :  { %9516 = vmatpush3.bf16.msra.mxu1 %v8286_v24 }
0x153f   :  { %9517 = vmatprep.subr.bf16.mxu1 %v8295_v40 }
0x1542   :  { %9518 = vmatpush3.bf16.msra.mxu1 %v8287_v4 }
0x1543   :  { %9519 = vmatprep.subr.bf16.mxu1 %v8296_v26 }
0x1546   :  { %9520 = vmatpush3.bf16.msra.mxu1 %v8288_v47 }
0x1547   :  { %9521 = vmatprep.subr.bf16.mxu1 %v8297_v5 }
0x154a   :  { %9522 = vmatpush3.bf16.msra.mxu1 %v8289_v33 }
0x154b   :  { %9523 = vmatprep.subr.bf16.mxu1 %v8298_v45 }
0x154e   :  { %9524 = vmatpush3.bf16.msra.mxu1 %v8290_v12 }
0x154f   :  { %9525 = vmatprep.subr.bf16.mxu1 %v8299_v10 }
0x1552   :  { %9526 = vmatpush3.bf16.msra.mxu1 %v8291_v21 }
0x1553   :  { %9564 = vmatprep.subr.bf16.mxu1 %v10177_v56 }
0x1555   :  { %8437 = vmatmul.mubr.bf16.vlgmr.msra.gmra.mrb[168].mxu1 %v8247_v37 }
0x1556   :  { %9565 = vmatpush3.bf16.msra.mxu1 %v8316_v15  ;;  %9580 = vmatprep.mubr.msk.bf16.mxu1 %vm10178_vm4, %v10177_v56 }
0x1557   :  { %9566 = vmatprep.subr.bf16.mxu1 %v10177_v56 }
0x155a   :  { %9567 = vmatpush3.bf16.msra.mxu1 %v8317_v19 }
0x155b   :  { %9568 = vmatprep.subr.bf16.mxu1 %v10177_v56 }
0x155e   :  { %9569 = vmatpush3.bf16.msra.mxu1 %v8318_v36 }
0x155f   :  { %9570 = vmatprep.subr.bf16.mxu1 %v10177_v56 }
0x1562   :  { %9571 = vmatpush3.bf16.msra.mxu1 %v8319_v42 }
0x1563   :  { %9572 = vmatprep.subr.bf16.mxu1 %v10177_v56 }
0x1566   :  { %9573 = vmatpush3.bf16.msra.mxu1 %v8320_v28 }
0x1567   :  { %9574 = vmatprep.subr.bf16.mxu1 %v10177_v56 }
0x156a   :  { %9575 = vmatpush3.bf16.msra.mxu1 %v8321_v8 }
0x156b   :  { %9576 = vmatprep.subr.bf16.mxu1 %v10177_v56 }
0x156e   :  { %9577 = vmatpush3.bf16.msra.mxu1 %v8322_v7 }
0x156f   :  { %9578 = vmatprep.subr.bf16.mxu1 %v10177_v56 }
0x1572   :  { %9579 = vmatpush3.bf16.msra.mxu1 %v8323_v34 }
0x1575   :  { %9581 = vmatmul.mubr.bf16.vlgmr.msra.gmra.mrb[172].mxu1 %v8251_v39 }
0x15ea   :  { %v9505_v59 = vpop.f32.mrb[168].mxu0 }
0x15eb   :  { %v9506_v6 = vpop.f32.mrb[169].mxu0 }
0x15ec   :  { %v9507_v49 = vadd.f32 %v9506_v6, %v9505_v59  ;;  %v9508_v53 = vpop.f32.mrb[170].mxu0 }
0x15ed   :  { %v9509_v18 = vpop.f32.mrb[171].mxu0 }
0x1608   :  { %v9483_v3 = vpop.f32.mrb[164].mxu1 }
0x1609   :  { %v9484_v52 = vpop.f32.mrb[165].mxu1 }
0x160a   :  { %v9485_v0 = vadd.f32 %v9484_v52, %v9483_v3  ;;  %v9486_v57 = vpop.f32.mrb[166].mxu1  ;;  %v9549_v55 = vpop.f32.mrb[172].mxu0 }
0x160b   :  { %v9487_v48 = vpop.f32.mrb[167].mxu1  ;;  %v9550_v38 = vpop.f32.mrb[173].mxu0 }
0x160c   :  { %v8399_v50 = vadd.f32 %v9507_v49, %v9485_v0  ;;  %v9551_v56 = vadd.f32 %v9550_v38, %v9549_v55  ;;  %v9552_v23 = vpop.f32.mrb[174].mxu0 }
0x160d   :  { %v9553_v58 = vpop.f32.mrb[175].mxu0 }
0x1628   :  { %v9527_v9 = vpop.f32.mrb[168].mxu1 }
0x1629   :  { %v9528_v2 = vpop.f32.mrb[169].mxu1 }
0x162a   :  { %v9529_v27 = vadd.f32 %v9528_v2, %v9527_v9  ;;  %v9530_v61 = vpop.f32.mrb[170].mxu1 }
0x162b   :  { %v9531_v14 = vpop.f32.mrb[171].mxu1 }
0x162c   :  { %v8439_v35 = vadd.f32 %v9529_v27, %v8399_v50 }
0x162e   :  { %v8479_v51 = vadd.f32 %v9551_v56, %v8439_v35 }
0x1648   :  { %v8518_v41 = vpop.f32.mrb[172].mxu1 }
0x1649   :  { %v8519_v54 = vadd.f32 %v8518_v41, %v8479_v51  ;;  %v9582_v30 = vpop.f32.mrb[173].mxu1 }
0x164a   :  { %v8521_v25 = vpop.f32.mrb[174].mxu1 }
0x164b   :  { %v9263_v16 = vmul.f32 -1.442695, %v8519_v54  ;;  %v9583_v29 = vpop.f32.mrb[175].mxu1 }
0x164d   :  { %10051 = vpow2.f32 %v9263_v16 }
0x1657   :  { %v10052_v46 = vpop.eup %10051 }
0x1658   :  { %v8527_v43 = vadd.f32 1.0, %v10052_v46 }
0x165a   :  { %10053 = vrcp.f32 %v8527_v43 }
0x1664   :  { %v10054_v17 = vpop.eup %10053 }
0x1665   :  { %8530 = vst [vmem:[#allocation16] sm:$0xff] %v10054_v17 }
0x1666   :  { %10132 = shalt.err (!%p10129_p0)
}
0x1667   :  { %s10133_s25 = scalar_lea.hbm %s12946_s11, 128 }
0x1668   :  { %p10134_p1 = scmp.ne.s32.totalorder %s12946_s11, %s10133_s25  ;;  %p10137_p2 = scmp.lt.u32.totalorder %s10133_s25, %s12946_s11 }
0x166a   :  { %p10139_p3 = pnand %p10137_p2, %p10134_p1 }
0x166c   :  { %10142 = shalt.err (!%p10139_p3)
}
0x166d   :  { %8540 = dma.vmem_to_hbm [thread:$0]  %s8538_s24, 128, %s12946_s11, [#allocation15]  }
0x166e   :  { %10155 = dma.done.wait [#allocation15], 128  }
0x166f   :  { %10156 = vsyncadd [#allocation15], 4294967168 }
0x1670   :  { %8544 = vsyncpa [#allocation14], 1 }
0x1671   :  { %8545 = vsyncpa [#allocation15], 1 }
0x1672   :  { %8546 = vsyncmov [#allocation7] }
0x1675   :  { %s8547_s14 = vpop.sfrf %8546 }
0x1676   :  { %p9264_p4 = scmp.ne.s32.totalorder %s8547_s14, 0 }
0x1678   :  { %8551 = shalt.err (%p9264_p4)  }
0x1679   :  { %8553 = vsyncmov [#allocation7 + $0x1] }
0x167c   :  { %s8554_s7 = vpop.sfrf %8553 }
0x167d   :  { %p9265_p5 = scmp.ne.s32.totalorder %s8554_s7, 0 }
0x167f   :  { %8558 = shalt.err (%p9265_p5)  }
0x1680   :  { %8560 = vsyncmov [#allocation7 + $0x2] }
0x1683   :  { %s8561_s1 = vpop.sfrf %8560 }
0x1684   :  { %p9266_p6 = scmp.ne.s32.totalorder %s8561_s1, 0 }
0x1686   :  { %8565 = shalt.err (%p9266_p6)  }
0x1687   :  { %8567 = vsyncmov [#allocation7 + $0x3] }
0x168a   :  { %s8568_s15 = vpop.sfrf %8567 }
0x168b   :  { %p9267_p7 = scmp.ne.s32.totalorder %s8568_s15, 0 }
0x168d   :  { %8572 = shalt.err (%p9267_p7)  }
0x168e   :  { %8574 = vsyncmov [#allocation7 + $0x4] }
0x1691   :  { %s8575_s11 = vpop.sfrf %8574 }
0x1692   :  { %p9268_p8 = scmp.ne.s32.totalorder %s8575_s11, 0 }
0x1694   :  { %8579 = shalt.err (%p9268_p8)  }

</bundles_post_ra>
